<compile_context>
chip_gen: v7x
topology: tpu7x:2x2x1
jax: 0.10.0
libtpu: 0.0.40
codegen_flags: <defaults>
</compile_context>

<pallas_src>
import functools

import numpy as np
import jax
import jax.numpy as jnp
from jax import lax
from jax.experimental import pallas as pl
from jax.experimental.pallas import tpu as pltpu

# int32 bit-patterns of the spatial-hash primes [1, 2654435761, 805459861]
_PRIME_Y = -1640531535          # == 2654435761 - 2**32 (same low 32 bits)
_PRIME_Z = 805459861


def hash_encode_kernel(res_m1_ref, pos_ref, idx_hbm, table_ref, out_ref,
                       idx_smem, sem, corner_ref, *, feat, tile_n):
    """One grid step = (one resolution level) x (one tile of points).

    res_m1_ref : SMEM int32 [L]                     resolution - 1 (prefetch)
    pos_ref    : VMEM f32   [tile_n, 3]             positions in [-1, 1]
    idx_hbm    : HBM  int32 [L, n_tiles, 8, tile_n] precomputed corner indices
    table_ref  : VMEM f32   [n0, feat]              this level's table (resident)
    out_ref    : VMEM f32   [tile_n, feat]          interpolated features
    idx_smem   : SMEM int32 [8, tile_n]             this tile's corner indices
    sem        : DMA semaphore [1]
    corner_ref : VMEM f32   [tile_n, 8*feat]        gathered corner rows
    """
    level = pl.program_id(0)
    tile = pl.program_id(1)

    # Start streaming this tile's corner indices HBM -> SMEM; overlap the DMA
    # with the vectorized weight computation below.
    idx_cp = pltpu.make_async_copy(idx_hbm.at[level, tile], idx_smem, sem.at[0])
    idx_cp.start()

    # ---- trilinear interpolation weights, vectorized on the VPU -------------
    # Same f32 recipe as the wrapper's floor (bit-identical), so weights and
    # gathered corners stay consistent.
    res_m1_f = jnp.full((1, 1), res_m1_ref[level],
                        dtype=jnp.int32).astype(jnp.float32)
    pos = pos_ref[...]                                      # [TN, 3]
    scaled = (pos + 1.0) * 0.5 * res_m1_f                   # [TN, 3]
    w = scaled - jnp.floor(scaled)                          # [TN, 3]
    wx, wy, wz = w[:, 0:1], w[:, 1:2], w[:, 2:3]            # [TN, 1] each

    idx_cp.wait()

    # ---- gather: 8 corner rows per point ------------------------------------
    # Hashes are already vectorized (wrapper); the only scalar-path work left
    # per corner is one SMEM index load and one (1, feat) row copy.  8 points
    # (= 64 independent copies) per loop body give the scheduler room to
    # overlap the dynamic loads/stores.
    points_per_iter = 8

    def gather_block(g, carry):
        base_p = pl.multiple_of(g * points_per_iter, points_per_iter)
        for dp in range(points_per_iter):
            p = base_p + dp
            for c in range(8):
                h = idx_smem[c, p]
                corner_ref[pl.ds(p, 1), c * feat:(c + 1) * feat] = (
                    table_ref[pl.ds(h, 1), :])
        return carry

    lax.fori_loop(0, tile_n // points_per_iter, gather_block, 0)

    # ---- trilinear blend (same corner order / op order as the PyTorch module)
    f = [corner_ref[:, c * feat:(c + 1) * feat] for c in range(8)]
    c00 = f[0] * (1.0 - wx) + f[1] * wx
    c01 = f[2] * (1.0 - wx) + f[3] * wx
    c10 = f[4] * (1.0 - wx) + f[5] * wx
    c11 = f[6] * (1.0 - wx) + f[7] * wx
    c0 = c00 * (1.0 - wy) + c01 * wy
    c1 = c10 * (1.0 - wy) + c11 * wy
    out_ref[...] = c0 * (1.0 - wz) + c1 * wz


def _padded_vmem_bytes(rows, cols, bytes_per_elem=4):
    """f32 VMEM footprint of a 2D buffer after (8, 128) tile padding."""
    return (-(-rows // 8) * 8) * (-(-cols // 128) * 128) * bytes_per_elem


def hash_encode(positions, tables, resolutions, *, tile_n=1024):
    """positions [N,3] f32 -> encoded [N, L*F] f32 (matches HashEncoder.forward)."""
    n = positions.shape[0]
    num_levels, n0, feat = tables.shape
    assert tile_n % 128 == 0, "tile_n must be a multiple of 128 (lane width)"
    # Hard config constraint (see review): the in-kernel/wrapper hash uses the
    # exact low 32 bits of the reference int64 hash, which equals `% n0` only
    # for power-of-two table sizes.  The module's default configs satisfy this.
    assert (n0 & (n0 - 1)) == 0, "hash-table size must be a power of two"

    # Pad N so callers do not have to; padded points produce valid (discarded)
    # rows and are sliced away below.
    n_pad = -(-n // tile_n) * tile_n
    if n_pad != n:
        positions = jnp.pad(positions, ((0, n_pad - n), (0, 0)))
    n_tiles = n_pad // tile_n

    res_m1 = jnp.asarray(resolutions, jnp.int32) - 1                      # [L]

    # ---- vectorized corner hashes (plain XLA elementwise; int32 wraparound
    #      mul/xor == exact low 32 bits of the reference int64 hash) ----------
    res_m1_f = res_m1.astype(jnp.float32)[:, None, None]
    scaled = (positions[None, :, :] + 1.0) * 0.5 * res_m1_f               # [L,Np,3]
    grid = jnp.floor(scaled).astype(jnp.int32)                            # [L,Np,3]
    hi = res_m1[:, None]                                                  # [L,1]
    mask = jnp.int32(n0 - 1)
    corner_hashes = []
    for dx in (0, 1):                              # corner order == PyTorch
        for dy in (0, 1):
            for dz in (0, 1):
                cx = jnp.clip(grid[..., 0] + dx, 0, hi)
                cy = jnp.clip(grid[..., 1] + dy, 0, hi)
                cz = jnp.clip(grid[..., 2] + dz, 0, hi)
                h = cx ^ (cy * _PRIME_Y) ^ (cz * _PRIME_Z)
                corner_hashes.append(h & mask)
    idx = jnp.stack(corner_hashes, axis=1)                                # [L,8,Np]
    idx = idx.reshape(num_levels, 8, n_tiles, tile_n).transpose(0, 2, 1, 3)
    # -> [L, n_tiles, 8, tile_n]: each kernel step DMAs one contiguous block.

    # ---- VMEM budget (right-sized instead of a flat 48 MiB) -----------------
    table_buf = _padded_vmem_bytes(n0, feat)
    pos_buf = _padded_vmem_bytes(tile_n, 3)
    out_buf = _padded_vmem_bytes(tile_n, feat)
    corner_buf = _padded_vmem_bytes(tile_n, 8 * feat)
    vmem_need = 2 * table_buf + 2 * pos_buf + 2 * out_buf + corner_buf
    vmem_limit = max(vmem_need + (4 << 20), 16 << 20)   # ~10 MiB for demo config

    kernel = functools.partial(hash_encode_kernel, feat=feat, tile_n=tile_n)
    out = pl.pallas_call(
        kernel,
        out_shape=jax.ShapeDtypeStruct((num_levels, n_pad, feat), jnp.float32),
        grid_spec=pltpu.PrefetchScalarGridSpec(
            num_scalar_prefetch=1,                    # res_m1 -> SMEM
            # Level is the OUTER grid axis: the table's block index only
            # changes once per level, so each per-level table stays
            # VMEM-resident across all point tiles.
            grid=(num_levels, n_tiles),
            in_specs=[
                pl.BlockSpec((tile_n, 3), lambda l, t, rm1: (t, 0)),      # positions
                pl.BlockSpec(memory_space=pl.ANY),                        # corner idx (HBM)
                pl.BlockSpec((None, n0, feat), lambda l, t, rm1: (l, 0, 0)),  # table
            ],
            out_specs=pl.BlockSpec((None, tile_n, feat),
                                   lambda l, t, rm1: (l, t, 0)),
            scratch_shapes=[
                pltpu.SMEM((8, tile_n), jnp.int32),
                pltpu.SemaphoreType.DMA((1,)),
                pltpu.VMEM((tile_n, 8 * feat), jnp.float32),
            ],
        ),
        compiler_params=pltpu.CompilerParams(
            dimension_semantics=("parallel", "parallel"),
            vmem_limit_bytes=vmem_limit),
    )(res_m1, positions, idx, tables)

    # [L, N, F] -> [N, L*F]; negligible vs. the gather-bound kernel steps.
    out = out[:, :n, :]
    return jnp.transpose(out, (1, 0, 2)).reshape(n, num_levels * feat)


def make_hash_encoder_params(key, num_levels, base_resolution,
                             log2_hashmap_size, feature_dim):
    """Deterministic re-implementation of HashEncoder.__init__ parameter init."""
    per_level_scale = 2.0
    std = 1e-4
    resolutions = []
    full_tables = []
    for i in range(num_levels):
        resolution = int(np.ceil(base_resolution * per_level_scale ** i))
        params_in_level = min(resolution ** 3, 2 ** log2_hashmap_size)
        resolutions.append(resolution)
        key, sub = jax.random.split(key)
        full_tables.append(
            jax.random.uniform(sub, (params_in_level, feature_dim),
                               dtype=jnp.float32, minval=-std, maxval=std))
    n0 = min(resolutions[0] ** 3, 2 ** log2_hashmap_size)
    # The reference hash takes `% embeddings[0].num_embeddings` for EVERY level,
    # so only the first n0 rows of each level's table are ever addressed.
    stacked = jnp.stack([t[:n0] for t in full_tables], axis=0)   # [L, N0, F]
    return stacked, np.asarray(resolutions, np.int32), full_tables, n0


def reference_hash_encode(positions, full_tables, resolutions, n0):
    """Pure-numpy replica of HashEncoder.forward (int64 hash, f32 math)."""
    pos = positions.astype(np.float32)
    primes = np.array([1, 2654435761, 805459861], dtype=np.int64)
    outs = []
    for level, res in enumerate(resolutions):
        res = int(res)
        scaled = (pos + np.float32(1.0)) / np.float32(2.0) * np.float32(res - 1)
        grid = np.floor(scaled).astype(np.int64)
        w = (scaled - grid.astype(np.float32)).astype(np.float32)
        table = np.asarray(full_tables[level])
        feats = []
        for dx in (0, 1):
            for dy in (0, 1):
                for dz in (0, 1):
                    corner = np.clip(grid + np.array([dx, dy, dz], np.int64),
                                     0, res - 1)
                    h = np.zeros(pos.shape[0], dtype=np.int64)
                    for i in range(3):
                        h ^= corner[:, i] * primes[i]
                    idx = h % n0
                    feats.append(table[idx])
        wx, wy, wz = w[:, 0:1], w[:, 1:2], w[:, 2:3]
        f = feats
        c00 = f[0] * (1 - wx) + f[1] * wx
        c01 = f[2] * (1 - wx) + f[3] * wx
        c10 = f[4] * (1 - wx) + f[5] * wx
        c11 = f[6] * (1 - wx) + f[7] * wx
        c0 = c00 * (1 - wy) + c01 * wy
        c1 = c10 * (1 - wy) + c11 * wy
        outs.append(c0 * (1 - wz) + c1 * wz)
    return np.concatenate(outs, axis=-1).astype(np.float32)


if __name__ == "__main__":
    # Small config consistent with InstantNGPConfig (per_level_scale = 2.0)
    num_levels = 4
    base_resolution = 16
    log2_hashmap_size = 12
    feature_dim = 2
    n_points = 1000          # deliberately NOT a multiple of tile_n (pads inside)

    key = jax.random.PRNGKey(0)
    key, kp = jax.random.split(key)
    positions = jax.random.uniform(kp, (n_points, 3), dtype=jnp.float32,
                                   minval=-1.0, maxval=1.0)

    tables, resolutions, full_tables, n0 = make_hash_encoder_params(
        key, num_levels, base_resolution, log2_hashmap_size, feature_dim)

    encoded = hash_encode(positions, tables,
                          jnp.asarray(resolutions, jnp.int32), tile_n=512)
    encoded = jax.block_until_ready(encoded)
    assert encoded.shape == (n_points, num_levels * feature_dim)

    ref = reference_hash_encode(np.asarray(positions),
                                [np.asarray(t) for t in full_tables],
                                resolutions, n0)
    np.testing.assert_allclose(np.asarray(encoded), ref, rtol=1e-5, atol=1e-8)
    print("KERNEL_OK")
</pallas_src>

<mosaic_0001>
module attributes {stable_mosaic.version = 11 : i64} {
  func.func @hash_encode_kernel(%arg0: i32, %arg1: i32, %arg2: memref<4xi32, #tpu.memory_space<smem>>, %arg3: memref<512x3xf32, #tpu.memory_space<vmem>>, %arg4: memref<4x2x8x512xi32, #tpu.memory_space<any>>, %arg5: memref<1x4096x2xf32, #tpu.memory_space<vmem>>, %arg6: memref<1x512x2xf32, #tpu.memory_space<vmem>>, %arg7: memref<8x512xi32, #tpu.memory_space<smem>>, %arg8: memref<1x!tpu.dma_semaphore, #tpu.memory_space<semaphore_mem>>, %arg9: memref<512x16xf32, #tpu.memory_space<vmem>>) attributes {dimension_semantics = [#tpu.dimension_semantics<parallel>, #tpu.dimension_semantics<parallel>], iteration_bounds = array<i64: 4, 2>, scalar_prefetch = 1 : i64, scratch_operands = 3 : i64, tpu.core_type = #tpu.core_type<tc>, window_params = [{transform_indices = @transform_0, window_bounds = array<i64: 512, 3>}, {}, {transform_indices = @transform_2, window_bounds = array<i64: 1, 4096, 2>}, {transform_indices = @transform_3, window_bounds = array<i64: 1, 512, 2>}]} {
    %c0_i32 = arith.constant 0 : i32
    %c0_i32_0 = arith.constant 0 : i32
    %c0_i32_1 = arith.constant 0 : i32
    %0 = tpu.memref_slice %arg4[%arg0, %arg1, %c0_i32_0, %c0_i32_1] : memref<4x2x8x512xi32, #tpu.memory_space<any>> -> memref<1x1x8x512xi32, #tpu.memory_space<any>>
    %1 = tpu.memref_squeeze %0 : memref<1x1x8x512xi32, #tpu.memory_space<any>> -> memref<8x512xi32, #tpu.memory_space<any>>
    %2 = tpu.memref_slice %arg8[%c0_i32] : memref<1x!tpu.dma_semaphore, #tpu.memory_space<semaphore_mem>> -> memref<1x!tpu.dma_semaphore, #tpu.memory_space<semaphore_mem>>
    %3 = tpu.memref_squeeze %2 : memref<1x!tpu.dma_semaphore, #tpu.memory_space<semaphore_mem>> -> memref<!tpu.dma_semaphore, #tpu.memory_space<semaphore_mem>>
    tpu.enqueue_dma source(%1 : memref<8x512xi32, #tpu.memory_space<any>>) target(%arg7 : memref<8x512xi32, #tpu.memory_space<smem>>) target_semaphore(%3 : memref<!tpu.dma_semaphore, #tpu.memory_space<semaphore_mem>>)
    %4 = arith.index_cast %arg0 : i32 to index
    %5 = memref.load %arg2[%4] : memref<4xi32, #tpu.memory_space<smem>>
    %6 = vector.broadcast %5 : i32 to vector<1x1xi32>
    %7 = arith.sitofp %6 : vector<1x1xi32> to vector<1x1xf32>
    %c0 = arith.constant 0 : index
    %c0_2 = arith.constant 0 : index
    %8 = vector.load %arg3[%c0, %c0_2] : memref<512x3xf32, #tpu.memory_space<vmem>>, vector<512x3xf32>
    %cst = arith.constant 1.000000e+00 : f32
    %9 = vector.broadcast %cst : f32 to vector<512x3xf32>
    %10 = arith.addf %8, %9 : vector<512x3xf32>
    %cst_3 = arith.constant 5.000000e-01 : f32
    %11 = vector.broadcast %cst_3 : f32 to vector<512x3xf32>
    %12 = arith.mulf %10, %11 : vector<512x3xf32>
    %13 = vector.broadcast %7 : vector<1x1xf32> to vector<512x3xf32>
    %14 = arith.mulf %12, %13 : vector<512x3xf32>
    %15 = math.floor %14 : vector<512x3xf32>
    %16 = arith.subf %14, %15 : vector<512x3xf32>
    %17 = vector.extract_strided_slice %16 {offsets = [0, 0], sizes = [512, 1], strides = [1, 1]} : vector<512x3xf32> to vector<512x1xf32>
    %18 = vector.extract_strided_slice %16 {offsets = [0, 1], sizes = [512, 1], strides = [1, 1]} : vector<512x3xf32> to vector<512x1xf32>
    %19 = vector.extract_strided_slice %16 {offsets = [0, 2], sizes = [512, 1], strides = [1, 1]} : vector<512x3xf32> to vector<512x1xf32>
    %c0_i32_4 = arith.constant 0 : i32
    %c0_i32_5 = arith.constant 0 : i32
    %c0_i32_6 = arith.constant 0 : i32
    %20 = tpu.memref_slice %arg4[%arg0, %arg1, %c0_i32_5, %c0_i32_6] : memref<4x2x8x512xi32, #tpu.memory_space<any>> -> memref<1x1x8x512xi32, #tpu.memory_space<any>>
    %21 = tpu.memref_squeeze %20 : memref<1x1x8x512xi32, #tpu.memory_space<any>> -> memref<8x512xi32, #tpu.memory_space<any>>
    %22 = tpu.memref_slice %arg8[%c0_i32_4] : memref<1x!tpu.dma_semaphore, #tpu.memory_space<semaphore_mem>> -> memref<1x!tpu.dma_semaphore, #tpu.memory_space<semaphore_mem>>
    %23 = tpu.memref_squeeze %22 : memref<1x!tpu.dma_semaphore, #tpu.memory_space<semaphore_mem>> -> memref<!tpu.dma_semaphore, #tpu.memory_space<semaphore_mem>>
    tpu.wait_dma2 semaphore(%23 : memref<!tpu.dma_semaphore, #tpu.memory_space<semaphore_mem>>) src(%21 : memref<8x512xi32, #tpu.memory_space<any>>) dst(%arg7 : memref<8x512xi32, #tpu.memory_space<smem>>)
    %c0_i32_7 = arith.constant 0 : i32
    %c64_i32 = arith.constant 64 : i32
    %24 = arith.addi %c0_i32_7, %c64_i32 : i32
    %c1_i32 = arith.constant 1 : i32
    scf.for %arg10 = %c0_i32_7 to %24 step %c1_i32  : i32 {
      %c8_i32 = arith.constant 8 : i32
      %85 = arith.muli %arg10, %c8_i32 : i32
      %86 = tpu.assume_multiple %85, 8 : i32
      %c0_i32_28 = arith.constant 0 : i32
      %87 = arith.addi %86, %c0_i32_28 : i32
      %c0_29 = arith.constant 0 : index
      %88 = arith.index_cast %87 : i32 to index
      %89 = memref.load %arg7[%c0_29, %88] : memref<8x512xi32, #tpu.memory_space<smem>>
      %c0_30 = arith.constant 0 : index
      %90 = arith.index_cast %89 : i32 to index
      %c0_31 = arith.constant 0 : index
      %91 = vector.load %arg5[%c0_30, %90, %c0_31] : memref<1x4096x2xf32, #tpu.memory_space<vmem>>, vector<1x1x2xf32>
      %92 = vector.shape_cast %91 : vector<1x1x2xf32> to vector<1x2xf32>
      %93 = arith.index_cast %87 : i32 to index
      %c0_32 = arith.constant 0 : index
      %94 = vector.load %arg9[%93, %c0_32] : memref<512x16xf32, #tpu.memory_space<vmem>>, vector<1x2xf32>
      tpu.vector_store %arg9[%93, %c0_32], %92 {strides = array<i32>} : memref<512x16xf32, #tpu.memory_space<vmem>>, vector<1x2xf32>,
      %c1 = arith.constant 1 : index
      %95 = arith.index_cast %87 : i32 to index
      %96 = memref.load %arg7[%c1, %95] : memref<8x512xi32, #tpu.memory_space<smem>>
      %c0_33 = arith.constant 0 : index
      %97 = arith.index_cast %96 : i32 to index
      %c0_34 = arith.constant 0 : index
      %98 = vector.load %arg5[%c0_33, %97, %c0_34] : memref<1x4096x2xf32, #tpu.memory_space<vmem>>, vector<1x1x2xf32>
      %99 = vector.shape_cast %98 : vector<1x1x2xf32> to vector<1x2xf32>
      %100 = arith.index_cast %87 : i32 to index
      %c2_35 = arith.constant 2 : index
      %101 = vector.load %arg9[%100, %c2_35] : memref<512x16xf32, #tpu.memory_space<vmem>>, vector<1x2xf32>
      tpu.vector_store %arg9[%100, %c2_35], %99 {strides = array<i32>} : memref<512x16xf32, #tpu.memory_space<vmem>>, vector<1x2xf32>,
      %c2_36 = arith.constant 2 : index
      %102 = arith.index_cast %87 : i32 to index
      %103 = memref.load %arg7[%c2_36, %102] : memref<8x512xi32, #tpu.memory_space<smem>>
      %c0_37 = arith.constant 0 : index
      %104 = arith.index_cast %103 : i32 to index
      %c0_38 = arith.constant 0 : index
      %105 = vector.load %arg5[%c0_37, %104, %c0_38] : memref<1x4096x2xf32, #tpu.memory_space<vmem>>, vector<1x1x2xf32>
      %106 = vector.shape_cast %105 : vector<1x1x2xf32> to vector<1x2xf32>
      %107 = arith.index_cast %87 : i32 to index
      %c4_39 = arith.constant 4 : index
      %108 = vector.load %arg9[%107, %c4_39] : memref<512x16xf32, #tpu.memory_space<vmem>>, vector<1x2xf32>
      tpu.vector_store %arg9[%107, %c4_39], %106 {strides = array<i32>} : memref<512x16xf32, #tpu.memory_space<vmem>>, vector<1x2xf32>,
      %c3 = arith.constant 3 : index
      %109 = arith.index_cast %87 : i32 to index
      %110 = memref.load %arg7[%c3, %109] : memref<8x512xi32, #tpu.memory_space<smem>>
      %c0_40 = arith.constant 0 : index
      %111 = arith.index_cast %110 : i32 to index
      %c0_41 = arith.constant 0 : index
      %112 = vector.load %arg5[%c0_40, %111, %c0_41] : memref<1x4096x2xf32, #tpu.memory_space<vmem>>, vector<1x1x2xf32>
      %113 = vector.shape_cast %112 : vector<1x1x2xf32> to vector<1x2xf32>
      %114 = arith.index_cast %87 : i32 to index
      %c6_42 = arith.constant 6 : index
      %115 = vector.load %arg9[%114, %c6_42] : memref<512x16xf32, #tpu.memory_space<vmem>>, vector<1x2xf32>
      tpu.vector_store %arg9[%114, %c6_42], %113 {strides = array<i32>} : memref<512x16xf32, #tpu.memory_space<vmem>>, vector<1x2xf32>,
      %c4_43 = arith.constant 4 : index
      %116 = arith.index_cast %87 : i32 to index
      %117 = memref.load %arg7[%c4_43, %116] : memref<8x512xi32, #tpu.memory_space<smem>>
      %c0_44 = arith.constant 0 : index
      %118 = arith.index_cast %117 : i32 to index
      %c0_45 = arith.constant 0 : index
      %119 = vector.load %arg5[%c0_44, %118, %c0_45] : memref<1x4096x2xf32, #tpu.memory_space<vmem>>, vector<1x1x2xf32>
      %120 = vector.shape_cast %119 : vector<1x1x2xf32> to vector<1x2xf32>
      %121 = arith.index_cast %87 : i32 to index
      %c8_46 = arith.constant 8 : index
      %122 = vector.load %arg9[%121, %c8_46] : memref<512x16xf32, #tpu.memory_space<vmem>>, vector<1x2xf32>
      tpu.vector_store %arg9[%121, %c8_46], %120 {strides = array<i32>} : memref<512x16xf32, #tpu.memory_space<vmem>>, vector<1x2xf32>,
      %c5 = arith.constant 5 : index
      %123 = arith.index_cast %87 : i32 to index
      %124 = memref.load %arg7[%c5, %123] : memref<8x512xi32, #tpu.memory_space<smem>>
      %c0_47 = arith.constant 0 : index
      %125 = arith.index_cast %124 : i32 to index
      %c0_48 = arith.constant 0 : index
      %126 = vector.load %arg5[%c0_47, %125, %c0_48] : memref<1x4096x2xf32, #tpu.memory_space<vmem>>, vector<1x1x2xf32>
      %127 = vector.shape_cast %126 : vector<1x1x2xf32> to vector<1x2xf32>
      %128 = arith.index_cast %87 : i32 to index
      %c10_49 = arith.constant 10 : index
      %129 = vector.load %arg9[%128, %c10_49] : memref<512x16xf32, #tpu.memory_space<vmem>>, vector<1x2xf32>
      tpu.vector_store %arg9[%128, %c10_49], %127 {strides = array<i32>} : memref<512x16xf32, #tpu.memory_space<vmem>>, vector<1x2xf32>,
      %c6_50 = arith.constant 6 : index
      %130 = arith.index_cast %87 : i32 to index
      %131 = memref.load %arg7[%c6_50, %130] : memref<8x512xi32, #tpu.memory_space<smem>>
      %c0_51 = arith.constant 0 : index
      %132 = arith.index_cast %131 : i32 to index
      %c0_52 = arith.constant 0 : index
      %133 = vector.load %arg5[%c0_51, %132, %c0_52] : memref<1x4096x2xf32, #tpu.memory_space<vmem>>, vector<1x1x2xf32>
      %134 = vector.shape_cast %133 : vector<1x1x2xf32> to vector<1x2xf32>
      %135 = arith.index_cast %87 : i32 to index
      %c12_53 = arith.constant 12 : index
      %136 = vector.load %arg9[%135, %c12_53] : memref<512x16xf32, #tpu.memory_space<vmem>>, vector<1x2xf32>
      tpu.vector_store %arg9[%135, %c12_53], %134 {strides = array<i32>} : memref<512x16xf32, #tpu.memory_space<vmem>>, vector<1x2xf32>,
      %c7 = arith.constant 7 : index
      %137 = arith.index_cast %87 : i32 to index
      %138 = memref.load %arg7[%c7, %137] : memref<8x512xi32, #tpu.memory_space<smem>>
      %c0_54 = arith.constant 0 : index
      %139 = arith.index_cast %138 : i32 to index
      %c0_55 = arith.constant 0 : index
      %140 = vector.load %arg5[%c0_54, %139, %c0_55] : memref<1x4096x2xf32, #tpu.memory_space<vmem>>, vector<1x1x2xf32>
      %141 = vector.shape_cast %140 : vector<1x1x2xf32> to vector<1x2xf32>
      %142 = arith.index_cast %87 : i32 to index
      %c14_56 = arith.constant 14 : index
      %143 = vector.load %arg9[%142, %c14_56] : memref<512x16xf32, #tpu.memory_space<vmem>>, vector<1x2xf32>
      tpu.vector_store %arg9[%142, %c14_56], %141 {strides = array<i32>} : memref<512x16xf32, #tpu.memory_space<vmem>>, vector<1x2xf32>,
      %c1_i32_57 = arith.constant 1 : i32
      %144 = arith.addi %86, %c1_i32_57 : i32
      %c0_58 = arith.constant 0 : index
      %145 = arith.index_cast %144 : i32 to index
      %146 = memref.load %arg7[%c0_58, %145] : memref<8x512xi32, #tpu.memory_space<smem>>
      %c0_59 = arith.constant 0 : index
      %147 = arith.index_cast %146 : i32 to index
      %c0_60 = arith.constant 0 : index
      %148 = vector.load %arg5[%c0_59, %147, %c0_60] : memref<1x4096x2xf32, #tpu.memory_space<vmem>>, vector<1x1x2xf32>
      %149 = vector.shape_cast %148 : vector<1x1x2xf32> to vector<1x2xf32>
      %150 = arith.index_cast %144 : i32 to index
      %c0_61 = arith.constant 0 : index
      %151 = vector.load %arg9[%150, %c0_61] : memref<512x16xf32, #tpu.memory_space<vmem>>, vector<1x2xf32>
      tpu.vector_store %arg9[%150, %c0_61], %149 {strides = array<i32>} : memref<512x16xf32, #tpu.memory_space<vmem>>, vector<1x2xf32>,
      %c1_62 = arith.constant 1 : index
      %152 = arith.index_cast %144 : i32 to index
      %153 = memref.load %arg7[%c1_62, %152] : memref<8x512xi32, #tpu.memory_space<smem>>
      %c0_63 = arith.constant 0 : index
      %154 = arith.index_cast %153 : i32 to index
      %c0_64 = arith.constant 0 : index
      %155 = vector.load %arg5[%c0_63, %154, %c0_64] : memref<1x4096x2xf32, #tpu.memory_space<vmem>>, vector<1x1x2xf32>
      %156 = vector.shape_cast %155 : vector<1x1x2xf32> to vector<1x2xf32>
      %157 = arith.index_cast %144 : i32 to index
      %c2_65 = arith.constant 2 : index
      %158 = vector.load %arg9[%157, %c2_65] : memref<512x16xf32, #tpu.memory_space<vmem>>, vector<1x2xf32>
      tpu.vector_store %arg9[%157, %c2_65], %156 {strides = array<i32>} : memref<512x16xf32, #tpu.memory_space<vmem>>, vector<1x2xf32>,
      %c2_66 = arith.constant 2 : index
      %159 = arith.index_cast %144 : i32 to index
      %160 = memref.load %arg7[%c2_66, %159] : memref<8x512xi32, #tpu.memory_space<smem>>
      %c0_67 = arith.constant 0 : index
      %161 = arith.index_cast %160 : i32 to index
      %c0_68 = arith.constant 0 : index
      %162 = vector.load %arg5[%c0_67, %161, %c0_68] : memref<1x4096x2xf32, #tpu.memory_space<vmem>>, vector<1x1x2xf32>
      %163 = vector.shape_cast %162 : vector<1x1x2xf32> to vector<1x2xf32>
      %164 = arith.index_cast %144 : i32 to index
      %c4_69 = arith.constant 4 : index
      %165 = vector.load %arg9[%164, %c4_69] : memref<512x16xf32, #tpu.memory_space<vmem>>, vector<1x2xf32>
      tpu.vector_store %arg9[%164, %c4_69], %163 {strides = array<i32>} : memref<512x16xf32, #tpu.memory_space<vmem>>, vector<1x2xf32>,
      %c3_70 = arith.constant 3 : index
      %166 = arith.index_cast %144 : i32 to index
      %167 = memref.load %arg7[%c3_70, %166] : memref<8x512xi32, #tpu.memory_space<smem>>
      %c0_71 = arith.constant 0 : index
      %168 = arith.index_cast %167 : i32 to index
      %c0_72 = arith.constant 0 : index
      %169 = vector.load %arg5[%c0_71, %168, %c0_72] : memref<1x4096x2xf32, #tpu.memory_space<vmem>>, vector<1x1x2xf32>
      %170 = vector.shape_cast %169 : vector<1x1x2xf32> to vector<1x2xf32>
      %171 = arith.index_cast %144 : i32 to index
      %c6_73 = arith.constant 6 : index
      %172 = vector.load %arg9[%171, %c6_73] : memref<512x16xf32, #tpu.memory_space<vmem>>, vector<1x2xf32>
      tpu.vector_store %arg9[%171, %c6_73], %170 {strides = array<i32>} : memref<512x16xf32, #tpu.memory_space<vmem>>, vector<1x2xf32>,
      %c4_74 = arith.constant 4 : index
      %173 = arith.index_cast %144 : i32 to index
      %174 = memref.load %arg7[%c4_74, %173] : memref<8x512xi32, #tpu.memory_space<smem>>
      %c0_75 = arith.constant 0 : index
      %175 = arith.index_cast %174 : i32 to index
      %c0_76 = arith.constant 0 : index
      %176 = vector.load %arg5[%c0_75, %175, %c0_76] : memref<1x4096x2xf32, #tpu.memory_space<vmem>>, vector<1x1x2xf32>
      %177 = vector.shape_cast %176 : vector<1x1x2xf32> to vector<1x2xf32>
      %178 = arith.index_cast %144 : i32 to index
      %c8_77 = arith.constant 8 : index
      %179 = vector.load %arg9[%178, %c8_77] : memref<512x16xf32, #tpu.memory_space<vmem>>, vector<1x2xf32>
      tpu.vector_store %arg9[%178, %c8_77], %177 {strides = array<i32>} : memref<512x16xf32, #tpu.memory_space<vmem>>, vector<1x2xf32>,
      %c5_78 = arith.constant 5 : index
      %180 = arith.index_cast %144 : i32 to index
      %181 = memref.load %arg7[%c5_78, %180] : memref<8x512xi32, #tpu.memory_space<smem>>
      %c0_79 = arith.constant 0 : index
      %182 = arith.index_cast %181 : i32 to index
      %c0_80 = arith.constant 0 : index
      %183 = vector.load %arg5[%c0_79, %182, %c0_80] : memref<1x4096x2xf32, #tpu.memory_space<vmem>>, vector<1x1x2xf32>
      %184 = vector.shape_cast %183 : vector<1x1x2xf32> to vector<1x2xf32>
      %185 = arith.index_cast %144 : i32 to index
      %c10_81 = arith.constant 10 : index
      %186 = vector.load %arg9[%185, %c10_81] : memref<512x16xf32, #tpu.memory_space<vmem>>, vector<1x2xf32>
      tpu.vector_store %arg9[%185, %c10_81], %184 {strides = array<i32>} : memref<512x16xf32, #tpu.memory_space<vmem>>, vector<1x2xf32>,
      %c6_82 = arith.constant 6 : index
      %187 = arith.index_cast %144 : i32 to index
      %188 = memref.load %arg7[%c6_82, %187] : memref<8x512xi32, #tpu.memory_space<smem>>
      %c0_83 = arith.constant 0 : index
      %189 = arith.index_cast %188 : i32 to index
      %c0_84 = arith.constant 0 : index
      %190 = vector.load %arg5[%c0_83, %189, %c0_84] : memref<1x4096x2xf32, #tpu.memory_space<vmem>>, vector<1x1x2xf32>
      %191 = vector.shape_cast %190 : vector<1x1x2xf32> to vector<1x2xf32>
      %192 = arith.index_cast %144 : i32 to index
      %c12_85 = arith.constant 12 : index
      %193 = vector.load %arg9[%192, %c12_85] : memref<512x16xf32, #tpu.memory_space<vmem>>, vector<1x2xf32>
      tpu.vector_store %arg9[%192, %c12_85], %191 {strides = array<i32>} : memref<512x16xf32, #tpu.memory_space<vmem>>, vector<1x2xf32>,
      %c7_86 = arith.constant 7 : index
      %194 = arith.index_cast %144 : i32 to index
      %195 = memref.load %arg7[%c7_86, %194] : memref<8x512xi32, #tpu.memory_space<smem>>
      %c0_87 = arith.constant 0 : index
      %196 = arith.index_cast %195 : i32 to index
      %c0_88 = arith.constant 0 : index
      %197 = vector.load %arg5[%c0_87, %196, %c0_88] : memref<1x4096x2xf32, #tpu.memory_space<vmem>>, vector<1x1x2xf32>
      %198 = vector.shape_cast %197 : vector<1x1x2xf32> to vector<1x2xf32>
      %199 = arith.index_cast %144 : i32 to index
      %c14_89 = arith.constant 14 : index
      %200 = vector.load %arg9[%199, %c14_89] : memref<512x16xf32, #tpu.memory_space<vmem>>, vector<1x2xf32>
      tpu.vector_store %arg9[%199, %c14_89], %198 {strides = array<i32>} : memref<512x16xf32, #tpu.memory_space<vmem>>, vector<1x2xf32>,
      %c2_i32 = arith.constant 2 : i32
      %201 = arith.addi %86, %c2_i32 : i32
      %c0_90 = arith.constant 0 : index
      %202 = arith.index_cast %201 : i32 to index
      %203 = memref.load %arg7[%c0_90, %202] : memref<8x512xi32, #tpu.memory_space<smem>>
      %c0_91 = arith.constant 0 : index
      %204 = arith.index_cast %203 : i32 to index
      %c0_92 = arith.constant 0 : index
      %205 = vector.load %arg5[%c0_91, %204, %c0_92] : memref<1x4096x2xf32, #tpu.memory_space<vmem>>, vector<1x1x2xf32>
      %206 = vector.shape_cast %205 : vector<1x1x2xf32> to vector<1x2xf32>
      %207 = arith.index_cast %201 : i32 to index
      %c0_93 = arith.constant 0 : index
      %208 = vector.load %arg9[%207, %c0_93] : memref<512x16xf32, #tpu.memory_space<vmem>>, vector<1x2xf32>
      tpu.vector_store %arg9[%207, %c0_93], %206 {strides = array<i32>} : memref<512x16xf32, #tpu.memory_space<vmem>>, vector<1x2xf32>,
      %c1_94 = arith.constant 1 : index
      %209 = arith.index_cast %201 : i32 to index
      %210 = memref.load %arg7[%c1_94, %209] : memref<8x512xi32, #tpu.memory_space<smem>>
      %c0_95 = arith.constant 0 : index
      %211 = arith.index_cast %210 : i32 to index
      %c0_96 = arith.constant 0 : index
      %212 = vector.load %arg5[%c0_95, %211, %c0_96] : memref<1x4096x2xf32, #tpu.memory_space<vmem>>, vector<1x1x2xf32>
      %213 = vector.shape_cast %212 : vector<1x1x2xf32> to vector<1x2xf32>
      %214 = arith.index_cast %201 : i32 to index
      %c2_97 = arith.constant 2 : index
      %215 = vector.load %arg9[%214, %c2_97] : memref<512x16xf32, #tpu.memory_space<vmem>>, vector<1x2xf32>
      tpu.vector_store %arg9[%214, %c2_97], %213 {strides = array<i32>} : memref<512x16xf32, #tpu.memory_space<vmem>>, vector<1x2xf32>,
      %c2_98 = arith.constant 2 : index
      %216 = arith.index_cast %201 : i32 to index
      %217 = memref.load %arg7[%c2_98, %216] : memref<8x512xi32, #tpu.memory_space<smem>>
      %c0_99 = arith.constant 0 : index
      %218 = arith.index_cast %217 : i32 to index
      %c0_100 = arith.constant 0 : index
      %219 = vector.load %arg5[%c0_99, %218, %c0_100] : memref<1x4096x2xf32, #tpu.memory_space<vmem>>, vector<1x1x2xf32>
      %220 = vector.shape_cast %219 : vector<1x1x2xf32> to vector<1x2xf32>
      %221 = arith.index_cast %201 : i32 to index
      %c4_101 = arith.constant 4 : index
      %222 = vector.load %arg9[%221, %c4_101] : memref<512x16xf32, #tpu.memory_space<vmem>>, vector<1x2xf32>
      tpu.vector_store %arg9[%221, %c4_101], %220 {strides = array<i32>} : memref<512x16xf32, #tpu.memory_space<vmem>>, vector<1x2xf32>,
      %c3_102 = arith.constant 3 : index
      %223 = arith.index_cast %201 : i32 to index
      %224 = memref.load %arg7[%c3_102, %223] : memref<8x512xi32, #tpu.memory_space<smem>>
      %c0_103 = arith.constant 0 : index
      %225 = arith.index_cast %224 : i32 to index
      %c0_104 = arith.constant 0 : index
      %226 = vector.load %arg5[%c0_103, %225, %c0_104] : memref<1x4096x2xf32, #tpu.memory_space<vmem>>, vector<1x1x2xf32>
      %227 = vector.shape_cast %226 : vector<1x1x2xf32> to vector<1x2xf32>
      %228 = arith.index_cast %201 : i32 to index
      %c6_105 = arith.constant 6 : index
      %229 = vector.load %arg9[%228, %c6_105] : memref<512x16xf32, #tpu.memory_space<vmem>>, vector<1x2xf32>
      tpu.vector_store %arg9[%228, %c6_105], %227 {strides = array<i32>} : memref<512x16xf32, #tpu.memory_space<vmem>>, vector<1x2xf32>,
      %c4_106 = arith.constant 4 : index
      %230 = arith.index_cast %201 : i32 to index
      %231 = memref.load %arg7[%c4_106, %230] : memref<8x512xi32, #tpu.memory_space<smem>>
      %c0_107 = arith.constant 0 : index
      %232 = arith.index_cast %231 : i32 to index
      %c0_108 = arith.constant 0 : index
      %233 = vector.load %arg5[%c0_107, %232, %c0_108] : memref<1x4096x2xf32, #tpu.memory_space<vmem>>, vector<1x1x2xf32>
      %234 = vector.shape_cast %233 : vector<1x1x2xf32> to vector<1x2xf32>
      %235 = arith.index_cast %201 : i32 to index
      %c8_109 = arith.constant 8 : index
      %236 = vector.load %arg9[%235, %c8_109] : memref<512x16xf32, #tpu.memory_space<vmem>>, vector<1x2xf32>
      tpu.vector_store %arg9[%235, %c8_109], %234 {strides = array<i32>} : memref<512x16xf32, #tpu.memory_space<vmem>>, vector<1x2xf32>,
      %c5_110 = arith.constant 5 : index
      %237 = arith.index_cast %201 : i32 to index
      %238 = memref.load %arg7[%c5_110, %237] : memref<8x512xi32, #tpu.memory_space<smem>>
      %c0_111 = arith.constant 0 : index
      %239 = arith.index_cast %238 : i32 to index
      %c0_112 = arith.constant 0 : index
      %240 = vector.load %arg5[%c0_111, %239, %c0_112] : memref<1x4096x2xf32, #tpu.memory_space<vmem>>, vector<1x1x2xf32>
      %241 = vector.shape_cast %240 : vector<1x1x2xf32> to vector<1x2xf32>
      %242 = arith.index_cast %201 : i32 to index
      %c10_113 = arith.constant 10 : index
      %243 = vector.load %arg9[%242, %c10_113] : memref<512x16xf32, #tpu.memory_space<vmem>>, vector<1x2xf32>
      tpu.vector_store %arg9[%242, %c10_113], %241 {strides = array<i32>} : memref<512x16xf32, #tpu.memory_space<vmem>>, vector<1x2xf32>,
      %c6_114 = arith.constant 6 : index
      %244 = arith.index_cast %201 : i32 to index
      %245 = memref.load %arg7[%c6_114, %244] : memref<8x512xi32, #tpu.memory_space<smem>>
      %c0_115 = arith.constant 0 : index
      %246 = arith.index_cast %245 : i32 to index
      %c0_116 = arith.constant 0 : index
      %247 = vector.load %arg5[%c0_115, %246, %c0_116] : memref<1x4096x2xf32, #tpu.memory_space<vmem>>, vector<1x1x2xf32>
      %248 = vector.shape_cast %247 : vector<1x1x2xf32> to vector<1x2xf32>
      %249 = arith.index_cast %201 : i32 to index
      %c12_117 = arith.constant 12 : index
      %250 = vector.load %arg9[%249, %c12_117] : memref<512x16xf32, #tpu.memory_space<vmem>>, vector<1x2xf32>
      tpu.vector_store %arg9[%249, %c12_117], %248 {strides = array<i32>} : memref<512x16xf32, #tpu.memory_space<vmem>>, vector<1x2xf32>,
      %c7_118 = arith.constant 7 : index
      %251 = arith.index_cast %201 : i32 to index
      %252 = memref.load %arg7[%c7_118, %251] : memref<8x512xi32, #tpu.memory_space<smem>>
      %c0_119 = arith.constant 0 : index
      %253 = arith.index_cast %252 : i32 to index
      %c0_120 = arith.constant 0 : index
      %254 = vector.load %arg5[%c0_119, %253, %c0_120] : memref<1x4096x2xf32, #tpu.memory_space<vmem>>, vector<1x1x2xf32>
      %255 = vector.shape_cast %254 : vector<1x1x2xf32> to vector<1x2xf32>
      %256 = arith.index_cast %201 : i32 to index
      %c14_121 = arith.constant 14 : index
      %257 = vector.load %arg9[%256, %c14_121] : memref<512x16xf32, #tpu.memory_space<vmem>>, vector<1x2xf32>
      tpu.vector_store %arg9[%256, %c14_121], %255 {strides = array<i32>} : memref<512x16xf32, #tpu.memory_space<vmem>>, vector<1x2xf32>,
      %c3_i32 = arith.constant 3 : i32
      %258 = arith.addi %86, %c3_i32 : i32
      %c0_122 = arith.constant 0 : index
      %259 = arith.index_cast %258 : i32 to index
      %260 = memref.load %arg7[%c0_122, %259] : memref<8x512xi32, #tpu.memory_space<smem>>
      %c0_123 = arith.constant 0 : index
      %261 = arith.index_cast %260 : i32 to index
      %c0_124 = arith.constant 0 : index
      %262 = vector.load %arg5[%c0_123, %261, %c0_124] : memref<1x4096x2xf32, #tpu.memory_space<vmem>>, vector<1x1x2xf32>
      %263 = vector.shape_cast %262 : vector<1x1x2xf32> to vector<1x2xf32>
      %264 = arith.index_cast %258 : i32 to index
      %c0_125 = arith.constant 0 : index
      %265 = vector.load %arg9[%264, %c0_125] : memref<512x16xf32, #tpu.memory_space<vmem>>, vector<1x2xf32>
      tpu.vector_store %arg9[%264, %c0_125], %263 {strides = array<i32>} : memref<512x16xf32, #tpu.memory_space<vmem>>, vector<1x2xf32>,
      %c1_126 = arith.constant 1 : index
      %266 = arith.index_cast %258 : i32 to index
      %267 = memref.load %arg7[%c1_126, %266] : memref<8x512xi32, #tpu.memory_space<smem>>
      %c0_127 = arith.constant 0 : index
      %268 = arith.index_cast %267 : i32 to index
      %c0_128 = arith.constant 0 : index
      %269 = vector.load %arg5[%c0_127, %268, %c0_128] : memref<1x4096x2xf32, #tpu.memory_space<vmem>>, vector<1x1x2xf32>
      %270 = vector.shape_cast %269 : vector<1x1x2xf32> to vector<1x2xf32>
      %271 = arith.index_cast %258 : i32 to index
      %c2_129 = arith.constant 2 : index
      %272 = vector.load %arg9[%271, %c2_129] : memref<512x16xf32, #tpu.memory_space<vmem>>, vector<1x2xf32>
      tpu.vector_store %arg9[%271, %c2_129], %270 {strides = array<i32>} : memref<512x16xf32, #tpu.memory_space<vmem>>, vector<1x2xf32>,
      %c2_130 = arith.constant 2 : index
      %273 = arith.index_cast %258 : i32 to index
      %274 = memref.load %arg7[%c2_130, %273] : memref<8x512xi32, #tpu.memory_space<smem>>
      %c0_131 = arith.constant 0 : index
      %275 = arith.index_cast %274 : i32 to index
      %c0_132 = arith.constant 0 : index
      %276 = vector.load %arg5[%c0_131, %275, %c0_132] : memref<1x4096x2xf32, #tpu.memory_space<vmem>>, vector<1x1x2xf32>
      %277 = vector.shape_cast %276 : vector<1x1x2xf32> to vector<1x2xf32>
      %278 = arith.index_cast %258 : i32 to index
      %c4_133 = arith.constant 4 : index
      %279 = vector.load %arg9[%278, %c4_133] : memref<512x16xf32, #tpu.memory_space<vmem>>, vector<1x2xf32>
      tpu.vector_store %arg9[%278, %c4_133], %277 {strides = array<i32>} : memref<512x16xf32, #tpu.memory_space<vmem>>, vector<1x2xf32>,
      %c3_134 = arith.constant 3 : index
      %280 = arith.index_cast %258 : i32 to index
      %281 = memref.load %arg7[%c3_134, %280] : memref<8x512xi32, #tpu.memory_space<smem>>
      %c0_135 = arith.constant 0 : index
      %282 = arith.index_cast %281 : i32 to index
      %c0_136 = arith.constant 0 : index
      %283 = vector.load %arg5[%c0_135, %282, %c0_136] : memref<1x4096x2xf32, #tpu.memory_space<vmem>>, vector<1x1x2xf32>
      %284 = vector.shape_cast %283 : vector<1x1x2xf32> to vector<1x2xf32>
      %285 = arith.index_cast %258 : i32 to index
      %c6_137 = arith.constant 6 : index
      %286 = vector.load %arg9[%285, %c6_137] : memref<512x16xf32, #tpu.memory_space<vmem>>, vector<1x2xf32>
      tpu.vector_store %arg9[%285, %c6_137], %284 {strides = array<i32>} : memref<512x16xf32, #tpu.memory_space<vmem>>, vector<1x2xf32>,
      %c4_138 = arith.constant 4 : index
      %287 = arith.index_cast %258 : i32 to index
      %288 = memref.load %arg7[%c4_138, %287] : memref<8x512xi32, #tpu.memory_space<smem>>
      %c0_139 = arith.constant 0 : index
      %289 = arith.index_cast %288 : i32 to index
      %c0_140 = arith.constant 0 : index
      %290 = vector.load %arg5[%c0_139, %289, %c0_140] : memref<1x4096x2xf32, #tpu.memory_space<vmem>>, vector<1x1x2xf32>
      %291 = vector.shape_cast %290 : vector<1x1x2xf32> to vector<1x2xf32>
      %292 = arith.index_cast %258 : i32 to index
      %c8_141 = arith.constant 8 : index
      %293 = vector.load %arg9[%292, %c8_141] : memref<512x16xf32, #tpu.memory_space<vmem>>, vector<1x2xf32>
      tpu.vector_store %arg9[%292, %c8_141], %291 {strides = array<i32>} : memref<512x16xf32, #tpu.memory_space<vmem>>, vector<1x2xf32>,
      %c5_142 = arith.constant 5 : index
      %294 = arith.index_cast %258 : i32 to index
      %295 = memref.load %arg7[%c5_142, %294] : memref<8x512xi32, #tpu.memory_space<smem>>
      %c0_143 = arith.constant 0 : index
      %296 = arith.index_cast %295 : i32 to index
      %c0_144 = arith.constant 0 : index
      %297 = vector.load %arg5[%c0_143, %296, %c0_144] : memref<1x4096x2xf32, #tpu.memory_space<vmem>>, vector<1x1x2xf32>
      %298 = vector.shape_cast %297 : vector<1x1x2xf32> to vector<1x2xf32>
      %299 = arith.index_cast %258 : i32 to index
      %c10_145 = arith.constant 10 : index
      %300 = vector.load %arg9[%299, %c10_145] : memref<512x16xf32, #tpu.memory_space<vmem>>, vector<1x2xf32>
      tpu.vector_store %arg9[%299, %c10_145], %298 {strides = array<i32>} : memref<512x16xf32, #tpu.memory_space<vmem>>, vector<1x2xf32>,
      %c6_146 = arith.constant 6 : index
      %301 = arith.index_cast %258 : i32 to index
      %302 = memref.load %arg7[%c6_146, %301] : memref<8x512xi32, #tpu.memory_space<smem>>
      %c0_147 = arith.constant 0 : index
      %303 = arith.index_cast %302 : i32 to index
      %c0_148 = arith.constant 0 : index
      %304 = vector.load %arg5[%c0_147, %303, %c0_148] : memref<1x4096x2xf32, #tpu.memory_space<vmem>>, vector<1x1x2xf32>
      %305 = vector.shape_cast %304 : vector<1x1x2xf32> to vector<1x2xf32>
      %306 = arith.index_cast %258 : i32 to index
      %c12_149 = arith.constant 12 : index
      %307 = vector.load %arg9[%306, %c12_149] : memref<512x16xf32, #tpu.memory_space<vmem>>, vector<1x2xf32>
      tpu.vector_store %arg9[%306, %c12_149], %305 {strides = array<i32>} : memref<512x16xf32, #tpu.memory_space<vmem>>, vector<1x2xf32>,
      %c7_150 = arith.constant 7 : index
      %308 = arith.index_cast %258 : i32 to index
      %309 = memref.load %arg7[%c7_150, %308] : memref<8x512xi32, #tpu.memory_space<smem>>
      %c0_151 = arith.constant 0 : index
      %310 = arith.index_cast %309 : i32 to index
      %c0_152 = arith.constant 0 : index
      %311 = vector.load %arg5[%c0_151, %310, %c0_152] : memref<1x4096x2xf32, #tpu.memory_space<vmem>>, vector<1x1x2xf32>
      %312 = vector.shape_cast %311 : vector<1x1x2xf32> to vector<1x2xf32>
      %313 = arith.index_cast %258 : i32 to index
      %c14_153 = arith.constant 14 : index
      %314 = vector.load %arg9[%313, %c14_153] : memref<512x16xf32, #tpu.memory_space<vmem>>, vector<1x2xf32>
      tpu.vector_store %arg9[%313, %c14_153], %312 {strides = array<i32>} : memref<512x16xf32, #tpu.memory_space<vmem>>, vector<1x2xf32>,
      %c4_i32 = arith.constant 4 : i32
      %315 = arith.addi %86, %c4_i32 : i32
      %c0_154 = arith.constant 0 : index
      %316 = arith.index_cast %315 : i32 to index
      %317 = memref.load %arg7[%c0_154, %316] : memref<8x512xi32, #tpu.memory_space<smem>>
      %c0_155 = arith.constant 0 : index
      %318 = arith.index_cast %317 : i32 to index
      %c0_156 = arith.constant 0 : index
      %319 = vector.load %arg5[%c0_155, %318, %c0_156] : memref<1x4096x2xf32, #tpu.memory_space<vmem>>, vector<1x1x2xf32>
      %320 = vector.shape_cast %319 : vector<1x1x2xf32> to vector<1x2xf32>
      %321 = arith.index_cast %315 : i32 to index
      %c0_157 = arith.constant 0 : index
      %322 = vector.load %arg9[%321, %c0_157] : memref<512x16xf32, #tpu.memory_space<vmem>>, vector<1x2xf32>
      tpu.vector_store %arg9[%321, %c0_157], %320 {strides = array<i32>} : memref<512x16xf32, #tpu.memory_space<vmem>>, vector<1x2xf32>,
      %c1_158 = arith.constant 1 : index
      %323 = arith.index_cast %315 : i32 to index
      %324 = memref.load %arg7[%c1_158, %323] : memref<8x512xi32, #tpu.memory_space<smem>>
      %c0_159 = arith.constant 0 : index
      %325 = arith.index_cast %324 : i32 to index
      %c0_160 = arith.constant 0 : index
      %326 = vector.load %arg5[%c0_159, %325, %c0_160] : memref<1x4096x2xf32, #tpu.memory_space<vmem>>, vector<1x1x2xf32>
      %327 = vector.shape_cast %326 : vector<1x1x2xf32> to vector<1x2xf32>
      %328 = arith.index_cast %315 : i32 to index
      %c2_161 = arith.constant 2 : index
      %329 = vector.load %arg9[%328, %c2_161] : memref<512x16xf32, #tpu.memory_space<vmem>>, vector<1x2xf32>
      tpu.vector_store %arg9[%328, %c2_161], %327 {strides = array<i32>} : memref<512x16xf32, #tpu.memory_space<vmem>>, vector<1x2xf32>,
      %c2_162 = arith.constant 2 : index
      %330 = arith.index_cast %315 : i32 to index
      %331 = memref.load %arg7[%c2_162, %330] : memref<8x512xi32, #tpu.memory_space<smem>>
      %c0_163 = arith.constant 0 : index
      %332 = arith.index_cast %331 : i32 to index
      %c0_164 = arith.constant 0 : index
      %333 = vector.load %arg5[%c0_163, %332, %c0_164] : memref<1x4096x2xf32, #tpu.memory_space<vmem>>, vector<1x1x2xf32>
      %334 = vector.shape_cast %333 : vector<1x1x2xf32> to vector<1x2xf32>
      %335 = arith.index_cast %315 : i32 to index
      %c4_165 = arith.constant 4 : index
      %336 = vector.load %arg9[%335, %c4_165] : memref<512x16xf32, #tpu.memory_space<vmem>>, vector<1x2xf32>
      tpu.vector_store %arg9[%335, %c4_165], %334 {strides = array<i32>} : memref<512x16xf32, #tpu.memory_space<vmem>>, vector<1x2xf32>,
      %c3_166 = arith.constant 3 : index
      %337 = arith.index_cast %315 : i32 to index
      %338 = memref.load %arg7[%c3_166, %337] : memref<8x512xi32, #tpu.memory_space<smem>>
      %c0_167 = arith.constant 0 : index
      %339 = arith.index_cast %338 : i32 to index
      %c0_168 = arith.constant 0 : index
      %340 = vector.load %arg5[%c0_167, %339, %c0_168] : memref<1x4096x2xf32, #tpu.memory_space<vmem>>, vector<1x1x2xf32>
      %341 = vector.shape_cast %340 : vector<1x1x2xf32> to vector<1x2xf32>
      %342 = arith.index_cast %315 : i32 to index
      %c6_169 = arith.constant 6 : index
      %343 = vector.load %arg9[%342, %c6_169] : memref<512x16xf32, #tpu.memory_space<vmem>>, vector<1x2xf32>
      tpu.vector_store %arg9[%342, %c6_169], %341 {strides = array<i32>} : memref<512x16xf32, #tpu.memory_space<vmem>>, vector<1x2xf32>,
      %c4_170 = arith.constant 4 : index
      %344 = arith.index_cast %315 : i32 to index
      %345 = memref.load %arg7[%c4_170, %344] : memref<8x512xi32, #tpu.memory_space<smem>>
      %c0_171 = arith.constant 0 : index
      %346 = arith.index_cast %345 : i32 to index
      %c0_172 = arith.constant 0 : index
      %347 = vector.load %arg5[%c0_171, %346, %c0_172] : memref<1x4096x2xf32, #tpu.memory_space<vmem>>, vector<1x1x2xf32>
      %348 = vector.shape_cast %347 : vector<1x1x2xf32> to vector<1x2xf32>
      %349 = arith.index_cast %315 : i32 to index
      %c8_173 = arith.constant 8 : index
      %350 = vector.load %arg9[%349, %c8_173] : memref<512x16xf32, #tpu.memory_space<vmem>>, vector<1x2xf32>
      tpu.vector_store %arg9[%349, %c8_173], %348 {strides = array<i32>} : memref<512x16xf32, #tpu.memory_space<vmem>>, vector<1x2xf32>,
      %c5_174 = arith.constant 5 : index
      %351 = arith.index_cast %315 : i32 to index
      %352 = memref.load %arg7[%c5_174, %351] : memref<8x512xi32, #tpu.memory_space<smem>>
      %c0_175 = arith.constant 0 : index
      %353 = arith.index_cast %352 : i32 to index
      %c0_176 = arith.constant 0 : index
      %354 = vector.load %arg5[%c0_175, %353, %c0_176] : memref<1x4096x2xf32, #tpu.memory_space<vmem>>, vector<1x1x2xf32>
      %355 = vector.shape_cast %354 : vector<1x1x2xf32> to vector<1x2xf32>
      %356 = arith.index_cast %315 : i32 to index
      %c10_177 = arith.constant 10 : index
      %357 = vector.load %arg9[%356, %c10_177] : memref<512x16xf32, #tpu.memory_space<vmem>>, vector<1x2xf32>
      tpu.vector_store %arg9[%356, %c10_177], %355 {strides = array<i32>} : memref<512x16xf32, #tpu.memory_space<vmem>>, vector<1x2xf32>,
      %c6_178 = arith.constant 6 : index
      %358 = arith.index_cast %315 : i32 to index
      %359 = memref.load %arg7[%c6_178, %358] : memref<8x512xi32, #tpu.memory_space<smem>>
      %c0_179 = arith.constant 0 : index
      %360 = arith.index_cast %359 : i32 to index
      %c0_180 = arith.constant 0 : index
      %361 = vector.load %arg5[%c0_179, %360, %c0_180] : memref<1x4096x2xf32, #tpu.memory_space<vmem>>, vector<1x1x2xf32>
      %362 = vector.shape_cast %361 : vector<1x1x2xf32> to vector<1x2xf32>
      %363 = arith.index_cast %315 : i32 to index
      %c12_181 = arith.constant 12 : index
      %364 = vector.load %arg9[%363, %c12_181] : memref<512x16xf32, #tpu.memory_space<vmem>>, vector<1x2xf32>
      tpu.vector_store %arg9[%363, %c12_181], %362 {strides = array<i32>} : memref<512x16xf32, #tpu.memory_space<vmem>>, vector<1x2xf32>,
      %c7_182 = arith.constant 7 : index
      %365 = arith.index_cast %315 : i32 to index
      %366 = memref.load %arg7[%c7_182, %365] : memref<8x512xi32, #tpu.memory_space<smem>>
      %c0_183 = arith.constant 0 : index
      %367 = arith.index_cast %366 : i32 to index
      %c0_184 = arith.constant 0 : index
      %368 = vector.load %arg5[%c0_183, %367, %c0_184] : memref<1x4096x2xf32, #tpu.memory_space<vmem>>, vector<1x1x2xf32>
      %369 = vector.shape_cast %368 : vector<1x1x2xf32> to vector<1x2xf32>
      %370 = arith.index_cast %315 : i32 to index
      %c14_185 = arith.constant 14 : index
      %371 = vector.load %arg9[%370, %c14_185] : memref<512x16xf32, #tpu.memory_space<vmem>>, vector<1x2xf32>
      tpu.vector_store %arg9[%370, %c14_185], %369 {strides = array<i32>} : memref<512x16xf32, #tpu.memory_space<vmem>>, vector<1x2xf32>,
      %c5_i32 = arith.constant 5 : i32
      %372 = arith.addi %86, %c5_i32 : i32
      %c0_186 = arith.constant 0 : index
      %373 = arith.index_cast %372 : i32 to index
      %374 = memref.load %arg7[%c0_186, %373] : memref<8x512xi32, #tpu.memory_space<smem>>
      %c0_187 = arith.constant 0 : index
      %375 = arith.index_cast %374 : i32 to index
      %c0_188 = arith.constant 0 : index
      %376 = vector.load %arg5[%c0_187, %375, %c0_188] : memref<1x4096x2xf32, #tpu.memory_space<vmem>>, vector<1x1x2xf32>
      %377 = vector.shape_cast %376 : vector<1x1x2xf32> to vector<1x2xf32>
      %378 = arith.index_cast %372 : i32 to index
      %c0_189 = arith.constant 0 : index
      %379 = vector.load %arg9[%378, %c0_189] : memref<512x16xf32, #tpu.memory_space<vmem>>, vector<1x2xf32>
      tpu.vector_store %arg9[%378, %c0_189], %377 {strides = array<i32>} : memref<512x16xf32, #tpu.memory_space<vmem>>, vector<1x2xf32>,
      %c1_190 = arith.constant 1 : index
      %380 = arith.index_cast %372 : i32 to index
      %381 = memref.load %arg7[%c1_190, %380] : memref<8x512xi32, #tpu.memory_space<smem>>
      %c0_191 = arith.constant 0 : index
      %382 = arith.index_cast %381 : i32 to index
      %c0_192 = arith.constant 0 : index
      %383 = vector.load %arg5[%c0_191, %382, %c0_192] : memref<1x4096x2xf32, #tpu.memory_space<vmem>>, vector<1x1x2xf32>
      %384 = vector.shape_cast %383 : vector<1x1x2xf32> to vector<1x2xf32>
      %385 = arith.index_cast %372 : i32 to index
      %c2_193 = arith.constant 2 : index
      %386 = vector.load %arg9[%385, %c2_193] : memref<512x16xf32, #tpu.memory_space<vmem>>, vector<1x2xf32>
      tpu.vector_store %arg9[%385, %c2_193], %384 {strides = array<i32>} : memref<512x16xf32, #tpu.memory_space<vmem>>, vector<1x2xf32>,
      %c2_194 = arith.constant 2 : index
      %387 = arith.index_cast %372 : i32 to index
      %388 = memref.load %arg7[%c2_194, %387] : memref<8x512xi32, #tpu.memory_space<smem>>
      %c0_195 = arith.constant 0 : index
      %389 = arith.index_cast %388 : i32 to index
      %c0_196 = arith.constant 0 : index
      %390 = vector.load %arg5[%c0_195, %389, %c0_196] : memref<1x4096x2xf32, #tpu.memory_space<vmem>>, vector<1x1x2xf32>
      %391 = vector.shape_cast %390 : vector<1x1x2xf32> to vector<1x2xf32>
      %392 = arith.index_cast %372 : i32 to index
      %c4_197 = arith.constant 4 : index
      %393 = vector.load %arg9[%392, %c4_197] : memref<512x16xf32, #tpu.memory_space<vmem>>, vector<1x2xf32>
      tpu.vector_store %arg9[%392, %c4_197], %391 {strides = array<i32>} : memref<512x16xf32, #tpu.memory_space<vmem>>, vector<1x2xf32>,
      %c3_198 = arith.constant 3 : index
      %394 = arith.index_cast %372 : i32 to index
      %395 = memref.load %arg7[%c3_198, %394] : memref<8x512xi32, #tpu.memory_space<smem>>
      %c0_199 = arith.constant 0 : index
      %396 = arith.index_cast %395 : i32 to index
      %c0_200 = arith.constant 0 : index
      %397 = vector.load %arg5[%c0_199, %396, %c0_200] : memref<1x4096x2xf32, #tpu.memory_space<vmem>>, vector<1x1x2xf32>
      %398 = vector.shape_cast %397 : vector<1x1x2xf32> to vector<1x2xf32>
      %399 = arith.index_cast %372 : i32 to index
      %c6_201 = arith.constant 6 : index
      %400 = vector.load %arg9[%399, %c6_201] : memref<512x16xf32, #tpu.memory_space<vmem>>, vector<1x2xf32>
      tpu.vector_store %arg9[%399, %c6_201], %398 {strides = array<i32>} : memref<512x16xf32, #tpu.memory_space<vmem>>, vector<1x2xf32>,
      %c4_202 = arith.constant 4 : index
      %401 = arith.index_cast %372 : i32 to index
      %402 = memref.load %arg7[%c4_202, %401] : memref<8x512xi32, #tpu.memory_space<smem>>
      %c0_203 = arith.constant 0 : index
      %403 = arith.index_cast %402 : i32 to index
      %c0_204 = arith.constant 0 : index
      %404 = vector.load %arg5[%c0_203, %403, %c0_204] : memref<1x4096x2xf32, #tpu.memory_space<vmem>>, vector<1x1x2xf32>
      %405 = vector.shape_cast %404 : vector<1x1x2xf32> to vector<1x2xf32>
      %406 = arith.index_cast %372 : i32 to index
      %c8_205 = arith.constant 8 : index
      %407 = vector.load %arg9[%406, %c8_205] : memref<512x16xf32, #tpu.memory_space<vmem>>, vector<1x2xf32>
      tpu.vector_store %arg9[%406, %c8_205], %405 {strides = array<i32>} : memref<512x16xf32, #tpu.memory_space<vmem>>, vector<1x2xf32>,
      %c5_206 = arith.constant 5 : index
      %408 = arith.index_cast %372 : i32 to index
      %409 = memref.load %arg7[%c5_206, %408] : memref<8x512xi32, #tpu.memory_space<smem>>
      %c0_207 = arith.constant 0 : index
      %410 = arith.index_cast %409 : i32 to index
      %c0_208 = arith.constant 0 : index
      %411 = vector.load %arg5[%c0_207, %410, %c0_208] : memref<1x4096x2xf32, #tpu.memory_space<vmem>>, vector<1x1x2xf32>
      %412 = vector.shape_cast %411 : vector<1x1x2xf32> to vector<1x2xf32>
      %413 = arith.index_cast %372 : i32 to index
      %c10_209 = arith.constant 10 : index
      %414 = vector.load %arg9[%413, %c10_209] : memref<512x16xf32, #tpu.memory_space<vmem>>, vector<1x2xf32>
      tpu.vector_store %arg9[%413, %c10_209], %412 {strides = array<i32>} : memref<512x16xf32, #tpu.memory_space<vmem>>, vector<1x2xf32>,
      %c6_210 = arith.constant 6 : index
      %415 = arith.index_cast %372 : i32 to index
      %416 = memref.load %arg7[%c6_210, %415] : memref<8x512xi32, #tpu.memory_space<smem>>
      %c0_211 = arith.constant 0 : index
      %417 = arith.index_cast %416 : i32 to index
      %c0_212 = arith.constant 0 : index
      %418 = vector.load %arg5[%c0_211, %417, %c0_212] : memref<1x4096x2xf32, #tpu.memory_space<vmem>>, vector<1x1x2xf32>
      %419 = vector.shape_cast %418 : vector<1x1x2xf32> to vector<1x2xf32>
      %420 = arith.index_cast %372 : i32 to index
      %c12_213 = arith.constant 12 : index
      %421 = vector.load %arg9[%420, %c12_213] : memref<512x16xf32, #tpu.memory_space<vmem>>, vector<1x2xf32>
      tpu.vector_store %arg9[%420, %c12_213], %419 {strides = array<i32>} : memref<512x16xf32, #tpu.memory_space<vmem>>, vector<1x2xf32>,
      %c7_214 = arith.constant 7 : index
      %422 = arith.index_cast %372 : i32 to index
      %423 = memref.load %arg7[%c7_214, %422] : memref<8x512xi32, #tpu.memory_space<smem>>
      %c0_215 = arith.constant 0 : index
      %424 = arith.index_cast %423 : i32 to index
      %c0_216 = arith.constant 0 : index
      %425 = vector.load %arg5[%c0_215, %424, %c0_216] : memref<1x4096x2xf32, #tpu.memory_space<vmem>>, vector<1x1x2xf32>
      %426 = vector.shape_cast %425 : vector<1x1x2xf32> to vector<1x2xf32>
      %427 = arith.index_cast %372 : i32 to index
      %c14_217 = arith.constant 14 : index
      %428 = vector.load %arg9[%427, %c14_217] : memref<512x16xf32, #tpu.memory_space<vmem>>, vector<1x2xf32>
      tpu.vector_store %arg9[%427, %c14_217], %426 {strides = array<i32>} : memref<512x16xf32, #tpu.memory_space<vmem>>, vector<1x2xf32>,
      %c6_i32 = arith.constant 6 : i32
      %429 = arith.addi %86, %c6_i32 : i32
      %c0_218 = arith.constant 0 : index
      %430 = arith.index_cast %429 : i32 to index
      %431 = memref.load %arg7[%c0_218, %430] : memref<8x512xi32, #tpu.memory_space<smem>>
      %c0_219 = arith.constant 0 : index
      %432 = arith.index_cast %431 : i32 to index
      %c0_220 = arith.constant 0 : index
      %433 = vector.load %arg5[%c0_219, %432, %c0_220] : memref<1x4096x2xf32, #tpu.memory_space<vmem>>, vector<1x1x2xf32>
      %434 = vector.shape_cast %433 : vector<1x1x2xf32> to vector<1x2xf32>
      %435 = arith.index_cast %429 : i32 to index
      %c0_221 = arith.constant 0 : index
      %436 = vector.load %arg9[%435, %c0_221] : memref<512x16xf32, #tpu.memory_space<vmem>>, vector<1x2xf32>
      tpu.vector_store %arg9[%435, %c0_221], %434 {strides = array<i32>} : memref<512x16xf32, #tpu.memory_space<vmem>>, vector<1x2xf32>,
      %c1_222 = arith.constant 1 : index
      %437 = arith.index_cast %429 : i32 to index
      %438 = memref.load %arg7[%c1_222, %437] : memref<8x512xi32, #tpu.memory_space<smem>>
      %c0_223 = arith.constant 0 : index
      %439 = arith.index_cast %438 : i32 to index
      %c0_224 = arith.constant 0 : index
      %440 = vector.load %arg5[%c0_223, %439, %c0_224] : memref<1x4096x2xf32, #tpu.memory_space<vmem>>, vector<1x1x2xf32>
      %441 = vector.shape_cast %440 : vector<1x1x2xf32> to vector<1x2xf32>
      %442 = arith.index_cast %429 : i32 to index
      %c2_225 = arith.constant 2 : index
      %443 = vector.load %arg9[%442, %c2_225] : memref<512x16xf32, #tpu.memory_space<vmem>>, vector<1x2xf32>
      tpu.vector_store %arg9[%442, %c2_225], %441 {strides = array<i32>} : memref<512x16xf32, #tpu.memory_space<vmem>>, vector<1x2xf32>,
      %c2_226 = arith.constant 2 : index
      %444 = arith.index_cast %429 : i32 to index
      %445 = memref.load %arg7[%c2_226, %444] : memref<8x512xi32, #tpu.memory_space<smem>>
      %c0_227 = arith.constant 0 : index
      %446 = arith.index_cast %445 : i32 to index
      %c0_228 = arith.constant 0 : index
      %447 = vector.load %arg5[%c0_227, %446, %c0_228] : memref<1x4096x2xf32, #tpu.memory_space<vmem>>, vector<1x1x2xf32>
      %448 = vector.shape_cast %447 : vector<1x1x2xf32> to vector<1x2xf32>
      %449 = arith.index_cast %429 : i32 to index
      %c4_229 = arith.constant 4 : index
      %450 = vector.load %arg9[%449, %c4_229] : memref<512x16xf32, #tpu.memory_space<vmem>>, vector<1x2xf32>
      tpu.vector_store %arg9[%449, %c4_229], %448 {strides = array<i32>} : memref<512x16xf32, #tpu.memory_space<vmem>>, vector<1x2xf32>,
      %c3_230 = arith.constant 3 : index
      %451 = arith.index_cast %429 : i32 to index
      %452 = memref.load %arg7[%c3_230, %451] : memref<8x512xi32, #tpu.memory_space<smem>>
      %c0_231 = arith.constant 0 : index
      %453 = arith.index_cast %452 : i32 to index
      %c0_232 = arith.constant 0 : index
      %454 = vector.load %arg5[%c0_231, %453, %c0_232] : memref<1x4096x2xf32, #tpu.memory_space<vmem>>, vector<1x1x2xf32>
      %455 = vector.shape_cast %454 : vector<1x1x2xf32> to vector<1x2xf32>
      %456 = arith.index_cast %429 : i32 to index
      %c6_233 = arith.constant 6 : index
      %457 = vector.load %arg9[%456, %c6_233] : memref<512x16xf32, #tpu.memory_space<vmem>>, vector<1x2xf32>
      tpu.vector_store %arg9[%456, %c6_233], %455 {strides = array<i32>} : memref<512x16xf32, #tpu.memory_space<vmem>>, vector<1x2xf32>,
      %c4_234 = arith.constant 4 : index
      %458 = arith.index_cast %429 : i32 to index
      %459 = memref.load %arg7[%c4_234, %458] : memref<8x512xi32, #tpu.memory_space<smem>>
      %c0_235 = arith.constant 0 : index
      %460 = arith.index_cast %459 : i32 to index
      %c0_236 = arith.constant 0 : index
      %461 = vector.load %arg5[%c0_235, %460, %c0_236] : memref<1x4096x2xf32, #tpu.memory_space<vmem>>, vector<1x1x2xf32>
      %462 = vector.shape_cast %461 : vector<1x1x2xf32> to vector<1x2xf32>
      %463 = arith.index_cast %429 : i32 to index
      %c8_237 = arith.constant 8 : index
      %464 = vector.load %arg9[%463, %c8_237] : memref<512x16xf32, #tpu.memory_space<vmem>>, vector<1x2xf32>
      tpu.vector_store %arg9[%463, %c8_237], %462 {strides = array<i32>} : memref<512x16xf32, #tpu.memory_space<vmem>>, vector<1x2xf32>,
      %c5_238 = arith.constant 5 : index
      %465 = arith.index_cast %429 : i32 to index
      %466 = memref.load %arg7[%c5_238, %465] : memref<8x512xi32, #tpu.memory_space<smem>>
      %c0_239 = arith.constant 0 : index
      %467 = arith.index_cast %466 : i32 to index
      %c0_240 = arith.constant 0 : index
      %468 = vector.load %arg5[%c0_239, %467, %c0_240] : memref<1x4096x2xf32, #tpu.memory_space<vmem>>, vector<1x1x2xf32>
      %469 = vector.shape_cast %468 : vector<1x1x2xf32> to vector<1x2xf32>
      %470 = arith.index_cast %429 : i32 to index
      %c10_241 = arith.constant 10 : index
      %471 = vector.load %arg9[%470, %c10_241] : memref<512x16xf32, #tpu.memory_space<vmem>>, vector<1x2xf32>
      tpu.vector_store %arg9[%470, %c10_241], %469 {strides = array<i32>} : memref<512x16xf32, #tpu.memory_space<vmem>>, vector<1x2xf32>,
      %c6_242 = arith.constant 6 : index
      %472 = arith.index_cast %429 : i32 to index
      %473 = memref.load %arg7[%c6_242, %472] : memref<8x512xi32, #tpu.memory_space<smem>>
      %c0_243 = arith.constant 0 : index
      %474 = arith.index_cast %473 : i32 to index
      %c0_244 = arith.constant 0 : index
      %475 = vector.load %arg5[%c0_243, %474, %c0_244] : memref<1x4096x2xf32, #tpu.memory_space<vmem>>, vector<1x1x2xf32>
      %476 = vector.shape_cast %475 : vector<1x1x2xf32> to vector<1x2xf32>
      %477 = arith.index_cast %429 : i32 to index
      %c12_245 = arith.constant 12 : index
      %478 = vector.load %arg9[%477, %c12_245] : memref<512x16xf32, #tpu.memory_space<vmem>>, vector<1x2xf32>
      tpu.vector_store %arg9[%477, %c12_245], %476 {strides = array<i32>} : memref<512x16xf32, #tpu.memory_space<vmem>>, vector<1x2xf32>,
      %c7_246 = arith.constant 7 : index
      %479 = arith.index_cast %429 : i32 to index
      %480 = memref.load %arg7[%c7_246, %479] : memref<8x512xi32, #tpu.memory_space<smem>>
      %c0_247 = arith.constant 0 : index
      %481 = arith.index_cast %480 : i32 to index
      %c0_248 = arith.constant 0 : index
      %482 = vector.load %arg5[%c0_247, %481, %c0_248] : memref<1x4096x2xf32, #tpu.memory_space<vmem>>, vector<1x1x2xf32>
      %483 = vector.shape_cast %482 : vector<1x1x2xf32> to vector<1x2xf32>
      %484 = arith.index_cast %429 : i32 to index
      %c14_249 = arith.constant 14 : index
      %485 = vector.load %arg9[%484, %c14_249] : memref<512x16xf32, #tpu.memory_space<vmem>>, vector<1x2xf32>
      tpu.vector_store %arg9[%484, %c14_249], %483 {strides = array<i32>} : memref<512x16xf32, #tpu.memory_space<vmem>>, vector<1x2xf32>,
      %c7_i32 = arith.constant 7 : i32
      %486 = arith.addi %86, %c7_i32 : i32
      %c0_250 = arith.constant 0 : index
      %487 = arith.index_cast %486 : i32 to index
      %488 = memref.load %arg7[%c0_250, %487] : memref<8x512xi32, #tpu.memory_space<smem>>
      %c0_251 = arith.constant 0 : index
      %489 = arith.index_cast %488 : i32 to index
      %c0_252 = arith.constant 0 : index
      %490 = vector.load %arg5[%c0_251, %489, %c0_252] : memref<1x4096x2xf32, #tpu.memory_space<vmem>>, vector<1x1x2xf32>
      %491 = vector.shape_cast %490 : vector<1x1x2xf32> to vector<1x2xf32>
      %492 = arith.index_cast %486 : i32 to index
      %c0_253 = arith.constant 0 : index
      %493 = vector.load %arg9[%492, %c0_253] : memref<512x16xf32, #tpu.memory_space<vmem>>, vector<1x2xf32>
      tpu.vector_store %arg9[%492, %c0_253], %491 {strides = array<i32>} : memref<512x16xf32, #tpu.memory_space<vmem>>, vector<1x2xf32>,
      %c1_254 = arith.constant 1 : index
      %494 = arith.index_cast %486 : i32 to index
      %495 = memref.load %arg7[%c1_254, %494] : memref<8x512xi32, #tpu.memory_space<smem>>
      %c0_255 = arith.constant 0 : index
      %496 = arith.index_cast %495 : i32 to index
      %c0_256 = arith.constant 0 : index
      %497 = vector.load %arg5[%c0_255, %496, %c0_256] : memref<1x4096x2xf32, #tpu.memory_space<vmem>>, vector<1x1x2xf32>
      %498 = vector.shape_cast %497 : vector<1x1x2xf32> to vector<1x2xf32>
      %499 = arith.index_cast %486 : i32 to index
      %c2_257 = arith.constant 2 : index
      %500 = vector.load %arg9[%499, %c2_257] : memref<512x16xf32, #tpu.memory_space<vmem>>, vector<1x2xf32>
      tpu.vector_store %arg9[%499, %c2_257], %498 {strides = array<i32>} : memref<512x16xf32, #tpu.memory_space<vmem>>, vector<1x2xf32>,
      %c2_258 = arith.constant 2 : index
      %501 = arith.index_cast %486 : i32 to index
      %502 = memref.load %arg7[%c2_258, %501] : memref<8x512xi32, #tpu.memory_space<smem>>
      %c0_259 = arith.constant 0 : index
      %503 = arith.index_cast %502 : i32 to index
      %c0_260 = arith.constant 0 : index
      %504 = vector.load %arg5[%c0_259, %503, %c0_260] : memref<1x4096x2xf32, #tpu.memory_space<vmem>>, vector<1x1x2xf32>
      %505 = vector.shape_cast %504 : vector<1x1x2xf32> to vector<1x2xf32>
      %506 = arith.index_cast %486 : i32 to index
      %c4_261 = arith.constant 4 : index
      %507 = vector.load %arg9[%506, %c4_261] : memref<512x16xf32, #tpu.memory_space<vmem>>, vector<1x2xf32>
      tpu.vector_store %arg9[%506, %c4_261], %505 {strides = array<i32>} : memref<512x16xf32, #tpu.memory_space<vmem>>, vector<1x2xf32>,
      %c3_262 = arith.constant 3 : index
      %508 = arith.index_cast %486 : i32 to index
      %509 = memref.load %arg7[%c3_262, %508] : memref<8x512xi32, #tpu.memory_space<smem>>
      %c0_263 = arith.constant 0 : index
      %510 = arith.index_cast %509 : i32 to index
      %c0_264 = arith.constant 0 : index
      %511 = vector.load %arg5[%c0_263, %510, %c0_264] : memref<1x4096x2xf32, #tpu.memory_space<vmem>>, vector<1x1x2xf32>
      %512 = vector.shape_cast %511 : vector<1x1x2xf32> to vector<1x2xf32>
      %513 = arith.index_cast %486 : i32 to index
      %c6_265 = arith.constant 6 : index
      %514 = vector.load %arg9[%513, %c6_265] : memref<512x16xf32, #tpu.memory_space<vmem>>, vector<1x2xf32>
      tpu.vector_store %arg9[%513, %c6_265], %512 {strides = array<i32>} : memref<512x16xf32, #tpu.memory_space<vmem>>, vector<1x2xf32>,
      %c4_266 = arith.constant 4 : index
      %515 = arith.index_cast %486 : i32 to index
      %516 = memref.load %arg7[%c4_266, %515] : memref<8x512xi32, #tpu.memory_space<smem>>
      %c0_267 = arith.constant 0 : index
      %517 = arith.index_cast %516 : i32 to index
      %c0_268 = arith.constant 0 : index
      %518 = vector.load %arg5[%c0_267, %517, %c0_268] : memref<1x4096x2xf32, #tpu.memory_space<vmem>>, vector<1x1x2xf32>
      %519 = vector.shape_cast %518 : vector<1x1x2xf32> to vector<1x2xf32>
      %520 = arith.index_cast %486 : i32 to index
      %c8_269 = arith.constant 8 : index
      %521 = vector.load %arg9[%520, %c8_269] : memref<512x16xf32, #tpu.memory_space<vmem>>, vector<1x2xf32>
      tpu.vector_store %arg9[%520, %c8_269], %519 {strides = array<i32>} : memref<512x16xf32, #tpu.memory_space<vmem>>, vector<1x2xf32>,
      %c5_270 = arith.constant 5 : index
      %522 = arith.index_cast %486 : i32 to index
      %523 = memref.load %arg7[%c5_270, %522] : memref<8x512xi32, #tpu.memory_space<smem>>
      %c0_271 = arith.constant 0 : index
      %524 = arith.index_cast %523 : i32 to index
      %c0_272 = arith.constant 0 : index
      %525 = vector.load %arg5[%c0_271, %524, %c0_272] : memref<1x4096x2xf32, #tpu.memory_space<vmem>>, vector<1x1x2xf32>
      %526 = vector.shape_cast %525 : vector<1x1x2xf32> to vector<1x2xf32>
      %527 = arith.index_cast %486 : i32 to index
      %c10_273 = arith.constant 10 : index
      %528 = vector.load %arg9[%527, %c10_273] : memref<512x16xf32, #tpu.memory_space<vmem>>, vector<1x2xf32>
      tpu.vector_store %arg9[%527, %c10_273], %526 {strides = array<i32>} : memref<512x16xf32, #tpu.memory_space<vmem>>, vector<1x2xf32>,
      %c6_274 = arith.constant 6 : index
      %529 = arith.index_cast %486 : i32 to index
      %530 = memref.load %arg7[%c6_274, %529] : memref<8x512xi32, #tpu.memory_space<smem>>
      %c0_275 = arith.constant 0 : index
      %531 = arith.index_cast %530 : i32 to index
      %c0_276 = arith.constant 0 : index
      %532 = vector.load %arg5[%c0_275, %531, %c0_276] : memref<1x4096x2xf32, #tpu.memory_space<vmem>>, vector<1x1x2xf32>
      %533 = vector.shape_cast %532 : vector<1x1x2xf32> to vector<1x2xf32>
      %534 = arith.index_cast %486 : i32 to index
      %c12_277 = arith.constant 12 : index
      %535 = vector.load %arg9[%534, %c12_277] : memref<512x16xf32, #tpu.memory_space<vmem>>, vector<1x2xf32>
      tpu.vector_store %arg9[%534, %c12_277], %533 {strides = array<i32>} : memref<512x16xf32, #tpu.memory_space<vmem>>, vector<1x2xf32>,
      %c7_278 = arith.constant 7 : index
      %536 = arith.index_cast %486 : i32 to index
      %537 = memref.load %arg7[%c7_278, %536] : memref<8x512xi32, #tpu.memory_space<smem>>
      %c0_279 = arith.constant 0 : index
      %538 = arith.index_cast %537 : i32 to index
      %c0_280 = arith.constant 0 : index
      %539 = vector.load %arg5[%c0_279, %538, %c0_280] : memref<1x4096x2xf32, #tpu.memory_space<vmem>>, vector<1x1x2xf32>
      %540 = vector.shape_cast %539 : vector<1x1x2xf32> to vector<1x2xf32>
      %541 = arith.index_cast %486 : i32 to index
      %c14_281 = arith.constant 14 : index
      %542 = vector.load %arg9[%541, %c14_281] : memref<512x16xf32, #tpu.memory_space<vmem>>, vector<1x2xf32>
      tpu.vector_store %arg9[%541, %c14_281], %540 {strides = array<i32>} : memref<512x16xf32, #tpu.memory_space<vmem>>, vector<1x2xf32>,
    }
    %c64_i32_8 = arith.constant 64 : i32
    %c0_9 = arith.constant 0 : index
    %c0_10 = arith.constant 0 : index
    %25 = vector.load %arg9[%c0_9, %c0_10] : memref<512x16xf32, #tpu.memory_space<vmem>>, vector<512x2xf32>
    %c0_11 = arith.constant 0 : index
    %c2 = arith.constant 2 : index
    %26 = vector.load %arg9[%c0_11, %c2] : memref<512x16xf32, #tpu.memory_space<vmem>>, vector<512x2xf32>
    %c0_12 = arith.constant 0 : index
    %c4 = arith.constant 4 : index
    %27 = vector.load %arg9[%c0_12, %c4] : memref<512x16xf32, #tpu.memory_space<vmem>>, vector<512x2xf32>
    %c0_13 = arith.constant 0 : index
    %c6 = arith.constant 6 : index
    %28 = vector.load %arg9[%c0_13, %c6] : memref<512x16xf32, #tpu.memory_space<vmem>>, vector<512x2xf32>
    %c0_14 = arith.constant 0 : index
    %c8 = arith.constant 8 : index
    %29 = vector.load %arg9[%c0_14, %c8] : memref<512x16xf32, #tpu.memory_space<vmem>>, vector<512x2xf32>
    %c0_15 = arith.constant 0 : index
    %c10 = arith.constant 10 : index
    %30 = vector.load %arg9[%c0_15, %c10] : memref<512x16xf32, #tpu.memory_space<vmem>>, vector<512x2xf32>
    %c0_16 = arith.constant 0 : index
    %c12 = arith.constant 12 : index
    %31 = vector.load %arg9[%c0_16, %c12] : memref<512x16xf32, #tpu.memory_space<vmem>>, vector<512x2xf32>
    %c0_17 = arith.constant 0 : index
    %c14 = arith.constant 14 : index
    %32 = vector.load %arg9[%c0_17, %c14] : memref<512x16xf32, #tpu.memory_space<vmem>>, vector<512x2xf32>
    %cst_18 = arith.constant 1.000000e+00 : f32
    %33 = vector.broadcast %cst_18 : f32 to vector<512x1xf32>
    %34 = arith.subf %33, %17 : vector<512x1xf32>
    %35 = vector.broadcast %34 : vector<512x1xf32> to vector<512x2xf32>
    %36 = arith.mulf %25, %35 : vector<512x2xf32>
    %37 = vector.broadcast %17 : vector<512x1xf32> to vector<512x2xf32>
    %38 = arith.mulf %26, %37 : vector<512x2xf32>
    %39 = arith.addf %36, %38 : vector<512x2xf32>
    %cst_19 = arith.constant 1.000000e+00 : f32
    %40 = vector.broadcast %cst_19 : f32 to vector<512x1xf32>
    %41 = arith.subf %40, %17 : vector<512x1xf32>
    %42 = vector.broadcast %41 : vector<512x1xf32> to vector<512x2xf32>
    %43 = arith.mulf %27, %42 : vector<512x2xf32>
    %44 = vector.broadcast %17 : vector<512x1xf32> to vector<512x2xf32>
    %45 = arith.mulf %28, %44 : vector<512x2xf32>
    %46 = arith.addf %43, %45 : vector<512x2xf32>
    %cst_20 = arith.constant 1.000000e+00 : f32
    %47 = vector.broadcast %cst_20 : f32 to vector<512x1xf32>
    %48 = arith.subf %47, %17 : vector<512x1xf32>
    %49 = vector.broadcast %48 : vector<512x1xf32> to vector<512x2xf32>
    %50 = arith.mulf %29, %49 : vector<512x2xf32>
    %51 = vector.broadcast %17 : vector<512x1xf32> to vector<512x2xf32>
    %52 = arith.mulf %30, %51 : vector<512x2xf32>
    %53 = arith.addf %50, %52 : vector<512x2xf32>
    %cst_21 = arith.constant 1.000000e+00 : f32
    %54 = vector.broadcast %cst_21 : f32 to vector<512x1xf32>
    %55 = arith.subf %54, %17 : vector<512x1xf32>
    %56 = vector.broadcast %55 : vector<512x1xf32> to vector<512x2xf32>
    %57 = arith.mulf %31, %56 : vector<512x2xf32>
    %58 = vector.broadcast %17 : vector<512x1xf32> to vector<512x2xf32>
    %59 = arith.mulf %32, %58 : vector<512x2xf32>
    %60 = arith.addf %57, %59 : vector<512x2xf32>
    %cst_22 = arith.constant 1.000000e+00 : f32
    %61 = vector.broadcast %cst_22 : f32 to vector<512x1xf32>
    %62 = arith.subf %61, %18 : vector<512x1xf32>
    %63 = vector.broadcast %62 : vector<512x1xf32> to vector<512x2xf32>
    %64 = arith.mulf %39, %63 : vector<512x2xf32>
    %65 = vector.broadcast %18 : vector<512x1xf32> to vector<512x2xf32>
    %66 = arith.mulf %46, %65 : vector<512x2xf32>
    %67 = arith.addf %64, %66 : vector<512x2xf32>
    %cst_23 = arith.constant 1.000000e+00 : f32
    %68 = vector.broadcast %cst_23 : f32 to vector<512x1xf32>
    %69 = arith.subf %68, %18 : vector<512x1xf32>
    %70 = vector.broadcast %69 : vector<512x1xf32> to vector<512x2xf32>
    %71 = arith.mulf %53, %70 : vector<512x2xf32>
    %72 = vector.broadcast %18 : vector<512x1xf32> to vector<512x2xf32>
    %73 = arith.mulf %60, %72 : vector<512x2xf32>
    %74 = arith.addf %71, %73 : vector<512x2xf32>
    %cst_24 = arith.constant 1.000000e+00 : f32
    %75 = vector.broadcast %cst_24 : f32 to vector<512x1xf32>
    %76 = arith.subf %75, %19 : vector<512x1xf32>
    %77 = vector.broadcast %76 : vector<512x1xf32> to vector<512x2xf32>
    %78 = arith.mulf %67, %77 : vector<512x2xf32>
    %79 = vector.broadcast %19 : vector<512x1xf32> to vector<512x2xf32>
    %80 = arith.mulf %74, %79 : vector<512x2xf32>
    %81 = arith.addf %78, %80 : vector<512x2xf32>
    %c0_25 = arith.constant 0 : index
    %c0_26 = arith.constant 0 : index
    %c0_27 = arith.constant 0 : index
    %82 = vector.load %arg6[%c0_25, %c0_26, %c0_27] : memref<1x512x2xf32, #tpu.memory_space<vmem>>, vector<1x512x2xf32>
    %83 = vector.shape_cast %82 : vector<1x512x2xf32> to vector<512x2xf32>
    %84 = vector.shape_cast %81 : vector<512x2xf32> to vector<1x512x2xf32>
    tpu.vector_store %arg6[%c0_25, %c0_26, %c0_27], %84 {strides = array<i32>} : memref<1x512x2xf32, #tpu.memory_space<vmem>>, vector<1x512x2xf32>,
    return
  }
  func.func @transform_0(%arg0: i32, %arg1: i32, %arg2: memref<4xi32, #tpu.memory_space<smem>>) -> (i32, i32) {
    %c0_i32 = arith.constant 0 : i32
    %c0_i32_0 = arith.constant 0 : i32
    return %arg1, %c0_i32 : i32, i32
  }
  func.func @transform_2(%arg0: i32, %arg1: i32, %arg2: memref<4xi32, #tpu.memory_space<smem>>) -> (i32, i32, i32) {
    %c0_i32 = arith.constant 0 : i32
    %c0_i32_0 = arith.constant 0 : i32
    %c0_i32_1 = arith.constant 0 : i32
    return %arg0, %c0_i32, %c0_i32_0 : i32, i32, i32
  }
  func.func @transform_3(%arg0: i32, %arg1: i32, %arg2: memref<4xi32, #tpu.memory_space<smem>>) -> (i32, i32, i32) {
    %c0_i32 = arith.constant 0 : i32
    %c0_i32_0 = arith.constant 0 : i32
    return %arg0, %arg1, %c0_i32 : i32, i32, i32
  }
}

</mosaic_0001>

<bundles_post_ra>
// kernel: tpu_custom_call.1
= control target key start
LH: loop header
LB: loop body
LE: loop exit
PB: predicated region body
PF: predicated region fallthrough
CT: control target
= control target key end

     0   :  { %s8940_s0 = inlined_call_operand.vmem [shape: s32[4], index: 0, kind: input, shape index: {}]   ;;  %s8941_s1 = inlined_call_operand.vmem [shape: f32[1024,3], index: 1, kind: input, shape index: {}]   ;;  %s8942_s2 = inlined_call_operand.vmem [shape: s32[4,2,8,512], index: 2, kind: input, shape index: {}]   ;;  %s8943_s3 = inlined_call_operand.vmem [shape: f32[4,4096,2], index: 3, kind: input, shape index: {}]   ;;  %s8944_s4 = inlined_call_operand.vmem [shape: f32[4,1024,2], index: 4, kind: output, shape index: {}]  }
   0x1   :  { %9290 = sst [smem:[#allocation301_spill]] %s8941_s1  ;;  %s9_s17 = sshll.u32 %s8940_s0, 4  ;;  %s10_s17 = int_to_ptr.vmem [resolvable:$true] %s9_s17 }
   0x2   :  { %9291 = sst [smem:[#allocation302_spill]] %s8942_s2  ;;  %s4897_s18 = scalar_lea.vmem %s10_s17, 16 }
   0x3   :  { %9292 = sst [smem:[#allocation303_spill]] %s8943_s3  ;;  %p4898_p0 = scmp.ne.s32.totalorder %s10_s17, %s4897_s18 }
   0x4   :  { %9293 = sst [smem:[#allocation304_spill]] %s8944_s4  ;;  %p4902_p1 = scmp.lt.s32.totalorder %s10_s17, %s10_s17 }
   0x5   :  { %p4903_p2 = scmp.lt.s32.totalorder %s4897_s18, %s4897_s18 }
   0x7   :  { %p4904_p3 = por %p4903_p2, %p4902_p1 }
   0x9   :  { %p4905_p4 = pnand %p4904_p3, %p4898_p0 }
   0xb   :  { %4908 = shalt.err (!%p4905_p4)  }
   0xc   :  { %s4973_s19 = smov [#allocation6]  }
   0xd   :  { %12 = dma.vmem_to_smem %s10_s17, 16, %s4973_s19, [#allocation5] }
   0xe   :  { %4945 = dma.done.wait [#allocation5], 16 }
   0xf   :  { %4946 = vsyncadd [#allocation5], 4294967280 }
  0x10   :  { %14 = sfence }
  0x11   :  { %s5016_s20 = smov 0   ;;  %s5018_s21 = smov 0  }
  0x12   :  { %s5020_s22 = smov 0   ;;  %s5022_s0 = smov 0  }
  0x13   :  { %s5024_s23 = smov 0  }
  0x14 LB: > { %9294 = sst [smem:[#allocation13_spill]] %s4959_s22  ;;  %s29_s24 = sadd.s32 1, %s4959_s22  ;;  %s4967_s23 = sphi %s5024_s23, %s20_s23   ;;  %s4963_s0 = sphi %s5022_s0, %s10506_s0   ;;  %s4959_s22 = sphi %s5020_s22, %s10505_s22   ;;  %s4955_s21 = sphi %s5018_s21, %s10504_s21   ;;  %s4951_s20 = sphi %s5016_s20, %s10503_s20  }
  0x15   : > { %9295 = sst [smem:[#allocation14_spill]] %s4963_s0  ;;  %s32_s25 = sadd.s32 1, %s4963_s0 }
  0x16   : > { %9296 = sst [smem:[#allocation15_spill]] %s4967_s23  ;;  %p30_p5 = scmp.ge.s32.totalorder %s29_s24, 2 }
  0x17   : > { %p4679_p6 = scmp.ge.s32.totalorder %s4967_s23, 1  ;;  %p145_p7 = scmp.lt.s32.totalorder %s4967_s23, 9 }
  0x18   : > { %s10508_s24 = smov (%p30_p5, %s29_s24), 0  ;;  %s10510_s25 = smov (!%p30_p5, %s32_s25), %s4963_s0 }
  0x19   : > { %9297 = sst [smem:[#allocation16_spill]] %s10508_s24  ;;  %p146_p8 = pnand %p4679_p6, %p145_p7 }
  0x1a   : > { %p34_p9 = scmp.ge.s32.totalorder %s10510_s25, 4 }
  0x1b   : > { %149 = sbr.rel (%p146_p8) target bundleno = 1694 (0x69e), region = 28 }
  0x1c   : > { %s10512_s25 = smov (%p34_p9, %s10510_s25), 0 }
  0x1d   : > { %9298 = sst [smem:[#allocation17_spill]] %s10512_s25 }
  0x22   : > { %s4680_s26 = sshll.u32 %s4951_s20, 6  ;;  %p182_p10 = scmp.lt.s32.totalorder %s4955_s21, 3 }
  0x23   : > { %p177_p11 = scmp.lt.s32.totalorder %s4680_s26, 127  ;;  %s4687_s27 = sshll.u32 %s4951_s20, 2 }
  0x24   : > { %s183_s28 = scalar_select %p182_p10, %s4955_s21, 3 }
  0x25   : > { %s10514_s26 = smov (!%p177_p11, %s4680_s26), 127  ;;  %s9299_s3 = sld [smem:[#allocation303_spill]] }
  0x26   : > { %s4765_s29 = sshll.u32 %s183_s28, 12  ;;  %s4685_s30 = sshll.u32 %s183_s28, 7 }
  0x27   : > { %s4681_s5 = sshll.u32 %s10514_s26, 3  ;;  %s9300_s1 = sld [smem:[#allocation301_spill]] }
  0x28   : > { %s193_s12 = sadd.s32 %s4685_s30, %s10514_s26  ;;  %s4688_s14 = sshll.u32 %s4955_s21, 3 }
  0x29   : > { %s4686_s13 = sshll.u32 %s193_s12, 3  ;;  %s9301_s4 = sld [smem:[#allocation304_spill]] }
  0x2a   : > { %s199_s18 = sadd.s32 %s4688_s14, %s4687_s27  ;;  %s9303_s2 = sld [smem:[#allocation302_spill]] }
  0x2b   : > { %s5057_s8 = scalar_lea.vmem %s9299_s3, %s4765_s29  ;;  %s4689_s19 = sshll.u32 %s199_s18, 3 }
  0x2c   : > { %s5091_s28 = sld [smem:[#allocation6 + %s4955_s21]] }
  0x2d   : > { %s5062_s11 = scalar_lea.vmem %s9300_s1, %s4681_s5 }
  0x2e   : > { %v216_v0 = vld [vmem:[%s5062_s11] sm:$0xff]  ;;  %v217_v1 = vld [vmem:[%s5062_s11 + $0x8] sm:$0xff]  ;;  %v218_v2 = vld [vmem:[%s5062_s11 + $0x10] sm:$0xff] }
  0x2f   : > { %s5071_s17 = scalar_lea.vmem %s9301_s4, %s4686_s13  ;;  %v219_v3 = vld [vmem:[%s5062_s11 + $0x18] sm:$0xff]  ;;  %v220_v4 = vld [vmem:[%s5062_s11 + $0x20] sm:$0xff]  ;;  %v221_v5 = vld [vmem:[%s5062_s11 + $0x28] sm:$0xff]  ;;  %v5076_v6 = vadd.f32 1.0, %v216_v0  ;;  %v5078_v7 = vadd.f32 1.0, %v217_v1  ;;  %v5080_v8 = vadd.f32 1.0, %v218_v2 }
  0x30   : > { %9302 = sst [smem:[#allocation18_spill]] %s5071_s17  ;;  %v222_v9 = vld [vmem:[%s5062_s11 + $0x30] sm:$0xff]  ;;  %v223_v10 = vld [vmem:[%s5062_s11 + $0x38] sm:$0xff]  ;;  %v224_v11 = vld [vmem:[%s5062_s11 + $0x40] sm:$0xff]  ;;  %v5085_v12 = vadd.f32 1.0, %v219_v3  ;;  %s201_s27 = scalar_lea.vmem %s9303_s2, %s4689_s19  ;;  %v5096_v16 = vadd.f32 1.0, %v220_v4 }
  0x31   : > { %v225_v13 = vld [vmem:[%s5062_s11 + $0x48] sm:$0xff]  ;;  %v226_v14 = vld [vmem:[%s5062_s11 + $0x50] sm:$0xff]  ;;  %v227_v15 = vld [vmem:[%s5062_s11 + $0x58] sm:$0xff]  ;;  %v5098_v17 = vadd.f32 1.0, %v221_v5  ;;  %s209_s29 = sshll.u32 %s201_s27, 4  ;;  %v5103_v21 = vadd.f32 1.0, %v222_v9  ;;  %s210_s29 = int_to_ptr.vmem [resolvable:$true] %s209_s29 }
  0x32   : > { %v228_v18 = vld [vmem:[%s5062_s11 + $0x60] sm:$0xff]  ;;  %v229_v19 = vld [vmem:[%s5062_s11 + $0x68] sm:$0xff]  ;;  %v230_v20 = vld [vmem:[%s5062_s11 + $0x70] sm:$0xff]  ;;  %v5105_v22 = vadd.f32 1.0, %v223_v10  ;;  %v5110_v26 = vadd.f32 1.0, %v224_v11  ;;  %v5112_v27 = vadd.f32 1.0, %v225_v13 }
  0x33   : > { %v231_v23 = vld [vmem:[%s5062_s11 + $0x78] sm:$0xff]  ;;  %v232_v24 = vld [vmem:[%s5062_s11 + $0x80] sm:$0xff]  ;;  %v233_v25 = vld [vmem:[%s5062_s11 + $0x88] sm:$0xff]  ;;  %v5114_v28 = vadd.f32 1.0, %v226_v14  ;;  %s4909_s21 = scalar_lea.vmem %s210_s29, 512  ;;  %s4911_s6 = sshll.u32 %s9303_s2, 4  ;;  %s4912_s6 = int_to_ptr.vmem [resolvable:$false] %s4911_s6 }
  0x34   : > { %p4910_p12 = scmp.ne.s32.totalorder %s210_s29, %s4909_s21  ;;  %s4913_s7 = scalar_lea.vmem %s4912_s6, 4096 }
  0x35   : > { %p4914_p13 = scmp.lt.s32.totalorder %s210_s29, %s4912_s6  ;;  %p4915_p0 = scmp.lt.s32.totalorder %s4913_s7, %s4909_s21 }
  0x37   : > { %p4916_p1 = por %p4915_p0, %p4914_p13 }
  0x39   : > { %p4917_p2 = pnand %p4916_p1, %p4910_p12 }
  0x3b   : > { %4920 = shalt.err (!%p4917_p2)  }
  0x3c   : > { %s4974_s9 = smov [#allocation2]   ;;  %v234_v29 = vld [vmem:[%s5062_s11 + $0x90] sm:$0xff]  ;;  %v235_v30 = vld [vmem:[%s5062_s11 + $0x98] sm:$0xff]  ;;  %v236_v31 = vld [vmem:[%s5062_s11 + $0xa0] sm:$0xff]  ;;  %v5122_v32 = vadd.f32 1.0, %v227_v15  ;;  %v5127_v36 = vadd.f32 1.0, %v228_v18 }
  0x3d   : > { %212 = dma.vmem_to_smem %s210_s29, 512, %s4974_s9, [#allocation3]  ;;  %v237_v33 = vld [vmem:[%s5062_s11 + $0xa8] sm:$0xff]  ;;  %v238_v34 = vld [vmem:[%s5062_s11 + $0xb0] sm:$0xff]  ;;  %v239_v35 = vld [vmem:[%s5062_s11 + $0xb8] sm:$0xff]  ;;  %v5129_v37 = vadd.f32 1.0, %v229_v19 }
  0x3e   : > { %v5131_v38 = vadd.f32 1.0, %v230_v20  ;;  %v240_v39 = vld [vmem:[%s5062_s11 + $0xc0] sm:$0xff]  ;;  %v241_v40 = vld [vmem:[%s5062_s11 + $0xc8] sm:$0xff]  ;;  %v242_v41 = vld [vmem:[%s5062_s11 + $0xd0] sm:$0xff]  ;;  %v5136_v42 = vadd.f32 1.0, %v231_v23  ;;  %v5138_v43 = vadd.f32 1.0, %v232_v24 }
  0x3f   : > { %v5140_v44 = vadd.f32 1.0, %v233_v25  ;;  %v243_v45 = vld [vmem:[%s5062_s11 + $0xd8] sm:$0xff]  ;;  %v244_v46 = vld [vmem:[%s5062_s11 + $0xe0] sm:$0xff]  ;;  %v245_v47 = vld [vmem:[%s5062_s11 + $0xe8] sm:$0xff]  ;;  %v5145_v48 = vadd.f32 1.0, %v234_v29  ;;  %v5147_v49 = vadd.f32 1.0, %v235_v30 }
  0x40   : > { %v5149_v50 = vadd.f32 1.0, %v236_v31  ;;  %v246_v51 = vld [vmem:[%s5062_s11 + $0xf0] sm:$0xff]  ;;  %v247_v52 = vld [vmem:[%s5062_s11 + $0xf8] sm:$0xff]  ;;  %v248_v53 = vld [vmem:[%s5062_s11 + $0x100] sm:$0xff]  ;;  %v5154_v54 = vadd.f32 1.0, %v237_v33  ;;  %v5156_v55 = vadd.f32 1.0, %v238_v34 }
  0x41   : > { %v5158_v56 = vadd.f32 1.0, %v239_v35  ;;  %v249_v57 = vld [vmem:[%s5062_s11 + $0x108] sm:$0xff]  ;;  %v250_v58 = vld [vmem:[%s5062_s11 + $0x110] sm:$0xff]  ;;  %v251_v59 = vld [vmem:[%s5062_s11 + $0x118] sm:$0xff]  ;;  %v5163_v60 = vadd.f32 1.0, %v240_v39  ;;  %v5165_v61 = vadd.f32 1.0, %v241_v40 }
  0x42   : > { %v5167_v62 = vadd.f32 1.0, %v242_v41  ;;  %v252_v63 = vld [vmem:[%s5062_s11 + $0x120] sm:$0xff]  ;;  %v253_v0 = vld [vmem:[%s5062_s11 + $0x128] sm:$0xff]  ;;  %v254_v1 = vld [vmem:[%s5062_s11 + $0x130] sm:$0xff]  ;;  %v5172_v2 = vadd.f32 1.0, %v243_v45  ;;  %v5174_v3 = vadd.f32 1.0, %v244_v46 }
  0x43   : > { %v5176_v4 = vadd.f32 1.0, %v245_v47  ;;  %v255_v5 = vld [vmem:[%s5062_s11 + $0x138] sm:$0xff]  ;;  %v256_v9 = vld [vmem:[%s5062_s11 + $0x140] sm:$0xff]  ;;  %v257_v10 = vld [vmem:[%s5062_s11 + $0x148] sm:$0xff]  ;;  %v5181_v11 = vadd.f32 1.0, %v246_v51  ;;  %v5183_v13 = vadd.f32 1.0, %v247_v52  ;;  %v214_v47 = vstv %s5091_s28 }
  0x44   : > { %v5185_v14 = vadd.f32 1.0, %v248_v53  ;;  %v258_v15 = vld [vmem:[%s5062_s11 + $0x150] sm:$0xff]  ;;  %v259_v18 = vld [vmem:[%s5062_s11 + $0x158] sm:$0xff]  ;;  %v260_v19 = vld [vmem:[%s5062_s11 + $0x160] sm:$0xff]  ;;  %v5190_v20 = vadd.f32 1.0, %v249_v57  ;;  %v5192_v23 = vadd.f32 1.0, %v250_v58 }
  0x45   : > { %v5194_v24 = vadd.f32 1.0, %v251_v59  ;;  %v261_v25 = vld [vmem:[%s5062_s11 + $0x168] sm:$0xff]  ;;  %v262_v29 = vld [vmem:[%s5062_s11 + $0x170] sm:$0xff]  ;;  %v263_v30 = vld [vmem:[%s5062_s11 + $0x178] sm:$0xff]  ;;  %v5199_v31 = vadd.f32 1.0, %v252_v63  ;;  %v5201_v33 = vadd.f32 1.0, %v253_v0 }
  0x46   : > { %v5203_v34 = vadd.f32 1.0, %v254_v1  ;;  %v264_v35 = vld [vmem:[%s5062_s11 + $0x180] sm:$0xff]  ;;  %v265_v39 = vld [vmem:[%s5062_s11 + $0x188] sm:$0xff]  ;;  %v266_v40 = vld [vmem:[%s5062_s11 + $0x190] sm:$0xff]  ;;  %v5208_v41 = vadd.f32 1.0, %v255_v5  ;;  %v5210_v45 = vadd.f32 1.0, %v256_v9 }
  0x47   : > { %v5212_v46 = vadd.f32 1.0, %v257_v10  ;;  %v267_v51 = vld [vmem:[%s5062_s11 + $0x198] sm:$0xff]  ;;  %v268_v52 = vld [vmem:[%s5062_s11 + $0x1a0] sm:$0xff]  ;;  %v269_v53 = vld [vmem:[%s5062_s11 + $0x1a8] sm:$0xff]  ;;  %v5218_v57 = vadd.f32 1.0, %v258_v15  ;;  %v5220_v58 = vadd.f32 1.0, %v259_v18 }
  0x48   : > { %9304 = vst [vmem:[#allocation19_spill] sm:$0xff] %v5208_v41  ;;  %9305 = vst [vmem:[#allocation20_spill] sm:$0xff] %v5210_v45  ;;  %v5222_v59 = vadd.f32 1.0, %v260_v19  ;;  %v270_v63 = vld [vmem:[%s5062_s11 + $0x1b0] sm:$0xff]  ;;  %v271_v0 = vld [vmem:[%s5062_s11 + $0x1b8] sm:$0xff]  ;;  %v5227_v5 = vadd.f32 1.0, %v261_v25 }
  0x49   : > { %9306 = vst [vmem:[#allocation21_spill] sm:$0xff] %v5212_v46  ;;  %9307 = vst [vmem:[#allocation22_spill] sm:$0xff] %v5218_v57  ;;  %v272_v1 = vld [vmem:[%s5062_s11 + $0x1c0] sm:$0xff]  ;;  %v5229_v9 = vadd.f32 1.0, %v262_v29  ;;  %v5231_v10 = vadd.f32 1.0, %v263_v30  ;;  %v273_v46 = vld [vmem:[%s5062_s11 + $0x1c8] sm:$0xff] }
  0x4a   : > { %9308 = vst [vmem:[#allocation23_spill] sm:$0xff] %v5220_v58  ;;  %9309 = vst [vmem:[#allocation24_spill] sm:$0xff] %v5222_v59  ;;  %v274_v15 = vld [vmem:[%s5062_s11 + $0x1d0] sm:$0xff]  ;;  %v275_v57 = vld [vmem:[%s5062_s11 + $0x1d8] sm:$0xff]  ;;  %v5236_v45 = vadd.f32 1.0, %v264_v35  ;;  %v5238_v18 = vadd.f32 1.0, %v265_v39  ;;  %v5242_v59 = vcvt.s32.f32 %v214_v47 }
  0x4b   : > { %9310 = vst [vmem:[#allocation25_spill] sm:$0xff] %v5227_v5  ;;  %9311 = vst [vmem:[#allocation26_spill] sm:$0xff] %v5229_v9  ;;  %v5240_v19 = vadd.f32 1.0, %v266_v40  ;;  %v276_v58 = vld [vmem:[%s5062_s11 + $0x1e0] sm:$0xff]  ;;  %v277_v41 = vld [vmem:[%s5062_s11 + $0x1e8] sm:$0xff]  ;;  %v5247_v5 = vadd.f32 1.0, %v267_v51 }
  0x4c   : > { %9312 = vst [vmem:[#allocation27_spill] sm:$0xff] %v5231_v10  ;;  %9314 = vst [vmem:[#allocation29_spill] sm:$0xff] %v5242_v59  ;;  %v278_v25 = vld [vmem:[%s5062_s11 + $0x1f0] sm:$0xff]  ;;  %v5249_v29 = vadd.f32 1.0, %v268_v52  ;;  %v5251_v30 = vadd.f32 1.0, %v269_v53  ;;  %v279_v10 = vld [vmem:[%s5062_s11 + $0x1f8] sm:$0xff] }
  0x4d   : > { %9313 = vst [vmem:[#allocation28_spill] sm:$0xff] %v5240_v19  ;;  %v5254_v9 = vadd.f32 1.0, %v270_v63  ;;  %v5256_v35 = vadd.f32 1.0, %v271_v0  ;;  %v5258_v39 = vadd.f32 1.0, %v272_v1  ;;  %v5260_v40 = vadd.f32 1.0, %v273_v46 }
  0x4e   : > { %v5262_v47 = vadd.f32 1.0, %v274_v15  ;;  %v5264_v59 = vadd.f32 1.0, %v275_v57  ;;  %v5266_v19 = vadd.f32 1.0, %v276_v58  ;;  %v5268_v51 = vadd.f32 1.0, %v277_v41 }
  0x4f   : > { %v5270_v52 = vadd.f32 1.0, %v278_v25  ;;  %v5272_v53 = vadd.f32 1.0, %v279_v10  ;;  %v5275_v63 = vmul.f32 0.5, %v5076_v6  ;;  %v5278_v0 = vmul.f32 0.5, %v5078_v7 }
  0x50   : > { %v5281_v46 = vmul.f32 0.5, %v5080_v8  ;;  %v5284_v57 = vmul.f32 0.5, %v5085_v12  ;;  %v5287_v58 = vmul.f32 0.5, %v5096_v16  ;;  %v5290_v41 = vmul.f32 0.5, %v5098_v17 }
  0x51   : > { %v5293_v1 = vmul.f32 0.5, %v5103_v21  ;;  %v5296_v6 = vmul.f32 0.5, %v5105_v22  ;;  %v5299_v7 = vmul.f32 0.5, %v5110_v26  ;;  %v5302_v8 = vmul.f32 0.5, %v5112_v27 }
  0x52   : > { %v5305_v12 = vmul.f32 0.5, %v5114_v28  ;;  %v5308_v16 = vmul.f32 0.5, %v5122_v32  ;;  %v5311_v17 = vmul.f32 0.5, %v5127_v36  ;;  %v5314_v21 = vmul.f32 0.5, %v5129_v37 }
  0x53   : > { %v5317_v22 = vmul.f32 0.5, %v5131_v38  ;;  %v5320_v26 = vmul.f32 0.5, %v5136_v42  ;;  %v5323_v27 = vmul.f32 0.5, %v5138_v43  ;;  %v5326_v28 = vmul.f32 0.5, %v5140_v44 }
  0x54   : > { %v5329_v32 = vmul.f32 0.5, %v5145_v48  ;;  %v5332_v36 = vmul.f32 0.5, %v5147_v49  ;;  %v5335_v37 = vmul.f32 0.5, %v5149_v50  ;;  %v5338_v38 = vmul.f32 0.5, %v5154_v54 }
  0x55   : > { %v5341_v42 = vmul.f32 0.5, %v5156_v55  ;;  %v5344_v43 = vmul.f32 0.5, %v5158_v56  ;;  %v5347_v44 = vmul.f32 0.5, %v5163_v60  ;;  %v5350_v48 = vmul.f32 0.5, %v5165_v61 }
  0x56   : > { %v5353_v49 = vmul.f32 0.5, %v5167_v62  ;;  %v5356_v50 = vmul.f32 0.5, %v5172_v2  ;;  %v5359_v54 = vmul.f32 0.5, %v5174_v3  ;;  %v5362_v55 = vmul.f32 0.5, %v5176_v4 }
  0x57   : > { %v5365_v56 = vmul.f32 0.5, %v5181_v11  ;;  %v5368_v60 = vmul.f32 0.5, %v5183_v13  ;;  %v5371_v61 = vmul.f32 0.5, %v5185_v14  ;;  %v5374_v62 = vmul.f32 0.5, %v5190_v20  ;;  %v9319_v14 = vld [vmem:[#allocation19_spill] sm:$0xff]  ;;  %v9321_v20 = vld [vmem:[#allocation20_spill] sm:$0xff] }
  0x58   : > { %v5377_v2 = vmul.f32 0.5, %v5192_v23  ;;  %v5380_v3 = vmul.f32 0.5, %v5194_v24  ;;  %v5383_v4 = vmul.f32 0.5, %v5199_v31  ;;  %v5386_v11 = vmul.f32 0.5, %v5201_v33  ;;  %v9323_v23 = vld [vmem:[#allocation21_spill] sm:$0xff]  ;;  %v9324_v24 = vld [vmem:[#allocation22_spill] sm:$0xff] }
  0x59   : > { %v5389_v13 = vmul.f32 0.5, %v5203_v34  ;;  %v5392_v10 = vmul.f32 0.5, %v9319_v14  ;;  %v5395_v15 = vmul.f32 0.5, %v9321_v20  ;;  %v5398_v25 = vmul.f32 0.5, %v9323_v23  ;;  %v9325_v31 = vld [vmem:[#allocation23_spill] sm:$0xff]  ;;  %v9327_v33 = vld [vmem:[#allocation24_spill] sm:$0xff] }
  0x5a   : > { %9315 = vst [vmem:[#allocation30_spill] sm:$0xff] %v5380_v3  ;;  %9316 = vst [vmem:[#allocation31_spill] sm:$0xff] %v5383_v4  ;;  %v5401_v3 = vmul.f32 0.5, %v9324_v24  ;;  %v5404_v4 = vmul.f32 0.5, %v9325_v31  ;;  %v9328_v34 = vld [vmem:[#allocation25_spill] sm:$0xff]  ;;  %v9329_v14 = vld [vmem:[#allocation26_spill] sm:$0xff] }
  0x5b   : > { %9317 = vst [vmem:[#allocation32_spill] sm:$0xff] %v5386_v11  ;;  %9318 = vst [vmem:[#allocation33_spill] sm:$0xff] %v5389_v13  ;;  %v5407_v11 = vmul.f32 0.5, %v9327_v33  ;;  %v5410_v13 = vmul.f32 0.5, %v9328_v34  ;;  %v9330_v20 = vld [vmem:[#allocation27_spill] sm:$0xff]  ;;  %v5419_v23 = vmul.f32 0.5, %v5236_v45 }
  0x5c   : > { %9320 = vst [vmem:[#allocation19_spill] sm:$0xff] %v5392_v10  ;;  %9322 = vst [vmem:[#allocation20_spill] sm:$0xff] %v5395_v15  ;;  %v5413_v10 = vmul.f32 0.5, %v9329_v14  ;;  %v5416_v15 = vmul.f32 0.5, %v9330_v20  ;;  %v5422_v24 = vmul.f32 0.5, %v5238_v18  ;;  %v9331_v31 = vld [vmem:[#allocation28_spill] sm:$0xff] }
  0x5d   : > { %9326 = vst [vmem:[#allocation21_spill] sm:$0xff] %v5404_v4  ;;  %v5425_v4 = vmul.f32 0.5, %v9331_v31  ;;  %v5428_v33 = vmul.f32 0.5, %v5247_v5  ;;  %v5431_v34 = vmul.f32 0.5, %v5249_v29  ;;  %v5434_v14 = vmul.f32 0.5, %v5251_v30 }
  0x5e   : > { %v5437_v20 = vmul.f32 0.5, %v5254_v9  ;;  %v5440_v45 = vmul.f32 0.5, %v5256_v35  ;;  %v5443_v18 = vmul.f32 0.5, %v5258_v39  ;;  %v5446_v31 = vmul.f32 0.5, %v5260_v40  ;;  %v9333_v40 = vld [vmem:[#allocation29_spill] sm:$0xff] }
  0x5f   : > { %v5449_v5 = vmul.f32 0.5, %v5262_v47  ;;  %v5452_v29 = vmul.f32 0.5, %v5264_v59  ;;  %v5455_v30 = vmul.f32 0.5, %v5266_v19  ;;  %v5458_v9 = vmul.f32 0.5, %v5268_v51 }
  0x60   : > { %9332 = vst [vmem:[#allocation22_spill] sm:$0xff] %v5446_v31  ;;  %v5461_v35 = vmul.f32 0.5, %v5270_v52  ;;  %v5464_v39 = vmul.f32 0.5, %v5272_v53  ;;  %v5468_v31 = vmul.f32 %v5275_v63, %v9333_v40  ;;  %v5472_v59 = vmul.f32 %v5278_v0, %v9333_v40 }
  0x61   : > { %v5476_v19 = vmul.f32 %v5281_v46, %v9333_v40  ;;  %v5480_v47 = vmul.f32 %v5284_v57, %v9333_v40  ;;  %v5484_v51 = vmul.f32 %v5287_v58, %v9333_v40  ;;  %v5488_v52 = vmul.f32 %v5290_v41, %v9333_v40 }
  0x62   : > { %v5492_v53 = vmul.f32 %v5293_v1, %v9333_v40  ;;  %v5496_v63 = vmul.f32 %v5296_v6, %v9333_v40  ;;  %v5500_v0 = vmul.f32 %v5299_v7, %v9333_v40  ;;  %v5504_v46 = vmul.f32 %v5302_v8, %v9333_v40 }
  0x63   : > { %v5508_v57 = vmul.f32 %v5305_v12, %v9333_v40  ;;  %v5512_v58 = vmul.f32 %v5308_v16, %v9333_v40  ;;  %v5516_v41 = vmul.f32 %v5311_v17, %v9333_v40  ;;  %v5520_v1 = vmul.f32 %v5314_v21, %v9333_v40 }
  0x64   : > { %v5524_v6 = vmul.f32 %v5317_v22, %v9333_v40  ;;  %v5528_v7 = vmul.f32 %v5320_v26, %v9333_v40  ;;  %v5532_v8 = vmul.f32 %v5323_v27, %v9333_v40  ;;  %v5536_v12 = vmul.f32 %v5326_v28, %v9333_v40 }
  0x65   : > { %v5540_v16 = vmul.f32 %v5329_v32, %v9333_v40  ;;  %v5544_v17 = vmul.f32 %v5332_v36, %v9333_v40  ;;  %v5548_v21 = vmul.f32 %v5335_v37, %v9333_v40  ;;  %v5552_v22 = vmul.f32 %v5338_v38, %v9333_v40 }
  0x66   : > { %v5556_v26 = vmul.f32 %v5341_v42, %v9333_v40  ;;  %v5560_v27 = vmul.f32 %v5344_v43, %v9333_v40  ;;  %v5564_v28 = vmul.f32 %v5347_v44, %v9333_v40  ;;  %v5568_v32 = vmul.f32 %v5350_v48, %v9333_v40 }
  0x67   : > { %9334 = vst [vmem:[#allocation23_spill] sm:$0xff] %v5552_v22  ;;  %v5572_v36 = vmul.f32 %v5353_v49, %v9333_v40  ;;  %v5576_v37 = vmul.f32 %v5356_v50, %v9333_v40  ;;  %v5580_v38 = vmul.f32 %v5359_v54, %v9333_v40  ;;  %v5584_v42 = vmul.f32 %v5362_v55, %v9333_v40  ;;  %v9342_v54 = vld [vmem:[#allocation30_spill] sm:$0xff] }
  0x68   : > { %9335 = vst [vmem:[#allocation24_spill] sm:$0xff] %v5556_v26  ;;  %9336 = vst [vmem:[#allocation25_spill] sm:$0xff] %v5560_v27  ;;  %v5588_v43 = vmul.f32 %v5365_v56, %v9333_v40  ;;  %v5592_v44 = vmul.f32 %v5368_v60, %v9333_v40  ;;  %v5596_v48 = vmul.f32 %v5371_v61, %v9333_v40  ;;  %v9343_v56 = vld [vmem:[#allocation31_spill] sm:$0xff] }
  0x69   : > { %9337 = vst [vmem:[#allocation26_spill] sm:$0xff] %v5572_v36  ;;  %v5600_v49 = vmul.f32 %v5374_v62, %v9333_v40  ;;  %v5604_v50 = vmul.f32 %v5377_v2, %v9333_v40  ;;  %v5608_v55 = vmul.f32 %v9342_v54, %v9333_v40  ;;  %v5612_v60 = vmul.f32 %v9343_v56, %v9333_v40 }
  0x6a   : > { %9338 = vst [vmem:[#allocation27_spill] sm:$0xff] %v5592_v44  ;;  %9339 = vst [vmem:[#allocation28_spill] sm:$0xff] %v5596_v48  ;;  %v9344_v44 = vld [vmem:[#allocation32_spill] sm:$0xff]  ;;  %v9346_v48 = vld [vmem:[#allocation33_spill] sm:$0xff]  ;;  %v5632_v56 = vmul.f32 %v5398_v25, %v9333_v40  ;;  %v5652_v25 = vmul.f32 %v5413_v10, %v9333_v40  ;;  %v5672_v10 = vmul.f32 %v5428_v33, %v9333_v40 }
  0x6b   : > { %9340 = vst [vmem:[#allocation29_spill] sm:$0xff] %v5600_v49  ;;  %9341 = vst [vmem:[#allocation34_spill] sm:$0xff] %v5604_v50  ;;  %v5616_v61 = vmul.f32 %v9344_v44, %v9333_v40  ;;  %v5620_v62 = vmul.f32 %v9346_v48, %v9333_v40  ;;  %v9347_v49 = vld [vmem:[#allocation19_spill] sm:$0xff]  ;;  %v9348_v50 = vld [vmem:[#allocation20_spill] sm:$0xff]  ;;  %v5636_v44 = vmul.f32 %v5401_v3, %v9333_v40 }
  0x6c   : > { %v5624_v2 = vmul.f32 %v9347_v49, %v9333_v40  ;;  %v5628_v54 = vmul.f32 %v9348_v50, %v9333_v40  ;;  %v5644_v49 = vmul.f32 %v5407_v11, %v9333_v40  ;;  %v5648_v50 = vmul.f32 %v5410_v13, %v9333_v40 }
  0x6d   : > { %9345 = vst [vmem:[#allocation30_spill] sm:$0xff] %v5616_v61  ;;  %v9350_v61 = vld [vmem:[#allocation21_spill] sm:$0xff]  ;;  %v5656_v3 = vmul.f32 %v5416_v15, %v9333_v40  ;;  %v5664_v11 = vmul.f32 %v5422_v24, %v9333_v40  ;;  %v5668_v13 = vmul.f32 %v5425_v4, %v9333_v40  ;;  %v5676_v15 = vmul.f32 %v5431_v34, %v9333_v40 }
  0x6e   : > { %9349 = vst [vmem:[#allocation31_spill] sm:$0xff] %v5628_v54  ;;  %v5640_v48 = vmul.f32 %v9350_v61, %v9333_v40  ;;  %v5660_v61 = vmul.f32 %v5419_v23, %v9333_v40  ;;  %9355 = vst [vmem:[#allocation21_spill] sm:$0xff] %v5672_v10  ;;  %v5680_v23 = vmul.f32 %v5434_v14, %v9333_v40  ;;  %v9356_v10 = vld [vmem:[#allocation22_spill] sm:$0xff] }
  0x6f   : > { %9351 = vst [vmem:[#allocation32_spill] sm:$0xff] %v5656_v3  ;;  %9353 = vst [vmem:[#allocation19_spill] sm:$0xff] %v5664_v11  ;;  %v5684_v24 = vmul.f32 %v5437_v20, %v9333_v40  ;;  %v5688_v4 = vmul.f32 %v5440_v45, %v9333_v40  ;;  %v5692_v33 = vmul.f32 %v5443_v18, %v9333_v40 }
  0x70   : > { %9352 = vst [vmem:[#allocation33_spill] sm:$0xff] %v5660_v61  ;;  %9354 = vst [vmem:[#allocation20_spill] sm:$0xff] %v5668_v13  ;;  %v5696_v34 = vmul.f32 %v9356_v10, %v9333_v40  ;;  %v5700_v14 = vmul.f32 %v5449_v5, %v9333_v40  ;;  %v5704_v20 = vmul.f32 %v5452_v29, %v9333_v40  ;;  %v9376_v29 = vfloor.f32 %v5480_v47 }
  0x71   : > { %v5708_v45 = vmul.f32 %v5455_v30, %v9333_v40  ;;  %v5712_v18 = vmul.f32 %v5458_v9, %v9333_v40  ;;  %v5716_v10 = vmul.f32 %v5461_v35, %v9333_v40  ;;  %v5720_v5 = vmul.f32 %v5464_v39, %v9333_v40  ;;  %v9363_v22 = vld [vmem:[#allocation28_spill] sm:$0xff] }
  0x72   : > { %9357 = vst [vmem:[#allocation22_spill] sm:$0xff] %v5700_v14  ;;  %9358 = vst [vmem:[#allocation35_spill] sm:$0xff] %v5704_v20  ;;  %v9362_v14 = vld [vmem:[#allocation27_spill] sm:$0xff]  ;;  %v9364_v26 = vld [vmem:[#allocation29_spill] sm:$0xff]  ;;  %v9369_v61 = vmov %v5704_v20  ;;  %v9375_v39 = vfloor.f32 %v5476_v19  ;;  %v5804_v20 = vsub.f32 %v5480_v47, %v9376_v29  ;;  %v9377_v30 = vfloor.f32 %v5484_v51 }
  0x73   : > { %9359 = vst [vmem:[#allocation36_spill] sm:$0xff] %v5708_v45  ;;  %9360 = vst [vmem:[#allocation37_spill] sm:$0xff] %v5712_v18  ;;  %v9365_v27 = vld [vmem:[#allocation34_spill] sm:$0xff]  ;;  %v9370_v11 = vmov %v5708_v45  ;;  %v9371_v13 = vmov %v5712_v18  ;;  %v9372_v54 = vmov %v5716_v10  ;;  %v9373_v45 = vfloor.f32 %v5468_v31 }
  0x74   : > { %9361 = vst [vmem:[#allocation38_spill] sm:$0xff] %v5716_v10  ;;  %v9366_v36 = vld [vmem:[#allocation30_spill] sm:$0xff]  ;;  %v9374_v18 = vfloor.f32 %v5472_v59  ;;  %v5799_v40 = vsub.f32 %v5476_v19, %v9375_v39  ;;  %v9380_v39 = vfloor.f32 %v5496_v63  ;;  %v9381_v29 = vfloor.f32 %v5500_v0 }
  0x75   : > { %v5789_v9 = vsub.f32 %v5468_v31, %v9373_v45  ;;  %v5809_v31 = vsub.f32 %v5484_v51, %v9377_v30  ;;  %v9378_v45 = vfloor.f32 %v5488_v52  ;;  %v9382_v30 = vfloor.f32 %v5504_v46 }
  0x76   : > { %v5794_v35 = vsub.f32 %v5472_v59, %v9374_v18  ;;  %v9379_v18 = vfloor.f32 %v5492_v53  ;;  %v5824_v47 = vsub.f32 %v5496_v63, %v9380_v39  ;;  %v5829_v51 = vsub.f32 %v5500_v0, %v9381_v29 }
  0x77   : > { %v5814_v59 = vsub.f32 %v5488_v52, %v9378_v45  ;;  %v5834_v52 = vsub.f32 %v5504_v46, %v9382_v30  ;;  %v9383_v45 = vfloor.f32 %v5508_v57  ;;  %v9385_v39 = vfloor.f32 %v5516_v41 }
  0x78   : > { %v5819_v19 = vsub.f32 %v5492_v53, %v9379_v18  ;;  %v9384_v18 = vfloor.f32 %v5512_v58  ;;  %v9386_v29 = vfloor.f32 %v5520_v1  ;;  %v9387_v30 = vfloor.f32 %v5524_v6 }
  0x79   : > { %v9368_v3 = vld [vmem:[#allocation22_spill] sm:$0xff]  ;;  %v5839_v53 = vsub.f32 %v5508_v57, %v9383_v45  ;;  %v5849_v0 = vsub.f32 %v5516_v41, %v9385_v39  ;;  %v9388_v45 = vfloor.f32 %v5528_v7  ;;  %v9391_v39 = vfloor.f32 %v5536_v12 }
  0x7a   : > { %v5844_v63 = vsub.f32 %v5512_v58, %v9384_v18  ;;  %v5854_v46 = vsub.f32 %v5520_v1, %v9386_v29  ;;  %v5859_v57 = vsub.f32 %v5524_v6, %v9387_v30  ;;  %v9389_v18 = vfloor.f32 %v5532_v8 }
  0x7b   : > { %v5864_v58 = vsub.f32 %v5528_v7, %v9388_v45  ;;  %v5874_v1 = vsub.f32 %v5536_v12, %v9391_v39  ;;  %v9392_v29 = vfloor.f32 %v5540_v16  ;;  %v9394_v30 = vfloor.f32 %v5544_v17  ;;  %v9400_v39 = vld [vmem:[#allocation24_spill] sm:$0xff] }
  0x7c   : > { %v5869_v41 = vsub.f32 %v5532_v8, %v9389_v18  ;;  %v9395_v45 = vfloor.f32 %v5548_v21  ;;  %v9397_v18 = vld [vmem:[#allocation23_spill] sm:$0xff] }
  0x7d   : > { %v5879_v6 = vsub.f32 %v5540_v16, %v9392_v29  ;;  %v5884_v7 = vsub.f32 %v5544_v17, %v9394_v30  ;;  %v9398_v10 = vfloor.f32 %v9397_v18  ;;  %v9402_v29 = vld [vmem:[#allocation25_spill] sm:$0xff]  ;;  %v9404_v30 = vfloor.f32 %v5564_v28 }
  0x7e   : > { %9390 = vst [vmem:[#allocation27_spill] sm:$0xff] %v5869_v41  ;;  %v5889_v8 = vsub.f32 %v5548_v21, %v9395_v45  ;;  %v9401_v41 = vfloor.f32 %v9400_v39  ;;  %v9405_v45 = vfloor.f32 %v5568_v32 }
  0x7f   : > { %9393 = vst [vmem:[#allocation28_spill] sm:$0xff] %v5879_v6  ;;  %v5894_v12 = vsub.f32 %v9397_v18, %v9398_v10  ;;  %v9403_v6 = vfloor.f32 %v9402_v29  ;;  %v5909_v21 = vsub.f32 %v5564_v28, %v9404_v30  ;;  %v9406_v18 = vld [vmem:[#allocation26_spill] sm:$0xff]  ;;  %v9411_v30 = vfloor.f32 %v5584_v42 }
  0x80   : > { %9396 = vst [vmem:[#allocation29_spill] sm:$0xff] %v5889_v8  ;;  %v5899_v16 = vsub.f32 %v9400_v39, %v9401_v41  ;;  %v5914_v10 = vsub.f32 %v5568_v32, %v9405_v45  ;;  %v9407_v8 = vfloor.f32 %v9406_v18  ;;  %v9408_v39 = vfloor.f32 %v5576_v37 }
  0x81   : > { %9399 = vst [vmem:[#allocation34_spill] sm:$0xff] %v5894_v12  ;;  %v5904_v17 = vsub.f32 %v9402_v29, %v9403_v6  ;;  %v9410_v29 = vfloor.f32 %v5580_v38  ;;  %v5934_v32 = vsub.f32 %v5584_v42, %v9411_v30  ;;  %v9413_v45 = vfloor.f32 %v5588_v43 }
  0x82   : > { %v5919_v41 = vsub.f32 %v9406_v18, %v9407_v8  ;;  %v5924_v6 = vsub.f32 %v5576_v37, %v9408_v39  ;;  %v9415_v18 = vfloor.f32 %v9362_v14  ;;  %v9417_v39 = vfloor.f32 %v9363_v22 }
  0x83   : > { %v5929_v28 = vsub.f32 %v5580_v38, %v9410_v29  ;;  %9412 = vst [vmem:[#allocation22_spill] sm:$0xff] %v5934_v32  ;;  %v5939_v8 = vsub.f32 %v5588_v43, %v9413_v45  ;;  %v9418_v29 = vfloor.f32 %v9364_v26  ;;  %v9420_v30 = vfloor.f32 %v9365_v27 }
  0x84   : > { %9409 = vst [vmem:[#allocation30_spill] sm:$0xff] %v5924_v6  ;;  %v5944_v37 = vsub.f32 %v9362_v14, %v9415_v18  ;;  %v5949_v38 = vsub.f32 %v9363_v22, %v9417_v39  ;;  %v9422_v45 = vfloor.f32 %v5608_v55  ;;  %v9424_v18 = vfloor.f32 %v5612_v60 }
  0x85   : > { %9414 = vst [vmem:[#allocation35_spill] sm:$0xff] %v5939_v8  ;;  %v5954_v42 = vsub.f32 %v9364_v26, %v9418_v29  ;;  %v5959_v43 = vsub.f32 %v9365_v27, %v9420_v30  ;;  %v9425_v39 = vfloor.f32 %v9366_v36  ;;  %v9427_v29 = vfloor.f32 %v5620_v62 }
  0x86   : > { %9416 = vst [vmem:[#allocation36_spill] sm:$0xff] %v5944_v37  ;;  %v5964_v14 = vsub.f32 %v5608_v55, %v9422_v45  ;;  %v5969_v22 = vsub.f32 %v5612_v60, %v9424_v18  ;;  %v9429_v30 = vfloor.f32 %v5624_v2  ;;  %v9431_v45 = vld [vmem:[#allocation31_spill] sm:$0xff]  ;;  %v9434_v18 = vfloor.f32 %v5632_v56 }
  0x87   : > { %9419 = vst [vmem:[#allocation37_spill] sm:$0xff] %v5954_v42  ;;  %9421 = vst [vmem:[#allocation38_spill] sm:$0xff] %v5959_v43  ;;  %v5974_v26 = vsub.f32 %v9366_v36, %v9425_v39  ;;  %v5979_v27 = vsub.f32 %v5620_v62, %v9427_v29  ;;  %v9432_v43 = vfloor.f32 %v9431_v45  ;;  %v9436_v39 = vfloor.f32 %v5636_v44 }
  0x88   : > { %9423 = vst [vmem:[#allocation23_spill] sm:$0xff] %v5964_v14  ;;  %v5984_v55 = vsub.f32 %v5624_v2, %v9429_v30  ;;  %v5994_v36 = vsub.f32 %v5632_v56, %v9434_v18  ;;  %v9438_v29 = vfloor.f32 %v5640_v48  ;;  %v9440_v30 = vfloor.f32 %v5644_v49 }
  0x89   : > { %9426 = vst [vmem:[#allocation24_spill] sm:$0xff] %v5974_v26  ;;  %9428 = vst [vmem:[#allocation25_spill] sm:$0xff] %v5979_v27  ;;  %v5989_v60 = vsub.f32 %v9431_v45, %v9432_v43  ;;  %v5999_v62 = vsub.f32 %v5636_v44, %v9436_v39  ;;  %v9442_v45 = vfloor.f32 %v5648_v50  ;;  %v9444_v18 = vfloor.f32 %v5652_v25  ;;  %v9446_v39 = vld [vmem:[#allocation32_spill] sm:$0xff] }
  0x8a   : > { %9430 = vst [vmem:[#allocation26_spill] sm:$0xff] %v5984_v55  ;;  %9435 = vst [vmem:[#allocation39_spill] sm:$0xff] %v5994_v36  ;;  %v6004_v2 = vsub.f32 %v5640_v48, %v9438_v29  ;;  %v6009_v43 = vsub.f32 %v5644_v49, %v9440_v30  ;;  %v9449_v29 = vld [vmem:[#allocation33_spill] sm:$0xff]  ;;  %v9452_v30 = vld [vmem:[#allocation19_spill] sm:$0xff] }
  0x8b   : > { %9433 = vst [vmem:[#allocation31_spill] sm:$0xff] %v5989_v60  ;;  %9437 = vst [vmem:[#allocation40_spill] sm:$0xff] %v5999_v62  ;;  %v6014_v56 = vsub.f32 %v5648_v50, %v9442_v45  ;;  %v6019_v44 = vsub.f32 %v5652_v25, %v9444_v18  ;;  %v9447_v62 = vfloor.f32 %v9446_v39  ;;  %v9455_v45 = vld [vmem:[#allocation20_spill] sm:$0xff]  ;;  %v9458_v18 = vld [vmem:[#allocation21_spill] sm:$0xff] }
  0x8c   : > { %9439 = vst [vmem:[#allocation41_spill] sm:$0xff] %v6004_v2  ;;  %9441 = vst [vmem:[#allocation42_spill] sm:$0xff] %v6009_v43  ;;  %v9450_v2 = vfloor.f32 %v9449_v29  ;;  %v9453_v43 = vfloor.f32 %v9452_v30 }
  0x8d   : > { %9443 = vst [vmem:[#allocation43_spill] sm:$0xff] %v6014_v56  ;;  %9445 = vst [vmem:[#allocation44_spill] sm:$0xff] %v6019_v44  ;;  %v6024_v48 = vsub.f32 %v9446_v39, %v9447_v62  ;;  %v9456_v56 = vfloor.f32 %v9455_v45  ;;  %v9459_v44 = vfloor.f32 %v9458_v18  ;;  %v9461_v39 = vfloor.f32 %v5676_v15 }
  0x8e   : > { %v6029_v49 = vsub.f32 %v9449_v29, %v9450_v2  ;;  %v6034_v50 = vsub.f32 %v9452_v30, %v9453_v43  ;;  %v9463_v29 = vfloor.f32 %v5680_v23  ;;  %v9465_v30 = vfloor.f32 %v5684_v24 }
  0x8f   : > { %9448 = vst [vmem:[#allocation32_spill] sm:$0xff] %v6024_v48  ;;  %v6039_v25 = vsub.f32 %v9455_v45, %v9456_v56  ;;  %v6044_v62 = vsub.f32 %v9458_v18, %v9459_v44  ;;  %v6049_v2 = vsub.f32 %v5676_v15, %v9461_v39  ;;  %v9467_v45 = vfloor.f32 %v5688_v4 }
  0x90   : > { %9451 = vst [vmem:[#allocation33_spill] sm:$0xff] %v6029_v49  ;;  %9454 = vst [vmem:[#allocation19_spill] sm:$0xff] %v6034_v50  ;;  %v6054_v43 = vsub.f32 %v5680_v23, %v9463_v29  ;;  %v6059_v56 = vsub.f32 %v5684_v24, %v9465_v30  ;;  %v9469_v18 = vfloor.f32 %v5692_v33  ;;  %v9471_v39 = vfloor.f32 %v5696_v34 }
  0x91   : > { %9457 = vst [vmem:[#allocation20_spill] sm:$0xff] %v6039_v25  ;;  %9460 = vst [vmem:[#allocation21_spill] sm:$0xff] %v6044_v62  ;;  %v6064_v44 = vsub.f32 %v5688_v4, %v9467_v45  ;;  %v9473_v29 = vfloor.f32 %v9368_v3  ;;  %v9475_v30 = vfloor.f32 %v9369_v61  ;;  %v9477_v45 = vfloor.f32 %v9370_v11 }
  0x92   : > { %9462 = vst [vmem:[#allocation45_spill] sm:$0xff] %v6049_v2  ;;  %9464 = vst [vmem:[#allocation46_spill] sm:$0xff] %v6054_v43  ;;  %v6069_v15 = vsub.f32 %v5692_v33, %v9469_v18  ;;  %v6074_v23 = vsub.f32 %v5696_v34, %v9471_v39  ;;  %v9479_v18 = vfloor.f32 %v9371_v13  ;;  %v9481_v39 = vfloor.f32 %v9372_v54 }
  0x93   : > { %9466 = vst [vmem:[#allocation47_spill] sm:$0xff] %v6059_v56  ;;  %9468 = vst [vmem:[#allocation48_spill] sm:$0xff] %v6064_v44  ;;  %v6079_v24 = vsub.f32 %v9368_v3, %v9473_v29  ;;  %v6084_v4 = vsub.f32 %v9369_v61, %v9475_v30  ;;  %v6089_v33 = vsub.f32 %v9370_v11, %v9477_v45  ;;  %v9483_v29 = vfloor.f32 %v5720_v5 }
  0x94   : > { %9470 = vst [vmem:[#allocation49_spill] sm:$0xff] %v6069_v15  ;;  %9472 = vst [vmem:[#allocation50_spill] sm:$0xff] %v6074_v23  ;;  %v6094_v34 = vsub.f32 %v9371_v13, %v9479_v18  ;;  %v6099_v3 = vsub.f32 %v9372_v54, %v9481_v39 }
  0x95   : > { %9474 = vst [vmem:[#allocation51_spill] sm:$0xff] %v6079_v24  ;;  %9476 = vst [vmem:[#allocation52_spill] sm:$0xff] %v6084_v4  ;;  %v6104_v61 = vsub.f32 %v5720_v5, %v9483_v29 }
  0x96   : > { %9478 = vst [vmem:[#allocation53_spill] sm:$0xff] %v6089_v33  ;;  %9480 = vst [vmem:[#allocation54_spill] sm:$0xff] %v6094_v34 }
  0x97   : > { %9482 = vst [vmem:[#allocation55_spill] sm:$0xff] %v6099_v3  ;;  %9484 = vst [vmem:[#allocation56_spill] sm:$0xff] %v6104_v61 }
  0x98   : > { %4947 = dma.done.wait [#allocation3], 512 }
  0x99   : > { %4948 = vsyncadd [#allocation3], 4294966784 }
  0x9a   : > { %604 = sfence }
  0x9b   : > { %s6106_s10 = smov 0  }
  0x9c LB: >> { %9485 = sst [smem:[#allocation57_spill]] %s4971_s10  ;;  %s6112_s11 = sshll.u32 %s4971_s10, 3  ;;  %vm622_vm0 = vcmask 8192   ;;  %vm633_vm1 = vcmask 24592   ;;  %vm644_vm2 = vcmask 40992   ;;  %vm655_vm3 = vcmask 57392   ;;  %s4971_s10 = sphi %s6106_s10, %s610_s10  }
  0x9d   : >> { %9486 = sst [smem:[#allocation58_spill]] %s6112_s11  ;;  %s612_s12 = sshra.s32 %s6112_s11, 7  ;;  %vm666_vm4 = vcmask 73792   ;;  %vm677_vm5 = vcmask 90192   ;;  %vm688_vm6 = vcmask 106592   ;;  %vm699_vm7 = vcmask 122992  }
  0x9e   : >> { %s6116_s13 = sand.u32 127, %s6112_s11  ;;  %s6118_s14 = sshll.u32 %s612_s12, 10 }
  0x9f   : >> { %9487 = sst [smem:[#allocation59_spill]] %s6116_s13  ;;  %s646_s15 = sadd.s32 384, %s6116_s13 }
  0xa0   : >> { %9488 = sst [smem:[#allocation60_spill]] %s6118_s14  ;;  %s624_s16 = sadd.s32 128, %s6116_s13 }
  0xa1   : >> { %s647_s18 = sadd.s32 %s6118_s14, %s646_s15  ;;  %s625_s19 = sadd.s32 %s6118_s14, %s624_s16 }
  0xa2   : >> { %s648_s20 = sld [smem:[#allocation2 + %s647_s18]]  ;;  %s657_s27 = sadd.s32 512, %s6116_s13 }
  0xa3   : >> { %s626_s26 = sld [smem:[#allocation2 + %s625_s19]]  ;;  %s635_s28 = sadd.s32 256, %s6116_s13 }
  0xa4   : >> { %s658_s29 = sadd.s32 %s6118_s14, %s657_s27  ;;  %s636_s21 = sadd.s32 %s6118_s14, %s635_s28 }
  0xa5   : >> { %s659_s30 = sld [smem:[#allocation2 + %s658_s29]]  ;;  %s679_s6 = sadd.s32 768, %s6116_s13 }
  0xa6   : >> { %s637_s5 = sld [smem:[#allocation2 + %s636_s21]]  ;;  %s680_s7 = sadd.s32 %s6118_s14, %s679_s6 }
  0xa7   : >> { %s681_s15 = sld [smem:[#allocation2 + %s680_s7]]  ;;  %s668_s16 = sadd.s32 640, %s6116_s13 }
  0xa8   : >> { %s649_s9 = scalar_lea.vmem %s5057_s8, %s648_s20  ;;  %s8988_s18 = smov 6  }
  0xa9   : >> { %s627_s12 = scalar_lea.vmem %s5057_s8, %s626_s26  ;;  %v650_v54 = vld [vmem:[%s649_s9] sm:$0x1]  ;;  %s8990_s19 = smov 2  }
  0xaa   : >> { %v628_v11 = vld [vmem:[%s627_s12] sm:$0x1]  ;;  %652 = vrot.lane.b32.xlu1 %v650_v54, %s8988_s18  ;;  %s669_s27 = sadd.s32 %s6118_s14, %s668_s16  ;;  %s701_s26 = sadd.s32 1, %s6112_s11 }
  0xab   : >> { %630 = vrot.lane.b32.xlu0 %v628_v11, %s8990_s19  ;;  %s660_s28 = scalar_lea.vmem %s5057_s8, %s659_s30  ;;  %s670_s20 = sld [smem:[#allocation2 + %s669_s27]] }
  0xac   : >> { %s638_s29 = scalar_lea.vmem %s5057_s8, %s637_s5  ;;  %v661_v13 = vld [vmem:[%s660_s28] sm:$0x1]  ;;  %s702_s21 = sshra.s32 %s701_s26, 7 }
  0xad   : >> { %v639_v5 = vld [vmem:[%s638_s29] sm:$0x1]  ;;  %s6139_s6 = sand.u32 127, %s701_s26  ;;  %s8984_s7 = smov 8  }
  0xae   : >> { %9489 = sst [smem:[#allocation61_spill]] %s6139_s6  ;;  %663 = vrot.lane.b32.xlu1 %v661_v13, %s8984_s7  ;;  %s8986_s9 = smov 4  }
  0xaf   : >> { %641 = vrot.lane.b32.xlu0 %v639_v5, %s8986_s9  ;;  %s6143_s30 = sshll.u32 %s702_s21, 10  ;;  %s713_s5 = sadd.s32 128, %s6139_s6 }
  0xb0   : >> { %9490 = sst [smem:[#allocation62_spill]] %s6143_s30  ;;  %s682_s12 = scalar_lea.vmem %s5057_s8, %s681_s15 }
  0xb1   : >> { %s714_s16 = sadd.s32 %s6143_s30, %s713_s5  ;;  %v683_v30 = vld [vmem:[%s682_s12] sm:$0x1]  ;;  %s690_s28 = sadd.s32 896, %s6116_s13 }
  0xb2   : >> { %s715_s27 = sld [smem:[#allocation2 + %s714_s16]]  ;;  %s691_s29 = sadd.s32 %s6118_s14, %s690_s28 }
  0xb3   : >> { %s8992_s26 = smov 12   ;;  %s671_s7 = scalar_lea.vmem %s5057_s8, %s670_s20 }
  0xb4   : >> { %685 = vrot.lane.b32.xlu1 %v683_v30, %s8992_s26  ;;  %s692_s21 = sld [smem:[#allocation2 + %s691_s29]]  ;;  %v672_v45 = vld [vmem:[%s671_s7] sm:$0x1]  ;;  %s733_s9 = sadd.s32 384, %s6139_s6 }
  0xb5   : >> { %s723_s18 = sadd.s32 256, %s6139_s6  ;;  %s8994_s15 = smov 10  }
  0xb6   : >> { %674 = vrot.lane.b32.xlu0 %v672_v45, %s8994_s15  ;;  %s734_s5 = sadd.s32 %s6143_s30, %s733_s9  ;;  %s724_s12 = sadd.s32 %s6143_s30, %s723_s18 }
  0xb7   : >> { %s735_s16 = sld [smem:[#allocation2 + %s734_s5]]  ;;  %s753_s26 = sadd.s32 640, %s6139_s6 }
  0xb8   : >> { %s725_s28 = sld [smem:[#allocation2 + %s724_s12]]  ;;  %s716_s19 = scalar_lea.vmem %s5057_s8, %s715_s27 }
  0xb9   : >> { %v717_v18 = vld [vmem:[%s716_s19] sm:$0x1]  ;;  %s754_s20 = sadd.s32 %s6143_s30, %s753_s26  ;;  %s743_s29 = sadd.s32 512, %s6139_s6 }
  0xba   : >> { %s9491_s7 = smov 2   ;;  %s693_s1 = scalar_lea.vmem %s5057_s8, %s692_s21 }
  0xbb   : >> { %719 = vrot.lane.b32.xlu1 %v717_v18, %s9491_s7  ;;  %s755_s2 = sld [smem:[#allocation2 + %s754_s20]]  ;;  %v694_v39 = vld [vmem:[%s693_s1] sm:$0x1]  ;;  %s744_s9 = sadd.s32 %s6143_s30, %s743_s29 }
  0xbc   : >> { %s773_s18 = sadd.s32 896, %s6139_s6  ;;  %s8999_s5 = smov 14  }
  0xbd   : >> { %696 = vrot.lane.b32.xlu0 %v694_v39, %s8999_s5  ;;  %s745_s27 = sld [smem:[#allocation2 + %s744_s9]]  ;;  %s774_s12 = sadd.s32 %s6143_s30, %s773_s18 }
  0xbe   : >> { %s736_s19 = scalar_lea.vmem %s5057_s8, %s735_s16  ;;  %s726_s26 = scalar_lea.vmem %s5057_s8, %s725_s28 }
  0xbf   : >> { %v737_v29 = vld [vmem:[%s736_s19] sm:$0x1]  ;;  %s775_s15 = sld [smem:[#allocation2 + %s774_s12]]  ;;  %s763_s3 = sadd.s32 768, %s6139_s6 }
  0xc0   : >> { %v727_v54 = vld [vmem:[%s726_s26] sm:$0x1]  ;;  %s9492_s21 = smov 6   ;;  %s764_s20 = sadd.s32 %s6143_s30, %s763_s3 }
  0xc1   : >> { %739 = vrot.lane.b32.xlu1 %v737_v29, %s9492_s21  ;;  %s783_s1 = sadd.s32 2, %s6112_s11  ;;  %s9493_s29 = smov 4  }
  0xc2   : >> { %729 = vrot.lane.b32.xlu0 %v727_v54, %s9493_s29  ;;  %s756_s4 = scalar_lea.vmem %s5057_s8, %s755_s2  ;;  %s765_s25 = sld [smem:[#allocation2 + %s764_s20]] }
  0xc3   : >> { %v757_v11 = vld [vmem:[%s756_s4] sm:$0x1]  ;;  %s784_s9 = sshra.s32 %s783_s1, 7  ;;  %s6175_s18 = sand.u32 127, %s783_s1 }
  0xc4   : >> { %9494 = sst [smem:[#allocation63_spill]] %s6175_s18  ;;  %s746_s16 = scalar_lea.vmem %s5057_s8, %s745_s27 }
  0xc5   : >> { %s6178_s28 = sshll.u32 %s784_s9, 10  ;;  %s9496_s12 = smov 10   ;;  %v747_v13 = vld [vmem:[%s746_s16] sm:$0x1] }
  0xc6   : >> { %9495 = sst [smem:[#allocation64_spill]] %s6178_s28  ;;  %759 = vrot.lane.b32.xlu1 %v757_v11, %s9496_s12  ;;  %s805_s2 = sadd.s32 256, %s6175_s18 }
  0xc7   : >> { %s795_s3 = sadd.s32 128, %s6175_s18  ;;  %s9497_s4 = smov 8  }
  0xc8   : >> { %749 = vrot.lane.b32.xlu0 %v747_v13, %s9497_s4  ;;  %s776_s19 = scalar_lea.vmem %s5057_s8, %s775_s15  ;;  %s806_s26 = sadd.s32 %s6178_s28, %s805_s2 }
  0xc9   : >> { %v777_v5 = vld [vmem:[%s776_s19] sm:$0x1]  ;;  %s807_s27 = sld [smem:[#allocation2 + %s806_s26]]  ;;  %s796_s20 = sadd.s32 %s6178_s28, %s795_s3 }
  0xca   : >> { %s766_s1 = scalar_lea.vmem %s5057_s8, %s765_s25  ;;  %s797_s9 = sld [smem:[#allocation2 + %s796_s20]]  ;;  %779 = vrot.lane.b32.xlu1 %v777_v5, %s8999_s5 }
  0xcb   : >> { %v767_v30 = vld [vmem:[%s766_s1] sm:$0x1]  ;;  %s825_s16 = sadd.s32 512, %s6175_s18  ;;  %s815_s24 = sadd.s32 384, %s6175_s18 }
  0xcc   : >> { %s9498_s0 = smov 12   ;;  %s826_s15 = sadd.s32 %s6178_s28, %s825_s16 }
  0xcd   : >> { %769 = vrot.lane.b32.xlu0 %v767_v30, %s9498_s0  ;;  %s816_s2 = sadd.s32 %s6178_s28, %s815_s24  ;;  %s827_s22 = sld [smem:[#allocation2 + %s826_s15]] }
  0xce   : >> { %s817_s19 = sld [smem:[#allocation2 + %s816_s2]]  ;;  %s845_s26 = sadd.s32 768, %s6175_s18 }
  0xcf   : >> { %s835_s3 = sadd.s32 640, %s6175_s18  ;;  %s808_s25 = scalar_lea.vmem %s5057_s8, %s807_s27 }
  0xd0   : >> { %s846_s23 = sadd.s32 %s6178_s28, %s845_s26  ;;  %v809_v45 = vld [vmem:[%s808_s25] sm:$0x1]  ;;  %s798_s20 = scalar_lea.vmem %s5057_s8, %s797_s9 }
  0xd1   : >> { %s847_s5 = sld [smem:[#allocation2 + %s846_s23]]  ;;  %811 = vrot.lane.b32.xlu1 %v809_v45, %s9493_s29  ;;  %v799_v18 = vld [vmem:[%s798_s20] sm:$0x1]  ;;  %s836_s1 = sadd.s32 %s6178_s28, %s835_s3 }
  0xd2   : >> { %s865_s17 = sadd.s32 3, %s6112_s11  ;;  %801 = vrot.lane.b32.xlu0 %v799_v18, %s9491_s7  ;;  %s837_s24 = sld [smem:[#allocation2 + %s836_s1]] }
  0xd3   : >> { %s866_s16 = sshra.s32 %s865_s17, 7  ;;  %s828_s15 = scalar_lea.vmem %s5057_s8, %s827_s22 }
  0xd4   : >> { %s818_s2 = scalar_lea.vmem %s5057_s8, %s817_s19  ;;  %v829_v39 = vld [vmem:[%s828_s15] sm:$0x1]  ;;  %s6205_s27 = sshll.u32 %s866_s16, 10 }
  0xd5   : >> { %v819_v29 = vld [vmem:[%s818_s2] sm:$0x1]  ;;  %s6207_s23 = sand.u32 127, %s865_s17  ;;  %831 = vrot.lane.b32.xlu1 %v829_v39, %s9497_s4  ;;  %s855_s26 = sadd.s32 896, %s6175_s18 }
  0xd6   : >> { %s877_s9 = sadd.s32 128, %s6207_s23  ;;  %821 = vrot.lane.b32.xlu0 %v819_v29, %s9492_s21  ;;  %s856_s17 = sadd.s32 %s6178_s28, %s855_s26 }
  0xd7   : >> { %s848_s22 = scalar_lea.vmem %s5057_s8, %s847_s5  ;;  %s878_s19 = sadd.s32 %s6205_s27, %s877_s9 }
  0xd8   : >> { %v849_v54 = vld [vmem:[%s848_s22] sm:$0x1]  ;;  %s879_s3 = sld [smem:[#allocation2 + %s878_s19]]  ;;  %s838_s25 = scalar_lea.vmem %s5057_s8, %s837_s24 }
  0xd9   : >> { %s857_s20 = sld [smem:[#allocation2 + %s856_s17]]  ;;  %851 = vrot.lane.b32.xlu1 %v849_v54, %s9498_s0  ;;  %v839_v11 = vld [vmem:[%s838_s25] sm:$0x1]  ;;  %s897_s1 = sadd.s32 384, %s6207_s23 }
  0xda   : >> { %s887_s16 = sadd.s32 256, %s6207_s23  ;;  %841 = vrot.lane.b32.xlu0 %v839_v11, %s9496_s12  ;;  %s898_s15 = sadd.s32 %s6205_s27, %s897_s1 }
  0xdb   : >> { %s888_s2 = sadd.s32 %s6205_s27, %s887_s16  ;;  %s899_s5 = sld [smem:[#allocation2 + %s898_s15]] }
  0xdc   : >> { %s889_s9 = sld [smem:[#allocation2 + %s888_s2]]  ;;  %s1029_s22 = sadd.s32 5, %s6112_s11 }
  0xdd   : >> { %s947_s10 = sadd.s32 4, %s6112_s11  ;;  %s1030_s26 = sshra.s32 %s1029_s22, 7 }
  0xde   : >> { %s880_s19 = scalar_lea.vmem %s5057_s8, %s879_s3  ;;  %s6227_s17 = sshll.u32 %s1030_s26, 10 }
  0xdf   : >> { %v881_v13 = vld [vmem:[%s880_s19] sm:$0x1]  ;;  %s858_s24 = scalar_lea.vmem %s5057_s8, %s857_s20  ;;  %s6230_s25 = sand.u32 127, %s1029_s22 }
  0xe0   : >> { %883 = vrot.lane.b32.xlu1 %v881_v13, %s9491_s7  ;;  %v859_v5 = vld [vmem:[%s858_s24] sm:$0x1]  ;;  %s948_s1 = sshra.s32 %s947_s10, 7  ;;  %s9499_s16 = smov 14  }
  0xe1   : >> { %861 = vrot.lane.b32.xlu0 %v859_v5, %s9499_s16  ;;  %s1041_s15 = sadd.s32 128, %s6230_s25  ;;  %s6234_s2 = sshll.u32 %s948_s1, 10 }
  0xe2   : >> { %s900_s3 = scalar_lea.vmem %s5057_s8, %s899_s5  ;;  %s890_s19 = scalar_lea.vmem %s5057_s8, %s889_s9 }
  0xe3   : >> { %v901_v30 = vld [vmem:[%s900_s3] sm:$0x1]  ;;  %s1042_s20 = sadd.s32 %s6227_s17, %s1041_s15  ;;  %s6239_s26 = sand.u32 127, %s947_s10 }
  0xe4   : >> { %v891_v45 = vld [vmem:[%s890_s19] sm:$0x1]  ;;  %903 = vrot.lane.b32.xlu1 %v901_v30, %s9492_s21  ;;  %s1043_s22 = sld [smem:[#allocation2 + %s1042_s20]]  ;;  %s959_s24 = sadd.s32 128, %s6239_s26 }
  0xe5   : >> { %893 = vrot.lane.b32.xlu0 %v891_v45, %s9493_s29  ;;  %s960_s28 = sadd.s32 %s6234_s2, %s959_s24  ;;  %s1193_s1 = sadd.s32 7, %s6112_s11 }
  0xe6   : >> { %s961_s18 = sld [smem:[#allocation2 + %s960_s28]]  ;;  %s1194_s5 = sshra.s32 %s1193_s1, 7 }
  0xe7   : >> { %s6246_s9 = sshll.u32 %s1194_s5, 10  ;;  %s6248_s15 = sand.u32 127, %s1193_s1 }
  0xe8   : >> { %s1205_s10 = sadd.s32 128, %s6248_s15  ;;  %s1111_s3 = sadd.s32 6, %s6112_s11 }
  0xe9   : >> { %s1206_s19 = sadd.s32 %s6246_s9, %s1205_s10  ;;  %s1112_s20 = sshra.s32 %s1111_s3, 7 }
  0xea   : >> { %s1044_s16 = scalar_lea.vmem %s5057_s8, %s1043_s22  ;;  %s1207_s24 = sld [smem:[#allocation2 + %s1206_s19]] }
  0xeb   : >> { %v1045_v18 = vld [vmem:[%s1044_s16] sm:$0x1]  ;;  %s6254_s28 = sshll.u32 %s1112_s20, 10  ;;  %s6256_s5 = sand.u32 127, %s1111_s3 }
  0xec   : >> { %1047 = vrot.lane.b32.xlu1 %v1045_v18, %s9491_s7  ;;  %s962_s1 = scalar_lea.vmem %s5057_s8, %s961_s18  ;;  %s1123_s11 = sadd.s32 128, %s6256_s5 }
  0xed   : >> { %v963_v39 = vld [vmem:[%s962_s1] sm:$0x1]  ;;  %s1124_s10 = sadd.s32 %s6254_s28, %s1123_s11  ;;  %s1051_s22 = sadd.s32 256, %s6230_s25 }
  0xee   : >> { %965 = vrot.lane.b32.xlu0 %v963_v39, %s9491_s7  ;;  %s1125_s16 = sld [smem:[#allocation2 + %s1124_s10]]  ;;  %s1052_s19 = sadd.s32 %s6227_s17, %s1051_s22 }
  0xef   : >> { %s1053_s3 = sld [smem:[#allocation2 + %s1052_s19]]  ;;  %s969_s20 = sadd.s32 256, %s6239_s26 }
  0xf0   : >> { %s1208_s30 = scalar_lea.vmem %s5057_s8, %s1207_s24  ;;  %s970_s6 = sadd.s32 %s6234_s2, %s969_s20 }
  0xf1   : >> { %v1209_v29 = vld [vmem:[%s1208_s30] sm:$0x1]  ;;  %s971_s18 = sld [smem:[#allocation2 + %s970_s6]]  ;;  %s1215_s14 = sadd.s32 256, %s6248_s15 }
  0xf2   : >> { %1211 = vrot.lane.b32.xlu1 %v1209_v29, %s9491_s7  ;;  %s1216_s11 = sadd.s32 %s6246_s9, %s1215_s14  ;;  %s1133_s1 = sadd.s32 256, %s6256_s5 }
  0xf3   : >> { %s1217_s13 = sld [smem:[#allocation2 + %s1216_s11]]  ;;  %s1134_s10 = sadd.s32 %s6254_s28, %s1133_s1 }
  0xf4   : >> { %s1126_s22 = scalar_lea.vmem %s5057_s8, %s1125_s16  ;;  %s1135_s19 = sld [smem:[#allocation2 + %s1134_s10]] }
  0xf5   : >> { %v1127_v54 = vld [vmem:[%s1126_s22] sm:$0x1]  ;;  %s1054_s24 = scalar_lea.vmem %s5057_s8, %s1053_s3  ;;  %s1061_s20 = sadd.s32 384, %s6230_s25 }
  0xf6   : >> { %1129 = vrot.lane.b32.xlu0 %v1127_v54, %s9491_s7  ;;  %v1055_v11 = vld [vmem:[%s1054_s24] sm:$0x1]  ;;  %s1062_s6 = sadd.s32 %s6227_s17, %s1061_s20  ;;  %s979_s30 = sadd.s32 384, %s6239_s26 }
  0xf7   : >> { %1057 = vrot.lane.b32.xlu1 %v1055_v11, %s9493_s29  ;;  %s972_s14 = scalar_lea.vmem %s5057_s8, %s971_s18  ;;  %s1063_s11 = sld [smem:[#allocation2 + %s1062_s6]] }
  0xf8   : >> { %v973_v13 = vld [vmem:[%s972_s14] sm:$0x1]  ;;  %s980_s16 = sadd.s32 %s6234_s2, %s979_s30  ;;  %s1225_s1 = sadd.s32 384, %s6248_s15 }
  0xf9   : >> { %s1218_s3 = scalar_lea.vmem %s5057_s8, %s1217_s13  ;;  %s981_s10 = sld [smem:[#allocation2 + %s980_s16]] }
  0xfa   : >> { %975 = vrot.lane.b32.xlu0 %v973_v13, %s9493_s29  ;;  %v1219_v5 = vld [vmem:[%s1218_s3] sm:$0x1]  ;;  %s1136_s7 = scalar_lea.vmem %s5057_s8, %s1135_s19  ;;  %s1226_s22 = sadd.s32 %s6246_s9, %s1225_s1 }
  0xfb   : >> { %1221 = vrot.lane.b32.xlu1 %v1219_v5, %s9493_s29  ;;  %v1137_v30 = vld [vmem:[%s1136_s7] sm:$0x1]  ;;  %s1227_s18 = sld [smem:[#allocation2 + %s1226_s22]]  ;;  %s1143_s24 = sadd.s32 384, %s6256_s5 }
  0xfc   : >> { %s1144_s20 = sadd.s32 %s6254_s28, %s1143_s24  ;;  %s989_s6 = sadd.s32 512, %s6239_s26 }
  0xfd   : >> { %s1064_s13 = scalar_lea.vmem %s5057_s8, %s1063_s11  ;;  %s1145_s30 = sld [smem:[#allocation2 + %s1144_s20]] }
  0xfe   : >> { %1139 = vrot.lane.b32.xlu0 %v1137_v30, %s9493_s29  ;;  %v1065_v45 = vld [vmem:[%s1064_s13] sm:$0x1]  ;;  %s990_s19 = sadd.s32 %s6234_s2, %s989_s6  ;;  %s907_s14 = sadd.s32 512, %s6207_s23 }
  0xff   : >> { %1067 = vrot.lane.b32.xlu1 %v1065_v45, %s9492_s21  ;;  %s982_s16 = scalar_lea.vmem %s5057_s8, %s981_s10  ;;  %s991_s1 = sld [smem:[#allocation2 + %s990_s19]] }
 0x100   : >> { %v983_v18 = vld [vmem:[%s982_s16] sm:$0x1]  ;;  %s908_s3 = sadd.s32 %s6205_s27, %s907_s14  ;;  %s1153_s7 = sadd.s32 512, %s6256_s5 }
 0x101   : >> { %s1228_s11 = scalar_lea.vmem %s5057_s8, %s1227_s18  ;;  %s909_s22 = sld [smem:[#allocation2 + %s908_s3]] }
 0x102   : >> { %985 = vrot.lane.b32.xlu0 %v983_v18, %s9492_s21  ;;  %v1229_v39 = vld [vmem:[%s1228_s11] sm:$0x1]  ;;  %s1154_s29 = sadd.s32 %s6254_s28, %s1153_s7  ;;  %s1071_s24 = sadd.s32 512, %s6230_s25 }
 0x103   : >> { %1231 = vrot.lane.b32.xlu1 %v1229_v39, %s9492_s21  ;;  %s1146_s10 = scalar_lea.vmem %s5057_s8, %s1145_s30  ;;  %s1155_s20 = sld [smem:[#allocation2 + %s1154_s29]] }
 0x104   : >> { %v1147_v29 = vld [vmem:[%s1146_s10] sm:$0x1]  ;;  %s1072_s6 = sadd.s32 %s6227_s17, %s1071_s24  ;;  %s917_s13 = sadd.s32 640, %s6207_s23 }
 0x105   : >> { %s992_s18 = scalar_lea.vmem %s5057_s8, %s991_s1  ;;  %s1073_s19 = sld [smem:[#allocation2 + %s1072_s6]] }
 0x106   : >> { %1149 = vrot.lane.b32.xlu0 %v1147_v29, %s9492_s21  ;;  %v993_v54 = vld [vmem:[%s992_s18] sm:$0x1]  ;;  %s918_s14 = sadd.s32 %s6205_s27, %s917_s13  ;;  %s1235_s16 = sadd.s32 512, %s6248_s15 }
 0x107   : >> { %995 = vrot.lane.b32.xlu1 %v993_v54, %s9497_s4  ;;  %s910_s30 = scalar_lea.vmem %s5057_s8, %s909_s22  ;;  %s919_s3 = sld [smem:[#allocation2 + %s918_s14]] }
 0x108   : >> { %v911_v11 = vld [vmem:[%s910_s30] sm:$0x1]  ;;  %s1236_s7 = sadd.s32 %s6246_s9, %s1235_s16  ;;  %s1081_s11 = sadd.s32 640, %s6230_s25 }
 0x109   : >> { %s1156_s1 = scalar_lea.vmem %s5057_s8, %s1155_s20  ;;  %s1237_s29 = sld [smem:[#allocation2 + %s1236_s7]] }
 0x10a   : >> { %913 = vrot.lane.b32.xlu0 %v911_v11, %s9497_s4  ;;  %v1157_v13 = vld [vmem:[%s1156_s1] sm:$0x1]  ;;  %s1082_s21 = sadd.s32 %s6227_s17, %s1081_s11  ;;  %s999_s24 = sadd.s32 640, %s6239_s26 }
 0x10b   : >> { %1159 = vrot.lane.b32.xlu1 %v1157_v13, %s9497_s4  ;;  %s1074_s22 = scalar_lea.vmem %s5057_s8, %s1073_s19  ;;  %s1083_s10 = sld [smem:[#allocation2 + %s1082_s21]] }
 0x10c   : >> { %v1075_v5 = vld [vmem:[%s1074_s22] sm:$0x1]  ;;  %s1000_s6 = sadd.s32 %s6234_s2, %s999_s24  ;;  %s1245_s13 = sadd.s32 640, %s6248_s15 }
 0x10d   : >> { %s920_s20 = scalar_lea.vmem %s5057_s8, %s919_s3  ;;  %s1001_s18 = sld [smem:[#allocation2 + %s1000_s6]] }
 0x10e   : >> { %1077 = vrot.lane.b32.xlu0 %v1075_v5, %s9497_s4  ;;  %v921_v30 = vld [vmem:[%s920_s20] sm:$0x1]  ;;  %s1246_s14 = sadd.s32 %s6246_s9, %s1245_s13  ;;  %s1163_s16 = sadd.s32 640, %s6256_s5 }
 0x10f   : >> { %923 = vrot.lane.b32.xlu1 %v921_v30, %s9496_s12  ;;  %s1238_s19 = scalar_lea.vmem %s5057_s8, %s1237_s29  ;;  %s1247_s30 = sld [smem:[#allocation2 + %s1246_s14]] }
 0x110   : >> { %v1239_v45 = vld [vmem:[%s1238_s19] sm:$0x1]  ;;  %s1164_s7 = sadd.s32 %s6254_s28, %s1163_s16  ;;  %s1009_s11 = sadd.s32 768, %s6239_s26 }
 0x111   : >> { %s1084_s3 = scalar_lea.vmem %s5057_s8, %s1083_s10  ;;  %s1165_s1 = sld [smem:[#allocation2 + %s1164_s7]] }
 0x112   : >> { %1241 = vrot.lane.b32.xlu0 %v1239_v45, %s9497_s4  ;;  %v1085_v18 = vld [vmem:[%s1084_s3] sm:$0x1]  ;;  %s1010_s21 = sadd.s32 %s6234_s2, %s1009_s11  ;;  %s927_s24 = sadd.s32 768, %s6207_s23 }
 0x113   : >> { %1087 = vrot.lane.b32.xlu1 %v1085_v18, %s9496_s12  ;;  %s1002_s29 = scalar_lea.vmem %s5057_s8, %s1001_s18  ;;  %s1011_s22 = sld [smem:[#allocation2 + %s1010_s21]] }
 0x114   : >> { %v1003_v39 = vld [vmem:[%s1002_s29] sm:$0x1]  ;;  %s928_s6 = sadd.s32 %s6205_s27, %s927_s24  ;;  %s1173_s13 = sadd.s32 768, %s6256_s5 }
 0x115   : >> { %s1248_s10 = scalar_lea.vmem %s5057_s8, %s1247_s30  ;;  %s929_s20 = sld [smem:[#allocation2 + %s928_s6]] }
 0x116   : >> { %1005 = vrot.lane.b32.xlu0 %v1003_v39, %s9496_s12  ;;  %v1249_v29 = vld [vmem:[%s1248_s10] sm:$0x1]  ;;  %s1174_s4 = sadd.s32 %s6254_s28, %s1173_s13  ;;  %s1091_s14 = sadd.s32 768, %s6230_s25 }
 0x117   : >> { %1251 = vrot.lane.b32.xlu1 %v1249_v29, %s9496_s12  ;;  %s1166_s18 = scalar_lea.vmem %s5057_s8, %s1165_s1  ;;  %s1175_s16 = sld [smem:[#allocation2 + %s1174_s4]] }
 0x118   : >> { %v1167_v54 = vld [vmem:[%s1166_s18] sm:$0x1]  ;;  %s1092_s19 = sadd.s32 %s6227_s17, %s1091_s14  ;;  %s937_s7 = sadd.s32 896, %s6207_s23 }
 0x119   : >> { %s1012_s30 = scalar_lea.vmem %s5057_s8, %s1011_s22  ;;  %s1093_s11 = sld [smem:[#allocation2 + %s1092_s19]] }
 0x11a   : >> { %1169 = vrot.lane.b32.xlu0 %v1167_v54, %s9496_s12  ;;  %v1013_v11 = vld [vmem:[%s1012_s30] sm:$0x1]  ;;  %s938_s3 = sadd.s32 %s6205_s27, %s937_s7  ;;  %s1255_s21 = sadd.s32 768, %s6248_s15 }
 0x11b   : >> { %1015 = vrot.lane.b32.xlu1 %v1013_v11, %s9498_s0  ;;  %s930_s1 = scalar_lea.vmem %s5057_s8, %s929_s20  ;;  %s939_s24 = sld [smem:[#allocation2 + %s938_s3]] }
 0x11c   : >> { %v931_v13 = vld [vmem:[%s930_s1] sm:$0x1]  ;;  %s1256_s29 = sadd.s32 %s6246_s9, %s1255_s21  ;;  %s1101_s6 = sadd.s32 896, %s6230_s25  ;;  %v653_v18 = vpop.permute.xlu1 %652 }
 0x11d   : >> { %s1176_s22 = scalar_lea.vmem %s5057_s8, %s1175_s16  ;;  %s1257_s13 = sld [smem:[#allocation2 + %s1256_s29]]  ;;  %v631_v39 = vpop.permute.xlu0 %630 }
 0x11e   : >> { %933 = vrot.lane.b32.xlu0 %v931_v13, %s9498_s0  ;;  %v1177_v5 = vld [vmem:[%s1176_s22] sm:$0x1]  ;;  %s1102_s12 = sadd.s32 %s6227_s17, %s1101_s6  ;;  %s1019_s10 = sadd.s32 896, %s6239_s26 }
 0x11f   : >> { %1179 = vrot.lane.b32.xlu1 %v1177_v5, %s9498_s0  ;;  %s1094_s4 = scalar_lea.vmem %s5057_s8, %s1093_s11  ;;  %s1103_s20 = sld [smem:[#allocation2 + %s1102_s12]] }
 0x120   : >> { %v1095_v30 = vld [vmem:[%s1094_s4] sm:$0x1]  ;;  %s9500_s14 = sld [smem:[#allocation59_spill]]  ;;  %s9501_s18 = sld [smem:[#allocation60_spill]]  ;;  %v664_v11 = vpop.permute.xlu1 %663 }
 0x121   : >> { %s1020_s19 = sadd.s32 %s6234_s2, %s1019_s10  ;;  %s1265_s16 = sadd.s32 896, %s6248_s15  ;;  %v642_v13 = vpop.permute.xlu0 %641 }
 0x122   : >> { %s940_s7 = scalar_lea.vmem %s5057_s8, %s939_s24  ;;  %s1021_s30 = sld [smem:[#allocation2 + %s1020_s19]]  ;;  %1097 = vrot.lane.b32.xlu0 %v1095_v30, %s9498_s0 }
 0x123   : >> { %v941_v45 = vld [vmem:[%s940_s7] sm:$0x1]  ;;  %s9502_s3 = sld [smem:[#allocation61_spill]]  ;;  %s9503_s21 = sld [smem:[#allocation62_spill]] }
 0x124   : >> { %s1266_s1 = sadd.s32 %s6246_s9, %s1265_s16  ;;  %s1183_s29 = sadd.s32 896, %s6256_s5 }
 0x125   : >> { %s9504_s6 = smov 14   ;;  %s1258_s11 = scalar_lea.vmem %s5057_s8, %s1257_s13 }
 0x126   : >> { %943 = vrot.lane.b32.xlu1 %v941_v45, %s9504_s6  ;;  %s1267_s22 = sld [smem:[#allocation2 + %s1266_s1]]  ;;  %v1259_v29 = vld [vmem:[%s1258_s11] sm:$0x1]  ;;  %s1184_s24 = sadd.s32 %s6254_s28, %s1183_s29  ;;  %v686_v45 = vpop.permute.xlu1 %685 }
 0x127   : >> { %s9505_s12 = sld [smem:[#allocation63_spill]]  ;;  %s9506_s10 = sld [smem:[#allocation64_spill]]  ;;  %1261 = vrot.lane.b32.xlu0 %v1259_v29, %s9498_s0 }
 0x128   : >> { %s617_s4 = sadd.s32 %s9501_s18, %s9500_s14  ;;  %s1104_s19 = scalar_lea.vmem %s5057_s8, %s1103_s20 }
 0x129   : >> { %s1185_s7 = sld [smem:[#allocation2 + %s1184_s24]]  ;;  %v1105_v54 = vld [vmem:[%s1104_s19] sm:$0x1]  ;;  %s707_s13 = sadd.s32 %s9503_s21, %s9502_s3 }
 0x12a   : >> { %s618_s16 = sld [smem:[#allocation2 + %s617_s4]]  ;;  %1107 = vrot.lane.b32.xlu1 %v1105_v54, %s9504_s6  ;;  %s1022_s1 = scalar_lea.vmem %s5057_s8, %s1021_s30 }
 0x12b   : >> { %s708_s11 = sld [smem:[#allocation2 + %s707_s13]]  ;;  %v1023_v5 = vld [vmem:[%s1022_s1] sm:$0x1]  ;;  %s871_s20 = sadd.s32 %s6205_s27, %s6207_s23 }
 0x12c   : >> { %s1268_s14 = scalar_lea.vmem %s5057_s8, %s1267_s22  ;;  %1025 = vrot.lane.b32.xlu0 %v1023_v5, %s9504_s6  ;;  %s6386_s18 = sld [smem:[#allocation2 + %s871_s20]]  ;;  %v675_v5 = vpop.permute.xlu0 %674 }
 0x12d   : >> { %s789_s29 = sadd.s32 %s9506_s10, %s9505_s12  ;;  %v1269_v30 = vld [vmem:[%s1268_s14] sm:$0x1]  ;;  %s1035_s3 = sadd.s32 %s6227_s17, %s6230_s25 }
 0x12e   : >> { %s6383_s0 = sld [smem:[#allocation2 + %s789_s29]]  ;;  %1271 = vrot.lane.b32.xlu1 %v1269_v30, %s9504_s6  ;;  %s953_s23 = sadd.s32 %s6234_s2, %s6239_s26 }
 0x12f   : >> { %s9507_s30 = sld [smem:[#allocation58_spill]]  ;;  %s1186_s21 = scalar_lea.vmem %s5057_s8, %s1185_s7 }
 0x130   : >> { %s6392_s12 = sld [smem:[#allocation2 + %s1035_s3]]  ;;  %v1187_v29 = vld [vmem:[%s1186_s21] sm:$0x1]  ;;  %s619_s27 = scalar_lea.vmem %s5057_s8, %s618_s16 }
 0x131   : >> { %v620_v54 = vld [vmem:[%s619_s27] sm:$0x1]  ;;  %s709_s17 = scalar_lea.vmem %s5057_s8, %s708_s11  ;;  %s6398_s25 = sld [smem:[#allocation2 + %s953_s23]]  ;;  %1189 = vrot.lane.b32.xlu0 %v1187_v29, %s9504_s6 }
 0x132   : >> { %v710_v30 = vld [vmem:[%s709_s17] sm:$0x1]  ;;  %s1199_s2 = sadd.s32 %s6246_s9, %s6248_s15  ;;  %s1117_s26 = sadd.s32 %s6254_s28, %s6256_s5 }
 0x133   : >> { %s1200_s10 = sld [smem:[#allocation2 + %s1199_s2]]  ;;  %s873_s9 = scalar_lea.vmem %s5057_s8, %s6386_s18 }
 0x134   : >> { %s791_s6 = scalar_lea.vmem %s5057_s8, %s6383_s0  ;;  %s1118_s15 = sld [smem:[#allocation2 + %s1117_s26]] }
 0x135   : >> { %s6402_s22 = scalar_lea.vmem [#allocation4], %s9507_s30  ;;  %v792_v29 = vld [vmem:[%s791_s6] sm:$0x1]  ;;  %s9508_s19 = sld [smem:[#allocation57_spill]] }
 0x136   : >> { %623 = vst.msk [vmem:[%s6402_s22] sm:$0x1] %vm622_vm0, %v620_v54  ;;  %4694 = vst.msk [vmem:[%s6402_s22 + $0x1] sm:$0x1] %vm622_vm0, %v710_v30  ;;  %v874_v54 = vld [vmem:[%s873_s9] sm:$0x1]  ;;  %s1037_s28 = scalar_lea.vmem %s5057_s8, %s6392_s12 }
 0x137   : >> { %634 = vst.msk [vmem:[%s6402_s22] sm:$0x1] %vm633_vm1, %v631_v39  ;;  %v720_v39 = vpop.permute.xlu1 %719  ;;  %s955_s5 = scalar_lea.vmem %s5057_s8, %s6398_s25 }
 0x138   : >> { %645 = vst.msk [vmem:[%s6402_s22] sm:$0x1] %vm644_vm2, %v642_v13  ;;  %v1038_v13 = vld [vmem:[%s1037_s28] sm:$0x1] }
 0x139   : >> { %656 = vst.msk [vmem:[%s6402_s22] sm:$0x1] %vm655_vm3, %v653_v18  ;;  %v697_v18 = vpop.permute.xlu0 %696  ;;  %s1201_s24 = scalar_lea.vmem %s5057_s8, %s1200_s10 }
 0x13a   : >> { %4704 = vst.msk [vmem:[%s6402_s22 + $0x2] sm:$0x1] %vm622_vm0, %v792_v29  ;;  %4714 = vst.msk [vmem:[%s6402_s22 + $0x3] sm:$0x1] %vm622_vm0, %v874_v54  ;;  %s1119_s4 = scalar_lea.vmem %s5057_s8, %s1118_s15 }
 0x13b   : >> { %667 = vst.msk [vmem:[%s6402_s22] sm:$0x1] %vm666_vm4, %v664_v11  ;;  %v956_v11 = vld [vmem:[%s955_s5] sm:$0x1]  ;;  %v740_v30 = vpop.permute.xlu1 %739  ;;  %s610_s10 = sadd.s32 1, %s9508_s19  }
 0x13c   : >> { %4695 = vst.msk [vmem:[%s6402_s22 + $0x1] sm:$0x1] %vm633_vm1, %v720_v39  ;;  %v1120_v39 = vld [vmem:[%s1119_s4] sm:$0x1]  ;;  %p607_p3 = scmp.ge.s32.totalorder %s610_s10, 64  }
 0x13d   : >> { %678 = vst.msk [vmem:[%s6402_s22] sm:$0x1] %vm677_vm5, %v675_v5  ;;  %v1202_v5 = vld [vmem:[%s1201_s24] sm:$0x1]  ;;  %v730_v29 = vpop.permute.xlu0 %729  ;;  %s4984_s8 = smov (%p607_p3), 126   ;;  %s4986_s7 = smov (%p607_p3), 124  }
 0x13e   : >> { %4734 = vst.msk [vmem:[%s6402_s22 + $0x5] sm:$0x1] %vm622_vm0, %v1038_v13  ;;  %4724 = vst.msk [vmem:[%s6402_s22 + $0x4] sm:$0x1] %vm622_vm0, %v956_v11  ;;  %s4987_s16 = smov (%p607_p3), 120   ;;  %s10420_s13 = sld [smem:[#allocation18_spill]] (%p607_p3) }
 0x13f   : >> { %689 = vst.msk [vmem:[%s6402_s22] sm:$0x1] %vm688_vm6, %v686_v45  ;;  %v760_v45 = vpop.permute.xlu1 %759  ;;  %vm4411_vm8 = vcmask (%p607_p3), 15360  }
 0x140   : >> { %700 = vst.msk [vmem:[%s6402_s22] sm:$0x1] %vm699_vm7, %v697_v18 }
 0x141   : >> { %4754 = vst.msk [vmem:[%s6402_s22 + $0x7] sm:$0x1] %vm622_vm0, %v1202_v5  ;;  %4744 = vst.msk [vmem:[%s6402_s22 + $0x6] sm:$0x1] %vm622_vm0, %v1120_v39  ;;  %v750_v54 = vpop.permute.xlu0 %749 }
 0x142   : >> { %4696 = vst.msk [vmem:[%s6402_s22 + $0x1] sm:$0x1] %vm644_vm2, %v730_v29 }
 0x143   : >> { %4697 = vst.msk [vmem:[%s6402_s22 + $0x1] sm:$0x1] %vm655_vm3, %v740_v30  ;;  %v780_v13 = vpop.permute.xlu1 %779 }
 0x144   : >> { %4698 = vst.msk [vmem:[%s6402_s22 + $0x1] sm:$0x1] %vm666_vm4, %v750_v54 }
 0x145   : >> { %4699 = vst.msk [vmem:[%s6402_s22 + $0x1] sm:$0x1] %vm677_vm5, %v760_v45  ;;  %v770_v18 = vpop.permute.xlu0 %769 }
 0x146   : >> { %4700 = vst.msk [vmem:[%s6402_s22 + $0x1] sm:$0x1] %vm688_vm6, %v770_v18 }
 0x147   : >> { %4701 = vst.msk [vmem:[%s6402_s22 + $0x1] sm:$0x1] %vm699_vm7, %v780_v13  ;;  %v812_v11 = vpop.permute.xlu1 %811 }
 0x149   : >> { %v802_v5 = vpop.permute.xlu0 %801 }
 0x14a   : >> { %4705 = vst.msk [vmem:[%s6402_s22 + $0x2] sm:$0x1] %vm633_vm1, %v802_v5 }
 0x14b   : >> { %4706 = vst.msk [vmem:[%s6402_s22 + $0x2] sm:$0x1] %vm644_vm2, %v812_v11  ;;  %v832_v30 = vpop.permute.xlu1 %831 }
 0x14d   : >> { %v822_v29 = vpop.permute.xlu0 %821 }
 0x14e   : >> { %4707 = vst.msk [vmem:[%s6402_s22 + $0x2] sm:$0x1] %vm655_vm3, %v822_v29 }
 0x14f   : >> { %4708 = vst.msk [vmem:[%s6402_s22 + $0x2] sm:$0x1] %vm666_vm4, %v832_v30  ;;  %v852_v39 = vpop.permute.xlu1 %851 }
 0x151   : >> { %v842_v45 = vpop.permute.xlu0 %841 }
 0x152   : >> { %4709 = vst.msk [vmem:[%s6402_s22 + $0x2] sm:$0x1] %vm677_vm5, %v842_v45 }
 0x153   : >> { %4710 = vst.msk [vmem:[%s6402_s22 + $0x2] sm:$0x1] %vm688_vm6, %v852_v39  ;;  %v884_v54 = vpop.permute.xlu1 %883 }
 0x154   : >> { %4715 = vst.msk [vmem:[%s6402_s22 + $0x3] sm:$0x1] %vm633_vm1, %v884_v54 }
 0x155   : >> { %v862_v13 = vpop.permute.xlu0 %861 }
 0x156   : >> { %4711 = vst.msk [vmem:[%s6402_s22 + $0x2] sm:$0x1] %vm699_vm7, %v862_v13 }
 0x157   : >> { %v904_v18 = vpop.permute.xlu1 %903 }
 0x159   : >> { %v894_v11 = vpop.permute.xlu0 %893 }
 0x15a   : >> { %4716 = vst.msk [vmem:[%s6402_s22 + $0x3] sm:$0x1] %vm644_vm2, %v894_v11 }
 0x15b   : >> { %4717 = vst.msk [vmem:[%s6402_s22 + $0x3] sm:$0x1] %vm655_vm3, %v904_v18 }
 0x15e   : >> { %v1048_v5 = vpop.permute.xlu1 %1047 }
 0x15f   : >> { %4735 = vst.msk [vmem:[%s6402_s22 + $0x5] sm:$0x1] %vm633_vm1, %v1048_v5 }
 0x160   : >> { %v966_v30 = vpop.permute.xlu0 %965 }
 0x161   : >> { %4725 = vst.msk [vmem:[%s6402_s22 + $0x4] sm:$0x1] %vm633_vm1, %v966_v30 }
 0x164   : >> { %v1212_v29 = vpop.permute.xlu1 %1211 }
 0x165   : >> { %4755 = vst.msk [vmem:[%s6402_s22 + $0x7] sm:$0x1] %vm633_vm1, %v1212_v29 }
 0x168   : >> { %v1130_v39 = vpop.permute.xlu0 %1129 }
 0x169   : >> { %4745 = vst.msk [vmem:[%s6402_s22 + $0x6] sm:$0x1] %vm633_vm1, %v1130_v39  ;;  %v1058_v45 = vpop.permute.xlu1 %1057 }
 0x16a   : >> { %4736 = vst.msk [vmem:[%s6402_s22 + $0x5] sm:$0x1] %vm644_vm2, %v1058_v45 }
 0x16c   : >> { %v976_v54 = vpop.permute.xlu0 %975 }
 0x16d   : >> { %4726 = vst.msk [vmem:[%s6402_s22 + $0x4] sm:$0x1] %vm644_vm2, %v976_v54  ;;  %v1222_v13 = vpop.permute.xlu1 %1221 }
 0x16e   : >> { %4756 = vst.msk [vmem:[%s6402_s22 + $0x7] sm:$0x1] %vm644_vm2, %v1222_v13 }
 0x170   : >> { %v1140_v18 = vpop.permute.xlu0 %1139 }
 0x171   : >> { %4746 = vst.msk [vmem:[%s6402_s22 + $0x6] sm:$0x1] %vm644_vm2, %v1140_v18  ;;  %v1068_v11 = vpop.permute.xlu1 %1067 }
 0x172   : >> { %4737 = vst.msk [vmem:[%s6402_s22 + $0x5] sm:$0x1] %vm655_vm3, %v1068_v11 }
 0x174   : >> { %v986_v5 = vpop.permute.xlu0 %985 }
 0x175   : >> { %4727 = vst.msk [vmem:[%s6402_s22 + $0x4] sm:$0x1] %vm655_vm3, %v986_v5  ;;  %v1232_v30 = vpop.permute.xlu1 %1231 }
 0x176   : >> { %4757 = vst.msk [vmem:[%s6402_s22 + $0x7] sm:$0x1] %vm655_vm3, %v1232_v30 }
 0x178   : >> { %v1150_v29 = vpop.permute.xlu0 %1149 }
 0x179   : >> { %4747 = vst.msk [vmem:[%s6402_s22 + $0x6] sm:$0x1] %vm655_vm3, %v1150_v29  ;;  %v996_v39 = vpop.permute.xlu1 %995 }
 0x17a   : >> { %4728 = vst.msk [vmem:[%s6402_s22 + $0x4] sm:$0x1] %vm666_vm4, %v996_v39 }
 0x17c   : >> { %v914_v45 = vpop.permute.xlu0 %913 }
 0x17d   : >> { %4718 = vst.msk [vmem:[%s6402_s22 + $0x3] sm:$0x1] %vm666_vm4, %v914_v45  ;;  %v1160_v54 = vpop.permute.xlu1 %1159 }
 0x17e   : >> { %4748 = vst.msk [vmem:[%s6402_s22 + $0x6] sm:$0x1] %vm666_vm4, %v1160_v54 }
 0x180   : >> { %v1078_v13 = vpop.permute.xlu0 %1077 }
 0x181   : >> { %4738 = vst.msk [vmem:[%s6402_s22 + $0x5] sm:$0x1] %vm666_vm4, %v1078_v13  ;;  %v924_v18 = vpop.permute.xlu1 %923 }
 0x182   : >> { %4719 = vst.msk [vmem:[%s6402_s22 + $0x3] sm:$0x1] %vm677_vm5, %v924_v18 }
 0x184   : >> { %v1242_v11 = vpop.permute.xlu0 %1241 }
 0x185   : >> { %4758 = vst.msk [vmem:[%s6402_s22 + $0x7] sm:$0x1] %vm666_vm4, %v1242_v11  ;;  %v1088_v5 = vpop.permute.xlu1 %1087 }
 0x186   : >> { %4739 = vst.msk [vmem:[%s6402_s22 + $0x5] sm:$0x1] %vm677_vm5, %v1088_v5 }
 0x188   : >> { %v1006_v30 = vpop.permute.xlu0 %1005 }
 0x189   : >> { %4729 = vst.msk [vmem:[%s6402_s22 + $0x4] sm:$0x1] %vm677_vm5, %v1006_v30  ;;  %v1252_v29 = vpop.permute.xlu1 %1251 }
 0x18a   : >> { %4759 = vst.msk [vmem:[%s6402_s22 + $0x7] sm:$0x1] %vm677_vm5, %v1252_v29 }
 0x18c   : >> { %v1170_v39 = vpop.permute.xlu0 %1169 }
 0x18d   : >> { %4749 = vst.msk [vmem:[%s6402_s22 + $0x6] sm:$0x1] %vm677_vm5, %v1170_v39  ;;  %v1016_v45 = vpop.permute.xlu1 %1015 }
 0x18e   : >> { %4730 = vst.msk [vmem:[%s6402_s22 + $0x4] sm:$0x1] %vm688_vm6, %v1016_v45 }
 0x190   : >> { %v934_v54 = vpop.permute.xlu0 %933 }
 0x191   : >> { %4720 = vst.msk [vmem:[%s6402_s22 + $0x3] sm:$0x1] %vm688_vm6, %v934_v54  ;;  %v1180_v13 = vpop.permute.xlu1 %1179  ;;  %v6550_v54 = vsub.f32 (%p607_p3), 1.0, %v5799_v40 }
 0x192   : >> { %4750 = vst.msk [vmem:[%s6402_s22 + $0x6] sm:$0x1] %vm688_vm6, %v1180_v13  ;;  %v6553_v13 = vsub.f32 (%p607_p3), 1.0, %v5789_v9 }
 0x193   : > { %9509 = vst [vmem:[#allocation65_spill] sm:$0xff] (%p607_p3), %v6550_v54 }
 0x194   : >> { %v1098_v18 = vpop.permute.xlu0 %1097  ;;  %9510 = vst [vmem:[#allocation66_spill] sm:$0xff] (%p607_p3), %v6553_v13 }
 0x195   : >> { %4740 = vst.msk [vmem:[%s6402_s22 + $0x5] sm:$0x1] %vm688_vm6, %v1098_v18  ;;  %v4982_v18 = vmov (%p607_p3), 0  }
 0x196   : > { %4830 = vset.pattern.permute.xlu1 (%p607_p3), %v4982_v18  ;;  %4829 = vset.pattern.permute.xlu0 (%p607_p3), %v4982_v18  ;;  %v6582_v18 = vsub.f32 (%p607_p3), 1.0, %v5834_v52 }
 0x197   : > { %1415 = vperm.xlu1 (%p607_p3), %4830, %v6550_v54   ;;  %1405 = vperm.xlu0 (%p607_p3), %4829, %v6553_v13  }
 0x198   : >> { %v944_v11 = vpop.permute.xlu1 %943  ;;  %9517 = vst [vmem:[#allocation73_spill] sm:$0xff] (%p607_p3), %v6582_v18 }
 0x199   : >> { %4721 = vst.msk [vmem:[%s6402_s22 + $0x3] sm:$0x1] %vm699_vm7, %v944_v11  ;;  %v1262_v5 = vpop.permute.xlu0 %1261  ;;  %v6558_v11 = vsub.f32 (%p607_p3), 1.0, %v5804_v20 }
 0x19a   : >> { %4760 = vst.msk [vmem:[%s6402_s22 + $0x7] sm:$0x1] %vm688_vm6, %v1262_v5  ;;  %v6561_v5 = vsub.f32 (%p607_p3), 1.0, %v5794_v35 }
 0x19b   : > { %9511 = vst [vmem:[#allocation67_spill] sm:$0xff] (%p607_p3), %v6558_v11  ;;  %1420 = vperm.xlu1 (%p607_p3), %4830, %v6558_v11   ;;  %v6585_v11 = vsub.f32 (%p607_p3), 1.0, %v5829_v51 }
 0x19c   : >> { %v1108_v30 = vpop.permute.xlu1 %1107  ;;  %9512 = vst [vmem:[#allocation68_spill] sm:$0xff] (%p607_p3), %v6561_v5  ;;  %1410 = vperm.xlu0 (%p607_p3), %4829, %v6561_v5  }
 0x19d   : >> { %4741 = vst.msk [vmem:[%s6402_s22 + $0x5] sm:$0x1] %vm699_vm7, %v1108_v30  ;;  %v6566_v30 = vsub.f32 (%p607_p3), 1.0, %v5814_v59  ;;  %9518 = vst [vmem:[#allocation74_spill] sm:$0xff] (%p607_p3), %v6585_v11 }
 0x19e   : >> { %v1026_v29 = vpop.permute.xlu0 %1025  ;;  %609 = sbr.rel (!%p607_p3) target bundleno = 156 (0x9c), region = 145 }
 0x19f   : >> { %4731 = vst.msk [vmem:[%s6402_s22 + $0x4] sm:$0x1] %vm699_vm7, %v1026_v29  ;;  %9513 = vst [vmem:[#allocation69_spill] sm:$0xff] (%p607_p3), %v6566_v30  ;;  %v6569_v29 = vsub.f32 (%p607_p3), 1.0, %v5809_v31  ;;  %1430 = vperm.xlu1 (%p607_p3), %4830, %v6566_v30   ;;  %v6590_v30 = vsub.f32 (%p607_p3), 1.0, %v5844_v63 }
 0x1a0   : >> { %v1272_v39 = vpop.permute.xlu1 %1271 }
 0x1a1   : >> { %4761 = vst.msk [vmem:[%s6402_s22 + $0x7] sm:$0x1] %vm699_vm7, %v1272_v39  ;;  %9514 = vst [vmem:[#allocation70_spill] sm:$0xff] (%p607_p3), %v6569_v29  ;;  %1425 = vperm.xlu0 (%p607_p3), %4829, %v6569_v29   ;;  %v6574_v39 = vsub.f32 (%p607_p3), 1.0, %v5824_v47  ;;  %v6593_v29 = vsub.f32 (%p607_p3), 1.0, %v5839_v53 }
 0x1a2   : > { %9519 = vst [vmem:[#allocation75_spill] sm:$0xff] (%p607_p3), %v6590_v30 }
 0x1a3   : >> { %v1190_v45 = vpop.permute.xlu0 %1189  ;;  %9515 = vst [vmem:[#allocation71_spill] sm:$0xff] (%p607_p3), %v6574_v39  ;;  %1440 = vperm.xlu1 (%p607_p3), %4830, %v6574_v39   ;;  %9520 = vst [vmem:[#allocation76_spill] sm:$0xff] (%p607_p3), %v6593_v29  ;;  %v6598_v39 = vsub.f32 (%p607_p3), 1.0, %v5854_v46 }
 0x1a4   : >> { %4751 = vst.msk [vmem:[%s6402_s22 + $0x6] sm:$0x1] %vm699_vm7, %v1190_v45  ;;  %v6577_v45 = vsub.f32 (%p607_p3), 1.0, %v5819_v19 }
 0x1a5   : > { %9521 = vst [vmem:[#allocation77_spill] sm:$0xff] %v6598_v39 }
 0x1a6   : > { %9516 = vst [vmem:[#allocation72_spill] sm:$0xff] %v6577_v45  ;;  %1435 = vperm.xlu0 %4829, %v6577_v45   ;;  %v6601_v45 = vsub.f32 1.0, %v5849_v0 }
 0x1a7   : > { %1450 = vperm.xlu1 %4830, %v6582_v18   ;;  %v6606_v18 = vsub.f32 1.0, %v5864_v58 }
 0x1a8   : > { %9522 = vst [vmem:[#allocation78_spill] sm:$0xff] %v6601_v45 }
 0x1a9   : > { %9523 = vst [vmem:[#allocation79_spill] sm:$0xff] %v6606_v18 }
 0x1aa   : > { %1445 = vperm.xlu0 %4829, %v6585_v11   ;;  %v6609_v11 = vsub.f32 1.0, %v5859_v57 }
 0x1ab   : > { %1460 = vperm.xlu1 %4830, %v6590_v30   ;;  %v6614_v30 = vsub.f32 1.0, %v5874_v1 }
 0x1ac   : > { %9524 = vst [vmem:[#allocation80_spill] sm:$0xff] %v6609_v11 }
 0x1ad   : > { %9525 = vst [vmem:[#allocation81_spill] sm:$0xff] %v6614_v30 }
 0x1ae   : > { %1455 = vperm.xlu0 %4829, %v6593_v29   ;;  %v9526_v29 = vld [vmem:[#allocation27_spill] sm:$0xff] }
 0x1af   : > { %1470 = vperm.xlu1 %4830, %v6598_v39   ;;  %v6617_v54 = vsub.f32 1.0, %v9526_v29  ;;  %v6622_v39 = vsub.f32 1.0, %v5884_v7 }
 0x1b1   : > { %9527 = vst [vmem:[#allocation27_spill] sm:$0xff] %v6617_v54  ;;  %9528 = vst [vmem:[#allocation82_spill] sm:$0xff] %v6622_v39 }
 0x1b2   : > { %1465 = vperm.xlu0 %4829, %v6601_v45   ;;  %v9529_v45 = vld [vmem:[#allocation28_spill] sm:$0xff] }
 0x1b3   : > { %1480 = vperm.xlu1 %4830, %v6606_v18   ;;  %v6625_v13 = vsub.f32 1.0, %v9529_v45  ;;  %v6630_v18 = vsub.f32 1.0, %v5894_v12 }
 0x1b5   : > { %9530 = vst [vmem:[#allocation28_spill] sm:$0xff] %v6625_v13  ;;  %9531 = vst [vmem:[#allocation83_spill] sm:$0xff] %v6630_v18 }
 0x1b6   : > { %1475 = vperm.xlu0 %4829, %v6609_v11   ;;  %v9532_v11 = vld [vmem:[#allocation29_spill] sm:$0xff] }
 0x1b7   : > { %1490 = vperm.xlu1 %4830, %v6614_v30   ;;  %v6633_v5 = vsub.f32 1.0, %v9532_v11  ;;  %v6638_v30 = vsub.f32 1.0, %v5904_v17 }
 0x1b9   : > { %9533 = vst [vmem:[#allocation29_spill] sm:$0xff] %v6633_v5  ;;  %9534 = vst [vmem:[#allocation84_spill] sm:$0xff] %v6638_v30 }
 0x1ba   : > { %1485 = vperm.xlu0 %4829, %v6617_v54   ;;  %v6641_v54 = vsub.f32 1.0, %v5899_v16 }
 0x1bb   : > { %1500 = vperm.xlu1 %4830, %v6622_v39   ;;  %v6646_v39 = vsub.f32 1.0, %v5914_v10 }
 0x1bc   : > { %9535 = vst [vmem:[#allocation85_spill] sm:$0xff] %v6641_v54 }
 0x1bd   : > { %9536 = vst [vmem:[#allocation86_spill] sm:$0xff] %v6646_v39 }
 0x1be   : > { %1495 = vperm.xlu0 %4829, %v6625_v13   ;;  %v6649_v13 = vsub.f32 1.0, %v5909_v21 }
 0x1bf   : > { %1510 = vperm.xlu1 %4830, %v6630_v18   ;;  %v6654_v18 = vsub.f32 1.0, %v5924_v6 }
 0x1c0   : > { %9537 = vst [vmem:[#allocation87_spill] sm:$0xff] %v6649_v13 }
 0x1c1   : > { %9538 = vst [vmem:[#allocation88_spill] sm:$0xff] %v6654_v18 }
 0x1c2   : > { %1505 = vperm.xlu0 %4829, %v6633_v5   ;;  %v6657_v5 = vsub.f32 1.0, %v5919_v41 }
 0x1c3   : > { %1520 = vperm.xlu1 %4830, %v6638_v30   ;;  %v6662_v30 = vsub.f32 1.0, %v5934_v32 }
 0x1c4   : > { %9539 = vst [vmem:[#allocation89_spill] sm:$0xff] %v6657_v5 }
 0x1c5   : > { %9540 = vst [vmem:[#allocation90_spill] sm:$0xff] %v6662_v30 }
 0x1c6   : > { %1515 = vperm.xlu0 %4829, %v6641_v54   ;;  %v6665_v54 = vsub.f32 1.0, %v5929_v28 }
 0x1c7   : > { %1530 = vperm.xlu1 %4830, %v6646_v39   ;;  %v6670_v39 = vsub.f32 1.0, %v5944_v37 }
 0x1c8   : > { %9541 = vst [vmem:[#allocation91_spill] sm:$0xff] %v6665_v54 }
 0x1c9   : > { %9542 = vst [vmem:[#allocation92_spill] sm:$0xff] %v6670_v39 }
 0x1ca   : > { %1525 = vperm.xlu0 %4829, %v6649_v13   ;;  %v6673_v13 = vsub.f32 1.0, %v5939_v8 }
 0x1cb   : > { %1540 = vperm.xlu1 %4830, %v6654_v18   ;;  %v6678_v18 = vsub.f32 1.0, %v5954_v42 }
 0x1cc   : > { %9543 = vst [vmem:[#allocation93_spill] sm:$0xff] %v6673_v13 }
 0x1cd   : > { %9544 = vst [vmem:[#allocation94_spill] sm:$0xff] %v6678_v18 }
 0x1ce   : > { %1535 = vperm.xlu0 %4829, %v6657_v5   ;;  %v6681_v5 = vsub.f32 1.0, %v5949_v38 }
 0x1cf   : > { %1550 = vperm.xlu1 %4830, %v6662_v30   ;;  %v6686_v30 = vsub.f32 1.0, %v5964_v14 }
 0x1d0   : > { %9545 = vst [vmem:[#allocation95_spill] sm:$0xff] %v6681_v5 }
 0x1d1   : > { %9546 = vst [vmem:[#allocation96_spill] sm:$0xff] %v6686_v30 }
 0x1d2   : > { %1545 = vperm.xlu0 %4829, %v6665_v54   ;;  %v9547_v54 = vld [vmem:[#allocation38_spill] sm:$0xff] }
 0x1d3   : > { %1560 = vperm.xlu1 %4830, %v6670_v39   ;;  %v6689_v8 = vsub.f32 1.0, %v9547_v54  ;;  %v6694_v39 = vsub.f32 1.0, %v5974_v26 }
 0x1d5   : > { %9548 = vst [vmem:[#allocation97_spill] sm:$0xff] %v6689_v8  ;;  %9549 = vst [vmem:[#allocation98_spill] sm:$0xff] %v6694_v39 }
 0x1d6   : > { %1555 = vperm.xlu0 %4829, %v6673_v13   ;;  %v6697_v13 = vsub.f32 1.0, %v5969_v22 }
 0x1d7   : > { %1570 = vperm.xlu1 %4830, %v6678_v18   ;;  %v6702_v18 = vsub.f32 1.0, %v5984_v55  ;;  %v9557_v55 = vld [vmem:[#allocation40_spill] sm:$0xff] }
 0x1d8   : > { %9550 = vst [vmem:[#allocation99_spill] sm:$0xff] %v6697_v13 }
 0x1d9   : > { %9551 = vst [vmem:[#allocation100_spill] sm:$0xff] %v6702_v18 }
 0x1da   : > { %1565 = vperm.xlu0 %4829, %v6681_v5   ;;  %v6705_v5 = vsub.f32 1.0, %v5979_v27  ;;  %v6721_v27 = vsub.f32 1.0, %v9557_v55 }
 0x1db   : > { %1580 = vperm.xlu1 %4830, %v6686_v30   ;;  %v6710_v30 = vsub.f32 1.0, %v5994_v36  ;;  %v9561_v36 = vld [vmem:[#allocation42_spill] sm:$0xff] }
 0x1dc   : > { %9552 = vst [vmem:[#allocation101_spill] sm:$0xff] %v6705_v5  ;;  %9558 = vst [vmem:[#allocation105_spill] sm:$0xff] %v6721_v27 }
 0x1dd   : > { %9553 = vst [vmem:[#allocation102_spill] sm:$0xff] %v6710_v30 }
 0x1de   : > { %1575 = vperm.xlu0 %4829, %v6689_v8   ;;  %v6713_v8 = vsub.f32 1.0, %v5989_v60  ;;  %v6729_v60 = vsub.f32 1.0, %v9561_v36 }
 0x1df   : > { %1590 = vperm.xlu1 %4830, %v6694_v39   ;;  %v9555_v39 = vld [vmem:[#allocation41_spill] sm:$0xff] }
 0x1e0   : > { %9554 = vst [vmem:[#allocation103_spill] sm:$0xff] %v6713_v8  ;;  %9562 = vst [vmem:[#allocation42_spill] sm:$0xff] %v6729_v60 }
 0x1e2   : > { %1585 = vperm.xlu0 %4829, %v6697_v13   ;;  %v6718_v13 = vsub.f32 1.0, %v9555_v39 }
 0x1e3   : > { %1600 = vperm.xlu1 %4830, %v6702_v18   ;;  %v9559_v18 = vld [vmem:[#allocation43_spill] sm:$0xff] }
 0x1e4   : > { %9556 = vst [vmem:[#allocation104_spill] sm:$0xff] %v6718_v13 }
 0x1e6   : > { %1595 = vperm.xlu0 %4829, %v6705_v5   ;;  %v6726_v5 = vsub.f32 1.0, %v9559_v18 }
 0x1e7   : > { %1610 = vperm.xlu1 %4830, %v6710_v30   ;;  %v6734_v30 = vsub.f32 1.0, %v6024_v48 }
 0x1e8   : > { %9560 = vst [vmem:[#allocation106_spill] sm:$0xff] %v6726_v5 }
 0x1e9   : > { %9563 = vst [vmem:[#allocation107_spill] sm:$0xff] %v6734_v30 }
 0x1ea   : > { %1605 = vperm.xlu0 %4829, %v6713_v8   ;;  %v9564_v8 = vld [vmem:[#allocation44_spill] sm:$0xff] }
 0x1eb   : > { %1620 = vperm.xlu1 %4830, %v6718_v13   ;;  %v6737_v55 = vsub.f32 1.0, %v9564_v8  ;;  %v6742_v13 = vsub.f32 1.0, %v6034_v50 }
 0x1ed   : > { %9565 = vst [vmem:[#allocation108_spill] sm:$0xff] %v6737_v55  ;;  %9566 = vst [vmem:[#allocation109_spill] sm:$0xff] %v6742_v13 }
 0x1ee   : > { %1615 = vperm.xlu0 %4829, %v6721_v27   ;;  %v6745_v27 = vsub.f32 1.0, %v6029_v49 }
 0x1ef   : > { %1630 = vperm.xlu1 %4830, %v6726_v5   ;;  %v6750_v5 = vsub.f32 1.0, %v6044_v62 }
 0x1f0   : > { %9567 = vst [vmem:[#allocation110_spill] sm:$0xff] %v6745_v27 }
 0x1f1   : > { %9568 = vst [vmem:[#allocation111_spill] sm:$0xff] %v6750_v5 }
 0x1f2   : > { %1625 = vperm.xlu0 %4829, %v6729_v60   ;;  %v6753_v60 = vsub.f32 1.0, %v6039_v25 }
 0x1f3   : > { %1640 = vperm.xlu1 %4830, %v6734_v30   ;;  %v6758_v30 = vsub.f32 1.0, %v6054_v43 }
 0x1f4   : > { %9569 = vst [vmem:[#allocation112_spill] sm:$0xff] %v6753_v60 }
 0x1f5   : > { %9570 = vst [vmem:[#allocation113_spill] sm:$0xff] %v6758_v30 }
 0x1f6   : > { %1635 = vperm.xlu0 %4829, %v6737_v55   ;;  %v6761_v55 = vsub.f32 1.0, %v6049_v2 }
 0x1f7   : > { %1650 = vperm.xlu1 %4830, %v6742_v13   ;;  %v6766_v13 = vsub.f32 1.0, %v6064_v44 }
 0x1f8   : > { %9571 = vst [vmem:[#allocation114_spill] sm:$0xff] %v6761_v55 }
 0x1f9   : > { %9572 = vst [vmem:[#allocation115_spill] sm:$0xff] %v6766_v13 }
 0x1fa   : > { %1645 = vperm.xlu0 %4829, %v6745_v27   ;;  %v6769_v27 = vsub.f32 1.0, %v6059_v56 }
 0x1fb   : > { %1660 = vperm.xlu1 %4830, %v6750_v5   ;;  %v6774_v5 = vsub.f32 1.0, %v6074_v23 }
 0x1fc   : > { %9573 = vst [vmem:[#allocation116_spill] sm:$0xff] %v6769_v27 }
 0x1fd   : > { %9574 = vst [vmem:[#allocation117_spill] sm:$0xff] %v6774_v5 }
 0x1fe   : > { %1655 = vperm.xlu0 %4829, %v6753_v60   ;;  %v6777_v60 = vsub.f32 1.0, %v6069_v15 }
 0x1ff   : > { %1670 = vperm.xlu1 %4830, %v6758_v30   ;;  %v6782_v30 = vsub.f32 1.0, %v6084_v4 }
 0x200   : > { %9575 = vst [vmem:[#allocation118_spill] sm:$0xff] %v6777_v60 }
 0x201   : > { %9576 = vst [vmem:[#allocation119_spill] sm:$0xff] %v6782_v30 }
 0x202   : > { %1665 = vperm.xlu0 %4829, %v6761_v55   ;;  %v6785_v55 = vsub.f32 1.0, %v6079_v24 }
 0x203   : > { %1680 = vperm.xlu1 %4830, %v6766_v13   ;;  %v6790_v13 = vsub.f32 1.0, %v6094_v34 }
 0x204   : > { %9577 = vst [vmem:[#allocation120_spill] sm:$0xff] %v6785_v55 }
 0x205   : > { %9578 = vst [vmem:[#allocation121_spill] sm:$0xff] %v6790_v13 }
 0x206   : > { %1675 = vperm.xlu0 %4829, %v6769_v27   ;;  %v6793_v27 = vsub.f32 1.0, %v6089_v33 }
 0x207   : > { %1690 = vperm.xlu1 %4830, %v6774_v5   ;;  %v6798_v5 = vsub.f32 1.0, %v6104_v61 }
 0x208   : > { %9579 = vst [vmem:[#allocation122_spill] sm:$0xff] %v6793_v27 }
 0x209   : > { %9580 = vst [vmem:[#allocation123_spill] sm:$0xff] %v6798_v5 }
 0x20a   : > { %1685 = vperm.xlu0 %4829, %v6777_v60   ;;  %v6801_v60 = vsub.f32 1.0, %v6099_v3 }
 0x20b   : > { %1700 = vperm.xlu1 %4830, %v6782_v30  }
 0x20c   : > { %9581 = vst [vmem:[#allocation124_spill] sm:$0xff] %v6801_v60 }
 0x20e   : > { %1695 = vperm.xlu0 %4829, %v6785_v55  }
 0x20f   : > { %1710 = vperm.xlu1 %4830, %v6790_v13  }
 0x212   : > { %1705 = vperm.xlu0 %4829, %v6793_v27  }
 0x213   : > { %1720 = vperm.xlu1 %4830, %v6798_v5  }
 0x216   : > { %1715 = vperm.xlu0 %4829, %v6801_v60   ;;  %v6805_v30 = vpop.permute.xlu1 %1415  ;;  %v6807_v55 = vpop.permute.xlu0 %1405 }
 0x217   : > { %9582 = vst [vmem:[#allocation125_spill] sm:$0xff] %v6805_v30  ;;  %9583 = vst [vmem:[#allocation126_spill] sm:$0xff] %v6807_v55  ;;  %1794 = vperm.xlu1 %4830, %v5794_v35  }
 0x21a   : > { %1789 = vperm.xlu0 %4829, %v5789_v9   ;;  %v6811_v13 = vpop.permute.xlu1 %1420 }
 0x21b   : > { %9584 = vst [vmem:[#allocation127_spill] sm:$0xff] %v6811_v13  ;;  %v6813_v27 = vpop.permute.xlu0 %1410  ;;  %1804 = vperm.xlu1 %4830, %v5804_v20  }
 0x21c   : > { %9585 = vst [vmem:[#allocation128_spill] sm:$0xff] %v6813_v27 }
 0x21e   : > { %1799 = vperm.xlu0 %4829, %v5799_v40   ;;  %v6817_v3 = vpop.permute.xlu1 %1430 }
 0x21f   : > { %9586 = vst [vmem:[#allocation129_spill] sm:$0xff] %v6817_v3  ;;  %1814 = vperm.xlu1 %4830, %v5814_v59  }
 0x220   : > { %v6819_v5 = vpop.permute.xlu0 %1425 }
 0x221   : > { %9587 = vst [vmem:[#allocation130_spill] sm:$0xff] %v6819_v5 }
 0x222   : > { %1809 = vperm.xlu0 %4829, %v5809_v31   ;;  %v6823_v30 = vpop.permute.xlu1 %1440 }
 0x223   : > { %9588 = vst [vmem:[#allocation131_spill] sm:$0xff] %v6823_v30  ;;  %1824 = vperm.xlu1 %4830, %v5824_v47  }
 0x225   : > { %v6825_v55 = vpop.permute.xlu0 %1435 }
 0x226   : > { %9589 = vst [vmem:[#allocation132_spill] sm:$0xff] %v6825_v55  ;;  %1819 = vperm.xlu0 %4829, %v5819_v19   ;;  %v6829_v13 = vpop.permute.xlu1 %1450 }
 0x227   : > { %9590 = vst [vmem:[#allocation133_spill] sm:$0xff] %v6829_v13  ;;  %1834 = vperm.xlu1 %4830, %v5834_v52  }
 0x229   : > { %v6831_v27 = vpop.permute.xlu0 %1445 }
 0x22a   : > { %9591 = vst [vmem:[#allocation134_spill] sm:$0xff] %v6831_v27  ;;  %1829 = vperm.xlu0 %4829, %v5829_v51   ;;  %v6835_v5 = vpop.permute.xlu1 %1460 }
 0x22b   : > { %9592 = vst [vmem:[#allocation135_spill] sm:$0xff] %v6835_v5  ;;  %1844 = vperm.xlu1 %4830, %v5844_v63  }
 0x22d   : > { %v6837_v3 = vpop.permute.xlu0 %1455 }
 0x22e   : > { %9593 = vst [vmem:[#allocation136_spill] sm:$0xff] %v6837_v3  ;;  %1839 = vperm.xlu0 %4829, %v5839_v53   ;;  %v6841_v55 = vpop.permute.xlu1 %1470 }
 0x22f   : > { %9594 = vst [vmem:[#allocation137_spill] sm:$0xff] %v6841_v55  ;;  %1854 = vperm.xlu1 %4830, %v5854_v46  }
 0x231   : > { %v6843_v30 = vpop.permute.xlu0 %1465 }
 0x232   : > { %9595 = vst [vmem:[#allocation138_spill] sm:$0xff] %v6843_v30  ;;  %1849 = vperm.xlu0 %4829, %v5849_v0   ;;  %v6847_v27 = vpop.permute.xlu1 %1480 }
 0x233   : > { %9596 = vst [vmem:[#allocation139_spill] sm:$0xff] %v6847_v27  ;;  %1864 = vperm.xlu1 %4830, %v5864_v58  }
 0x235   : > { %v6849_v13 = vpop.permute.xlu0 %1475 }
 0x236   : > { %9597 = vst [vmem:[#allocation140_spill] sm:$0xff] %v6849_v13  ;;  %1859 = vperm.xlu0 %4829, %v5859_v57   ;;  %v6853_v3 = vpop.permute.xlu1 %1490 }
 0x237   : > { %9598 = vst [vmem:[#allocation141_spill] sm:$0xff] %v6853_v3  ;;  %1874 = vperm.xlu1 %4830, %v5874_v1  }
 0x239   : > { %v6855_v5 = vpop.permute.xlu0 %1485 }
 0x23a   : > { %9599 = vst [vmem:[#allocation142_spill] sm:$0xff] %v6855_v5  ;;  %1869 = vperm.xlu0 %4829, %v9526_v29   ;;  %v6859_v30 = vpop.permute.xlu1 %1500 }
 0x23b   : > { %9600 = vst [vmem:[#allocation143_spill] sm:$0xff] %v6859_v30  ;;  %1884 = vperm.xlu1 %4830, %v5884_v7  }
 0x23d   : > { %v6861_v55 = vpop.permute.xlu0 %1495 }
 0x23e   : > { %9601 = vst [vmem:[#allocation144_spill] sm:$0xff] %v6861_v55  ;;  %1879 = vperm.xlu0 %4829, %v9529_v45   ;;  %v6865_v13 = vpop.permute.xlu1 %1510 }
 0x23f   : > { %9602 = vst [vmem:[#allocation145_spill] sm:$0xff] %v6865_v13  ;;  %1894 = vperm.xlu1 %4830, %v5894_v12  }
 0x241   : > { %v6867_v27 = vpop.permute.xlu0 %1505 }
 0x242   : > { %9603 = vst [vmem:[#allocation146_spill] sm:$0xff] %v6867_v27  ;;  %1889 = vperm.xlu0 %4829, %v9532_v11   ;;  %v6871_v5 = vpop.permute.xlu1 %1520 }
 0x243   : > { %9604 = vst [vmem:[#allocation147_spill] sm:$0xff] %v6871_v5  ;;  %1904 = vperm.xlu1 %4830, %v5904_v17  }
 0x245   : > { %v6873_v3 = vpop.permute.xlu0 %1515 }
 0x246   : > { %9605 = vst [vmem:[#allocation148_spill] sm:$0xff] %v6873_v3  ;;  %1899 = vperm.xlu0 %4829, %v5899_v16   ;;  %v6877_v55 = vpop.permute.xlu1 %1530 }
 0x247   : > { %9606 = vst [vmem:[#allocation149_spill] sm:$0xff] %v6877_v55  ;;  %1914 = vperm.xlu1 %4830, %v5914_v10  }
 0x249   : > { %v6879_v30 = vpop.permute.xlu0 %1525 }
 0x24a   : > { %9607 = vst [vmem:[#allocation150_spill] sm:$0xff] %v6879_v30  ;;  %1909 = vperm.xlu0 %4829, %v5909_v21   ;;  %v6883_v27 = vpop.permute.xlu1 %1540 }
 0x24b   : > { %9608 = vst [vmem:[#allocation151_spill] sm:$0xff] %v6883_v27  ;;  %1924 = vperm.xlu1 %4830, %v5924_v6   ;;  %v9614_v27 = vld [vmem:[#allocation35_spill] sm:$0xff] }
 0x24d   : > { %v6885_v13 = vpop.permute.xlu0 %1535 }
 0x24e   : > { %9609 = vst [vmem:[#allocation152_spill] sm:$0xff] %v6885_v13  ;;  %1919 = vperm.xlu0 %4829, %v5919_v41   ;;  %v6889_v3 = vpop.permute.xlu1 %1550 }
 0x24f   : > { %9610 = vst [vmem:[#allocation153_spill] sm:$0xff] %v6889_v3  ;;  %1934 = vperm.xlu1 %4830, %v5934_v32  }
 0x251   : > { %v6891_v5 = vpop.permute.xlu0 %1545 }
 0x252   : > { %9611 = vst [vmem:[#allocation154_spill] sm:$0xff] %v6891_v5  ;;  %1929 = vperm.xlu0 %4829, %v5929_v28   ;;  %v6895_v30 = vpop.permute.xlu1 %1560 }
 0x253   : > { %9612 = vst [vmem:[#allocation155_spill] sm:$0xff] %v6895_v30  ;;  %1944 = vperm.xlu1 %4830, %v5944_v37  }
 0x255   : > { %v6897_v55 = vpop.permute.xlu0 %1555 }
 0x256   : > { %9613 = vst [vmem:[#allocation156_spill] sm:$0xff] %v6897_v55  ;;  %1939 = vperm.xlu0 %4829, %v9614_v27   ;;  %v6901_v13 = vpop.permute.xlu1 %1570 }
 0x257   : > { %9615 = vst [vmem:[#allocation157_spill] sm:$0xff] %v6901_v13  ;;  %1954 = vperm.xlu1 %4830, %v5954_v42   ;;  %v9623_v42 = vld [vmem:[#allocation26_spill] sm:$0xff] }
 0x259   : > { %v6903_v6 = vpop.permute.xlu0 %1565 }
 0x25a   : > { %9616 = vst [vmem:[#allocation158_spill] sm:$0xff] %v6903_v6  ;;  %1949 = vperm.xlu0 %4829, %v5949_v38   ;;  %v6907_v5 = vpop.permute.xlu1 %1580 }
 0x25b   : > { %9617 = vst [vmem:[#allocation159_spill] sm:$0xff] %v6907_v5  ;;  %1964 = vperm.xlu1 %4830, %v5964_v14   ;;  %v9624_v5 = vld [vmem:[#allocation25_spill] sm:$0xff] }
 0x25d   : > { %v6909_v3 = vpop.permute.xlu0 %1575 }
 0x25e   : > { %9618 = vst [vmem:[#allocation160_spill] sm:$0xff] %v6909_v3  ;;  %1959 = vperm.xlu0 %4829, %v9547_v54   ;;  %v6913_v55 = vpop.permute.xlu1 %1590  ;;  %v9627_v54 = vld [vmem:[#allocation39_spill] sm:$0xff] }
 0x25f   : > { %9619 = vst [vmem:[#allocation161_spill] sm:$0xff] %v6913_v55  ;;  %1974 = vperm.xlu1 %4830, %v5974_v26   ;;  %v9628_v55 = vld [vmem:[#allocation31_spill] sm:$0xff] }
 0x261   : > { %v6915_v30 = vpop.permute.xlu0 %1585 }
 0x262   : > { %9620 = vst [vmem:[#allocation162_spill] sm:$0xff] %v6915_v30  ;;  %1969 = vperm.xlu0 %4829, %v5969_v22   ;;  %v6919_v6 = vpop.permute.xlu1 %1600 }
 0x263   : > { %9621 = vst [vmem:[#allocation163_spill] sm:$0xff] %v6919_v6  ;;  %1984 = vperm.xlu1 %4830, %v9623_v42   ;;  %v9631_v6 = vld [vmem:[#allocation40_spill] sm:$0xff] }
 0x265   : > { %v6921_v13 = vpop.permute.xlu0 %1595 }
 0x266   : > { %9622 = vst [vmem:[#allocation164_spill] sm:$0xff] %v6921_v13  ;;  %1979 = vperm.xlu0 %4829, %v9624_v5   ;;  %v6925_v3 = vpop.permute.xlu1 %1610 }
 0x267   : > { %9625 = vst [vmem:[#allocation25_spill] sm:$0xff] %v6925_v3  ;;  %1994 = vperm.xlu1 %4830, %v9627_v54  }
 0x269   : > { %v6927_v14 = vpop.permute.xlu0 %1605 }
 0x26a   : > { %9626 = vst [vmem:[#allocation165_spill] sm:$0xff] %v6927_v14  ;;  %1989 = vperm.xlu0 %4829, %v9628_v55   ;;  %v6931_v30 = vpop.permute.xlu1 %1620 }
 0x26b   : > { %9629 = vst [vmem:[#allocation31_spill] sm:$0xff] %v6931_v30  ;;  %2004 = vperm.xlu1 %4830, %v9555_v39  }
 0x26d   : > { %v6933_v26 = vpop.permute.xlu0 %1615 }
 0x26e   : > { %9630 = vst [vmem:[#allocation166_spill] sm:$0xff] %v6933_v26  ;;  %1999 = vperm.xlu0 %4829, %v9631_v6   ;;  %v6937_v13 = vpop.permute.xlu1 %1630 }
 0x26f   : > { %9632 = vst [vmem:[#allocation40_spill] sm:$0xff] %v6937_v13  ;;  %2014 = vperm.xlu1 %4830, %v9559_v18  }
 0x271   : > { %v6939_v42 = vpop.permute.xlu0 %1625 }
 0x272   : > { %9633 = vst [vmem:[#allocation167_spill] sm:$0xff] %v6939_v42  ;;  %2009 = vperm.xlu0 %4829, %v9561_v36   ;;  %v6943_v14 = vpop.permute.xlu1 %1640 }
 0x273   : > { %9634 = vst [vmem:[#allocation168_spill] sm:$0xff] %v6943_v14  ;;  %2024 = vperm.xlu1 %4830, %v6024_v48  }
 0x275   : > { %v6945_v3 = vpop.permute.xlu0 %1635 }
 0x276   : > { %9635 = vst [vmem:[#allocation169_spill] sm:$0xff] %v6945_v3  ;;  %2019 = vperm.xlu0 %4829, %v9564_v8   ;;  %v6949_v26 = vpop.permute.xlu1 %1650 }
 0x277   : > { %9636 = vst [vmem:[#allocation170_spill] sm:$0xff] %v6949_v26  ;;  %2034 = vperm.xlu1 %4830, %v6034_v50  }
 0x279   : > { %v6951_v30 = vpop.permute.xlu0 %1645 }
 0x27a   : > { %9637 = vst [vmem:[#allocation171_spill] sm:$0xff] %v6951_v30  ;;  %2029 = vperm.xlu0 %4829, %v6029_v49   ;;  %v6955_v42 = vpop.permute.xlu1 %1660 }
 0x27b   : > { %9638 = vst [vmem:[#allocation172_spill] sm:$0xff] %v6955_v42  ;;  %2044 = vperm.xlu1 %4830, %v6044_v62  }
 0x27d   : > { %v6957_v13 = vpop.permute.xlu0 %1655 }
 0x27e   : > { %9639 = vst [vmem:[#allocation173_spill] sm:$0xff] %v6957_v13  ;;  %2039 = vperm.xlu0 %4829, %v6039_v25   ;;  %v6961_v3 = vpop.permute.xlu1 %1670 }
 0x27f   : > { %9640 = vst [vmem:[#allocation174_spill] sm:$0xff] %v6961_v3  ;;  %2054 = vperm.xlu1 %4830, %v6054_v43  }
 0x281   : > { %v6963_v14 = vpop.permute.xlu0 %1665 }
 0x282   : > { %9641 = vst [vmem:[#allocation175_spill] sm:$0xff] %v6963_v14  ;;  %2049 = vperm.xlu0 %4829, %v6049_v2   ;;  %v6967_v30 = vpop.permute.xlu1 %1680 }
 0x283   : > { %9642 = vst [vmem:[#allocation176_spill] sm:$0xff] %v6967_v30  ;;  %2064 = vperm.xlu1 %4830, %v6064_v44   ;;  %v4983_v44 = vmov 1  }
 0x285   : > { %v6969_v26 = vpop.permute.xlu0 %1675 }
 0x286   : > { %9643 = vst [vmem:[#allocation177_spill] sm:$0xff] %v6969_v26  ;;  %2059 = vperm.xlu0 %4829, %v6059_v56   ;;  %v6973_v13 = vpop.permute.xlu1 %1690 }
 0x287   : > { %9644 = vst [vmem:[#allocation178_spill] sm:$0xff] %v6973_v13  ;;  %2074 = vperm.xlu1 %4830, %v6074_v23  }
 0x289   : > { %v6975_v42 = vpop.permute.xlu0 %1685 }
 0x28a   : > { %9645 = vst [vmem:[#allocation179_spill] sm:$0xff] %v6975_v42  ;;  %2069 = vperm.xlu0 %4829, %v6069_v15   ;;  %v6979_v14 = vpop.permute.xlu1 %1700 }
 0x28b   : > { %9646 = vst [vmem:[#allocation180_spill] sm:$0xff] %v6979_v14  ;;  %2084 = vperm.xlu1 %4830, %v6084_v4   ;;  %v9652_v14 = vld [vmem:[#allocation55_spill] sm:$0xff]  ;;  %v1276_v4 = vld [vmem:[#allocation4 + $0x8] sm:$0xff] }
 0x28d   : > { %v6981_v3 = vpop.permute.xlu0 %1695 }
 0x28e   : > { %9647 = vst [vmem:[#allocation181_spill] sm:$0xff] %v6981_v3  ;;  %2079 = vperm.xlu0 %4829, %v6079_v24   ;;  %v6985_v26 = vpop.permute.xlu1 %1710  ;;  %v1275_v3 = vld [vmem:[#allocation4] sm:$0xff] }
 0x28f   : > { %9648 = vst [vmem:[#allocation182_spill] sm:$0xff] %v6985_v26  ;;  %2094 = vperm.xlu1 %4830, %v6094_v34  }
 0x291   : > { %v6987_v30 = vpop.permute.xlu0 %1705 }
 0x292   : > { %9649 = vst [vmem:[#allocation183_spill] sm:$0xff] %v6987_v30  ;;  %2089 = vperm.xlu0 %4829, %v6089_v33   ;;  %v6991_v42 = vpop.permute.xlu1 %1720  ;;  %v1281_v33 = vld [vmem:[#allocation4 + $0x30] sm:$0xff] }
 0x293   : > { %9650 = vst [vmem:[#allocation184_spill] sm:$0xff] %v6991_v42  ;;  %2104 = vperm.xlu1 %4830, %v6104_v61   ;;  %v6999_v42 = vld [vmem:[#allocation4 + $0x10] sm:$0xff] }
 0x294   : > { %9653 = vst [vmem:[#allocation186_spill] sm:$0xff] %v6999_v42 }
 0x295   : > { %v6993_v13 = vpop.permute.xlu0 %1715 }
 0x296   : > { %9651 = vst [vmem:[#allocation185_spill] sm:$0xff] %v6993_v13  ;;  %2099 = vperm.xlu0 %4829, %v9652_v14   ;;  %v1795_v23 = vpop.permute.xlu1 %1794  ;;  %v7001_v13 = vld [vmem:[#allocation4 + $0x18] sm:$0xff] }
 0x297   : > { %v2108_v15 = vmul.f32 %v1795_v23, %v1276_v4  ;;  %4832 = vset.pattern.permute.xlu1 %v4983_v44  ;;  %9654 = vst [vmem:[#allocation187_spill] sm:$0xff] %v7001_v13  ;;  %v1279_v23 = vld [vmem:[#allocation4 + $0x20] sm:$0xff] }
 0x299   : > { %v1790_v24 = vpop.permute.xlu0 %1789  ;;  %2237 = vrot.lane.b32.xlu1 %v2108_v15, %s4984_s8 }
 0x29a   : > { %v2107_v26 = vmul.f32 %v1790_v24, %v1275_v3  ;;  %4831 = vset.pattern.permute.xlu0 %v4983_v44  ;;  %v1805_v30 = vpop.permute.xlu1 %1804  ;;  %v1280_v44 = vld [vmem:[#allocation4 + $0x28] sm:$0xff]  ;;  %v1282_v3 = vld [vmem:[#allocation4 + $0x38] sm:$0xff] }
 0x29b   : > { %v2110_v14 = vmul.f32 %v1805_v30, %v7001_v13 }
 0x29c   : > { %2235 = vrot.lane.b32.xlu0 %v2107_v26, %s4984_s8 }
 0x29d   : > { %v1800_v61 = vpop.permute.xlu0 %1799  ;;  %2241 = vrot.lane.b32.xlu1 %v2110_v14, %s4984_s8  ;;  %v1284_v14 = vld [vmem:[#allocation4 + $0x48] sm:$0xff] }
 0x29e   : > { %v2109_v34 = vmul.f32 %v1800_v61, %v6999_v42  ;;  %v1815_v24 = vpop.permute.xlu1 %1814 }
 0x29f   : > { %v2112_v4 = vmul.f32 %v1815_v24, %v1280_v44  ;;  %v1286_v24 = vld [vmem:[#allocation4 + $0x58] sm:$0xff] }
 0x2a0   : > { %2239 = vrot.lane.b32.xlu0 %v2109_v34, %s4984_s8  ;;  %v1283_v34 = vld [vmem:[#allocation4 + $0x40] sm:$0xff] }
 0x2a1   : > { %v1810_v15 = vpop.permute.xlu0 %1809  ;;  %2245 = vrot.lane.b32.xlu1 %v2112_v4, %s4984_s8 }
 0x2a2   : > { %v2111_v26 = vmul.f32 %v1810_v15, %v1279_v23  ;;  %v1825_v56 = vpop.permute.xlu1 %1824  ;;  %v1285_v15 = vld [vmem:[#allocation4 + $0x50] sm:$0xff] }
 0x2a3   : > { %v2114_v13 = vmul.f32 %v1825_v56, %v1282_v3  ;;  %v1287_v3 = vld [vmem:[#allocation4 + $0x60] sm:$0xff] }
 0x2a4   : > { %2243 = vrot.lane.b32.xlu0 %v2111_v26, %s4984_s8 }
 0x2a5   : > { %v1820_v30 = vpop.permute.xlu0 %1819  ;;  %2249 = vrot.lane.b32.xlu1 %v2114_v13, %s4984_s8  ;;  %v1288_v13 = vld [vmem:[#allocation4 + $0x68] sm:$0xff] }
 0x2a6   : > { %v2113_v61 = vmul.f32 %v1820_v30, %v1281_v33  ;;  %v1835_v42 = vpop.permute.xlu1 %1834 }
 0x2a7   : > { %v2116_v44 = vmul.f32 %v1835_v42, %v1284_v14  ;;  %v1290_v14 = vld [vmem:[#allocation4 + $0x78] sm:$0xff] }
 0x2a8   : > { %2247 = vrot.lane.b32.xlu0 %v2113_v61, %s4984_s8 }
 0x2a9   : > { %v1830_v43 = vpop.permute.xlu0 %1829  ;;  %2253 = vrot.lane.b32.xlu1 %v2116_v44, %s4984_s8 }
 0x2aa   : > { %v2115_v23 = vmul.f32 %v1830_v43, %v1283_v34  ;;  %v1845_v4 = vpop.permute.xlu1 %1844  ;;  %v1289_v34 = vld [vmem:[#allocation4 + $0x70] sm:$0xff] }
 0x2ab   : > { %v2118_v56 = vmul.f32 %v1845_v4, %v1286_v24  ;;  %v1292_v4 = vld [vmem:[#allocation4 + $0x88] sm:$0xff] }
 0x2ac   : > { %2251 = vrot.lane.b32.xlu0 %v2115_v23, %s4984_s8 }
 0x2ad   : > { %v1840_v26 = vpop.permute.xlu0 %1839  ;;  %2257 = vrot.lane.b32.xlu1 %v2118_v56, %s4984_s8 }
 0x2ae   : > { %v2117_v33 = vmul.f32 %v1840_v26, %v1285_v15  ;;  %v1855_v30 = vpop.permute.xlu1 %1854  ;;  %v1291_v26 = vld [vmem:[#allocation4 + $0x80] sm:$0xff] }
 0x2af   : > { %v2120_v42 = vmul.f32 %v1855_v30, %v1288_v13  ;;  %v1294_v30 = vld [vmem:[#allocation4 + $0x98] sm:$0xff] }
 0x2b0   : > { %2255 = vrot.lane.b32.xlu0 %v2117_v33, %s4984_s8 }
 0x2b1   : > { %v1850_v61 = vpop.permute.xlu0 %1849  ;;  %2261 = vrot.lane.b32.xlu1 %v2120_v42, %s4984_s8 }
 0x2b2   : > { %v2119_v43 = vmul.f32 %v1850_v61, %v1287_v3  ;;  %v1865_v44 = vpop.permute.xlu1 %1864  ;;  %v1293_v61 = vld [vmem:[#allocation4 + $0x90] sm:$0xff] }
 0x2b3   : > { %v2122_v24 = vmul.f32 %v1865_v44, %v1290_v14  ;;  %v1296_v44 = vld [vmem:[#allocation4 + $0xa8] sm:$0xff] }
 0x2b4   : > { %2259 = vrot.lane.b32.xlu0 %v2119_v43, %s4984_s8 }
 0x2b5   : > { %v1860_v23 = vpop.permute.xlu0 %1859  ;;  %2265 = vrot.lane.b32.xlu1 %v2122_v24, %s4984_s8 }
 0x2b6   : > { %v2121_v15 = vmul.f32 %v1860_v23, %v1289_v34  ;;  %v1875_v56 = vpop.permute.xlu1 %1874  ;;  %v1295_v23 = vld [vmem:[#allocation4 + $0xa0] sm:$0xff] }
 0x2b7   : > { %v2124_v13 = vmul.f32 %v1875_v56, %v1292_v4  ;;  %v1298_v56 = vld [vmem:[#allocation4 + $0xb8] sm:$0xff] }
 0x2b8   : > { %2263 = vrot.lane.b32.xlu0 %v2121_v15, %s4984_s8 }
 0x2b9   : > { %v1870_v33 = vpop.permute.xlu0 %1869  ;;  %2269 = vrot.lane.b32.xlu1 %v2124_v13, %s4984_s8 }
 0x2ba   : > { %v2123_v3 = vmul.f32 %v1870_v33, %v1291_v26  ;;  %v1885_v42 = vpop.permute.xlu1 %1884  ;;  %v1297_v33 = vld [vmem:[#allocation4 + $0xb0] sm:$0xff] }
 0x2bb   : > { %v2126_v14 = vmul.f32 %v1885_v42, %v1294_v30  ;;  %v1300_v42 = vld [vmem:[#allocation4 + $0xc8] sm:$0xff] }
 0x2bc   : > { %2267 = vrot.lane.b32.xlu0 %v2123_v3, %s4984_s8 }
 0x2bd   : > { %v1880_v43 = vpop.permute.xlu0 %1879  ;;  %2273 = vrot.lane.b32.xlu1 %v2126_v14, %s4984_s8 }
 0x2be   : > { %v2125_v34 = vmul.f32 %v1880_v43, %v1293_v61  ;;  %v1895_v24 = vpop.permute.xlu1 %1894  ;;  %v1299_v43 = vld [vmem:[#allocation4 + $0xc0] sm:$0xff] }
 0x2bf   : > { %v2128_v4 = vmul.f32 %v1895_v24, %v1296_v44  ;;  %v1302_v24 = vld [vmem:[#allocation4 + $0xd8] sm:$0xff] }
 0x2c0   : > { %2271 = vrot.lane.b32.xlu0 %v2125_v34, %s4984_s8 }
 0x2c1   : > { %v1890_v15 = vpop.permute.xlu0 %1889  ;;  %2277 = vrot.lane.b32.xlu1 %v2128_v4, %s4984_s8 }
 0x2c2   : > { %v2127_v26 = vmul.f32 %v1890_v15, %v1295_v23  ;;  %v1905_v13 = vpop.permute.xlu1 %1904  ;;  %v1301_v15 = vld [vmem:[#allocation4 + $0xd0] sm:$0xff] }
 0x2c3   : > { %v2130_v30 = vmul.f32 %v1905_v13, %v1298_v56  ;;  %v1304_v13 = vld [vmem:[#allocation4 + $0xe8] sm:$0xff] }
 0x2c4   : > { %2275 = vrot.lane.b32.xlu0 %v2127_v26, %s4984_s8 }
 0x2c5   : > { %v1900_v3 = vpop.permute.xlu0 %1899  ;;  %2281 = vrot.lane.b32.xlu1 %v2130_v30, %s4984_s8 }
 0x2c6   : > { %v2129_v61 = vmul.f32 %v1900_v3, %v1297_v33  ;;  %v1915_v14 = vpop.permute.xlu1 %1914  ;;  %v1303_v3 = vld [vmem:[#allocation4 + $0xe0] sm:$0xff] }
 0x2c7   : > { %v2132_v44 = vmul.f32 %v1915_v14, %v1300_v42  ;;  %v1306_v14 = vld [vmem:[#allocation4 + $0xf8] sm:$0xff] }
 0x2c8   : > { %2279 = vrot.lane.b32.xlu0 %v2129_v61, %s4984_s8 }
 0x2c9   : > { %v1910_v34 = vpop.permute.xlu0 %1909  ;;  %2285 = vrot.lane.b32.xlu1 %v2132_v44, %s4984_s8 }
 0x2ca   : > { %v2131_v23 = vmul.f32 %v1910_v34, %v1299_v43  ;;  %v1925_v4 = vpop.permute.xlu1 %1924  ;;  %v1305_v34 = vld [vmem:[#allocation4 + $0xf0] sm:$0xff] }
 0x2cb   : > { %v2134_v56 = vmul.f32 %v1925_v4, %v1302_v24  ;;  %v1308_v4 = vld [vmem:[#allocation4 + $0x108] sm:$0xff] }
 0x2cc   : > { %2283 = vrot.lane.b32.xlu0 %v2131_v23, %s4984_s8 }
 0x2cd   : > { %v1920_v26 = vpop.permute.xlu0 %1919  ;;  %2289 = vrot.lane.b32.xlu1 %v2134_v56, %s4984_s8 }
 0x2ce   : > { %v2133_v33 = vmul.f32 %v1920_v26, %v1301_v15  ;;  %v1935_v30 = vpop.permute.xlu1 %1934  ;;  %v1307_v26 = vld [vmem:[#allocation4 + $0x100] sm:$0xff] }
 0x2cf   : > { %v2136_v42 = vmul.f32 %v1935_v30, %v1304_v13  ;;  %v1310_v30 = vld [vmem:[#allocation4 + $0x118] sm:$0xff] }
 0x2d0   : > { %2287 = vrot.lane.b32.xlu0 %v2133_v33, %s4984_s8 }
 0x2d1   : > { %v1930_v61 = vpop.permute.xlu0 %1929  ;;  %2293 = vrot.lane.b32.xlu1 %v2136_v42, %s4984_s8 }
 0x2d2   : > { %v2135_v43 = vmul.f32 %v1930_v61, %v1303_v3  ;;  %v1945_v44 = vpop.permute.xlu1 %1944  ;;  %v1309_v61 = vld [vmem:[#allocation4 + $0x110] sm:$0xff] }
 0x2d3   : > { %v2138_v24 = vmul.f32 %v1945_v44, %v1306_v14  ;;  %v1312_v44 = vld [vmem:[#allocation4 + $0x128] sm:$0xff] }
 0x2d4   : > { %2291 = vrot.lane.b32.xlu0 %v2135_v43, %s4984_s8 }
 0x2d5   : > { %v1940_v23 = vpop.permute.xlu0 %1939  ;;  %2297 = vrot.lane.b32.xlu1 %v2138_v24, %s4984_s8 }
 0x2d6   : > { %v2137_v15 = vmul.f32 %v1940_v23, %v1305_v34  ;;  %v1955_v56 = vpop.permute.xlu1 %1954  ;;  %v1311_v23 = vld [vmem:[#allocation4 + $0x120] sm:$0xff] }
 0x2d7   : > { %v2140_v13 = vmul.f32 %v1955_v56, %v1308_v4  ;;  %v1314_v56 = vld [vmem:[#allocation4 + $0x138] sm:$0xff] }
 0x2d8   : > { %2295 = vrot.lane.b32.xlu0 %v2137_v15, %s4984_s8 }
 0x2d9   : > { %v1950_v33 = vpop.permute.xlu0 %1949  ;;  %2301 = vrot.lane.b32.xlu1 %v2140_v13, %s4984_s8 }
 0x2da   : > { %v2139_v3 = vmul.f32 %v1950_v33, %v1307_v26  ;;  %v1965_v42 = vpop.permute.xlu1 %1964  ;;  %v1313_v33 = vld [vmem:[#allocation4 + $0x130] sm:$0xff] }
 0x2db   : > { %v2142_v14 = vmul.f32 %v1965_v42, %v1310_v30  ;;  %v1316_v42 = vld [vmem:[#allocation4 + $0x148] sm:$0xff] }
 0x2dc   : > { %2299 = vrot.lane.b32.xlu0 %v2139_v3, %s4984_s8 }
 0x2dd   : > { %v1960_v43 = vpop.permute.xlu0 %1959  ;;  %2305 = vrot.lane.b32.xlu1 %v2142_v14, %s4984_s8 }
 0x2de   : > { %v2141_v34 = vmul.f32 %v1960_v43, %v1309_v61  ;;  %v1975_v24 = vpop.permute.xlu1 %1974  ;;  %v1315_v43 = vld [vmem:[#allocation4 + $0x140] sm:$0xff] }
 0x2df   : > { %v2144_v4 = vmul.f32 %v1975_v24, %v1312_v44  ;;  %v1318_v24 = vld [vmem:[#allocation4 + $0x158] sm:$0xff] }
 0x2e0   : > { %2303 = vrot.lane.b32.xlu0 %v2141_v34, %s4984_s8 }
 0x2e1   : > { %v1970_v15 = vpop.permute.xlu0 %1969  ;;  %2309 = vrot.lane.b32.xlu1 %v2144_v4, %s4984_s8 }
 0x2e2   : > { %v2143_v26 = vmul.f32 %v1970_v15, %v1311_v23  ;;  %v1985_v13 = vpop.permute.xlu1 %1984  ;;  %v1317_v15 = vld [vmem:[#allocation4 + $0x150] sm:$0xff] }
 0x2e3   : > { %v2146_v30 = vmul.f32 %v1985_v13, %v1314_v56  ;;  %v1320_v13 = vld [vmem:[#allocation4 + $0x168] sm:$0xff] }
 0x2e4   : > { %2307 = vrot.lane.b32.xlu0 %v2143_v26, %s4984_s8 }
 0x2e5   : > { %v1980_v3 = vpop.permute.xlu0 %1979  ;;  %2313 = vrot.lane.b32.xlu1 %v2146_v30, %s4984_s8 }
 0x2e6   : > { %v2145_v61 = vmul.f32 %v1980_v3, %v1313_v33  ;;  %v1995_v14 = vpop.permute.xlu1 %1994  ;;  %v1319_v3 = vld [vmem:[#allocation4 + $0x160] sm:$0xff] }
 0x2e7   : > { %v2148_v44 = vmul.f32 %v1995_v14, %v1316_v42  ;;  %v1322_v14 = vld [vmem:[#allocation4 + $0x178] sm:$0xff] }
 0x2e8   : > { %2311 = vrot.lane.b32.xlu0 %v2145_v61, %s4984_s8 }
 0x2e9   : > { %v1990_v34 = vpop.permute.xlu0 %1989  ;;  %2317 = vrot.lane.b32.xlu1 %v2148_v44, %s4984_s8 }
 0x2ea   : > { %v2147_v23 = vmul.f32 %v1990_v34, %v1315_v43  ;;  %v2005_v4 = vpop.permute.xlu1 %2004  ;;  %v1321_v34 = vld [vmem:[#allocation4 + $0x170] sm:$0xff] }
 0x2eb   : > { %v2150_v56 = vmul.f32 %v2005_v4, %v1318_v24  ;;  %v1324_v4 = vld [vmem:[#allocation4 + $0x188] sm:$0xff] }
 0x2ec   : > { %2315 = vrot.lane.b32.xlu0 %v2147_v23, %s4984_s8 }
 0x2ed   : > { %v2000_v26 = vpop.permute.xlu0 %1999  ;;  %2321 = vrot.lane.b32.xlu1 %v2150_v56, %s4984_s8 }
 0x2ee   : > { %v2149_v33 = vmul.f32 %v2000_v26, %v1317_v15  ;;  %v2015_v30 = vpop.permute.xlu1 %2014  ;;  %v1323_v26 = vld [vmem:[#allocation4 + $0x180] sm:$0xff] }
 0x2ef   : > { %v2152_v42 = vmul.f32 %v2015_v30, %v1320_v13  ;;  %v1326_v30 = vld [vmem:[#allocation4 + $0x198] sm:$0xff] }
 0x2f0   : > { %2319 = vrot.lane.b32.xlu0 %v2149_v33, %s4984_s8 }
 0x2f1   : > { %v2010_v61 = vpop.permute.xlu0 %2009  ;;  %2325 = vrot.lane.b32.xlu1 %v2152_v42, %s4984_s8 }
 0x2f2   : > { %v2151_v43 = vmul.f32 %v2010_v61, %v1319_v3  ;;  %v2025_v44 = vpop.permute.xlu1 %2024  ;;  %v1325_v61 = vld [vmem:[#allocation4 + $0x190] sm:$0xff] }
 0x2f3   : > { %v2154_v24 = vmul.f32 %v2025_v44, %v1322_v14  ;;  %v1328_v44 = vld [vmem:[#allocation4 + $0x1a8] sm:$0xff] }
 0x2f4   : > { %2323 = vrot.lane.b32.xlu0 %v2151_v43, %s4984_s8 }
 0x2f5   : > { %v2020_v23 = vpop.permute.xlu0 %2019  ;;  %2329 = vrot.lane.b32.xlu1 %v2154_v24, %s4984_s8 }
 0x2f6   : > { %v2153_v15 = vmul.f32 %v2020_v23, %v1321_v34  ;;  %v2035_v56 = vpop.permute.xlu1 %2034  ;;  %v1327_v23 = vld [vmem:[#allocation4 + $0x1a0] sm:$0xff] }
 0x2f7   : > { %v2156_v13 = vmul.f32 %v2035_v56, %v1324_v4  ;;  %v1330_v56 = vld [vmem:[#allocation4 + $0x1b8] sm:$0xff] }
 0x2f8   : > { %2327 = vrot.lane.b32.xlu0 %v2153_v15, %s4984_s8 }
 0x2f9   : > { %v2030_v33 = vpop.permute.xlu0 %2029  ;;  %2333 = vrot.lane.b32.xlu1 %v2156_v13, %s4984_s8 }
 0x2fa   : > { %v2155_v3 = vmul.f32 %v2030_v33, %v1323_v26  ;;  %v2045_v42 = vpop.permute.xlu1 %2044  ;;  %v1329_v33 = vld [vmem:[#allocation4 + $0x1b0] sm:$0xff] }
 0x2fb   : > { %v2158_v14 = vmul.f32 %v2045_v42, %v1326_v30  ;;  %v1332_v42 = vld [vmem:[#allocation4 + $0x1c8] sm:$0xff] }
 0x2fc   : > { %2331 = vrot.lane.b32.xlu0 %v2155_v3, %s4984_s8 }
 0x2fd   : > { %v2040_v43 = vpop.permute.xlu0 %2039  ;;  %2337 = vrot.lane.b32.xlu1 %v2158_v14, %s4984_s8 }
 0x2fe   : > { %v2157_v34 = vmul.f32 %v2040_v43, %v1325_v61  ;;  %v2055_v24 = vpop.permute.xlu1 %2054  ;;  %v1331_v43 = vld [vmem:[#allocation4 + $0x1c0] sm:$0xff] }
 0x2ff   : > { %v2160_v4 = vmul.f32 %v2055_v24, %v1328_v44  ;;  %v1334_v24 = vld [vmem:[#allocation4 + $0x1d8] sm:$0xff] }
 0x300   : > { %2335 = vrot.lane.b32.xlu0 %v2157_v34, %s4984_s8 }
 0x301   : > { %v2050_v15 = vpop.permute.xlu0 %2049  ;;  %2341 = vrot.lane.b32.xlu1 %v2160_v4, %s4984_s8 }
 0x302   : > { %v2159_v26 = vmul.f32 %v2050_v15, %v1327_v23  ;;  %v2065_v13 = vpop.permute.xlu1 %2064  ;;  %v1333_v15 = vld [vmem:[#allocation4 + $0x1d0] sm:$0xff] }
 0x303   : > { %v2162_v30 = vmul.f32 %v2065_v13, %v1330_v56  ;;  %v1336_v13 = vld [vmem:[#allocation4 + $0x1e8] sm:$0xff] }
 0x304   : > { %2339 = vrot.lane.b32.xlu0 %v2159_v26, %s4984_s8 }
 0x305   : > { %v2060_v3 = vpop.permute.xlu0 %2059  ;;  %2345 = vrot.lane.b32.xlu1 %v2162_v30, %s4984_s8 }
 0x306   : > { %v2161_v61 = vmul.f32 %v2060_v3, %v1329_v33  ;;  %v2075_v14 = vpop.permute.xlu1 %2074  ;;  %v1335_v3 = vld [vmem:[#allocation4 + $0x1e0] sm:$0xff] }
 0x307   : > { %v2164_v44 = vmul.f32 %v2075_v14, %v1332_v42  ;;  %v1338_v14 = vld [vmem:[#allocation4 + $0x1f8] sm:$0xff] }
 0x308   : > { %2343 = vrot.lane.b32.xlu0 %v2161_v61, %s4984_s8 }
 0x309   : > { %v2070_v34 = vpop.permute.xlu0 %2069  ;;  %2349 = vrot.lane.b32.xlu1 %v2164_v44, %s4984_s8 }
 0x30a   : > { %v2163_v23 = vmul.f32 %v2070_v34, %v1331_v43  ;;  %v2085_v4 = vpop.permute.xlu1 %2084  ;;  %v1337_v34 = vld [vmem:[#allocation4 + $0x1f0] sm:$0xff] }
 0x30b   : > { %v2166_v56 = vmul.f32 %v2085_v4, %v1334_v24 }
 0x30c   : > { %2347 = vrot.lane.b32.xlu0 %v2163_v23, %s4984_s8 }
 0x30d   : > { %v2080_v26 = vpop.permute.xlu0 %2079  ;;  %2353 = vrot.lane.b32.xlu1 %v2166_v56, %s4984_s8  ;;  %v9655_v56 = vld [vmem:[#allocation68_spill] sm:$0xff] }
 0x30e   : > { %v2165_v33 = vmul.f32 %v2080_v26, %v1333_v15  ;;  %v2095_v30 = vpop.permute.xlu1 %2094 }
 0x30f   : > { %v2168_v42 = vmul.f32 %v2095_v30, %v1336_v13  ;;  %v9657_v30 = vld [vmem:[#allocation65_spill] sm:$0xff] }
 0x310   : > { %2351 = vrot.lane.b32.xlu0 %v2165_v33, %s4984_s8  ;;  %v9656_v33 = vld [vmem:[#allocation66_spill] sm:$0xff] }
 0x311   : > { %v2090_v61 = vpop.permute.xlu0 %2089  ;;  %2357 = vrot.lane.b32.xlu1 %v2168_v42, %s4984_s8 }
 0x312   : > { %v2167_v43 = vmul.f32 %v2090_v61, %v1335_v3  ;;  %v2105_v44 = vpop.permute.xlu1 %2104  ;;  %v9658_v61 = vld [vmem:[#allocation67_spill] sm:$0xff] }
 0x313   : > { %v2170_v24 = vmul.f32 %v2105_v44, %v1338_v14  ;;  %v9660_v14 = vld [vmem:[#allocation70_spill] sm:$0xff] }
 0x314   : > { %2355 = vrot.lane.b32.xlu0 %v2167_v43, %s4984_s8 }
 0x315   : > { %v2100_v23 = vpop.permute.xlu0 %2099  ;;  %2361 = vrot.lane.b32.xlu1 %v2170_v24, %s4984_s8  ;;  %v9664_v24 = vld [vmem:[#allocation72_spill] sm:$0xff] }
 0x316   : > { %v2169_v15 = vmul.f32 %v2100_v23, %v1337_v34  ;;  %v7067_v4 = vpop.permute.xlu1 %2237  ;;  %v9661_v34 = vld [vmem:[#allocation69_spill] sm:$0xff] }
 0x318   : > { %2359 = vrot.lane.b32.xlu0 %v2169_v15, %s4984_s8  ;;  %v9665_v15 = vld [vmem:[#allocation71_spill] sm:$0xff] }
 0x319   : > { %v7069_v26 = vpop.permute.xlu0 %2235  ;;  %2496 = vperm.xlu1 %4832, %v9655_v56   ;;  %v9669_v56 = vld [vmem:[#allocation73_spill] sm:$0xff] }
 0x31a   : > { %v7073_v13 = vpop.permute.xlu1 %2241 }
 0x31c   : > { %2492 = vperm.xlu0 %4831, %v9656_v33  }
 0x31d   : > { %v7075_v3 = vpop.permute.xlu0 %2239  ;;  %2500 = vperm.xlu1 %4832, %v9657_v30  }
 0x31e   : > { %v7079_v42 = vpop.permute.xlu1 %2245 }
 0x320   : > { %2504 = vperm.xlu0 %4831, %v9658_v61   ;;  %v9668_v61 = vld [vmem:[#allocation74_spill] sm:$0xff] }
 0x321   : > { %v7081_v43 = vpop.permute.xlu0 %2243  ;;  %2508 = vperm.xlu1 %4832, %v9660_v14  }
 0x322   : > { %9659 = vst [vmem:[#allocation188_spill] sm:$0xff] %v7081_v43  ;;  %v7085_v44 = vpop.permute.xlu1 %2249 }
 0x323   : > { %9662 = vst [vmem:[#allocation189_spill] sm:$0xff] %v7085_v44  ;;  %v9673_v44 = vld [vmem:[#allocation75_spill] sm:$0xff] }
 0x324   : > { %2512 = vperm.xlu0 %4831, %v9661_v34   ;;  %v9672_v34 = vld [vmem:[#allocation76_spill] sm:$0xff] }
 0x325   : > { %v7087_v23 = vpop.permute.xlu0 %2247  ;;  %2516 = vperm.xlu1 %4832, %v9664_v24  }
 0x326   : > { %9663 = vst [vmem:[#allocation190_spill] sm:$0xff] %v7087_v23  ;;  %v7091_v33 = vpop.permute.xlu1 %2253 }
 0x327   : > { %9666 = vst [vmem:[#allocation191_spill] sm:$0xff] %v7091_v33  ;;  %v9677_v33 = vld [vmem:[#allocation77_spill] sm:$0xff] }
 0x328   : > { %2520 = vperm.xlu0 %4831, %v9665_v15   ;;  %v9676_v15 = vld [vmem:[#allocation78_spill] sm:$0xff] }
 0x329   : > { %v7093_v30 = vpop.permute.xlu0 %2251  ;;  %2524 = vperm.xlu1 %4832, %v9668_v61  }
 0x32a   : > { %9667 = vst [vmem:[#allocation192_spill] sm:$0xff] %v7093_v30  ;;  %v7097_v43 = vpop.permute.xlu1 %2257 }
 0x32b   : > { %9670 = vst [vmem:[#allocation193_spill] sm:$0xff] %v7097_v43  ;;  %v9681_v43 = vld [vmem:[#allocation79_spill] sm:$0xff] }
 0x32c   : > { %2528 = vperm.xlu0 %4831, %v9669_v56   ;;  %v9680_v56 = vld [vmem:[#allocation80_spill] sm:$0xff] }
 0x32d   : > { %v7099_v14 = vpop.permute.xlu0 %2255  ;;  %2532 = vperm.xlu1 %4832, %v9672_v34  }
 0x32e   : > { %9671 = vst [vmem:[#allocation194_spill] sm:$0xff] %v7099_v14  ;;  %v7103_v23 = vpop.permute.xlu1 %2261 }
 0x32f   : > { %9674 = vst [vmem:[#allocation195_spill] sm:$0xff] %v7103_v23  ;;  %v9685_v23 = vld [vmem:[#allocation81_spill] sm:$0xff] }
 0x330   : > { %2536 = vperm.xlu0 %4831, %v9673_v44   ;;  %v9684_v44 = vld [vmem:[#allocation27_spill] sm:$0xff] }
 0x331   : > { %v7105_v24 = vpop.permute.xlu0 %2259  ;;  %2540 = vperm.xlu1 %4832, %v9676_v15  }
 0x332   : > { %9675 = vst [vmem:[#allocation196_spill] sm:$0xff] %v7105_v24  ;;  %v7109_v30 = vpop.permute.xlu1 %2265 }
 0x333   : > { %9678 = vst [vmem:[#allocation197_spill] sm:$0xff] %v7109_v30  ;;  %v9689_v30 = vld [vmem:[#allocation82_spill] sm:$0xff] }
 0x334   : > { %2544 = vperm.xlu0 %4831, %v9677_v33   ;;  %v9688_v33 = vld [vmem:[#allocation28_spill] sm:$0xff] }
 0x335   : > { %v7111_v61 = vpop.permute.xlu0 %2263  ;;  %2548 = vperm.xlu1 %4832, %v9680_v56  }
 0x336   : > { %9679 = vst [vmem:[#allocation198_spill] sm:$0xff] %v7111_v61  ;;  %v7115_v14 = vpop.permute.xlu1 %2269 }
 0x337   : > { %9682 = vst [vmem:[#allocation199_spill] sm:$0xff] %v7115_v14  ;;  %v9693_v14 = vld [vmem:[#allocation83_spill] sm:$0xff] }
 0x338   : > { %2552 = vperm.xlu0 %4831, %v9681_v43   ;;  %v9692_v43 = vld [vmem:[#allocation29_spill] sm:$0xff] }
 0x339   : > { %v7117_v34 = vpop.permute.xlu0 %2267  ;;  %2556 = vperm.xlu1 %4832, %v9684_v44  }
 0x33a   : > { %9683 = vst [vmem:[#allocation200_spill] sm:$0xff] %v7117_v34  ;;  %v7121_v24 = vpop.permute.xlu1 %2273 }
 0x33b   : > { %9686 = vst [vmem:[#allocation201_spill] sm:$0xff] %v7121_v24  ;;  %v9697_v24 = vld [vmem:[#allocation84_spill] sm:$0xff] }
 0x33c   : > { %2560 = vperm.xlu0 %4831, %v9685_v23   ;;  %v9696_v23 = vld [vmem:[#allocation85_spill] sm:$0xff] }
 0x33d   : > { %v7123_v15 = vpop.permute.xlu0 %2271  ;;  %2564 = vperm.xlu1 %4832, %v9688_v33  }
 0x33e   : > { %9687 = vst [vmem:[#allocation202_spill] sm:$0xff] %v7123_v15  ;;  %v7127_v61 = vpop.permute.xlu1 %2277 }
 0x33f   : > { %9690 = vst [vmem:[#allocation203_spill] sm:$0xff] %v7127_v61  ;;  %v9701_v61 = vld [vmem:[#allocation86_spill] sm:$0xff] }
 0x340   : > { %2568 = vperm.xlu0 %4831, %v9689_v30   ;;  %v9700_v30 = vld [vmem:[#allocation87_spill] sm:$0xff] }
 0x341   : > { %v7129_v56 = vpop.permute.xlu0 %2275  ;;  %2572 = vperm.xlu1 %4832, %v9692_v43  }
 0x342   : > { %9691 = vst [vmem:[#allocation204_spill] sm:$0xff] %v7129_v56  ;;  %v7133_v34 = vpop.permute.xlu1 %2281 }
 0x343   : > { %9694 = vst [vmem:[#allocation205_spill] sm:$0xff] %v7133_v34  ;;  %v9705_v34 = vld [vmem:[#allocation88_spill] sm:$0xff] }
 0x344   : > { %2576 = vperm.xlu0 %4831, %v9693_v14   ;;  %v9704_v14 = vld [vmem:[#allocation89_spill] sm:$0xff] }
 0x345   : > { %v7135_v44 = vpop.permute.xlu0 %2279  ;;  %2580 = vperm.xlu1 %4832, %v9696_v23  }
 0x346   : > { %9695 = vst [vmem:[#allocation206_spill] sm:$0xff] %v7135_v44  ;;  %v7139_v15 = vpop.permute.xlu1 %2285 }
 0x347   : > { %9698 = vst [vmem:[#allocation207_spill] sm:$0xff] %v7139_v15  ;;  %v9709_v15 = vld [vmem:[#allocation90_spill] sm:$0xff] }
 0x348   : > { %2584 = vperm.xlu0 %4831, %v9697_v24   ;;  %v9708_v24 = vld [vmem:[#allocation91_spill] sm:$0xff] }
 0x349   : > { %v7141_v33 = vpop.permute.xlu0 %2283  ;;  %2588 = vperm.xlu1 %4832, %v9700_v30  }
 0x34a   : > { %9699 = vst [vmem:[#allocation208_spill] sm:$0xff] %v7141_v33  ;;  %v7145_v56 = vpop.permute.xlu1 %2289 }
 0x34b   : > { %9702 = vst [vmem:[#allocation209_spill] sm:$0xff] %v7145_v56  ;;  %v9713_v56 = vld [vmem:[#allocation92_spill] sm:$0xff] }
 0x34c   : > { %2592 = vperm.xlu0 %4831, %v9701_v61   ;;  %v9712_v61 = vld [vmem:[#allocation93_spill] sm:$0xff] }
 0x34d   : > { %v7147_v43 = vpop.permute.xlu0 %2287  ;;  %2596 = vperm.xlu1 %4832, %v9704_v14  }
 0x34e   : > { %9703 = vst [vmem:[#allocation210_spill] sm:$0xff] %v7147_v43  ;;  %v7151_v44 = vpop.permute.xlu1 %2293 }
 0x34f   : > { %9706 = vst [vmem:[#allocation211_spill] sm:$0xff] %v7151_v44  ;;  %v9717_v44 = vld [vmem:[#allocation94_spill] sm:$0xff] }
 0x350   : > { %2600 = vperm.xlu0 %4831, %v9705_v34   ;;  %v9716_v34 = vld [vmem:[#allocation95_spill] sm:$0xff] }
 0x351   : > { %v7153_v23 = vpop.permute.xlu0 %2291  ;;  %2604 = vperm.xlu1 %4832, %v9708_v24  }
 0x352   : > { %9707 = vst [vmem:[#allocation212_spill] sm:$0xff] %v7153_v23  ;;  %v7157_v33 = vpop.permute.xlu1 %2297 }
 0x353   : > { %9710 = vst [vmem:[#allocation213_spill] sm:$0xff] %v7157_v33  ;;  %v9721_v33 = vld [vmem:[#allocation96_spill] sm:$0xff] }
 0x354   : > { %2608 = vperm.xlu0 %4831, %v9709_v15   ;;  %v9720_v15 = vld [vmem:[#allocation97_spill] sm:$0xff] }
 0x355   : > { %v7159_v30 = vpop.permute.xlu0 %2295  ;;  %2612 = vperm.xlu1 %4832, %v9712_v61  }
 0x356   : > { %9711 = vst [vmem:[#allocation214_spill] sm:$0xff] %v7159_v30  ;;  %v7163_v43 = vpop.permute.xlu1 %2301 }
 0x357   : > { %9714 = vst [vmem:[#allocation215_spill] sm:$0xff] %v7163_v43  ;;  %v9725_v43 = vld [vmem:[#allocation98_spill] sm:$0xff] }
 0x358   : > { %2616 = vperm.xlu0 %4831, %v9713_v56   ;;  %v9724_v56 = vld [vmem:[#allocation99_spill] sm:$0xff] }
 0x359   : > { %v7165_v14 = vpop.permute.xlu0 %2299  ;;  %2620 = vperm.xlu1 %4832, %v9716_v34  }
 0x35a   : > { %9715 = vst [vmem:[#allocation216_spill] sm:$0xff] %v7165_v14  ;;  %v7169_v23 = vpop.permute.xlu1 %2305 }
 0x35b   : > { %9718 = vst [vmem:[#allocation217_spill] sm:$0xff] %v7169_v23  ;;  %v9729_v23 = vld [vmem:[#allocation100_spill] sm:$0xff] }
 0x35c   : > { %2624 = vperm.xlu0 %4831, %v9717_v44   ;;  %v9728_v44 = vld [vmem:[#allocation101_spill] sm:$0xff] }
 0x35d   : > { %v7171_v24 = vpop.permute.xlu0 %2303  ;;  %2628 = vperm.xlu1 %4832, %v9720_v15  }
 0x35e   : > { %9719 = vst [vmem:[#allocation218_spill] sm:$0xff] %v7171_v24  ;;  %v7175_v30 = vpop.permute.xlu1 %2309 }
 0x35f   : > { %9722 = vst [vmem:[#allocation219_spill] sm:$0xff] %v7175_v30  ;;  %v9733_v30 = vld [vmem:[#allocation102_spill] sm:$0xff] }
 0x360   : > { %2632 = vperm.xlu0 %4831, %v9721_v33   ;;  %v9732_v33 = vld [vmem:[#allocation103_spill] sm:$0xff] }
 0x361   : > { %v7177_v61 = vpop.permute.xlu0 %2307  ;;  %2636 = vperm.xlu1 %4832, %v9724_v56  }
 0x362   : > { %9723 = vst [vmem:[#allocation220_spill] sm:$0xff] %v7177_v61  ;;  %v7181_v14 = vpop.permute.xlu1 %2313 }
 0x363   : > { %9726 = vst [vmem:[#allocation221_spill] sm:$0xff] %v7181_v14  ;;  %v9737_v14 = vld [vmem:[#allocation104_spill] sm:$0xff] }
 0x364   : > { %2640 = vperm.xlu0 %4831, %v9725_v43   ;;  %v9736_v43 = vld [vmem:[#allocation105_spill] sm:$0xff] }
 0x365   : > { %v7183_v34 = vpop.permute.xlu0 %2311  ;;  %2644 = vperm.xlu1 %4832, %v9728_v44  }
 0x366   : > { %9727 = vst [vmem:[#allocation222_spill] sm:$0xff] %v7183_v34  ;;  %v7187_v24 = vpop.permute.xlu1 %2317 }
 0x367   : > { %9730 = vst [vmem:[#allocation223_spill] sm:$0xff] %v7187_v24  ;;  %v9741_v24 = vld [vmem:[#allocation106_spill] sm:$0xff] }
 0x368   : > { %2648 = vperm.xlu0 %4831, %v9729_v23   ;;  %v9740_v23 = vld [vmem:[#allocation42_spill] sm:$0xff] }
 0x369   : > { %v7189_v15 = vpop.permute.xlu0 %2315  ;;  %2652 = vperm.xlu1 %4832, %v9732_v33  }
 0x36a   : > { %9731 = vst [vmem:[#allocation224_spill] sm:$0xff] %v7189_v15  ;;  %v7193_v61 = vpop.permute.xlu1 %2321 }
 0x36b   : > { %9734 = vst [vmem:[#allocation225_spill] sm:$0xff] %v7193_v61  ;;  %v9745_v61 = vld [vmem:[#allocation107_spill] sm:$0xff] }
 0x36c   : > { %2656 = vperm.xlu0 %4831, %v9733_v30   ;;  %v9744_v30 = vld [vmem:[#allocation108_spill] sm:$0xff] }
 0x36d   : > { %v7195_v56 = vpop.permute.xlu0 %2319  ;;  %2660 = vperm.xlu1 %4832, %v9736_v43  }
 0x36e   : > { %9735 = vst [vmem:[#allocation226_spill] sm:$0xff] %v7195_v56  ;;  %v7199_v34 = vpop.permute.xlu1 %2325 }
 0x36f   : > { %9738 = vst [vmem:[#allocation227_spill] sm:$0xff] %v7199_v34  ;;  %v9749_v34 = vld [vmem:[#allocation109_spill] sm:$0xff] }
 0x370   : > { %2664 = vperm.xlu0 %4831, %v9737_v14   ;;  %v9748_v14 = vld [vmem:[#allocation110_spill] sm:$0xff] }
 0x371   : > { %v7201_v44 = vpop.permute.xlu0 %2323  ;;  %2668 = vperm.xlu1 %4832, %v9740_v23  }
 0x372   : > { %9739 = vst [vmem:[#allocation228_spill] sm:$0xff] %v7201_v44  ;;  %v7205_v15 = vpop.permute.xlu1 %2329 }
 0x373   : > { %9742 = vst [vmem:[#allocation229_spill] sm:$0xff] %v7205_v15  ;;  %v9753_v15 = vld [vmem:[#allocation111_spill] sm:$0xff] }
 0x374   : > { %2672 = vperm.xlu0 %4831, %v9741_v24   ;;  %v9752_v24 = vld [vmem:[#allocation112_spill] sm:$0xff] }
 0x375   : > { %v7207_v33 = vpop.permute.xlu0 %2327  ;;  %2676 = vperm.xlu1 %4832, %v9744_v30  }
 0x376   : > { %9743 = vst [vmem:[#allocation230_spill] sm:$0xff] %v7207_v33  ;;  %v7211_v56 = vpop.permute.xlu1 %2333 }
 0x377   : > { %9746 = vst [vmem:[#allocation231_spill] sm:$0xff] %v7211_v56  ;;  %v9757_v56 = vld [vmem:[#allocation113_spill] sm:$0xff] }
 0x378   : > { %2680 = vperm.xlu0 %4831, %v9745_v61   ;;  %v9756_v61 = vld [vmem:[#allocation114_spill] sm:$0xff] }
 0x379   : > { %v7213_v43 = vpop.permute.xlu0 %2331  ;;  %2684 = vperm.xlu1 %4832, %v9748_v14  }
 0x37a   : > { %9747 = vst [vmem:[#allocation232_spill] sm:$0xff] %v7213_v43  ;;  %v7217_v44 = vpop.permute.xlu1 %2337 }
 0x37b   : > { %9750 = vst [vmem:[#allocation233_spill] sm:$0xff] %v7217_v44  ;;  %v9761_v44 = vld [vmem:[#allocation115_spill] sm:$0xff] }
 0x37c   : > { %2688 = vperm.xlu0 %4831, %v9749_v34   ;;  %v9760_v34 = vld [vmem:[#allocation116_spill] sm:$0xff] }
 0x37d   : > { %v7219_v23 = vpop.permute.xlu0 %2335  ;;  %2692 = vperm.xlu1 %4832, %v9752_v24  }
 0x37e   : > { %9751 = vst [vmem:[#allocation234_spill] sm:$0xff] %v7219_v23  ;;  %v7223_v33 = vpop.permute.xlu1 %2341 }
 0x37f   : > { %9754 = vst [vmem:[#allocation235_spill] sm:$0xff] %v7223_v33  ;;  %v9765_v33 = vld [vmem:[#allocation117_spill] sm:$0xff] }
 0x380   : > { %2696 = vperm.xlu0 %4831, %v9753_v15   ;;  %v9764_v15 = vld [vmem:[#allocation118_spill] sm:$0xff] }
 0x381   : > { %v7225_v30 = vpop.permute.xlu0 %2339  ;;  %2700 = vperm.xlu1 %4832, %v9756_v61  }
 0x382   : > { %9755 = vst [vmem:[#allocation236_spill] sm:$0xff] %v7225_v30  ;;  %v7229_v43 = vpop.permute.xlu1 %2345 }
 0x383   : > { %9758 = vst [vmem:[#allocation237_spill] sm:$0xff] %v7229_v43  ;;  %v9768_v43 = vld [vmem:[#allocation119_spill] sm:$0xff] }
 0x384   : > { %2704 = vperm.xlu0 %4831, %v9757_v56   ;;  %v9767_v56 = vld [vmem:[#allocation120_spill] sm:$0xff] }
 0x385   : > { %v7231_v14 = vpop.permute.xlu0 %2343  ;;  %2708 = vperm.xlu1 %4832, %v9760_v34  }
 0x386   : > { %9759 = vst [vmem:[#allocation238_spill] sm:$0xff] %v7231_v14  ;;  %v7235_v23 = vpop.permute.xlu1 %2349 }
 0x387   : > { %9762 = vst [vmem:[#allocation239_spill] sm:$0xff] %v7235_v23  ;;  %v9770_v23 = vld [vmem:[#allocation121_spill] sm:$0xff] }
 0x388   : > { %2712 = vperm.xlu0 %4831, %v9761_v44   ;;  %v9769_v44 = vld [vmem:[#allocation122_spill] sm:$0xff] }
 0x389   : > { %v7237_v24 = vpop.permute.xlu0 %2347  ;;  %2716 = vperm.xlu1 %4832, %v9764_v15  }
 0x38a   : > { %9763 = vst [vmem:[#allocation240_spill] sm:$0xff] %v7237_v24  ;;  %v7241_v30 = vpop.permute.xlu1 %2353 }
 0x38c   : > { %2720 = vperm.xlu0 %4831, %v9765_v33   ;;  %v9771_v33 = vld [vmem:[#allocation123_spill] sm:$0xff] }
 0x38d   : > { %v7243_v61 = vpop.permute.xlu0 %2351  ;;  %2724 = vperm.xlu1 %4832, %v9767_v56  }
 0x38e   : > { %9766 = vst [vmem:[#allocation241_spill] sm:$0xff] %v7243_v61  ;;  %v7247_v14 = vpop.permute.xlu1 %2357 }
 0x390   : > { %2728 = vperm.xlu0 %4831, %v9768_v43  }
 0x391   : > { %v7249_v34 = vpop.permute.xlu0 %2355  ;;  %2732 = vperm.xlu1 %4832, %v9769_v44  }
 0x392   : > { %v7253_v24 = vpop.permute.xlu1 %2361 }
 0x394   : > { %2736 = vperm.xlu0 %4831, %v9770_v23  }
 0x395   : > { %v7255_v15 = vpop.permute.xlu0 %2359  ;;  %2740 = vperm.xlu1 %4832, %v6801_v60  }
 0x398   : > { %2744 = vperm.xlu0 %4831, %v9771_v33   ;;  %v7259_v61 = vpop.permute.xlu1 %2496 }
 0x399   : > { %9772 = vst [vmem:[#allocation123_spill] sm:$0xff] %v7259_v61  ;;  %2812 = vperm.xlu1 %4832, %v5789_v9  }
 0x39b   : > { %v7261_v56 = vpop.permute.xlu0 %2492 }
 0x39c   : > { %9773 = vst [vmem:[#allocation242_spill] sm:$0xff] %v7261_v56  ;;  %2816 = vperm.xlu0 %4831, %v5794_v35   ;;  %v7265_v43 = vpop.permute.xlu1 %2500 }
 0x39d   : > { %9774 = vst [vmem:[#allocation243_spill] sm:$0xff] %v7265_v43  ;;  %2820 = vperm.xlu1 %4832, %v5799_v40  }
 0x39f   : > { %v7267_v44 = vpop.permute.xlu0 %2504 }
 0x3a0   : > { %9775 = vst [vmem:[#allocation244_spill] sm:$0xff] %v7267_v44  ;;  %2824 = vperm.xlu0 %4831, %v5804_v20   ;;  %v7271_v23 = vpop.permute.xlu1 %2508 }
 0x3a1   : > { %9776 = vst [vmem:[#allocation245_spill] sm:$0xff] %v7271_v23  ;;  %2828 = vperm.xlu1 %4832, %v5809_v31  }
 0x3a3   : > { %v7273_v60 = vpop.permute.xlu0 %2512 }
 0x3a4   : > { %9777 = vst [vmem:[#allocation246_spill] sm:$0xff] %v7273_v60  ;;  %2832 = vperm.xlu0 %4831, %v5814_v59   ;;  %v7277_v61 = vpop.permute.xlu1 %2516 }
 0x3a5   : > { %9778 = vst [vmem:[#allocation247_spill] sm:$0xff] %v7277_v61  ;;  %2836 = vperm.xlu1 %4832, %v5819_v19  }
 0x3a7   : > { %v7279_v56 = vpop.permute.xlu0 %2520 }
 0x3a8   : > { %9779 = vst [vmem:[#allocation248_spill] sm:$0xff] %v7279_v56  ;;  %2840 = vperm.xlu0 %4831, %v5824_v47   ;;  %v7283_v44 = vpop.permute.xlu1 %2524 }
 0x3a9   : > { %9780 = vst [vmem:[#allocation249_spill] sm:$0xff] %v7283_v44  ;;  %2844 = vperm.xlu1 %4832, %v5829_v51  }
 0x3ab   : > { %v7285_v43 = vpop.permute.xlu0 %2528 }
 0x3ac   : > { %9781 = vst [vmem:[#allocation250_spill] sm:$0xff] %v7285_v43  ;;  %2848 = vperm.xlu0 %4831, %v5834_v52   ;;  %v7289_v60 = vpop.permute.xlu1 %2532 }
 0x3ad   : > { %9782 = vst [vmem:[#allocation251_spill] sm:$0xff] %v7289_v60  ;;  %2852 = vperm.xlu1 %4832, %v5839_v53  }
 0x3af   : > { %v7291_v23 = vpop.permute.xlu0 %2536 }
 0x3b0   : > { %9783 = vst [vmem:[#allocation252_spill] sm:$0xff] %v7291_v23  ;;  %2856 = vperm.xlu0 %4831, %v5844_v63   ;;  %v7295_v56 = vpop.permute.xlu1 %2540 }
 0x3b1   : > { %9784 = vst [vmem:[#allocation253_spill] sm:$0xff] %v7295_v56  ;;  %2860 = vperm.xlu1 %4832, %v5849_v0  }
 0x3b3   : > { %v7297_v61 = vpop.permute.xlu0 %2544 }
 0x3b4   : > { %9785 = vst [vmem:[#allocation254_spill] sm:$0xff] %v7297_v61  ;;  %2864 = vperm.xlu0 %4831, %v5854_v46   ;;  %v7301_v43 = vpop.permute.xlu1 %2548 }
 0x3b5   : > { %9786 = vst [vmem:[#allocation255_spill] sm:$0xff] %v7301_v43  ;;  %2868 = vperm.xlu1 %4832, %v5859_v57  }
 0x3b7   : > { %v7303_v44 = vpop.permute.xlu0 %2552 }
 0x3b8   : > { %9787 = vst [vmem:[#allocation256_spill] sm:$0xff] %v7303_v44  ;;  %2872 = vperm.xlu0 %4831, %v5864_v58   ;;  %v7307_v23 = vpop.permute.xlu1 %2556 }
 0x3b9   : > { %9788 = vst [vmem:[#allocation257_spill] sm:$0xff] %v7307_v23  ;;  %2876 = vperm.xlu1 %4832, %v9526_v29  }
 0x3bb   : > { %v7309_v60 = vpop.permute.xlu0 %2560 }
 0x3bc   : > { %9789 = vst [vmem:[#allocation258_spill] sm:$0xff] %v7309_v60  ;;  %2880 = vperm.xlu0 %4831, %v5874_v1   ;;  %v7313_v61 = vpop.permute.xlu1 %2564 }
 0x3bd   : > { %9790 = vst [vmem:[#allocation259_spill] sm:$0xff] %v7313_v61  ;;  %2884 = vperm.xlu1 %4832, %v9529_v45  }
 0x3bf   : > { %v7315_v56 = vpop.permute.xlu0 %2568 }
 0x3c0   : > { %9791 = vst [vmem:[#allocation260_spill] sm:$0xff] %v7315_v56  ;;  %2888 = vperm.xlu0 %4831, %v5884_v7   ;;  %v7319_v44 = vpop.permute.xlu1 %2572 }
 0x3c1   : > { %9792 = vst [vmem:[#allocation261_spill] sm:$0xff] %v7319_v44  ;;  %2892 = vperm.xlu1 %4832, %v9532_v11  }
 0x3c3   : > { %v7321_v43 = vpop.permute.xlu0 %2576 }
 0x3c4   : > { %9793 = vst [vmem:[#allocation262_spill] sm:$0xff] %v7321_v43  ;;  %2896 = vperm.xlu0 %4831, %v5894_v12   ;;  %v7325_v60 = vpop.permute.xlu1 %2580 }
 0x3c5   : > { %9794 = vst [vmem:[#allocation263_spill] sm:$0xff] %v7325_v60  ;;  %2900 = vperm.xlu1 %4832, %v5899_v16   ;;  %v9800_v60 = vld [vmem:[#allocation30_spill] sm:$0xff] }
 0x3c7   : > { %v7327_v23 = vpop.permute.xlu0 %2584 }
 0x3c8   : > { %9795 = vst [vmem:[#allocation264_spill] sm:$0xff] %v7327_v23  ;;  %2904 = vperm.xlu0 %4831, %v5904_v17   ;;  %v7331_v56 = vpop.permute.xlu1 %2588 }
 0x3c9   : > { %9796 = vst [vmem:[#allocation265_spill] sm:$0xff] %v7331_v56  ;;  %2908 = vperm.xlu1 %4832, %v5909_v21  }
 0x3cb   : > { %v7333_v61 = vpop.permute.xlu0 %2592 }
 0x3cc   : > { %9797 = vst [vmem:[#allocation266_spill] sm:$0xff] %v7333_v61  ;;  %2912 = vperm.xlu0 %4831, %v5914_v10   ;;  %v7337_v43 = vpop.permute.xlu1 %2596 }
 0x3cd   : > { %9798 = vst [vmem:[#allocation267_spill] sm:$0xff] %v7337_v43  ;;  %2916 = vperm.xlu1 %4832, %v5919_v41  }
 0x3cf   : > { %v7339_v44 = vpop.permute.xlu0 %2600 }
 0x3d0   : > { %9799 = vst [vmem:[#allocation268_spill] sm:$0xff] %v7339_v44  ;;  %2920 = vperm.xlu0 %4831, %v9800_v60   ;;  %v7343_v23 = vpop.permute.xlu1 %2604 }
 0x3d1   : > { %9801 = vst [vmem:[#allocation269_spill] sm:$0xff] %v7343_v23  ;;  %2924 = vperm.xlu1 %4832, %v5929_v28   ;;  %v9807_v23 = vld [vmem:[#allocation37_spill] sm:$0xff] }
 0x3d3   : > { %v7345_v12 = vpop.permute.xlu0 %2608 }
 0x3d4   : > { %9802 = vst [vmem:[#allocation270_spill] sm:$0xff] %v7345_v12  ;;  %2928 = vperm.xlu0 %4831, %v5934_v32   ;;  %v7349_v61 = vpop.permute.xlu1 %2612  ;;  %v9810_v32 = vld [vmem:[#allocation38_spill] sm:$0xff] }
 0x3d5   : > { %9803 = vst [vmem:[#allocation271_spill] sm:$0xff] %v7349_v61  ;;  %2932 = vperm.xlu1 %4832, %v9614_v27   ;;  %v9811_v61 = vld [vmem:[#allocation23_spill] sm:$0xff] }
 0x3d7   : > { %v7351_v56 = vpop.permute.xlu0 %2616 }
 0x3d8   : > { %9804 = vst [vmem:[#allocation272_spill] sm:$0xff] %v7351_v56  ;;  %2936 = vperm.xlu0 %4831, %v5944_v37   ;;  %v7355_v44 = vpop.permute.xlu1 %2620 }
 0x3d9   : > { %9805 = vst [vmem:[#allocation273_spill] sm:$0xff] %v7355_v44  ;;  %2940 = vperm.xlu1 %4832, %v5949_v38   ;;  %v9814_v44 = vld [vmem:[#allocation24_spill] sm:$0xff] }
 0x3db   : > { %v7357_v43 = vpop.permute.xlu0 %2624 }
 0x3dc   : > { %9806 = vst [vmem:[#allocation274_spill] sm:$0xff] %v7357_v43  ;;  %2944 = vperm.xlu0 %4831, %v9807_v23   ;;  %v7361_v12 = vpop.permute.xlu1 %2628 }
 0x3dd   : > { %9808 = vst [vmem:[#allocation275_spill] sm:$0xff] %v7361_v12  ;;  %2948 = vperm.xlu1 %4832, %v9810_v32   ;;  %v9817_v12 = vld [vmem:[#allocation26_spill] sm:$0xff] }
 0x3df   : > { %v7363_v60 = vpop.permute.xlu0 %2632 }
 0x3e0   : > { %9809 = vst [vmem:[#allocation276_spill] sm:$0xff] %v7363_v60  ;;  %2952 = vperm.xlu0 %4831, %v9811_v61   ;;  %v7367_v56 = vpop.permute.xlu1 %2636 }
 0x3e1   : > { %9812 = vst [vmem:[#allocation38_spill] sm:$0xff] %v7367_v56  ;;  %2956 = vperm.xlu1 %4832, %v5969_v22  }
 0x3e3   : > { %v7369_v27 = vpop.permute.xlu0 %2640 }
 0x3e4   : > { %9813 = vst [vmem:[#allocation23_spill] sm:$0xff] %v7369_v27  ;;  %2960 = vperm.xlu0 %4831, %v9814_v44   ;;  %v7373_v43 = vpop.permute.xlu1 %2644 }
 0x3e5   : > { %9815 = vst [vmem:[#allocation24_spill] sm:$0xff] %v7373_v43  ;;  %2964 = vperm.xlu1 %4832, %v9624_v5  }
 0x3e7   : > { %v7375_v37 = vpop.permute.xlu0 %2648 }
 0x3e8   : > { %9816 = vst [vmem:[#allocation277_spill] sm:$0xff] %v7375_v37  ;;  %2968 = vperm.xlu0 %4831, %v9817_v12   ;;  %v7379_v60 = vpop.permute.xlu1 %2652 }
 0x3e9   : > { %9818 = vst [vmem:[#allocation26_spill] sm:$0xff] %v7379_v60  ;;  %2972 = vperm.xlu1 %4832, %v9628_v55  }
 0x3eb   : > { %v7381_v23 = vpop.permute.xlu0 %2656 }
 0x3ec   : > { %9819 = vst [vmem:[#allocation278_spill] sm:$0xff] %v7381_v23  ;;  %2976 = vperm.xlu0 %4831, %v9627_v54   ;;  %v7385_v27 = vpop.permute.xlu1 %2660  ;;  %v9858_v54 = vld [vmem:[#allocation187_spill] sm:$0xff] }
 0x3ed   : > { %9820 = vst [vmem:[#allocation279_spill] sm:$0xff] %v7385_v27  ;;  %2980 = vperm.xlu1 %4832, %v9631_v6  }
 0x3ef   : > { %v7387_v56 = vpop.permute.xlu0 %2664 }
 0x3f0   : > { %9821 = vst [vmem:[#allocation280_spill] sm:$0xff] %v7387_v56  ;;  %2984 = vperm.xlu0 %4831, %v9555_v39   ;;  %v7391_v37 = vpop.permute.xlu1 %2668  ;;  %v9853_v39 = vld [vmem:[#allocation55_spill] sm:$0xff] }
 0x3f1   : > { %9822 = vst [vmem:[#allocation281_spill] sm:$0xff] %v7391_v37  ;;  %2988 = vperm.xlu1 %4832, %v9561_v36  }
 0x3f3   : > { %v7393_v43 = vpop.permute.xlu0 %2672 }
 0x3f4   : > { %9823 = vst [vmem:[#allocation282_spill] sm:$0xff] %v7393_v43  ;;  %2992 = vperm.xlu0 %4831, %v9559_v18   ;;  %v7397_v23 = vpop.permute.xlu1 %2676 }
 0x3f5   : > { %9824 = vst [vmem:[#allocation283_spill] sm:$0xff] %v7397_v23  ;;  %2996 = vperm.xlu1 %4832, %v9564_v8  }
 0x3f7   : > { %v7399_v60 = vpop.permute.xlu0 %2680 }
 0x3f8   : > { %9825 = vst [vmem:[#allocation284_spill] sm:$0xff] %v7399_v60  ;;  %3000 = vperm.xlu0 %4831, %v6024_v48   ;;  %v7403_v56 = vpop.permute.xlu1 %2684 }
 0x3f9   : > { %9826 = vst [vmem:[#allocation285_spill] sm:$0xff] %v7403_v56  ;;  %3004 = vperm.xlu1 %4832, %v6029_v49   ;;  %v9832_v56 = vld [vmem:[#allocation46_spill] sm:$0xff]  ;;  %v9852_v49 = vld [vmem:[#allocation128_spill] sm:$0xff] }
 0x3fb   : > { %v7405_v27 = vpop.permute.xlu0 %2688 }
 0x3fc   : > { %9827 = vst [vmem:[#allocation286_spill] sm:$0xff] %v7405_v27  ;;  %3008 = vperm.xlu0 %4831, %v6034_v50   ;;  %v7409_v43 = vpop.permute.xlu1 %2692  ;;  %v9835_v50 = vld [vmem:[#allocation47_spill] sm:$0xff] }
 0x3fd   : > { %9828 = vst [vmem:[#allocation287_spill] sm:$0xff] %v7409_v43  ;;  %3012 = vperm.xlu1 %4832, %v6039_v25   ;;  %v9836_v43 = vld [vmem:[#allocation48_spill] sm:$0xff] }
 0x3ff   : > { %v7411_v37 = vpop.permute.xlu0 %2696 }
 0x400   : > { %9829 = vst [vmem:[#allocation288_spill] sm:$0xff] %v7411_v37  ;;  %3016 = vperm.xlu0 %4831, %v6044_v62   ;;  %v7415_v60 = vpop.permute.xlu1 %2700  ;;  %v9839_v62 = vld [vmem:[#allocation49_spill] sm:$0xff] }
 0x401   : > { %9830 = vst [vmem:[#allocation289_spill] sm:$0xff] %v7415_v60  ;;  %3020 = vperm.xlu1 %4832, %v6049_v2   ;;  %v9840_v60 = vld [vmem:[#allocation50_spill] sm:$0xff] }
 0x403   : > { %v7417_v23 = vpop.permute.xlu0 %2704 }
 0x404   : > { %9831 = vst [vmem:[#allocation290_spill] sm:$0xff] %v7417_v23  ;;  %3024 = vperm.xlu0 %4831, %v9832_v56   ;;  %v7421_v27 = vpop.permute.xlu1 %2708  ;;  %v9843_v56 = vld [vmem:[#allocation51_spill] sm:$0xff] }
 0x405   : > { %9833 = vst [vmem:[#allocation291_spill] sm:$0xff] %v7421_v27  ;;  %3028 = vperm.xlu1 %4832, %v9835_v50   ;;  %v9844_v27 = vld [vmem:[#allocation52_spill] sm:$0xff] }
 0x407   : > { %v7423_v48 = vpop.permute.xlu0 %2712 }
 0x408   : > { %9834 = vst [vmem:[#allocation292_spill] sm:$0xff] %v7423_v48  ;;  %3032 = vperm.xlu0 %4831, %v9836_v43   ;;  %v7427_v37 = vpop.permute.xlu1 %2716  ;;  %v9847_v43 = vld [vmem:[#allocation53_spill] sm:$0xff] }
 0x409   : > { %9837 = vst [vmem:[#allocation293_spill] sm:$0xff] %v7427_v37  ;;  %3036 = vperm.xlu1 %4832, %v9839_v62   ;;  %v9848_v37 = vld [vmem:[#allocation54_spill] sm:$0xff] }
 0x40b   : > { %v7429_v25 = vpop.permute.xlu0 %2720 }
 0x40c   : > { %9838 = vst [vmem:[#allocation294_spill] sm:$0xff] %v7429_v25  ;;  %3040 = vperm.xlu0 %4831, %v9840_v60   ;;  %v7433_v23 = vpop.permute.xlu1 %2724  ;;  %v4835_v60 = vld [vmem:[#allocation4] sm:$0xff] }
 0x40d   : > { %9841 = vst [vmem:[#allocation295_spill] sm:$0xff] %v7433_v23  ;;  %3044 = vperm.xlu1 %4832, %v9843_v56   ;;  %v9851_v23 = vld [vmem:[#allocation126_spill] sm:$0xff] }
 0x40e   : > { %v1723_v18 = vmul.f32 %v4835_v60, %v9851_v23  ;;  %v9859_v60 = vld [vmem:[#allocation127_spill] sm:$0xff] }
 0x40f   : > { %v7435_v2 = vpop.permute.xlu0 %2728  ;;  %v1726_v23 = vmul.f32 %v9859_v60, %v9858_v54  ;;  %v4837_v54 = vld [vmem:[#allocation4 + $0x28] sm:$0xff] }
 0x410   : > { %9842 = vst [vmem:[#allocation296_spill] sm:$0xff] %v7435_v2  ;;  %3048 = vperm.xlu0 %4831, %v9844_v27   ;;  %v7439_v48 = vpop.permute.xlu1 %2732  ;;  %v4836_v2 = vld [vmem:[#allocation4 + $0x8] sm:$0xff] }
 0x411   : > { %9845 = vst [vmem:[#allocation297_spill] sm:$0xff] %v7439_v48  ;;  %3052 = vperm.xlu1 %4832, %v9847_v43   ;;  %v1724_v56 = vmul.f32 %v4836_v2, %v9852_v49  ;;  %v9854_v27 = vld [vmem:[#allocation56_spill] sm:$0xff]  ;;  %v7457_v48 = vadd.f32 %v7069_v26, %v1723_v18 }
 0x413   : > { %v7441_v50 = vpop.permute.xlu0 %2736 }
 0x414   : > { %9846 = vst [vmem:[#allocation298_spill] sm:$0xff] %v7441_v50  ;;  %3056 = vperm.xlu0 %4831, %v9848_v37   ;;  %v7445_v25 = vpop.permute.xlu1 %2740  ;;  %v7454_v50 = vadd.f32 %v7067_v4, %v1724_v56  ;;  %v9856_v37 = vld [vmem:[#allocation186_spill] sm:$0xff]  ;;  %v7466_v4 = vadd.f32 %v7073_v13, %v1726_v23 }
 0x415   : > { %9849 = vst [vmem:[#allocation299_spill] sm:$0xff] %v7445_v25  ;;  %3060 = vperm.xlu1 %4832, %v9853_v39   ;;  %v9857_v25 = vld [vmem:[#allocation125_spill] sm:$0xff]  ;;  %v4985_v39 = vmov 2   ;;  %v9862_v56 = vld [vmem:[#allocation130_spill] sm:$0xff] }
 0x416   : > { %9855 = vst [vmem:[#allocation126_spill] sm:$0xff] %v7454_v50  ;;  %v1725_v43 = vmul.f32 %v9857_v25, %v9856_v37  ;;  %9860 = vst [vmem:[#allocation128_spill] sm:$0xff] %v7466_v4 }
 0x417   : > { %v7447_v62 = vpop.permute.xlu0 %2744 }
 0x418   : > { %9850 = vst [vmem:[#allocation300_spill] sm:$0xff] %v7447_v62  ;;  %3064 = vperm.xlu0 %4831, %v9854_v27   ;;  %v2813_v62 = vpop.permute.xlu1 %2812  ;;  %v7469_v18 = vadd.f32 %v7075_v3, %v1725_v43  ;;  %v9864_v43 = vld [vmem:[#allocation188_spill] sm:$0xff] }
 0x419   : > { %v3067_v49 = vmul.f32 %v2813_v62, %v7457_v48  ;;  %4833 = vset.pattern.permute.xlu1 %v4985_v39  ;;  %v9861_v62 = vld [vmem:[#allocation129_spill] sm:$0xff] }
 0x41a   : > { %v1728_v26 = vmul.f32 %v4837_v54, %v9861_v62  ;;  %v4839_v54 = vld [vmem:[#allocation4 + $0x38] sm:$0xff]  ;;  %v9866_v62 = vld [vmem:[#allocation131_spill] sm:$0xff] }
 0x41b   : > { %v2817_v8 = vpop.permute.xlu0 %2816  ;;  %3195 = vrot.lane.b32.xlu1 %v3067_v49, %s4986_s7  ;;  %v1730_v27 = vmul.f32 %v4839_v54, %v9866_v62  ;;  %v4841_v54 = vld [vmem:[#allocation4 + $0x48] sm:$0xff]  ;;  %v9872_v62 = vld [vmem:[#allocation133_spill] sm:$0xff] }
 0x41c   : > { %v3068_v2 = vmul.f32 %v2817_v8, %v7454_v50  ;;  %4834 = vset.pattern.permute.xlu0 %v4985_v39  ;;  %v2821_v37 = vpop.permute.xlu1 %2820  ;;  %v4838_v8 = vld [vmem:[#allocation4 + $0x20] sm:$0xff]  ;;  %v7478_v3 = vadd.f32 %v7079_v42, %v1728_v26  ;;  %v9868_v26 = vld [vmem:[#allocation189_spill] sm:$0xff]  ;;  %v1732_v50 = vmul.f32 %v4841_v54, %v9872_v62  ;;  %v4843_v54 = vld [vmem:[#allocation4 + $0x58] sm:$0xff] }
 0x41d   : > { %v1727_v60 = vmul.f32 %v4838_v8, %v9862_v56  ;;  %v3069_v39 = vmul.f32 %v2821_v37, %v7469_v18  ;;  %v4840_v8 = vld [vmem:[#allocation4 + $0x30] sm:$0xff]  ;;  %v9867_v56 = vld [vmem:[#allocation132_spill] sm:$0xff]  ;;  %v9878_v62 = vld [vmem:[#allocation135_spill] sm:$0xff] }
 0x41e   : > { %3197 = vrot.lane.b32.xlu0 %v3068_v2, %s4986_s7  ;;  %9863 = vst [vmem:[#allocation186_spill] sm:$0xff] %v7478_v3  ;;  %v1729_v37 = vmul.f32 %v4840_v8, %v9867_v56  ;;  %v4842_v8 = vld [vmem:[#allocation4 + $0x40] sm:$0xff]  ;;  %v9873_v56 = vld [vmem:[#allocation134_spill] sm:$0xff] }
 0x41f   : > { %v2825_v25 = vpop.permute.xlu0 %2824  ;;  %v7481_v23 = vadd.f32 %v9864_v43, %v1727_v60  ;;  %3199 = vrot.lane.b32.xlu1 %v3069_v39, %s4986_s7  ;;  %v9870_v60 = vld [vmem:[#allocation190_spill] sm:$0xff] }
 0x420   : > { %v3070_v13 = vmul.f32 %v2825_v25, %v7466_v4  ;;  %v2829_v49 = vpop.permute.xlu1 %2828  ;;  %v7490_v4 = vadd.f32 %v9868_v26, %v1730_v27  ;;  %v7493_v43 = vadd.f32 %v9870_v60, %v1729_v37  ;;  %v9874_v26 = vld [vmem:[#allocation191_spill] sm:$0xff]  ;;  %v9876_v37 = vld [vmem:[#allocation192_spill] sm:$0xff] }
 0x421   : > { %9865 = vst [vmem:[#allocation125_spill] sm:$0xff] %v7481_v23  ;;  %v3071_v25 = vmul.f32 %v2829_v49, %v7481_v23  ;;  %v1731_v49 = vmul.f32 %v4842_v8, %v9873_v56  ;;  %v1734_v23 = vmul.f32 %v4843_v54, %v9878_v62  ;;  %v4844_v8 = vld [vmem:[#allocation4 + $0x50] sm:$0xff]  ;;  %v9879_v56 = vld [vmem:[#allocation136_spill] sm:$0xff] }
 0x422   : > { %3201 = vrot.lane.b32.xlu0 %v3070_v13, %s4986_s7  ;;  %9869 = vst [vmem:[#allocation187_spill] sm:$0xff] %v7490_v4  ;;  %9871 = vst [vmem:[#allocation127_spill] sm:$0xff] %v7493_v43  ;;  %v4845_v54 = vld [vmem:[#allocation4 + $0x68] sm:$0xff]  ;;  %v9884_v62 = vld [vmem:[#allocation137_spill] sm:$0xff] }
 0x423   : > { %v2833_v2 = vpop.permute.xlu0 %2832  ;;  %3203 = vrot.lane.b32.xlu1 %v3071_v25, %s4986_s7  ;;  %v7505_v60 = vadd.f32 %v9876_v37, %v1731_v49  ;;  %v9882_v49 = vld [vmem:[#allocation194_spill] sm:$0xff] }
 0x424   : > { %v3072_v42 = vmul.f32 %v2833_v2, %v7478_v3  ;;  %v2837_v39 = vpop.permute.xlu1 %2836  ;;  %v7502_v3 = vadd.f32 %v9874_v26, %v1732_v50  ;;  %v9880_v26 = vld [vmem:[#allocation193_spill] sm:$0xff] }
 0x425   : > { %v3073_v2 = vmul.f32 %v2837_v39, %v7493_v43  ;;  %9877 = vst [vmem:[#allocation130_spill] sm:$0xff] %v7505_v60  ;;  %v1733_v39 = vmul.f32 %v4844_v8, %v9879_v56  ;;  %v1736_v43 = vmul.f32 %v4845_v54, %v9884_v62  ;;  %v4846_v8 = vld [vmem:[#allocation4 + $0x60] sm:$0xff]  ;;  %v9885_v56 = vld [vmem:[#allocation138_spill] sm:$0xff] }
 0x426   : > { %3205 = vrot.lane.b32.xlu0 %v3072_v42, %s4986_s7  ;;  %9875 = vst [vmem:[#allocation129_spill] sm:$0xff] %v7502_v3  ;;  %v4847_v54 = vld [vmem:[#allocation4 + $0x78] sm:$0xff]  ;;  %v9890_v62 = vld [vmem:[#allocation139_spill] sm:$0xff] }
 0x427   : > { %v2841_v13 = vpop.permute.xlu0 %2840  ;;  %3207 = vrot.lane.b32.xlu1 %v3073_v2, %s4986_s7  ;;  %v7517_v37 = vadd.f32 %v9882_v49, %v1733_v39  ;;  %v9888_v39 = vld [vmem:[#allocation196_spill] sm:$0xff] }
 0x428   : > { %v3074_v27 = vmul.f32 %v2841_v13, %v7490_v4  ;;  %v2845_v25 = vpop.permute.xlu1 %2844  ;;  %v7514_v4 = vadd.f32 %v9880_v26, %v1734_v23  ;;  %v9886_v26 = vld [vmem:[#allocation195_spill] sm:$0xff] }
 0x429   : > { %v3075_v13 = vmul.f32 %v2845_v25, %v7505_v60  ;;  %9883 = vst [vmem:[#allocation131_spill] sm:$0xff] %v7517_v37  ;;  %v1735_v25 = vmul.f32 %v4846_v8, %v9885_v56  ;;  %v1738_v60 = vmul.f32 %v4847_v54, %v9890_v62  ;;  %v4848_v8 = vld [vmem:[#allocation4 + $0x70] sm:$0xff]  ;;  %v9891_v56 = vld [vmem:[#allocation140_spill] sm:$0xff] }
 0x42a   : > { %3209 = vrot.lane.b32.xlu0 %v3074_v27, %s4986_s7  ;;  %9881 = vst [vmem:[#allocation188_spill] sm:$0xff] %v7514_v4  ;;  %v4849_v54 = vld [vmem:[#allocation4 + $0x88] sm:$0xff]  ;;  %v9896_v62 = vld [vmem:[#allocation141_spill] sm:$0xff] }
 0x42b   : > { %v2849_v42 = vpop.permute.xlu0 %2848  ;;  %3211 = vrot.lane.b32.xlu1 %v3075_v13, %s4986_s7  ;;  %v7529_v49 = vadd.f32 %v9888_v39, %v1735_v25  ;;  %v9894_v25 = vld [vmem:[#allocation198_spill] sm:$0xff] }
 0x42c   : > { %v3076_v50 = vmul.f32 %v2849_v42, %v7502_v3  ;;  %v2853_v2 = vpop.permute.xlu1 %2852  ;;  %v7526_v3 = vadd.f32 %v9886_v26, %v1736_v43  ;;  %v9892_v26 = vld [vmem:[#allocation197_spill] sm:$0xff] }
 0x42d   : > { %v3077_v42 = vmul.f32 %v2853_v2, %v7517_v37  ;;  %9889 = vst [vmem:[#allocation189_spill] sm:$0xff] %v7529_v49  ;;  %v1737_v2 = vmul.f32 %v4848_v8, %v9891_v56  ;;  %v1740_v37 = vmul.f32 %v4849_v54, %v9896_v62  ;;  %v4850_v8 = vld [vmem:[#allocation4 + $0x80] sm:$0xff]  ;;  %v9897_v56 = vld [vmem:[#allocation142_spill] sm:$0xff] }
 0x42e   : > { %3213 = vrot.lane.b32.xlu0 %v3076_v50, %s4986_s7  ;;  %9887 = vst [vmem:[#allocation132_spill] sm:$0xff] %v7526_v3  ;;  %v4851_v54 = vld [vmem:[#allocation4 + $0x98] sm:$0xff]  ;;  %v9902_v62 = vld [vmem:[#allocation143_spill] sm:$0xff] }
 0x42f   : > { %v2857_v27 = vpop.permute.xlu0 %2856  ;;  %3215 = vrot.lane.b32.xlu1 %v3077_v42, %s4986_s7  ;;  %v7541_v39 = vadd.f32 %v9894_v25, %v1737_v2  ;;  %v9900_v2 = vld [vmem:[#allocation200_spill] sm:$0xff] }
 0x430   : > { %v3078_v23 = vmul.f32 %v2857_v27, %v7514_v4  ;;  %v2861_v13 = vpop.permute.xlu1 %2860  ;;  %v7538_v4 = vadd.f32 %v9892_v26, %v1738_v60  ;;  %v9898_v26 = vld [vmem:[#allocation199_spill] sm:$0xff] }
 0x431   : > { %v3079_v27 = vmul.f32 %v2861_v13, %v7529_v49  ;;  %9895 = vst [vmem:[#allocation133_spill] sm:$0xff] %v7541_v39  ;;  %v1739_v13 = vmul.f32 %v4850_v8, %v9897_v56  ;;  %v1742_v49 = vmul.f32 %v4851_v54, %v9902_v62  ;;  %v4852_v8 = vld [vmem:[#allocation4 + $0x90] sm:$0xff]  ;;  %v9903_v56 = vld [vmem:[#allocation144_spill] sm:$0xff] }
 0x432   : > { %3217 = vrot.lane.b32.xlu0 %v3078_v23, %s4986_s7  ;;  %9893 = vst [vmem:[#allocation190_spill] sm:$0xff] %v7538_v4  ;;  %v4853_v54 = vld [vmem:[#allocation4 + $0xa8] sm:$0xff]  ;;  %v9908_v62 = vld [vmem:[#allocation145_spill] sm:$0xff] }
 0x433   : > { %v2865_v50 = vpop.permute.xlu0 %2864  ;;  %3219 = vrot.lane.b32.xlu1 %v3079_v27, %s4986_s7  ;;  %v7553_v25 = vadd.f32 %v9900_v2, %v1739_v13  ;;  %v9906_v13 = vld [vmem:[#allocation202_spill] sm:$0xff] }
 0x434   : > { %v3080_v43 = vmul.f32 %v2865_v50, %v7526_v3  ;;  %v2869_v42 = vpop.permute.xlu1 %2868  ;;  %v7550_v3 = vadd.f32 %v9898_v26, %v1740_v37  ;;  %v9904_v26 = vld [vmem:[#allocation201_spill] sm:$0xff] }
 0x435   : > { %v3081_v50 = vmul.f32 %v2869_v42, %v7541_v39  ;;  %9901 = vst [vmem:[#allocation191_spill] sm:$0xff] %v7553_v25  ;;  %v1741_v42 = vmul.f32 %v4852_v8, %v9903_v56  ;;  %v1744_v39 = vmul.f32 %v4853_v54, %v9908_v62  ;;  %v4854_v8 = vld [vmem:[#allocation4 + $0xa0] sm:$0xff]  ;;  %v9909_v56 = vld [vmem:[#allocation146_spill] sm:$0xff] }
 0x436   : > { %3221 = vrot.lane.b32.xlu0 %v3080_v43, %s4986_s7  ;;  %9899 = vst [vmem:[#allocation134_spill] sm:$0xff] %v7550_v3  ;;  %v4855_v54 = vld [vmem:[#allocation4 + $0xb8] sm:$0xff]  ;;  %v9914_v62 = vld [vmem:[#allocation147_spill] sm:$0xff] }
 0x437   : > { %v2873_v23 = vpop.permute.xlu0 %2872  ;;  %3223 = vrot.lane.b32.xlu1 %v3081_v50, %s4986_s7  ;;  %v7565_v2 = vadd.f32 %v9906_v13, %v1741_v42  ;;  %v9912_v42 = vld [vmem:[#allocation204_spill] sm:$0xff] }
 0x438   : > { %v3082_v60 = vmul.f32 %v2873_v23, %v7538_v4  ;;  %v2877_v27 = vpop.permute.xlu1 %2876  ;;  %v7562_v4 = vadd.f32 %v9904_v26, %v1742_v49  ;;  %v9910_v26 = vld [vmem:[#allocation203_spill] sm:$0xff] }
 0x439   : > { %v3083_v23 = vmul.f32 %v2877_v27, %v7553_v25  ;;  %9907 = vst [vmem:[#allocation135_spill] sm:$0xff] %v7565_v2  ;;  %v1743_v27 = vmul.f32 %v4854_v8, %v9909_v56  ;;  %v1746_v25 = vmul.f32 %v4855_v54, %v9914_v62  ;;  %v4856_v8 = vld [vmem:[#allocation4 + $0xb0] sm:$0xff]  ;;  %v9915_v56 = vld [vmem:[#allocation148_spill] sm:$0xff] }
 0x43a   : > { %3225 = vrot.lane.b32.xlu0 %v3082_v60, %s4986_s7  ;;  %9905 = vst [vmem:[#allocation192_spill] sm:$0xff] %v7562_v4  ;;  %v4857_v54 = vld [vmem:[#allocation4 + $0xc8] sm:$0xff]  ;;  %v9920_v62 = vld [vmem:[#allocation149_spill] sm:$0xff] }
 0x43b   : > { %v2881_v43 = vpop.permute.xlu0 %2880  ;;  %3227 = vrot.lane.b32.xlu1 %v3083_v23, %s4986_s7  ;;  %v7577_v13 = vadd.f32 %v9912_v42, %v1743_v27  ;;  %v9918_v27 = vld [vmem:[#allocation206_spill] sm:$0xff] }
 0x43c   : > { %v3084_v37 = vmul.f32 %v2881_v43, %v7550_v3  ;;  %v2885_v50 = vpop.permute.xlu1 %2884  ;;  %v7574_v3 = vadd.f32 %v9910_v26, %v1744_v39  ;;  %v9916_v26 = vld [vmem:[#allocation205_spill] sm:$0xff] }
 0x43d   : > { %v3085_v43 = vmul.f32 %v2885_v50, %v7565_v2  ;;  %9913 = vst [vmem:[#allocation193_spill] sm:$0xff] %v7577_v13  ;;  %v1745_v50 = vmul.f32 %v4856_v8, %v9915_v56  ;;  %v1748_v2 = vmul.f32 %v4857_v54, %v9920_v62  ;;  %v4858_v8 = vld [vmem:[#allocation4 + $0xc0] sm:$0xff]  ;;  %v9921_v56 = vld [vmem:[#allocation150_spill] sm:$0xff] }
 0x43e   : > { %3229 = vrot.lane.b32.xlu0 %v3084_v37, %s4986_s7  ;;  %9911 = vst [vmem:[#allocation136_spill] sm:$0xff] %v7574_v3  ;;  %v4859_v54 = vld [vmem:[#allocation4 + $0xd8] sm:$0xff]  ;;  %v9926_v62 = vld [vmem:[#allocation151_spill] sm:$0xff] }
 0x43f   : > { %v2889_v60 = vpop.permute.xlu0 %2888  ;;  %3231 = vrot.lane.b32.xlu1 %v3085_v43, %s4986_s7  ;;  %v7589_v42 = vadd.f32 %v9918_v27, %v1745_v50  ;;  %v9924_v50 = vld [vmem:[#allocation208_spill] sm:$0xff] }
 0x440   : > { %v3086_v49 = vmul.f32 %v2889_v60, %v7562_v4  ;;  %v2893_v23 = vpop.permute.xlu1 %2892  ;;  %v7586_v4 = vadd.f32 %v9916_v26, %v1746_v25  ;;  %v9922_v26 = vld [vmem:[#allocation207_spill] sm:$0xff] }
 0x441   : > { %v3087_v60 = vmul.f32 %v2893_v23, %v7577_v13  ;;  %9919 = vst [vmem:[#allocation137_spill] sm:$0xff] %v7589_v42  ;;  %v1747_v23 = vmul.f32 %v4858_v8, %v9921_v56  ;;  %v1750_v13 = vmul.f32 %v4859_v54, %v9926_v62  ;;  %v4860_v8 = vld [vmem:[#allocation4 + $0xd0] sm:$0xff]  ;;  %v9927_v56 = vld [vmem:[#allocation152_spill] sm:$0xff] }
 0x442   : > { %3233 = vrot.lane.b32.xlu0 %v3086_v49, %s4986_s7  ;;  %9917 = vst [vmem:[#allocation194_spill] sm:$0xff] %v7586_v4  ;;  %v4861_v54 = vld [vmem:[#allocation4 + $0xe8] sm:$0xff]  ;;  %v9932_v62 = vld [vmem:[#allocation153_spill] sm:$0xff] }
 0x443   : > { %v2897_v37 = vpop.permute.xlu0 %2896  ;;  %3235 = vrot.lane.b32.xlu1 %v3087_v60, %s4986_s7  ;;  %v7601_v27 = vadd.f32 %v9924_v50, %v1747_v23  ;;  %v9930_v23 = vld [vmem:[#allocation210_spill] sm:$0xff] }
 0x444   : > { %v3088_v39 = vmul.f32 %v2897_v37, %v7574_v3  ;;  %v2901_v43 = vpop.permute.xlu1 %2900  ;;  %v7598_v3 = vadd.f32 %v9922_v26, %v1748_v2  ;;  %v9928_v26 = vld [vmem:[#allocation209_spill] sm:$0xff] }
 0x445   : > { %v3089_v37 = vmul.f32 %v2901_v43, %v7589_v42  ;;  %9925 = vst [vmem:[#allocation195_spill] sm:$0xff] %v7601_v27  ;;  %v1749_v43 = vmul.f32 %v4860_v8, %v9927_v56  ;;  %v1752_v42 = vmul.f32 %v4861_v54, %v9932_v62  ;;  %v4862_v8 = vld [vmem:[#allocation4 + $0xe0] sm:$0xff]  ;;  %v9933_v56 = vld [vmem:[#allocation154_spill] sm:$0xff] }
 0x446   : > { %3237 = vrot.lane.b32.xlu0 %v3088_v39, %s4986_s7  ;;  %9923 = vst [vmem:[#allocation138_spill] sm:$0xff] %v7598_v3  ;;  %v4863_v54 = vld [vmem:[#allocation4 + $0xf8] sm:$0xff]  ;;  %v9938_v62 = vld [vmem:[#allocation155_spill] sm:$0xff] }
 0x447   : > { %v2905_v49 = vpop.permute.xlu0 %2904  ;;  %3239 = vrot.lane.b32.xlu1 %v3089_v37, %s4986_s7  ;;  %v7613_v50 = vadd.f32 %v9930_v23, %v1749_v43  ;;  %v9936_v43 = vld [vmem:[#allocation212_spill] sm:$0xff] }
 0x448   : > { %v3090_v25 = vmul.f32 %v2905_v49, %v7586_v4  ;;  %v2909_v60 = vpop.permute.xlu1 %2908  ;;  %v7610_v4 = vadd.f32 %v9928_v26, %v1750_v13  ;;  %v9934_v26 = vld [vmem:[#allocation211_spill] sm:$0xff] }
 0x449   : > { %v3091_v49 = vmul.f32 %v2909_v60, %v7601_v27  ;;  %9931 = vst [vmem:[#allocation139_spill] sm:$0xff] %v7613_v50  ;;  %v1751_v60 = vmul.f32 %v4862_v8, %v9933_v56  ;;  %v1754_v27 = vmul.f32 %v4863_v54, %v9938_v62  ;;  %v4864_v8 = vld [vmem:[#allocation4 + $0xf0] sm:$0xff]  ;;  %v9939_v56 = vld [vmem:[#allocation156_spill] sm:$0xff] }
 0x44a   : > { %3241 = vrot.lane.b32.xlu0 %v3090_v25, %s4986_s7  ;;  %9929 = vst [vmem:[#allocation196_spill] sm:$0xff] %v7610_v4  ;;  %v4865_v54 = vld [vmem:[#allocation4 + $0x108] sm:$0xff]  ;;  %v9944_v62 = vld [vmem:[#allocation157_spill] sm:$0xff] }
 0x44b   : > { %v2913_v39 = vpop.permute.xlu0 %2912  ;;  %3243 = vrot.lane.b32.xlu1 %v3091_v49, %s4986_s7  ;;  %v7625_v23 = vadd.f32 %v9936_v43, %v1751_v60  ;;  %v9942_v60 = vld [vmem:[#allocation214_spill] sm:$0xff] }
 0x44c   : > { %v3092_v2 = vmul.f32 %v2913_v39, %v7598_v3  ;;  %v2917_v37 = vpop.permute.xlu1 %2916  ;;  %v7622_v3 = vadd.f32 %v9934_v26, %v1752_v42  ;;  %v9940_v26 = vld [vmem:[#allocation213_spill] sm:$0xff] }
 0x44d   : > { %v3093_v39 = vmul.f32 %v2917_v37, %v7613_v50  ;;  %9937 = vst [vmem:[#allocation197_spill] sm:$0xff] %v7625_v23  ;;  %v1753_v37 = vmul.f32 %v4864_v8, %v9939_v56  ;;  %v1756_v50 = vmul.f32 %v4865_v54, %v9944_v62  ;;  %v4866_v8 = vld [vmem:[#allocation4 + $0x100] sm:$0xff]  ;;  %v9945_v56 = vld [vmem:[#allocation158_spill] sm:$0xff] }
 0x44e   : > { %3245 = vrot.lane.b32.xlu0 %v3092_v2, %s4986_s7  ;;  %9935 = vst [vmem:[#allocation140_spill] sm:$0xff] %v7622_v3  ;;  %v4867_v54 = vld [vmem:[#allocation4 + $0x118] sm:$0xff]  ;;  %v9950_v62 = vld [vmem:[#allocation159_spill] sm:$0xff] }
 0x44f   : > { %v2921_v25 = vpop.permute.xlu0 %2920  ;;  %3247 = vrot.lane.b32.xlu1 %v3093_v39, %s4986_s7  ;;  %v7637_v43 = vadd.f32 %v9942_v60, %v1753_v37  ;;  %v9948_v37 = vld [vmem:[#allocation216_spill] sm:$0xff] }
 0x450   : > { %v3094_v13 = vmul.f32 %v2921_v25, %v7610_v4  ;;  %v2925_v49 = vpop.permute.xlu1 %2924  ;;  %v7634_v4 = vadd.f32 %v9940_v26, %v1754_v27  ;;  %v9946_v26 = vld [vmem:[#allocation215_spill] sm:$0xff] }
 0x451   : > { %v3095_v25 = vmul.f32 %v2925_v49, %v7625_v23  ;;  %9943 = vst [vmem:[#allocation141_spill] sm:$0xff] %v7637_v43  ;;  %v1755_v49 = vmul.f32 %v4866_v8, %v9945_v56  ;;  %v1758_v23 = vmul.f32 %v4867_v54, %v9950_v62  ;;  %v4868_v8 = vld [vmem:[#allocation4 + $0x110] sm:$0xff]  ;;  %v9951_v56 = vld [vmem:[#allocation160_spill] sm:$0xff] }
 0x452   : > { %3249 = vrot.lane.b32.xlu0 %v3094_v13, %s4986_s7  ;;  %9941 = vst [vmem:[#allocation198_spill] sm:$0xff] %v7634_v4  ;;  %v4869_v54 = vld [vmem:[#allocation4 + $0x128] sm:$0xff]  ;;  %v9956_v62 = vld [vmem:[#allocation161_spill] sm:$0xff] }
 0x453   : > { %v2929_v2 = vpop.permute.xlu0 %2928  ;;  %3251 = vrot.lane.b32.xlu1 %v3095_v25, %s4986_s7  ;;  %v7649_v60 = vadd.f32 %v9948_v37, %v1755_v49  ;;  %v9954_v49 = vld [vmem:[#allocation218_spill] sm:$0xff] }
 0x454   : > { %v3096_v42 = vmul.f32 %v2929_v2, %v7622_v3  ;;  %v2933_v39 = vpop.permute.xlu1 %2932  ;;  %v7646_v3 = vadd.f32 %v9946_v26, %v1756_v50  ;;  %v9952_v26 = vld [vmem:[#allocation217_spill] sm:$0xff] }
 0x455   : > { %v3097_v2 = vmul.f32 %v2933_v39, %v7637_v43  ;;  %9949 = vst [vmem:[#allocation199_spill] sm:$0xff] %v7649_v60  ;;  %v1757_v39 = vmul.f32 %v4868_v8, %v9951_v56  ;;  %v1760_v43 = vmul.f32 %v4869_v54, %v9956_v62  ;;  %v4870_v8 = vld [vmem:[#allocation4 + $0x120] sm:$0xff]  ;;  %v9957_v56 = vld [vmem:[#allocation162_spill] sm:$0xff] }
 0x456   : > { %3253 = vrot.lane.b32.xlu0 %v3096_v42, %s4986_s7  ;;  %9947 = vst [vmem:[#allocation142_spill] sm:$0xff] %v7646_v3  ;;  %v4871_v54 = vld [vmem:[#allocation4 + $0x138] sm:$0xff]  ;;  %v9962_v62 = vld [vmem:[#allocation163_spill] sm:$0xff] }
 0x457   : > { %v2937_v13 = vpop.permute.xlu0 %2936  ;;  %3255 = vrot.lane.b32.xlu1 %v3097_v2, %s4986_s7  ;;  %v7661_v37 = vadd.f32 %v9954_v49, %v1757_v39  ;;  %v9960_v39 = vld [vmem:[#allocation220_spill] sm:$0xff] }
 0x458   : > { %v3098_v27 = vmul.f32 %v2937_v13, %v7634_v4  ;;  %v2941_v25 = vpop.permute.xlu1 %2940  ;;  %v7658_v4 = vadd.f32 %v9952_v26, %v1758_v23  ;;  %v9958_v26 = vld [vmem:[#allocation219_spill] sm:$0xff] }
 0x459   : > { %v3099_v13 = vmul.f32 %v2941_v25, %v7649_v60  ;;  %9955 = vst [vmem:[#allocation143_spill] sm:$0xff] %v7661_v37  ;;  %v1759_v25 = vmul.f32 %v4870_v8, %v9957_v56  ;;  %v1762_v60 = vmul.f32 %v4871_v54, %v9962_v62  ;;  %v4872_v8 = vld [vmem:[#allocation4 + $0x130] sm:$0xff]  ;;  %v9963_v56 = vld [vmem:[#allocation164_spill] sm:$0xff] }
 0x45a   : > { %3257 = vrot.lane.b32.xlu0 %v3098_v27, %s4986_s7  ;;  %9953 = vst [vmem:[#allocation200_spill] sm:$0xff] %v7658_v4  ;;  %v4873_v54 = vld [vmem:[#allocation4 + $0x148] sm:$0xff]  ;;  %v9968_v62 = vld [vmem:[#allocation25_spill] sm:$0xff] }
 0x45b   : > { %v2945_v42 = vpop.permute.xlu0 %2944  ;;  %3259 = vrot.lane.b32.xlu1 %v3099_v13, %s4986_s7  ;;  %v7673_v49 = vadd.f32 %v9960_v39, %v1759_v25  ;;  %v9966_v25 = vld [vmem:[#allocation222_spill] sm:$0xff] }
 0x45c   : > { %v3100_v50 = vmul.f32 %v2945_v42, %v7646_v3  ;;  %v2949_v2 = vpop.permute.xlu1 %2948  ;;  %v7670_v3 = vadd.f32 %v9958_v26, %v1760_v43  ;;  %v9964_v26 = vld [vmem:[#allocation221_spill] sm:$0xff] }
 0x45d   : > { %v3101_v42 = vmul.f32 %v2949_v2, %v7661_v37  ;;  %9961 = vst [vmem:[#allocation201_spill] sm:$0xff] %v7673_v49  ;;  %v1761_v2 = vmul.f32 %v4872_v8, %v9963_v56  ;;  %v1764_v37 = vmul.f32 %v4873_v54, %v9968_v62  ;;  %v4874_v8 = vld [vmem:[#allocation4 + $0x140] sm:$0xff]  ;;  %v9969_v56 = vld [vmem:[#allocation165_spill] sm:$0xff]  ;;  %v4875_v54 = vld [vmem:[#allocation4 + $0x158] sm:$0xff] }
 0x45e   : > { %3261 = vrot.lane.b32.xlu0 %v3100_v50, %s4986_s7  ;;  %9959 = vst [vmem:[#allocation144_spill] sm:$0xff] %v7670_v3  ;;  %v9974_v62 = vld [vmem:[#allocation31_spill] sm:$0xff] }
 0x45f   : > { %v2953_v27 = vpop.permute.xlu0 %2952  ;;  %3263 = vrot.lane.b32.xlu1 %v3101_v42, %s4986_s7  ;;  %v7685_v39 = vadd.f32 %v9966_v25, %v1761_v2  ;;  %v9972_v2 = vld [vmem:[#allocation224_spill] sm:$0xff] }
 0x460   : > { %v3102_v23 = vmul.f32 %v2953_v27, %v7658_v4  ;;  %v2957_v13 = vpop.permute.xlu1 %2956  ;;  %v7682_v4 = vadd.f32 %v9964_v26, %v1762_v60  ;;  %v9970_v26 = vld [vmem:[#allocation223_spill] sm:$0xff] }
 0x461   : > { %v3103_v27 = vmul.f32 %v2957_v13, %v7673_v49  ;;  %9967 = vst [vmem:[#allocation145_spill] sm:$0xff] %v7685_v39  ;;  %v1763_v13 = vmul.f32 %v4874_v8, %v9969_v56  ;;  %v1766_v49 = vmul.f32 %v4875_v54, %v9974_v62  ;;  %v4876_v8 = vld [vmem:[#allocation4 + $0x150] sm:$0xff]  ;;  %v9975_v56 = vld [vmem:[#allocation166_spill] sm:$0xff]  ;;  %v4877_v54 = vld [vmem:[#allocation4 + $0x168] sm:$0xff] }
 0x462   : > { %3265 = vrot.lane.b32.xlu0 %v3102_v23, %s4986_s7  ;;  %9965 = vst [vmem:[#allocation202_spill] sm:$0xff] %v7682_v4  ;;  %v9980_v62 = vld [vmem:[#allocation40_spill] sm:$0xff] }
 0x463   : > { %v2961_v50 = vpop.permute.xlu0 %2960  ;;  %3267 = vrot.lane.b32.xlu1 %v3103_v27, %s4986_s7  ;;  %v7697_v25 = vadd.f32 %v9972_v2, %v1763_v13  ;;  %v9978_v13 = vld [vmem:[#allocation226_spill] sm:$0xff] }
 0x464   : > { %v3104_v43 = vmul.f32 %v2961_v50, %v7670_v3  ;;  %v2965_v42 = vpop.permute.xlu1 %2964  ;;  %v7694_v3 = vadd.f32 %v9970_v26, %v1764_v37  ;;  %v9976_v26 = vld [vmem:[#allocation225_spill] sm:$0xff] }
 0x465   : > { %v3105_v50 = vmul.f32 %v2965_v42, %v7685_v39  ;;  %9973 = vst [vmem:[#allocation203_spill] sm:$0xff] %v7697_v25  ;;  %v1765_v42 = vmul.f32 %v4876_v8, %v9975_v56  ;;  %v1768_v39 = vmul.f32 %v4877_v54, %v9980_v62  ;;  %v4878_v8 = vld [vmem:[#allocation4 + $0x160] sm:$0xff]  ;;  %v4879_v54 = vld [vmem:[#allocation4 + $0x178] sm:$0xff]  ;;  %v9986_v62 = vld [vmem:[#allocation168_spill] sm:$0xff] }
 0x466   : > { %3269 = vrot.lane.b32.xlu0 %v3104_v43, %s4986_s7  ;;  %9971 = vst [vmem:[#allocation146_spill] sm:$0xff] %v7694_v3  ;;  %v9981_v56 = vld [vmem:[#allocation167_spill] sm:$0xff] }
 0x467   : > { %v2969_v23 = vpop.permute.xlu0 %2968  ;;  %3271 = vrot.lane.b32.xlu1 %v3105_v50, %s4986_s7  ;;  %v7709_v2 = vadd.f32 %v9978_v13, %v1765_v42  ;;  %v9984_v42 = vld [vmem:[#allocation228_spill] sm:$0xff] }
 0x468   : > { %v3106_v60 = vmul.f32 %v2969_v23, %v7682_v4  ;;  %v2973_v27 = vpop.permute.xlu1 %2972  ;;  %v7706_v4 = vadd.f32 %v9976_v26, %v1766_v49  ;;  %v9982_v26 = vld [vmem:[#allocation227_spill] sm:$0xff] }
 0x469   : > { %v3107_v23 = vmul.f32 %v2973_v27, %v7697_v25  ;;  %9979 = vst [vmem:[#allocation147_spill] sm:$0xff] %v7709_v2  ;;  %v1767_v27 = vmul.f32 %v4878_v8, %v9981_v56  ;;  %v1770_v25 = vmul.f32 %v4879_v54, %v9986_v62  ;;  %v4880_v8 = vld [vmem:[#allocation4 + $0x170] sm:$0xff]  ;;  %v4881_v54 = vld [vmem:[#allocation4 + $0x188] sm:$0xff]  ;;  %v9992_v62 = vld [vmem:[#allocation170_spill] sm:$0xff] }
 0x46a   : > { %3273 = vrot.lane.b32.xlu0 %v3106_v60, %s4986_s7  ;;  %9977 = vst [vmem:[#allocation204_spill] sm:$0xff] %v7706_v4  ;;  %v9987_v56 = vld [vmem:[#allocation169_spill] sm:$0xff] }
 0x46b   : > { %v2977_v43 = vpop.permute.xlu0 %2976  ;;  %3275 = vrot.lane.b32.xlu1 %v3107_v23, %s4986_s7  ;;  %v7721_v13 = vadd.f32 %v9984_v42, %v1767_v27  ;;  %v9990_v27 = vld [vmem:[#allocation230_spill] sm:$0xff] }
 0x46c   : > { %v3108_v37 = vmul.f32 %v2977_v43, %v7694_v3  ;;  %v2981_v50 = vpop.permute.xlu1 %2980  ;;  %v7718_v3 = vadd.f32 %v9982_v26, %v1768_v39  ;;  %v9988_v26 = vld [vmem:[#allocation229_spill] sm:$0xff] }
 0x46d   : > { %v3109_v43 = vmul.f32 %v2981_v50, %v7709_v2  ;;  %9985 = vst [vmem:[#allocation205_spill] sm:$0xff] %v7721_v13  ;;  %v1769_v50 = vmul.f32 %v4880_v8, %v9987_v56  ;;  %v1772_v2 = vmul.f32 %v4881_v54, %v9992_v62  ;;  %v4882_v8 = vld [vmem:[#allocation4 + $0x180] sm:$0xff]  ;;  %v4883_v54 = vld [vmem:[#allocation4 + $0x198] sm:$0xff]  ;;  %v9998_v62 = vld [vmem:[#allocation172_spill] sm:$0xff] }
 0x46e   : > { %3277 = vrot.lane.b32.xlu0 %v3108_v37, %s4986_s7  ;;  %9983 = vst [vmem:[#allocation148_spill] sm:$0xff] %v7718_v3  ;;  %v9993_v56 = vld [vmem:[#allocation171_spill] sm:$0xff] }
 0x46f   : > { %v2985_v60 = vpop.permute.xlu0 %2984  ;;  %3279 = vrot.lane.b32.xlu1 %v3109_v43, %s4986_s7  ;;  %v7733_v42 = vadd.f32 %v9990_v27, %v1769_v50  ;;  %v9996_v50 = vld [vmem:[#allocation232_spill] sm:$0xff] }
 0x470   : > { %v3110_v49 = vmul.f32 %v2985_v60, %v7706_v4  ;;  %v2989_v23 = vpop.permute.xlu1 %2988  ;;  %v7730_v4 = vadd.f32 %v9988_v26, %v1770_v25  ;;  %v9994_v26 = vld [vmem:[#allocation231_spill] sm:$0xff] }
 0x471   : > { %v3111_v60 = vmul.f32 %v2989_v23, %v7721_v13  ;;  %9991 = vst [vmem:[#allocation149_spill] sm:$0xff] %v7733_v42  ;;  %v1771_v23 = vmul.f32 %v4882_v8, %v9993_v56  ;;  %v1774_v13 = vmul.f32 %v4883_v54, %v9998_v62  ;;  %v4884_v8 = vld [vmem:[#allocation4 + $0x190] sm:$0xff]  ;;  %v4885_v54 = vld [vmem:[#allocation4 + $0x1a8] sm:$0xff]  ;;  %v10004_v62 = vld [vmem:[#allocation174_spill] sm:$0xff] }
 0x472   : > { %3281 = vrot.lane.b32.xlu0 %v3110_v49, %s4986_s7  ;;  %9989 = vst [vmem:[#allocation206_spill] sm:$0xff] %v7730_v4  ;;  %v9999_v56 = vld [vmem:[#allocation173_spill] sm:$0xff] }
 0x473   : > { %v2993_v37 = vpop.permute.xlu0 %2992  ;;  %3283 = vrot.lane.b32.xlu1 %v3111_v60, %s4986_s7  ;;  %v7745_v27 = vadd.f32 %v9996_v50, %v1771_v23  ;;  %v10002_v23 = vld [vmem:[#allocation234_spill] sm:$0xff] }
 0x474   : > { %v3112_v39 = vmul.f32 %v2993_v37, %v7718_v3  ;;  %v2997_v43 = vpop.permute.xlu1 %2996  ;;  %v7742_v3 = vadd.f32 %v9994_v26, %v1772_v2  ;;  %v10000_v26 = vld [vmem:[#allocation233_spill] sm:$0xff] }
 0x475   : > { %v3113_v37 = vmul.f32 %v2997_v43, %v7733_v42  ;;  %9997 = vst [vmem:[#allocation207_spill] sm:$0xff] %v7745_v27  ;;  %v1773_v43 = vmul.f32 %v4884_v8, %v9999_v56  ;;  %v1776_v42 = vmul.f32 %v4885_v54, %v10004_v62  ;;  %v4886_v8 = vld [vmem:[#allocation4 + $0x1a0] sm:$0xff]  ;;  %v4887_v54 = vld [vmem:[#allocation4 + $0x1b8] sm:$0xff]  ;;  %v10010_v62 = vld [vmem:[#allocation176_spill] sm:$0xff] }
 0x476   : > { %3285 = vrot.lane.b32.xlu0 %v3112_v39, %s4986_s7  ;;  %9995 = vst [vmem:[#allocation150_spill] sm:$0xff] %v7742_v3  ;;  %v10005_v56 = vld [vmem:[#allocation175_spill] sm:$0xff] }
 0x477   : > { %v3001_v49 = vpop.permute.xlu0 %3000  ;;  %3287 = vrot.lane.b32.xlu1 %v3113_v37, %s4986_s7  ;;  %v7757_v50 = vadd.f32 %v10002_v23, %v1773_v43  ;;  %v10008_v43 = vld [vmem:[#allocation236_spill] sm:$0xff] }
 0x478   : > { %v3114_v25 = vmul.f32 %v3001_v49, %v7730_v4  ;;  %v3005_v60 = vpop.permute.xlu1 %3004  ;;  %v7754_v4 = vadd.f32 %v10000_v26, %v1774_v13  ;;  %v10006_v26 = vld [vmem:[#allocation235_spill] sm:$0xff] }
 0x479   : > { %v3115_v49 = vmul.f32 %v3005_v60, %v7745_v27  ;;  %10003 = vst [vmem:[#allocation151_spill] sm:$0xff] %v7757_v50  ;;  %v1775_v60 = vmul.f32 %v4886_v8, %v10005_v56  ;;  %v1778_v27 = vmul.f32 %v4887_v54, %v10010_v62  ;;  %v4888_v8 = vld [vmem:[#allocation4 + $0x1b0] sm:$0xff]  ;;  %v4889_v54 = vld [vmem:[#allocation4 + $0x1c8] sm:$0xff]  ;;  %v10016_v62 = vld [vmem:[#allocation178_spill] sm:$0xff] }
 0x47a   : > { %3289 = vrot.lane.b32.xlu0 %v3114_v25, %s4986_s7  ;;  %10001 = vst [vmem:[#allocation208_spill] sm:$0xff] %v7754_v4  ;;  %v10011_v56 = vld [vmem:[#allocation177_spill] sm:$0xff] }
 0x47b   : > { %v3009_v39 = vpop.permute.xlu0 %3008  ;;  %3291 = vrot.lane.b32.xlu1 %v3115_v49, %s4986_s7  ;;  %v7769_v23 = vadd.f32 %v10008_v43, %v1775_v60  ;;  %v10014_v60 = vld [vmem:[#allocation238_spill] sm:$0xff] }
 0x47c   : > { %v3116_v2 = vmul.f32 %v3009_v39, %v7742_v3  ;;  %v3013_v37 = vpop.permute.xlu1 %3012  ;;  %v7766_v3 = vadd.f32 %v10006_v26, %v1776_v42  ;;  %v10012_v26 = vld [vmem:[#allocation237_spill] sm:$0xff] }
 0x47d   : > { %v3117_v39 = vmul.f32 %v3013_v37, %v7757_v50  ;;  %10009 = vst [vmem:[#allocation209_spill] sm:$0xff] %v7769_v23  ;;  %v1777_v37 = vmul.f32 %v4888_v8, %v10011_v56  ;;  %v1780_v50 = vmul.f32 %v4889_v54, %v10016_v62  ;;  %v4890_v8 = vld [vmem:[#allocation4 + $0x1c0] sm:$0xff]  ;;  %v4891_v54 = vld [vmem:[#allocation4 + $0x1d8] sm:$0xff]  ;;  %v10022_v62 = vld [vmem:[#allocation180_spill] sm:$0xff] }
 0x47e   : > { %3293 = vrot.lane.b32.xlu0 %v3116_v2, %s4986_s7  ;;  %10007 = vst [vmem:[#allocation152_spill] sm:$0xff] %v7766_v3  ;;  %v10017_v56 = vld [vmem:[#allocation179_spill] sm:$0xff] }
 0x47f   : > { %v3017_v25 = vpop.permute.xlu0 %3016  ;;  %3295 = vrot.lane.b32.xlu1 %v3117_v39, %s4986_s7  ;;  %v7781_v43 = vadd.f32 %v10014_v60, %v1777_v37  ;;  %v10020_v37 = vld [vmem:[#allocation240_spill] sm:$0xff] }
 0x480   : > { %v3118_v13 = vmul.f32 %v3017_v25, %v7754_v4  ;;  %v3021_v49 = vpop.permute.xlu1 %3020  ;;  %v7778_v4 = vadd.f32 %v10012_v26, %v1778_v27  ;;  %v10018_v26 = vld [vmem:[#allocation239_spill] sm:$0xff] }
 0x481   : > { %v3119_v25 = vmul.f32 %v3021_v49, %v7769_v23  ;;  %10015 = vst [vmem:[#allocation153_spill] sm:$0xff] %v7781_v43  ;;  %v1779_v49 = vmul.f32 %v4890_v8, %v10017_v56  ;;  %v1782_v23 = vmul.f32 %v4891_v54, %v10022_v62  ;;  %v4892_v8 = vld [vmem:[#allocation4 + $0x1d0] sm:$0xff]  ;;  %v4893_v54 = vld [vmem:[#allocation4 + $0x1e8] sm:$0xff]  ;;  %v10027_v62 = vld [vmem:[#allocation182_spill] sm:$0xff] }
 0x482   : > { %3297 = vrot.lane.b32.xlu0 %v3118_v13, %s4986_s7  ;;  %10013 = vst [vmem:[#allocation210_spill] sm:$0xff] %v7778_v4  ;;  %v10023_v56 = vld [vmem:[#allocation181_spill] sm:$0xff] }
 0x483   : > { %v3025_v2 = vpop.permute.xlu0 %3024  ;;  %3299 = vrot.lane.b32.xlu1 %v3119_v25, %s4986_s7  ;;  %v7793_v60 = vadd.f32 %v10020_v37, %v1779_v49  ;;  %v10025_v49 = vld [vmem:[#allocation241_spill] sm:$0xff] }
 0x484   : > { %v3120_v42 = vmul.f32 %v3025_v2, %v7766_v3  ;;  %v3029_v39 = vpop.permute.xlu1 %3028  ;;  %v7790_v3 = vadd.f32 %v10018_v26, %v1780_v50  ;;  %v7802_v26 = vadd.f32 %v7241_v30, %v1782_v23 }
 0x485   : > { %v3121_v2 = vmul.f32 %v3029_v39, %v7781_v43  ;;  %10021 = vst [vmem:[#allocation211_spill] sm:$0xff] %v7793_v60  ;;  %v1781_v39 = vmul.f32 %v4892_v8, %v10023_v56  ;;  %v4894_v8 = vld [vmem:[#allocation4 + $0x1e0] sm:$0xff] }
 0x486   : > { %3301 = vrot.lane.b32.xlu0 %v3120_v42, %s4986_s7  ;;  %10019 = vst [vmem:[#allocation154_spill] sm:$0xff] %v7790_v3  ;;  %10024 = vst [vmem:[#allocation212_spill] sm:$0xff] %v7802_v26  ;;  %v10028_v56 = vld [vmem:[#allocation183_spill] sm:$0xff] }
 0x487   : > { %v3033_v13 = vpop.permute.xlu0 %3032  ;;  %3303 = vrot.lane.b32.xlu1 %v3121_v2, %s4986_s7  ;;  %v7805_v37 = vadd.f32 %v10025_v49, %v1781_v39  ;;  %v4895_v49 = vld [vmem:[#allocation4 + $0x1f8] sm:$0xff]  ;;  %v10057_v43 = vld [vmem:[#allocation79_spill] sm:$0xff] }
 0x488   : > { %v3122_v27 = vmul.f32 %v3033_v13, %v7778_v4  ;;  %v3037_v25 = vpop.permute.xlu1 %3036  ;;  %v1784_v4 = vmul.f32 %v4893_v54, %v10027_v62  ;;  %v10031_v54 = vld [vmem:[#allocation184_spill] sm:$0xff] }
 0x489   : > { %v3123_v13 = vmul.f32 %v3037_v25, %v7793_v60  ;;  %10026 = vst [vmem:[#allocation155_spill] sm:$0xff] %v7805_v37  ;;  %v1783_v25 = vmul.f32 %v4894_v8, %v10028_v56  ;;  %v1786_v62 = vmul.f32 %v4895_v49, %v10031_v54  ;;  %v4896_v8 = vld [vmem:[#allocation4 + $0x1f0] sm:$0xff] }
 0x48a   : > { %3305 = vrot.lane.b32.xlu0 %v3122_v27, %s4986_s7  ;;  %v7814_v23 = vadd.f32 %v7247_v14, %v1784_v4  ;;  %v10032_v56 = vld [vmem:[#allocation185_spill] sm:$0xff] }
 0x48b   : > { %v3041_v42 = vpop.permute.xlu0 %3040  ;;  %3307 = vrot.lane.b32.xlu1 %v3123_v13, %s4986_s7  ;;  %v7817_v39 = vadd.f32 %v7249_v34, %v1783_v25  ;;  %v7826_v4 = vadd.f32 %v7253_v24, %v1786_v62 }
 0x48c   : > { %v3124_v50 = vmul.f32 %v3041_v42, %v7790_v3  ;;  %v3045_v2 = vpop.permute.xlu1 %3044  ;;  %10029 = vst [vmem:[#allocation156_spill] sm:$0xff] %v7814_v23 }
 0x48d   : > { %v3125_v42 = vmul.f32 %v3045_v2, %v7805_v37  ;;  %10030 = vst [vmem:[#allocation213_spill] sm:$0xff] %v7817_v39  ;;  %v1785_v2 = vmul.f32 %v4896_v8, %v10032_v56  ;;  %10033 = vst [vmem:[#allocation214_spill] sm:$0xff] %v7826_v4  ;;  %v10037_v8 = vld [vmem:[#allocation70_spill] sm:$0xff]  ;;  %v10038_v56 = vld [vmem:[#allocation65_spill] sm:$0xff] }
 0x48e   : > { %3309 = vrot.lane.b32.xlu0 %v3124_v50, %s4986_s7  ;;  %v10053_v37 = vld [vmem:[#allocation77_spill] sm:$0xff] }
 0x48f   : > { %v3049_v27 = vpop.permute.xlu0 %3048  ;;  %3311 = vrot.lane.b32.xlu1 %v3125_v42, %s4986_s7  ;;  %v7829_v34 = vadd.f32 %v7255_v15, %v1785_v2  ;;  %v10035_v15 = vld [vmem:[#allocation68_spill] sm:$0xff] }
 0x490   : > { %v3126_v30 = vmul.f32 %v3049_v27, %v7802_v26  ;;  %v3053_v13 = vpop.permute.xlu1 %3052 }
 0x491   : > { %v3127_v27 = vmul.f32 %v3053_v13, %v7817_v39  ;;  %10034 = vst [vmem:[#allocation157_spill] sm:$0xff] %v7829_v34  ;;  %v10049_v39 = vld [vmem:[#allocation75_spill] sm:$0xff] }
 0x492   : > { %3313 = vrot.lane.b32.xlu0 %v3126_v30, %s4986_s7 }
 0x493   : > { %v3057_v50 = vpop.permute.xlu0 %3056  ;;  %3315 = vrot.lane.b32.xlu1 %v3127_v27, %s4986_s7 }
 0x494   : > { %v3128_v14 = vmul.f32 %v3057_v50, %v7814_v23  ;;  %v3061_v25 = vpop.permute.xlu1 %3060  ;;  %v10036_v50 = vld [vmem:[#allocation66_spill] sm:$0xff] }
 0x495   : > { %v3129_v30 = vmul.f32 %v3061_v25, %v7829_v34  ;;  %v10040_v25 = vld [vmem:[#allocation67_spill] sm:$0xff]  ;;  %v10046_v34 = vld [vmem:[#allocation73_spill] sm:$0xff] }
 0x496   : > { %3317 = vrot.lane.b32.xlu0 %v3128_v14, %s4986_s7  ;;  %v10039_v14 = vld [vmem:[#allocation72_spill] sm:$0xff] }
 0x497   : > { %v3065_v42 = vpop.permute.xlu0 %3064  ;;  %3319 = vrot.lane.b32.xlu1 %v3129_v30, %s4986_s7 }
 0x498   : > { %v3130_v49 = vmul.f32 %v3065_v42, %v7826_v4  ;;  %v7839_v24 = vpop.permute.xlu1 %3195  ;;  %v10044_v4 = vld [vmem:[#allocation71_spill] sm:$0xff] }
 0x49a   : > { %3321 = vrot.lane.b32.xlu0 %v3130_v49, %s4986_s7  ;;  %v10041_v49 = vld [vmem:[#allocation74_spill] sm:$0xff] }
 0x49b   : > { %v7837_v13 = vpop.permute.xlu0 %3197  ;;  %3452 = vperm.xlu1 %4833, %v10036_v50  }
 0x49c   : > { %v7845_v62 = vpop.permute.xlu1 %3199 }
 0x49e   : > { %3456 = vperm.xlu0 %4834, %v10035_v15   ;;  %v10042_v15 = vld [vmem:[#allocation69_spill] sm:$0xff] }
 0x49f   : > { %v7843_v54 = vpop.permute.xlu0 %3201  ;;  %3460 = vperm.xlu1 %4833, %v10038_v56   ;;  %v10043_v56 = vld [vmem:[#allocation76_spill] sm:$0xff] }
 0x4a0   : > { %v7851_v27 = vpop.permute.xlu1 %3203 }
 0x4a2   : > { %3468 = vperm.xlu0 %4834, %v10037_v8  }
 0x4a3   : > { %v7849_v2 = vpop.permute.xlu0 %3205  ;;  %3464 = vperm.xlu1 %4833, %v10040_v25   ;;  %v10045_v25 = vld [vmem:[#allocation78_spill] sm:$0xff] }
 0x4a4   : > { %v7857_v30 = vpop.permute.xlu1 %3207 }
 0x4a6   : > { %3476 = vperm.xlu0 %4834, %v10039_v14  }
 0x4a7   : > { %v7855_v42 = vpop.permute.xlu0 %3209  ;;  %3472 = vperm.xlu1 %4833, %v10042_v15   ;;  %v10048_v15 = vld [vmem:[#allocation80_spill] sm:$0xff] }
 0x4a8   : > { %v7863_v8 = vpop.permute.xlu1 %3211 }
 0x4aa   : > { %3484 = vperm.xlu0 %4834, %v10041_v49  }
 0x4ab   : > { %v7861_v50 = vpop.permute.xlu0 %3213  ;;  %3480 = vperm.xlu1 %4833, %v10044_v4   ;;  %v10052_v4 = vld [vmem:[#allocation27_spill] sm:$0xff] }
 0x4ac   : > { %v7869_v14 = vpop.permute.xlu1 %3215 }
 0x4ae   : > { %3492 = vperm.xlu0 %4834, %v10043_v56  }
 0x4af   : > { %v7867_v23 = vpop.permute.xlu0 %3217  ;;  %3488 = vperm.xlu1 %4833, %v10046_v34   ;;  %v10056_v34 = vld [vmem:[#allocation28_spill] sm:$0xff] }
 0x4b0   : > { %v7875_v49 = vpop.permute.xlu1 %3219 }
 0x4b2   : > { %3500 = vperm.xlu0 %4834, %v10045_v25  }
 0x4b3   : > { %v7873_v26 = vpop.permute.xlu0 %3221  ;;  %3496 = vperm.xlu1 %4833, %v10049_v39   ;;  %v10060_v39 = vld [vmem:[#allocation29_spill] sm:$0xff] }
 0x4b4   : > { %10047 = vst [vmem:[#allocation158_spill] sm:$0xff] %v7873_v26  ;;  %v7881_v56 = vpop.permute.xlu1 %3223 }
 0x4b5   : > { %10051 = vst [vmem:[#allocation216_spill] sm:$0xff] %v7881_v56 }
 0x4b6   : > { %3508 = vperm.xlu0 %4834, %v10048_v15  }
 0x4b7   : > { %v7879_v3 = vpop.permute.xlu0 %3225  ;;  %3504 = vperm.xlu1 %4833, %v10053_v37   ;;  %v10064_v37 = vld [vmem:[#allocation85_spill] sm:$0xff] }
 0x4b8   : > { %10050 = vst [vmem:[#allocation215_spill] sm:$0xff] %v7879_v3  ;;  %v7887_v25 = vpop.permute.xlu1 %3227  ;;  %v10061_v3 = vld [vmem:[#allocation81_spill] sm:$0xff] }
 0x4b9   : > { %10055 = vst [vmem:[#allocation160_spill] sm:$0xff] %v7887_v25 }
 0x4ba   : > { %3516 = vperm.xlu0 %4834, %v10052_v4  }
 0x4bb   : > { %v7885_v60 = vpop.permute.xlu0 %3229  ;;  %3512 = vperm.xlu1 %4833, %v10057_v43   ;;  %v10068_v43 = vld [vmem:[#allocation87_spill] sm:$0xff] }
 0x4bc   : > { %10054 = vst [vmem:[#allocation159_spill] sm:$0xff] %v7885_v60  ;;  %v7893_v15 = vpop.permute.xlu1 %3231  ;;  %v10065_v60 = vld [vmem:[#allocation82_spill] sm:$0xff] }
 0x4bd   : > { %10059 = vst [vmem:[#allocation218_spill] sm:$0xff] %v7893_v15 }
 0x4be   : > { %3524 = vperm.xlu0 %4834, %v10056_v34  }
 0x4bf   : > { %v7891_v26 = vpop.permute.xlu0 %3233  ;;  %3520 = vperm.xlu1 %4833, %v10061_v3   ;;  %v10072_v3 = vld [vmem:[#allocation89_spill] sm:$0xff] }
 0x4c0   : > { %10058 = vst [vmem:[#allocation217_spill] sm:$0xff] %v7891_v26  ;;  %v7899_v4 = vpop.permute.xlu1 %3235  ;;  %v10069_v26 = vld [vmem:[#allocation83_spill] sm:$0xff] }
 0x4c1   : > { %10063 = vst [vmem:[#allocation162_spill] sm:$0xff] %v7899_v4 }
 0x4c2   : > { %3532 = vperm.xlu0 %4834, %v10060_v39  }
 0x4c3   : > { %v7897_v56 = vpop.permute.xlu0 %3237  ;;  %3528 = vperm.xlu1 %4833, %v10065_v60   ;;  %v10076_v60 = vld [vmem:[#allocation91_spill] sm:$0xff] }
 0x4c4   : > { %10062 = vst [vmem:[#allocation161_spill] sm:$0xff] %v7897_v56  ;;  %v7905_v34 = vpop.permute.xlu1 %3239  ;;  %v10073_v56 = vld [vmem:[#allocation84_spill] sm:$0xff] }
 0x4c5   : > { %10067 = vst [vmem:[#allocation220_spill] sm:$0xff] %v7905_v34 }
 0x4c6   : > { %3540 = vperm.xlu0 %4834, %v10064_v37  }
 0x4c7   : > { %v7903_v25 = vpop.permute.xlu0 %3241  ;;  %3536 = vperm.xlu1 %4833, %v10069_v26   ;;  %v10080_v26 = vld [vmem:[#allocation93_spill] sm:$0xff] }
 0x4c8   : > { %10066 = vst [vmem:[#allocation219_spill] sm:$0xff] %v7903_v25  ;;  %v7911_v39 = vpop.permute.xlu1 %3243  ;;  %v10077_v25 = vld [vmem:[#allocation86_spill] sm:$0xff] }
 0x4c9   : > { %10071 = vst [vmem:[#allocation164_spill] sm:$0xff] %v7911_v39 }
 0x4ca   : > { %3548 = vperm.xlu0 %4834, %v10068_v43  }
 0x4cb   : > { %v7909_v15 = vpop.permute.xlu0 %3245  ;;  %3544 = vperm.xlu1 %4833, %v10073_v56   ;;  %v10084_v56 = vld [vmem:[#allocation95_spill] sm:$0xff] }
 0x4cc   : > { %10070 = vst [vmem:[#allocation163_spill] sm:$0xff] %v7909_v15  ;;  %v7917_v37 = vpop.permute.xlu1 %3247  ;;  %v10081_v15 = vld [vmem:[#allocation88_spill] sm:$0xff] }
 0x4cd   : > { %10075 = vst [vmem:[#allocation222_spill] sm:$0xff] %v7917_v37 }
 0x4ce   : > { %3556 = vperm.xlu0 %4834, %v10072_v3  }
 0x4cf   : > { %v7915_v4 = vpop.permute.xlu0 %3249  ;;  %3552 = vperm.xlu1 %4833, %v10077_v25   ;;  %v10088_v25 = vld [vmem:[#allocation97_spill] sm:$0xff] }
 0x4d0   : > { %10074 = vst [vmem:[#allocation221_spill] sm:$0xff] %v7915_v4  ;;  %v7923_v43 = vpop.permute.xlu1 %3251  ;;  %v10085_v4 = vld [vmem:[#allocation90_spill] sm:$0xff] }
 0x4d1   : > { %10079 = vst [vmem:[#allocation165_spill] sm:$0xff] %v7923_v43 }
 0x4d2   : > { %3564 = vperm.xlu0 %4834, %v10076_v60  }
 0x4d3   : > { %v7921_v34 = vpop.permute.xlu0 %3253  ;;  %3560 = vperm.xlu1 %4833, %v10081_v15   ;;  %v10092_v15 = vld [vmem:[#allocation99_spill] sm:$0xff] }
 0x4d4   : > { %10078 = vst [vmem:[#allocation25_spill] sm:$0xff] %v7921_v34  ;;  %v7929_v3 = vpop.permute.xlu1 %3255  ;;  %v10089_v34 = vld [vmem:[#allocation92_spill] sm:$0xff] }
 0x4d5   : > { %10083 = vst [vmem:[#allocation224_spill] sm:$0xff] %v7929_v3 }
 0x4d6   : > { %3572 = vperm.xlu0 %4834, %v10080_v26  }
 0x4d7   : > { %v7927_v39 = vpop.permute.xlu0 %3257  ;;  %3568 = vperm.xlu1 %4833, %v10085_v4   ;;  %v10096_v4 = vld [vmem:[#allocation101_spill] sm:$0xff] }
 0x4d8   : > { %10082 = vst [vmem:[#allocation223_spill] sm:$0xff] %v7927_v39  ;;  %v7935_v60 = vpop.permute.xlu1 %3259  ;;  %v10093_v39 = vld [vmem:[#allocation94_spill] sm:$0xff] }
 0x4d9   : > { %10087 = vst [vmem:[#allocation166_spill] sm:$0xff] %v7935_v60 }
 0x4da   : > { %3580 = vperm.xlu0 %4834, %v10084_v56  }
 0x4db   : > { %v7933_v37 = vpop.permute.xlu0 %3261  ;;  %3576 = vperm.xlu1 %4833, %v10089_v34   ;;  %v10100_v34 = vld [vmem:[#allocation103_spill] sm:$0xff] }
 0x4dc   : > { %10086 = vst [vmem:[#allocation31_spill] sm:$0xff] %v7933_v37  ;;  %v7941_v26 = vpop.permute.xlu1 %3263  ;;  %v10097_v37 = vld [vmem:[#allocation96_spill] sm:$0xff] }
 0x4dd   : > { %10091 = vst [vmem:[#allocation226_spill] sm:$0xff] %v7941_v26 }
 0x4de   : > { %3588 = vperm.xlu0 %4834, %v10088_v25  }
 0x4df   : > { %v7939_v43 = vpop.permute.xlu0 %3265  ;;  %3584 = vperm.xlu1 %4833, %v10093_v39   ;;  %v10104_v39 = vld [vmem:[#allocation105_spill] sm:$0xff] }
 0x4e0   : > { %10090 = vst [vmem:[#allocation225_spill] sm:$0xff] %v7939_v43  ;;  %v7947_v56 = vpop.permute.xlu1 %3267  ;;  %v10101_v43 = vld [vmem:[#allocation98_spill] sm:$0xff] }
 0x4e1   : > { %10095 = vst [vmem:[#allocation167_spill] sm:$0xff] %v7947_v56 }
 0x4e2   : > { %3596 = vperm.xlu0 %4834, %v10092_v15  }
 0x4e3   : > { %v7945_v3 = vpop.permute.xlu0 %3269  ;;  %3592 = vperm.xlu1 %4833, %v10097_v37   ;;  %v10108_v37 = vld [vmem:[#allocation42_spill] sm:$0xff] }
 0x4e4   : > { %10094 = vst [vmem:[#allocation40_spill] sm:$0xff] %v7945_v3  ;;  %v7953_v25 = vpop.permute.xlu1 %3271  ;;  %v10105_v3 = vld [vmem:[#allocation100_spill] sm:$0xff] }
 0x4e5   : > { %10099 = vst [vmem:[#allocation228_spill] sm:$0xff] %v7953_v25 }
 0x4e6   : > { %3604 = vperm.xlu0 %4834, %v10096_v4  }
 0x4e7   : > { %v7951_v60 = vpop.permute.xlu0 %3273  ;;  %3600 = vperm.xlu1 %4833, %v10101_v43   ;;  %v10112_v43 = vld [vmem:[#allocation108_spill] sm:$0xff] }
 0x4e8   : > { %10098 = vst [vmem:[#allocation227_spill] sm:$0xff] %v7951_v60  ;;  %v7959_v15 = vpop.permute.xlu1 %3275  ;;  %v10109_v60 = vld [vmem:[#allocation102_spill] sm:$0xff] }
 0x4e9   : > { %10103 = vst [vmem:[#allocation169_spill] sm:$0xff] %v7959_v15 }
 0x4ea   : > { %3612 = vperm.xlu0 %4834, %v10100_v34  }
 0x4eb   : > { %v7957_v26 = vpop.permute.xlu0 %3277  ;;  %3608 = vperm.xlu1 %4833, %v10105_v3   ;;  %v10116_v3 = vld [vmem:[#allocation110_spill] sm:$0xff] }
 0x4ec   : > { %10102 = vst [vmem:[#allocation168_spill] sm:$0xff] %v7957_v26  ;;  %v7965_v4 = vpop.permute.xlu1 %3279  ;;  %v10113_v26 = vld [vmem:[#allocation104_spill] sm:$0xff] }
 0x4ed   : > { %10107 = vst [vmem:[#allocation230_spill] sm:$0xff] %v7965_v4 }
 0x4ee   : > { %3620 = vperm.xlu0 %4834, %v10104_v39  }
 0x4ef   : > { %v7963_v56 = vpop.permute.xlu0 %3281  ;;  %3616 = vperm.xlu1 %4833, %v10109_v60   ;;  %v10120_v60 = vld [vmem:[#allocation112_spill] sm:$0xff] }
 0x4f0   : > { %10106 = vst [vmem:[#allocation229_spill] sm:$0xff] %v7963_v56  ;;  %v7971_v34 = vpop.permute.xlu1 %3283  ;;  %v10117_v56 = vld [vmem:[#allocation106_spill] sm:$0xff] }
 0x4f1   : > { %10111 = vst [vmem:[#allocation171_spill] sm:$0xff] %v7971_v34 }
 0x4f2   : > { %3628 = vperm.xlu0 %4834, %v10108_v37  }
 0x4f3   : > { %v7969_v25 = vpop.permute.xlu0 %3285  ;;  %3624 = vperm.xlu1 %4833, %v10113_v26   ;;  %v10124_v26 = vld [vmem:[#allocation114_spill] sm:$0xff] }
 0x4f4   : > { %10110 = vst [vmem:[#allocation170_spill] sm:$0xff] %v7969_v25  ;;  %v7977_v39 = vpop.permute.xlu1 %3287  ;;  %v10121_v25 = vld [vmem:[#allocation107_spill] sm:$0xff] }
 0x4f5   : > { %10115 = vst [vmem:[#allocation232_spill] sm:$0xff] %v7977_v39 }
 0x4f6   : > { %3636 = vperm.xlu0 %4834, %v10112_v43  }
 0x4f7   : > { %v7975_v15 = vpop.permute.xlu0 %3289  ;;  %3632 = vperm.xlu1 %4833, %v10117_v56   ;;  %v10128_v56 = vld [vmem:[#allocation116_spill] sm:$0xff] }
 0x4f8   : > { %10114 = vst [vmem:[#allocation231_spill] sm:$0xff] %v7975_v15  ;;  %v7983_v37 = vpop.permute.xlu1 %3291  ;;  %v10125_v15 = vld [vmem:[#allocation109_spill] sm:$0xff] }
 0x4f9   : > { %10119 = vst [vmem:[#allocation173_spill] sm:$0xff] %v7983_v37 }
 0x4fa   : > { %3644 = vperm.xlu0 %4834, %v10116_v3  }
 0x4fb   : > { %v7981_v4 = vpop.permute.xlu0 %3293  ;;  %3640 = vperm.xlu1 %4833, %v10121_v25   ;;  %v10132_v25 = vld [vmem:[#allocation118_spill] sm:$0xff] }
 0x4fc   : > { %10118 = vst [vmem:[#allocation172_spill] sm:$0xff] %v7981_v4  ;;  %v7989_v43 = vpop.permute.xlu1 %3295  ;;  %v10129_v4 = vld [vmem:[#allocation111_spill] sm:$0xff] }
 0x4fd   : > { %10123 = vst [vmem:[#allocation234_spill] sm:$0xff] %v7989_v43 }
 0x4fe   : > { %3652 = vperm.xlu0 %4834, %v10120_v60  }
 0x4ff   : > { %v7987_v34 = vpop.permute.xlu0 %3297  ;;  %3648 = vperm.xlu1 %4833, %v10125_v15   ;;  %v10136_v15 = vld [vmem:[#allocation120_spill] sm:$0xff] }
 0x500   : > { %10122 = vst [vmem:[#allocation233_spill] sm:$0xff] %v7987_v34  ;;  %v7995_v3 = vpop.permute.xlu1 %3299  ;;  %v10133_v34 = vld [vmem:[#allocation113_spill] sm:$0xff] }
 0x501   : > { %10127 = vst [vmem:[#allocation175_spill] sm:$0xff] %v7995_v3 }
 0x502   : > { %3660 = vperm.xlu0 %4834, %v10124_v26  }
 0x503   : > { %v7993_v39 = vpop.permute.xlu0 %3301  ;;  %3656 = vperm.xlu1 %4833, %v10129_v4   ;;  %v10139_v4 = vld [vmem:[#allocation122_spill] sm:$0xff] }
 0x504   : > { %10126 = vst [vmem:[#allocation174_spill] sm:$0xff] %v7993_v39  ;;  %v8001_v60 = vpop.permute.xlu1 %3303  ;;  %v10137_v39 = vld [vmem:[#allocation115_spill] sm:$0xff] }
 0x505   : > { %10131 = vst [vmem:[#allocation236_spill] sm:$0xff] %v8001_v60 }
 0x506   : > { %3668 = vperm.xlu0 %4834, %v10128_v56  }
 0x507   : > { %v7999_v37 = vpop.permute.xlu0 %3305  ;;  %3664 = vperm.xlu1 %4833, %v10133_v34   ;;  %v10141_v34 = vld [vmem:[#allocation124_spill] sm:$0xff] }
 0x508   : > { %10130 = vst [vmem:[#allocation235_spill] sm:$0xff] %v7999_v37  ;;  %v8007_v26 = vpop.permute.xlu1 %3307  ;;  %v10140_v37 = vld [vmem:[#allocation117_spill] sm:$0xff] }
 0x509   : > { %10135 = vst [vmem:[#allocation177_spill] sm:$0xff] %v8007_v26 }
 0x50a   : > { %3676 = vperm.xlu0 %4834, %v10132_v25  }
 0x50b   : > { %v8005_v43 = vpop.permute.xlu0 %3309  ;;  %3672 = vperm.xlu1 %4833, %v10137_v39   ;;  %v10143_v39 = vld [vmem:[#allocation121_spill] sm:$0xff] }
 0x50c   : > { %10134 = vst [vmem:[#allocation176_spill] sm:$0xff] %v8005_v43  ;;  %v8013_v56 = vpop.permute.xlu1 %3311  ;;  %v10142_v43 = vld [vmem:[#allocation119_spill] sm:$0xff] }
 0x50e   : > { %3684 = vperm.xlu0 %4834, %v10136_v15  }
 0x50f   : > { %v8011_v3 = vpop.permute.xlu0 %3313  ;;  %3680 = vperm.xlu1 %4833, %v10140_v37  }
 0x510   : > { %10138 = vst [vmem:[#allocation237_spill] sm:$0xff] %v8011_v3  ;;  %v8019_v25 = vpop.permute.xlu1 %3315 }
 0x512   : > { %3692 = vperm.xlu0 %4834, %v10139_v4  }
 0x513   : > { %v8017_v60 = vpop.permute.xlu0 %3317  ;;  %3688 = vperm.xlu1 %4833, %v10142_v43  }
 0x514   : > { %v8025_v15 = vpop.permute.xlu1 %3319 }
 0x516   : > { %3700 = vperm.xlu0 %4834, %v10141_v34  }
 0x517   : > { %v8023_v26 = vpop.permute.xlu0 %3321  ;;  %3696 = vperm.xlu1 %4833, %v10143_v39  }
 0x51a   : > { %3772 = vperm.xlu0 %4834, %v5789_v9   ;;  %v8031_v4 = vpop.permute.xlu1 %3452 }
 0x51b   : > { %3704 = vperm.xlu1 %4833, %v9771_v33  }
 0x51d   : > { %v8029_v3 = vpop.permute.xlu0 %3456 }
 0x51e   : > { %3780 = vperm.xlu0 %4834, %v5799_v40   ;;  %v8037_v34 = vpop.permute.xlu1 %3460 }
 0x51f   : > { %3776 = vperm.xlu1 %4833, %v5794_v35  }
 0x521   : > { %v8035_v37 = vpop.permute.xlu0 %3468 }
 0x522   : > { %3788 = vperm.xlu0 %4834, %v5809_v31   ;;  %v8043_v9 = vpop.permute.xlu1 %3464 }
 0x523   : > { %3784 = vperm.xlu1 %4833, %v5804_v20  }
 0x525   : > { %v8041_v43 = vpop.permute.xlu0 %3476 }
 0x526   : > { %3796 = vperm.xlu0 %4834, %v5819_v19   ;;  %v8049_v40 = vpop.permute.xlu1 %3472 }
 0x527   : > { %3792 = vperm.xlu1 %4833, %v5814_v59  }
 0x529   : > { %v8047_v39 = vpop.permute.xlu0 %3484 }
 0x52a   : > { %3804 = vperm.xlu0 %4834, %v5829_v51   ;;  %v8055_v31 = vpop.permute.xlu1 %3480 }
 0x52b   : > { %3800 = vperm.xlu1 %4833, %v5824_v47  }
 0x52d   : > { %v8053_v33 = vpop.permute.xlu0 %3492 }
 0x52e   : > { %3812 = vperm.xlu0 %4834, %v5839_v53   ;;  %v8061_v19 = vpop.permute.xlu1 %3488 }
 0x52f   : > { %3808 = vperm.xlu1 %4833, %v5834_v52  }
 0x531   : > { %v8059_v35 = vpop.permute.xlu0 %3500 }
 0x532   : > { %3820 = vperm.xlu0 %4834, %v5849_v0   ;;  %v8067_v51 = vpop.permute.xlu1 %3496 }
 0x533   : > { %3816 = vperm.xlu1 %4833, %v5844_v63  }
 0x535   : > { %v8065_v20 = vpop.permute.xlu0 %3508 }
 0x536   : > { %3828 = vperm.xlu0 %4834, %v5859_v57   ;;  %v8073_v53 = vpop.permute.xlu1 %3504 }
 0x537   : > { %3824 = vperm.xlu1 %4833, %v5854_v46  }
 0x539   : > { %v8071_v59 = vpop.permute.xlu0 %3516 }
 0x53a   : > { %3836 = vperm.xlu0 %4834, %v9526_v29   ;;  %v8079_v0 = vpop.permute.xlu1 %3512 }
 0x53b   : > { %3832 = vperm.xlu1 %4833, %v5864_v58   ;;  %v10149_v58 = vld [vmem:[#allocation34_spill] sm:$0xff] }
 0x53d   : > { %v8077_v47 = vpop.permute.xlu0 %3524 }
 0x53e   : > { %3844 = vperm.xlu0 %4834, %v9529_v45   ;;  %v8085_v57 = vpop.permute.xlu1 %3520 }
 0x53f   : > { %10144 = vst [vmem:[#allocation238_spill] sm:$0xff] %v8085_v57  ;;  %3840 = vperm.xlu1 %4833, %v5874_v1  }
 0x541   : > { %v8083_v52 = vpop.permute.xlu0 %3532 }
 0x542   : > { %3852 = vperm.xlu0 %4834, %v9532_v11   ;;  %v8091_v29 = vpop.permute.xlu1 %3528 }
 0x543   : > { %10146 = vst [vmem:[#allocation179_spill] sm:$0xff] %v8091_v29  ;;  %3848 = vperm.xlu1 %4833, %v5884_v7  }
 0x545   : > { %v8089_v63 = vpop.permute.xlu0 %3540 }
 0x546   : > { %10145 = vst [vmem:[#allocation178_spill] sm:$0xff] %v8089_v63  ;;  %3860 = vperm.xlu0 %4834, %v5899_v16   ;;  %v8097_v45 = vpop.permute.xlu1 %3536 }
 0x547   : > { %10148 = vst [vmem:[#allocation240_spill] sm:$0xff] %v8097_v45  ;;  %3856 = vperm.xlu1 %4833, %v10149_v58   ;;  %v10156_v58 = vld [vmem:[#allocation35_spill] sm:$0xff] }
 0x549   : > { %v8095_v46 = vpop.permute.xlu0 %3548 }
 0x54a   : > { %10147 = vst [vmem:[#allocation239_spill] sm:$0xff] %v8095_v46  ;;  %3868 = vperm.xlu0 %4834, %v5909_v21   ;;  %v8103_v11 = vpop.permute.xlu1 %3544 }
 0x54b   : > { %10151 = vst [vmem:[#allocation181_spill] sm:$0xff] %v8103_v11  ;;  %3864 = vperm.xlu1 %4833, %v5904_v17   ;;  %v10160_v17 = vld [vmem:[#allocation22_spill] sm:$0xff] }
 0x54d   : > { %v8101_v57 = vpop.permute.xlu0 %3556 }
 0x54e   : > { %10150 = vst [vmem:[#allocation180_spill] sm:$0xff] %v8101_v57  ;;  %3876 = vperm.xlu0 %4834, %v5919_v41   ;;  %v8109_v16 = vpop.permute.xlu1 %3552  ;;  %v10157_v57 = vld [vmem:[#allocation30_spill] sm:$0xff] }
 0x54f   : > { %10153 = vst [vmem:[#allocation182_spill] sm:$0xff] %v8109_v16  ;;  %3872 = vperm.xlu1 %4833, %v5914_v10   ;;  %v10163_v10 = vld [vmem:[#allocation36_spill] sm:$0xff] }
 0x551   : > { %v8107_v1 = vpop.permute.xlu0 %3564 }
 0x552   : > { %10152 = vst [vmem:[#allocation241_spill] sm:$0xff] %v8107_v1  ;;  %3884 = vperm.xlu0 %4834, %v5929_v28   ;;  %v8115_v21 = vpop.permute.xlu1 %3560 }
 0x553   : > { %10155 = vst [vmem:[#allocation184_spill] sm:$0xff] %v8115_v21  ;;  %3880 = vperm.xlu1 %4833, %v10157_v57   ;;  %v10166_v57 = vld [vmem:[#allocation37_spill] sm:$0xff] }
 0x555   : > { %v8113_v7 = vpop.permute.xlu0 %3572 }
 0x556   : > { %10154 = vst [vmem:[#allocation183_spill] sm:$0xff] %v8113_v7  ;;  %3892 = vperm.xlu0 %4834, %v10156_v58   ;;  %v8121_v41 = vpop.permute.xlu1 %3568 }
 0x557   : > { %10159 = vst [vmem:[#allocation68_spill] sm:$0xff] %v8121_v41  ;;  %3888 = vperm.xlu1 %4833, %v10160_v17  }
 0x559   : > { %v8119_v11 = vpop.permute.xlu0 %3580 }
 0x55a   : > { %10158 = vst [vmem:[#allocation185_spill] sm:$0xff] %v8119_v11  ;;  %3900 = vperm.xlu0 %4834, %v5949_v38   ;;  %v8127_v28 = vpop.permute.xlu1 %3576 }
 0x55b   : > { %10162 = vst [vmem:[#allocation70_spill] sm:$0xff] %v8127_v28  ;;  %3896 = vperm.xlu1 %4833, %v10163_v10  }
 0x55d   : > { %v8125_v16 = vpop.permute.xlu0 %3588 }
 0x55e   : > { %10161 = vst [vmem:[#allocation66_spill] sm:$0xff] %v8125_v16  ;;  %3908 = vperm.xlu0 %4834, %v9810_v32   ;;  %v8133_v58 = vpop.permute.xlu1 %3584 }
 0x55f   : > { %10165 = vst [vmem:[#allocation72_spill] sm:$0xff] %v8133_v58  ;;  %3904 = vperm.xlu1 %4833, %v10166_v57  }
 0x561   : > { %v8131_v21 = vpop.permute.xlu0 %3596 }
 0x562   : > { %10164 = vst [vmem:[#allocation65_spill] sm:$0xff] %v8131_v21  ;;  %3916 = vperm.xlu0 %4834, %v5969_v22   ;;  %v8139_v38 = vpop.permute.xlu1 %3592 }
 0x563   : > { %10168 = vst [vmem:[#allocation74_spill] sm:$0xff] %v8139_v38  ;;  %3912 = vperm.xlu1 %4833, %v9811_v61   ;;  %v10175_v61 = vld [vmem:[#allocation39_spill] sm:$0xff] }
 0x565   : > { %v8137_v41 = vpop.permute.xlu0 %3604 }
 0x566   : > { %10167 = vst [vmem:[#allocation67_spill] sm:$0xff] %v8137_v41  ;;  %3924 = vperm.xlu0 %4834, %v9624_v5   ;;  %v8145_v32 = vpop.permute.xlu1 %3600  ;;  %v10225_v41 = vld [vmem:[#allocation247_spill] sm:$0xff] }
 0x567   : > { %10170 = vst [vmem:[#allocation76_spill] sm:$0xff] %v8145_v32  ;;  %3920 = vperm.xlu1 %4833, %v9814_v44   ;;  %v10178_v44 = vld [vmem:[#allocation44_spill] sm:$0xff] }
 0x569   : > { %v8143_v17 = vpop.permute.xlu0 %3612 }
 0x56a   : > { %10169 = vst [vmem:[#allocation69_spill] sm:$0xff] %v8143_v17  ;;  %3932 = vperm.xlu0 %4834, %v9628_v55   ;;  %v8151_v22 = vpop.permute.xlu1 %3608  ;;  %v10215_v17 = vld [vmem:[#allocation54_spill] sm:$0xff] }
 0x56b   : > { %10172 = vst [vmem:[#allocation78_spill] sm:$0xff] %v8151_v22  ;;  %3928 = vperm.xlu1 %4833, %v9817_v12   ;;  %v10182_v12 = vld [vmem:[#allocation33_spill] sm:$0xff] }
 0x56d   : > { %v8149_v10 = vpop.permute.xlu0 %3620 }
 0x56e   : > { %10171 = vst [vmem:[#allocation71_spill] sm:$0xff] %v8149_v10  ;;  %3940 = vperm.xlu0 %4834, %v9631_v6   ;;  %v8157_v5 = vpop.permute.xlu1 %3616  ;;  %v10179_v10 = vld [vmem:[#allocation41_spill] sm:$0xff] }
 0x56f   : > { %10174 = vst [vmem:[#allocation80_spill] sm:$0xff] %v8157_v5  ;;  %3936 = vperm.xlu1 %4833, %v10175_v61   ;;  %v10186_v61 = vld [vmem:[#allocation20_spill] sm:$0xff] }
 0x571   : > { %v8155_v57 = vpop.permute.xlu0 %3628 }
 0x572   : > { %10173 = vst [vmem:[#allocation73_spill] sm:$0xff] %v8155_v57  ;;  %3948 = vperm.xlu0 %4834, %v9561_v36   ;;  %v8163_v55 = vpop.permute.xlu1 %3624  ;;  %v10183_v57 = vld [vmem:[#allocation43_spill] sm:$0xff] }
 0x573   : > { %10177 = vst [vmem:[#allocation27_spill] sm:$0xff] %v8163_v55  ;;  %3944 = vperm.xlu1 %4833, %v10179_v10   ;;  %v10190_v10 = vld [vmem:[#allocation45_spill] sm:$0xff] }
 0x575   : > { %v8161_v32 = vpop.permute.xlu0 %3636 }
 0x576   : > { %10176 = vst [vmem:[#allocation75_spill] sm:$0xff] %v8161_v32  ;;  %3956 = vperm.xlu0 %4834, %v10178_v44   ;;  %v8169_v6 = vpop.permute.xlu1 %3632  ;;  %v10187_v32 = vld [vmem:[#allocation32_spill] sm:$0xff] }
 0x577   : > { %10181 = vst [vmem:[#allocation28_spill] sm:$0xff] %v8169_v6  ;;  %3952 = vperm.xlu1 %4833, %v10183_v57   ;;  %v10194_v57 = vld [vmem:[#allocation47_spill] sm:$0xff] }
 0x579   : > { %v8167_v22 = vpop.permute.xlu0 %3644 }
 0x57a   : > { %10180 = vst [vmem:[#allocation77_spill] sm:$0xff] %v8167_v22  ;;  %3964 = vperm.xlu0 %4834, %v10182_v12   ;;  %v8175_v36 = vpop.permute.xlu1 %3640  ;;  %v10191_v22 = vld [vmem:[#allocation19_spill] sm:$0xff] }
 0x57b   : > { %10185 = vst [vmem:[#allocation29_spill] sm:$0xff] %v8175_v36  ;;  %3960 = vperm.xlu1 %4833, %v10187_v32   ;;  %v10198_v32 = vld [vmem:[#allocation49_spill] sm:$0xff] }
 0x57d   : > { %v8173_v5 = vpop.permute.xlu0 %3652 }
 0x57e   : > { %10184 = vst [vmem:[#allocation79_spill] sm:$0xff] %v8173_v5  ;;  %3972 = vperm.xlu0 %4834, %v10186_v61   ;;  %v8181_v44 = vpop.permute.xlu1 %3648  ;;  %v10195_v5 = vld [vmem:[#allocation21_spill] sm:$0xff] }
 0x57f   : > { %10189 = vst [vmem:[#allocation85_spill] sm:$0xff] %v8181_v44  ;;  %3968 = vperm.xlu1 %4833, %v10191_v22   ;;  %v10202_v22 = vld [vmem:[#allocation51_spill] sm:$0xff] }
 0x581   : > { %v8179_v55 = vpop.permute.xlu0 %3660 }
 0x582   : > { %10188 = vst [vmem:[#allocation81_spill] sm:$0xff] %v8179_v55  ;;  %3980 = vperm.xlu0 %4834, %v10190_v10   ;;  %v8187_v12 = vpop.permute.xlu1 %3656  ;;  %v10199_v55 = vld [vmem:[#allocation46_spill] sm:$0xff] }
 0x583   : > { %10193 = vst [vmem:[#allocation87_spill] sm:$0xff] %v8187_v12  ;;  %3976 = vperm.xlu1 %4833, %v10195_v5   ;;  %v10206_v5 = vld [vmem:[#allocation53_spill] sm:$0xff] }
 0x585   : > { %v8185_v6 = vpop.permute.xlu0 %3668 }
 0x586   : > { %10192 = vst [vmem:[#allocation82_spill] sm:$0xff] %v8185_v6  ;;  %3988 = vperm.xlu0 %4834, %v10194_v57   ;;  %v8193_v61 = vpop.permute.xlu1 %3664  ;;  %v10203_v6 = vld [vmem:[#allocation48_spill] sm:$0xff] }
 0x587   : > { %10197 = vst [vmem:[#allocation89_spill] sm:$0xff] %v8193_v61  ;;  %3984 = vperm.xlu1 %4833, %v10199_v55   ;;  %v10210_v55 = vld [vmem:[#allocation242_spill] sm:$0xff] }
 0x589   : > { %v8191_v36 = vpop.permute.xlu0 %3676 }
 0x58a   : > { %10196 = vst [vmem:[#allocation83_spill] sm:$0xff] %v8191_v36  ;;  %3996 = vperm.xlu0 %4834, %v10198_v32   ;;  %v8199_v10 = vpop.permute.xlu1 %3672  ;;  %v10207_v36 = vld [vmem:[#allocation50_spill] sm:$0xff] }
 0x58b   : > { %10201 = vst [vmem:[#allocation91_spill] sm:$0xff] %v8199_v10  ;;  %3992 = vperm.xlu1 %4833, %v10203_v6   ;;  %v10211_v10 = vld [vmem:[#allocation55_spill] sm:$0xff] }
 0x58d   : > { %v8197_v44 = vpop.permute.xlu0 %3684 }
 0x58e   : > { %10200 = vst [vmem:[#allocation84_spill] sm:$0xff] %v8197_v44  ;;  %4004 = vperm.xlu0 %4834, %v10202_v22   ;;  %v8205_v57 = vpop.permute.xlu1 %3680  ;;  %v2747_v44 = vmul.f32 %v10210_v55, %v7457_v48  ;;  %v10212_v22 = vld [vmem:[#allocation52_spill] sm:$0xff] }
 0x58f   : > { %10205 = vst [vmem:[#allocation93_spill] sm:$0xff] %v8205_v57  ;;  %4000 = vperm.xlu1 %4833, %v10207_v36  }
 0x590   : > { %v8218_v6 = vadd.f32 %v7839_v24, %v2747_v44  ;;  %v10217_v24 = vld [vmem:[#allocation126_spill] sm:$0xff]  ;;  %v10218_v44 = vld [vmem:[#allocation123_spill] sm:$0xff] }
 0x591   : > { %v8203_v12 = vpop.permute.xlu0 %3692  ;;  %v2748_v55 = vmul.f32 %v10218_v44, %v10217_v24  ;;  %v10224_v44 = vld [vmem:[#allocation127_spill] sm:$0xff] }
 0x592   : > { %10204 = vst [vmem:[#allocation86_spill] sm:$0xff] %v8203_v12  ;;  %4012 = vperm.xlu0 %4834, %v10206_v5   ;;  %v8211_v32 = vpop.permute.xlu1 %3688  ;;  %v10214_v5 = vld [vmem:[#allocation243_spill] sm:$0xff] }
 0x593   : > { %10209 = vst [vmem:[#allocation95_spill] sm:$0xff] %v8211_v32  ;;  %4008 = vperm.xlu1 %4833, %v10212_v22   ;;  %v2749_v36 = vmul.f32 %v10214_v5, %v7469_v18  ;;  %v10219_v22 = vld [vmem:[#allocation125_spill] sm:$0xff] }
 0x595   : > { %v8209_v61 = vpop.permute.xlu0 %3700  ;;  %v8227_v32 = vadd.f32 %v7845_v62, %v2749_v36  ;;  %v10222_v36 = vld [vmem:[#allocation128_spill] sm:$0xff] }
 0x596   : > { %10208 = vst [vmem:[#allocation88_spill] sm:$0xff] %v8209_v61  ;;  %4020 = vperm.xlu0 %4834, %v10211_v10   ;;  %v8220_v57 = vpop.permute.xlu1 %3696 }
 0x597   : > { %10213 = vst [vmem:[#allocation90_spill] sm:$0xff] %v8220_v57  ;;  %4016 = vperm.xlu1 %4833, %v10215_v17   ;;  %v10220_v57 = vld [vmem:[#allocation245_spill] sm:$0xff]  ;;  %v8239_v17 = vadd.f32 %v7837_v13, %v2748_v55 }
 0x598   : > { %v2751_v38 = vmul.f32 %v10220_v57, %v10219_v22  ;;  %v2753_v57 = vmul.f32 %v10225_v41, %v10224_v44  ;;  %v10228_v41 = vld [vmem:[#allocation130_spill] sm:$0xff] }
 0x599   : > { %v3773_v12 = vpop.permute.xlu0 %3772 }
 0x59a   : > { %v4027_v61 = vmul.f32 %v3773_v12, %v8218_v6  ;;  %v8230_v10 = vpop.permute.xlu1 %3704  ;;  %v10221_v12 = vld [vmem:[#allocation56_spill] sm:$0xff]  ;;  %v8242_v62 = vadd.f32 %v7851_v27, %v2751_v38  ;;  %v8255_v27 = vadd.f32 %v7857_v30, %v2753_v57 }
 0x59b   : > { %10216 = vst [vmem:[#allocation97_spill] sm:$0xff] %v8230_v10  ;;  %4024 = vperm.xlu1 %4833, %v10221_v12   ;;  %v10223_v10 = vld [vmem:[#allocation244_spill] sm:$0xff] }
 0x59c   : > { %4155 = vrot.lane.b32.xlu0 %v4027_v61, %s4987_s16  ;;  %v2750_v24 = vmul.f32 %v10223_v10, %v10222_v36  ;;  %v10226_v10 = vld [vmem:[#allocation186_spill] sm:$0xff]  ;;  %v10229_v36 = vld [vmem:[#allocation249_spill] sm:$0xff] }
 0x59d   : > { %v3781_v48 = vpop.permute.xlu0 %3780 }
 0x59e   : > { %v4029_v18 = vmul.f32 %v3781_v48, %v8227_v32  ;;  %v3777_v5 = vpop.permute.xlu1 %3776  ;;  %v8252_v13 = vadd.f32 %v7843_v54, %v2750_v24 }
 0x59f   : > { %v4028_v22 = vmul.f32 %v3777_v5, %v8239_v17 }
 0x5a0   : > { %4159 = vrot.lane.b32.xlu0 %v4029_v18, %s4987_s16  ;;  %v10227_v18 = vld [vmem:[#allocation246_spill] sm:$0xff] }
 0x5a1   : > { %v3789_v61 = vpop.permute.xlu0 %3788  ;;  %4157 = vrot.lane.b32.xlu1 %v4028_v22, %s4987_s16  ;;  %v2752_v12 = vmul.f32 %v10227_v18, %v10226_v10  ;;  %v10231_v22 = vld [vmem:[#allocation248_spill] sm:$0xff]  ;;  %v10232_v18 = vld [vmem:[#allocation131_spill] sm:$0xff] }
 0x5a2   : > { %v4031_v48 = vmul.f32 %v3789_v61, %v8242_v62  ;;  %v3785_v55 = vpop.permute.xlu1 %3784  ;;  %v2755_v61 = vmul.f32 %v10229_v36, %v10228_v41  ;;  %v10233_v41 = vld [vmem:[#allocation251_spill] sm:$0xff] }
 0x5a3   : > { %v4030_v54 = vmul.f32 %v3785_v55, %v8252_v13  ;;  %v8266_v24 = vadd.f32 %v7849_v2, %v2752_v12 }
 0x5a4   : > { %4163 = vrot.lane.b32.xlu0 %v4031_v48, %s4987_s16  ;;  %v8269_v30 = vadd.f32 %v7863_v8, %v2755_v61  ;;  %v10230_v48 = vld [vmem:[#allocation187_spill] sm:$0xff] }
 0x5a5   : > { %v3797_v38 = vpop.permute.xlu0 %3796  ;;  %4161 = vrot.lane.b32.xlu1 %v4030_v54, %s4987_s16  ;;  %v2754_v10 = vmul.f32 %v10231_v22, %v10230_v48  ;;  %v10235_v54 = vld [vmem:[#allocation250_spill] sm:$0xff]  ;;  %v10236_v22 = vld [vmem:[#allocation189_spill] sm:$0xff] }
 0x5a6   : > { %v4033_v5 = vmul.f32 %v3797_v38, %v8255_v27  ;;  %v3793_v57 = vpop.permute.xlu1 %3792  ;;  %v2757_v38 = vmul.f32 %v10233_v41, %v10232_v18  ;;  %v10237_v18 = vld [vmem:[#allocation253_spill] sm:$0xff] }
 0x5a7   : > { %v4032_v2 = vmul.f32 %v3793_v57, %v8266_v24  ;;  %v8280_v12 = vadd.f32 %v7855_v42, %v2754_v10 }
 0x5a8   : > { %4167 = vrot.lane.b32.xlu0 %v4033_v5, %s4987_s16  ;;  %v8283_v8 = vadd.f32 %v7869_v14, %v2757_v38  ;;  %v10234_v5 = vld [vmem:[#allocation129_spill] sm:$0xff] }
 0x5a9   : > { %v3805_v44 = vpop.permute.xlu0 %3804  ;;  %4165 = vrot.lane.b32.xlu1 %v4032_v2, %s4987_s16  ;;  %v2756_v48 = vmul.f32 %v10235_v54, %v10234_v5  ;;  %v10239_v2 = vld [vmem:[#allocation252_spill] sm:$0xff]  ;;  %v10240_v54 = vld [vmem:[#allocation133_spill] sm:$0xff] }
 0x5aa   : > { %v4035_v55 = vmul.f32 %v3805_v44, %v8269_v30  ;;  %v3801_v61 = vpop.permute.xlu1 %3800  ;;  %v2759_v44 = vmul.f32 %v10237_v18, %v10236_v22  ;;  %v10241_v22 = vld [vmem:[#allocation255_spill] sm:$0xff] }
 0x5ab   : > { %v4034_v42 = vmul.f32 %v3801_v61, %v8280_v12  ;;  %v8294_v10 = vadd.f32 %v7861_v50, %v2756_v48 }
 0x5ac   : > { %4171 = vrot.lane.b32.xlu0 %v4035_v55, %s4987_s16  ;;  %v8297_v14 = vadd.f32 %v7875_v49, %v2759_v44  ;;  %v10238_v55 = vld [vmem:[#allocation188_spill] sm:$0xff] }
 0x5ad   : > { %v3813_v36 = vpop.permute.xlu0 %3812  ;;  %4169 = vrot.lane.b32.xlu1 %v4034_v42, %s4987_s16  ;;  %v2758_v5 = vmul.f32 %v10239_v2, %v10238_v55  ;;  %v10242_v49 = vld [vmem:[#allocation216_spill] sm:$0xff]  ;;  %v10244_v55 = vld [vmem:[#allocation254_spill] sm:$0xff] }
 0x5ae   : > { %v4037_v57 = vmul.f32 %v3813_v36, %v8283_v8  ;;  %v3809_v38 = vpop.permute.xlu1 %3808  ;;  %v2761_v36 = vmul.f32 %v10241_v22, %v10240_v54  ;;  %v10243_v42 = vld [vmem:[#allocation132_spill] sm:$0xff]  ;;  %v10245_v54 = vld [vmem:[#allocation191_spill] sm:$0xff]  ;;  %v10246_v22 = vld [vmem:[#allocation257_spill] sm:$0xff] }
 0x5af   : > { %v4036_v50 = vmul.f32 %v3809_v38, %v8294_v10  ;;  %v8308_v48 = vadd.f32 %v7867_v23, %v2758_v5  ;;  %v2760_v2 = vmul.f32 %v10244_v55, %v10243_v42  ;;  %v10247_v5 = vld [vmem:[#allocation158_spill] sm:$0xff]  ;;  %v10250_v55 = vld [vmem:[#allocation256_spill] sm:$0xff] }
 0x5b0   : > { %4175 = vrot.lane.b32.xlu0 %v4037_v57, %s4987_s16  ;;  %v8311_v18 = vadd.f32 %v10242_v49, %v2761_v36  ;;  %v10248_v36 = vld [vmem:[#allocation160_spill] sm:$0xff]  ;;  %v10249_v42 = vld [vmem:[#allocation190_spill] sm:$0xff] }
 0x5b1   : > { %v3821_v41 = vpop.permute.xlu0 %3820  ;;  %4173 = vrot.lane.b32.xlu1 %v4036_v50, %s4987_s16  ;;  %v8322_v58 = vadd.f32 %v10247_v5, %v2760_v2  ;;  %v2762_v21 = vmul.f32 %v10250_v55, %v10249_v42  ;;  %v10253_v5 = vld [vmem:[#allocation215_spill] sm:$0xff]  ;;  %v10255_v42 = vld [vmem:[#allocation134_spill] sm:$0xff] }
 0x5b2   : > { %v4039_v61 = vmul.f32 %v3821_v41, %v8297_v14  ;;  %v3817_v57 = vpop.permute.xlu1 %3816  ;;  %v2763_v41 = vmul.f32 %v10246_v22, %v10245_v54  ;;  %v10251_v54 = vld [vmem:[#allocation135_spill] sm:$0xff]  ;;  %v10256_v55 = vld [vmem:[#allocation258_spill] sm:$0xff] }
 0x5b3   : > { %v4038_v23 = vmul.f32 %v3817_v57, %v8308_v48  ;;  %v10252_v22 = vld [vmem:[#allocation259_spill] sm:$0xff]  ;;  %v8336_v28 = vadd.f32 %v10253_v5, %v2762_v21  ;;  %v2764_v16 = vmul.f32 %v10256_v55, %v10255_v42  ;;  %v10261_v42 = vld [vmem:[#allocation192_spill] sm:$0xff] }
 0x5b4   : > { %4179 = vrot.lane.b32.xlu0 %v4039_v61, %s4987_s16  ;;  %v8325_v49 = vadd.f32 %v10248_v36, %v2763_v41  ;;  %v10254_v41 = vld [vmem:[#allocation218_spill] sm:$0xff]  ;;  %v10259_v5 = vld [vmem:[#allocation159_spill] sm:$0xff]  ;;  %v10262_v55 = vld [vmem:[#allocation260_spill] sm:$0xff] }
 0x5b5   : > { %v3829_v44 = vpop.permute.xlu0 %3828  ;;  %4177 = vrot.lane.b32.xlu1 %v4038_v23, %s4987_s16  ;;  %v8350_v11 = vadd.f32 %v10259_v5, %v2764_v16  ;;  %v2766_v7 = vmul.f32 %v10262_v55, %v10261_v42  ;;  %v10265_v5 = vld [vmem:[#allocation217_spill] sm:$0xff]  ;;  %v10268_v42 = vld [vmem:[#allocation136_spill] sm:$0xff]  ;;  %v10269_v55 = vld [vmem:[#allocation262_spill] sm:$0xff] }
 0x5b6   : > { %v4041_v38 = vmul.f32 %v3829_v44, %v8311_v18  ;;  %v3825_v50 = vpop.permute.xlu1 %3824  ;;  %v2765_v44 = vmul.f32 %v10252_v22, %v10251_v54  ;;  %v10257_v54 = vld [vmem:[#allocation193_spill] sm:$0xff]  ;;  %v2768_v45 = vmul.f32 %v10269_v55, %v10268_v42  ;;  %v10276_v42 = vld [vmem:[#allocation194_spill] sm:$0xff]  ;;  %v10277_v55 = vld [vmem:[#allocation264_spill] sm:$0xff] }
 0x5b7   : > { %v4040_v2 = vmul.f32 %v3825_v50, %v8322_v58  ;;  %v10258_v22 = vld [vmem:[#allocation261_spill] sm:$0xff]  ;;  %v8364_v1 = vadd.f32 %v10265_v5, %v2766_v7  ;;  %v2770_v29 = vmul.f32 %v10277_v55, %v10276_v42  ;;  %v10284_v42 = vld [vmem:[#allocation138_spill] sm:$0xff] }
 0x5b8   : > { %4183 = vrot.lane.b32.xlu0 %v4041_v38, %s4987_s16  ;;  %v8339_v36 = vadd.f32 %v10254_v41, %v2765_v44  ;;  %v10260_v44 = vld [vmem:[#allocation162_spill] sm:$0xff]  ;;  %v10272_v5 = vld [vmem:[#allocation161_spill] sm:$0xff] }
 0x5b9   : > { %v3837_v61 = vpop.permute.xlu0 %3836  ;;  %4181 = vrot.lane.b32.xlu1 %v4040_v2, %s4987_s16  ;;  %10266 = vst [vmem:[#allocation92_spill] sm:$0xff] %v8364_v1  ;;  %v8378_v46 = vadd.f32 %v10272_v5, %v2768_v45  ;;  %v10280_v5 = vld [vmem:[#allocation219_spill] sm:$0xff]  ;;  %v10285_v55 = vld [vmem:[#allocation266_spill] sm:$0xff] }
 0x5ba   : > { %v4043_v57 = vmul.f32 %v3837_v61, %v8325_v49  ;;  %v3833_v23 = vpop.permute.xlu1 %3832  ;;  %v2767_v61 = vmul.f32 %v10258_v22, %v10257_v54  ;;  %v10263_v54 = vld [vmem:[#allocation137_spill] sm:$0xff]  ;;  %v10264_v22 = vld [vmem:[#allocation263_spill] sm:$0xff]  ;;  %v2772_v63 = vmul.f32 %v10285_v55, %v10284_v42  ;;  %v10292_v42 = vld [vmem:[#allocation196_spill] sm:$0xff] }
 0x5bb   : > { %v4042_v21 = vmul.f32 %v3833_v23, %v8336_v28  ;;  %10273 = vst [vmem:[#allocation99_spill] sm:$0xff] %v8378_v46  ;;  %v10293_v55 = vld [vmem:[#allocation268_spill] sm:$0xff] }
 0x5bc   : > { %4187 = vrot.lane.b32.xlu0 %v4043_v57, %s4987_s16  ;;  %v8353_v41 = vadd.f32 %v10260_v44, %v2767_v61  ;;  %v10267_v61 = vld [vmem:[#allocation220_spill] sm:$0xff] }
 0x5bd   : > { %v3845_v38 = vpop.permute.xlu0 %3844  ;;  %4185 = vrot.lane.b32.xlu1 %v4042_v21, %s4987_s16 }
 0x5be   : > { %v4045_v50 = vmul.f32 %v3845_v38, %v8339_v36  ;;  %v3841_v2 = vpop.permute.xlu1 %3840  ;;  %v2769_v38 = vmul.f32 %v10264_v22, %v10263_v54  ;;  %v10270_v54 = vld [vmem:[#allocation195_spill] sm:$0xff]  ;;  %v10271_v22 = vld [vmem:[#allocation265_spill] sm:$0xff] }
 0x5bf   : > { %v4044_v16 = vmul.f32 %v3841_v2, %v8350_v11 }
 0x5c0   : > { %4191 = vrot.lane.b32.xlu0 %v4045_v50, %s4987_s16  ;;  %v8367_v44 = vadd.f32 %v10267_v61, %v2769_v38  ;;  %v10274_v38 = vld [vmem:[#allocation164_spill] sm:$0xff] }
 0x5c1   : > { %v3853_v57 = vpop.permute.xlu0 %3852  ;;  %4189 = vrot.lane.b32.xlu1 %v4044_v16, %s4987_s16 }
 0x5c2   : > { %v4047_v23 = vmul.f32 %v3853_v57, %v8353_v41  ;;  %v3849_v21 = vpop.permute.xlu1 %3848  ;;  %v2771_v57 = vmul.f32 %v10271_v22, %v10270_v54  ;;  %v10278_v54 = vld [vmem:[#allocation139_spill] sm:$0xff] }
 0x5c3   : > { %v4046_v7 = vmul.f32 %v3849_v21, %v8364_v1  ;;  %v10279_v22 = vld [vmem:[#allocation267_spill] sm:$0xff]  ;;  %v8392_v1 = vadd.f32 %v10280_v5, %v2770_v29 }
 0x5c4   : > { %4195 = vrot.lane.b32.xlu0 %v4047_v23, %s4987_s16  ;;  %v8381_v61 = vadd.f32 %v10274_v38, %v2771_v57  ;;  %v10282_v57 = vld [vmem:[#allocation222_spill] sm:$0xff]  ;;  %v10288_v5 = vld [vmem:[#allocation163_spill] sm:$0xff] }
 0x5c5   : > { %v3861_v50 = vpop.permute.xlu0 %3860  ;;  %4193 = vrot.lane.b32.xlu1 %v4046_v7, %s4987_s16  ;;  %10281 = vst [vmem:[#allocation101_spill] sm:$0xff] %v8392_v1 }
 0x5c6   : > { %v4049_v2 = vmul.f32 %v3861_v50, %v8367_v44  ;;  %10275 = vst [vmem:[#allocation94_spill] sm:$0xff] %v8381_v61  ;;  %v3857_v16 = vpop.permute.xlu1 %3856  ;;  %v2773_v50 = vmul.f32 %v10279_v22, %v10278_v54  ;;  %v10286_v54 = vld [vmem:[#allocation197_spill] sm:$0xff] }
 0x5c7   : > { %v4048_v45 = vmul.f32 %v3857_v16, %v8378_v46  ;;  %v10287_v22 = vld [vmem:[#allocation269_spill] sm:$0xff]  ;;  %v8406_v46 = vadd.f32 %v10288_v5, %v2772_v63 }
 0x5c8   : > { %4199 = vrot.lane.b32.xlu0 %v4049_v2, %s4987_s16  ;;  %v8395_v38 = vadd.f32 %v10282_v57, %v2773_v50  ;;  %v10290_v50 = vld [vmem:[#allocation165_spill] sm:$0xff] }
 0x5c9   : > { %v3869_v23 = vpop.permute.xlu0 %3868  ;;  %4197 = vrot.lane.b32.xlu1 %v4048_v45, %s4987_s16  ;;  %10289 = vst [vmem:[#allocation103_spill] sm:$0xff] %v8406_v46  ;;  %v10296_v5 = vld [vmem:[#allocation221_spill] sm:$0xff] }
 0x5ca   : > { %v4051_v21 = vmul.f32 %v3869_v23, %v8381_v61  ;;  %10283 = vst [vmem:[#allocation96_spill] sm:$0xff] %v8395_v38  ;;  %v3865_v7 = vpop.permute.xlu1 %3864  ;;  %v2775_v23 = vmul.f32 %v10287_v22, %v10286_v54  ;;  %v2774_v61 = vmul.f32 %v10293_v55, %v10292_v42  ;;  %v10294_v54 = vld [vmem:[#allocation141_spill] sm:$0xff]  ;;  %v10295_v22 = vld [vmem:[#allocation271_spill] sm:$0xff]  ;;  %v10300_v42 = vld [vmem:[#allocation140_spill] sm:$0xff] }
 0x5cb   : > { %v4050_v29 = vmul.f32 %v3865_v7, %v8392_v1  ;;  %v10301_v55 = vld [vmem:[#allocation270_spill] sm:$0xff] }
 0x5cc   : > { %4203 = vrot.lane.b32.xlu0 %v4051_v21, %s4987_s16  ;;  %v8409_v57 = vadd.f32 %v10290_v50, %v2775_v23  ;;  %v8420_v1 = vadd.f32 %v10296_v5, %v2774_v61  ;;  %v10298_v23 = vld [vmem:[#allocation224_spill] sm:$0xff]  ;;  %v10304_v5 = vld [vmem:[#allocation25_spill] sm:$0xff] }
 0x5cd   : > { %v3877_v2 = vpop.permute.xlu0 %3876  ;;  %4201 = vrot.lane.b32.xlu1 %v4050_v29, %s4987_s16 }
 0x5ce   : > { %v4053_v16 = vmul.f32 %v3877_v2, %v8395_v38  ;;  %10291 = vst [vmem:[#allocation98_spill] sm:$0xff] %v8409_v57  ;;  %v3873_v45 = vpop.permute.xlu1 %3872  ;;  %v2777_v2 = vmul.f32 %v10295_v22, %v10294_v54  ;;  %10297 = vst [vmem:[#allocation105_spill] sm:$0xff] %v8420_v1  ;;  %v2776_v38 = vmul.f32 %v10301_v55, %v10300_v42  ;;  %v10302_v54 = vld [vmem:[#allocation199_spill] sm:$0xff]  ;;  %v10303_v22 = vld [vmem:[#allocation273_spill] sm:$0xff] }
 0x5cf   : > { %v4052_v63 = vmul.f32 %v3873_v45, %v8406_v46  ;;  %v10308_v42 = vld [vmem:[#allocation198_spill] sm:$0xff]  ;;  %v10309_v55 = vld [vmem:[#allocation272_spill] sm:$0xff] }
 0x5d0   : > { %4207 = vrot.lane.b32.xlu0 %v4053_v16, %s4987_s16  ;;  %v8423_v50 = vadd.f32 %v10298_v23, %v2777_v2  ;;  %v8434_v46 = vadd.f32 %v10304_v5, %v2776_v38  ;;  %v10306_v2 = vld [vmem:[#allocation166_spill] sm:$0xff]  ;;  %v10312_v5 = vld [vmem:[#allocation223_spill] sm:$0xff] }
 0x5d1   : > { %v3885_v21 = vpop.permute.xlu0 %3884  ;;  %4205 = vrot.lane.b32.xlu1 %v4052_v63, %s4987_s16 }
 0x5d2   : > { %v4055_v7 = vmul.f32 %v3885_v21, %v8409_v57  ;;  %10299 = vst [vmem:[#allocation100_spill] sm:$0xff] %v8423_v50  ;;  %v3881_v29 = vpop.permute.xlu1 %3880  ;;  %v2779_v21 = vmul.f32 %v10303_v22, %v10302_v54  ;;  %10305 = vst [vmem:[#allocation42_spill] sm:$0xff] %v8434_v46  ;;  %v2778_v57 = vmul.f32 %v10309_v55, %v10308_v42  ;;  %v10310_v54 = vld [vmem:[#allocation143_spill] sm:$0xff]  ;;  %v10316_v42 = vld [vmem:[#allocation142_spill] sm:$0xff] }
 0x5d3   : > { %v4054_v61 = vmul.f32 %v3881_v29, %v8420_v1  ;;  %v10311_v22 = vld [vmem:[#allocation275_spill] sm:$0xff]  ;;  %v10317_v55 = vld [vmem:[#allocation274_spill] sm:$0xff] }
 0x5d4   : > { %4211 = vrot.lane.b32.xlu0 %v4055_v7, %s4987_s16  ;;  %v8437_v23 = vadd.f32 %v10306_v2, %v2779_v21  ;;  %v8448_v1 = vadd.f32 %v10312_v5, %v2778_v57  ;;  %v10314_v21 = vld [vmem:[#allocation226_spill] sm:$0xff]  ;;  %v10320_v5 = vld [vmem:[#allocation31_spill] sm:$0xff] }
 0x5d5   : > { %v3893_v16 = vpop.permute.xlu0 %3892  ;;  %4209 = vrot.lane.b32.xlu1 %v4054_v61, %s4987_s16 }
 0x5d6   : > { %v4057_v45 = vmul.f32 %v3893_v16, %v8423_v50  ;;  %10307 = vst [vmem:[#allocation102_spill] sm:$0xff] %v8437_v23  ;;  %v3889_v63 = vpop.permute.xlu1 %3888  ;;  %v2781_v16 = vmul.f32 %v10311_v22, %v10310_v54  ;;  %10313 = vst [vmem:[#allocation108_spill] sm:$0xff] %v8448_v1  ;;  %v2780_v50 = vmul.f32 %v10317_v55, %v10316_v42  ;;  %v10318_v54 = vld [vmem:[#allocation201_spill] sm:$0xff]  ;;  %v10319_v22 = vld [vmem:[#allocation38_spill] sm:$0xff] }
 0x5d7   : > { %v4056_v38 = vmul.f32 %v3889_v63, %v8434_v46  ;;  %v10324_v42 = vld [vmem:[#allocation200_spill] sm:$0xff] }
 0x5d8   : > { %4215 = vrot.lane.b32.xlu0 %v4057_v45, %s4987_s16  ;;  %v8451_v2 = vadd.f32 %v10314_v21, %v2781_v16  ;;  %v8462_v46 = vadd.f32 %v10320_v5, %v2780_v50  ;;  %v10322_v16 = vld [vmem:[#allocation167_spill] sm:$0xff]  ;;  %v10325_v55 = vld [vmem:[#allocation276_spill] sm:$0xff]  ;;  %v10328_v5 = vld [vmem:[#allocation225_spill] sm:$0xff] }
 0x5d9   : > { %v3901_v7 = vpop.permute.xlu0 %3900  ;;  %4213 = vrot.lane.b32.xlu1 %v4056_v38, %s4987_s16 }
 0x5da   : > { %v4059_v29 = vmul.f32 %v3901_v7, %v8437_v23  ;;  %10315 = vst [vmem:[#allocation104_spill] sm:$0xff] %v8451_v2  ;;  %v3897_v61 = vpop.permute.xlu1 %3896  ;;  %v2783_v7 = vmul.f32 %v10319_v22, %v10318_v54  ;;  %10321 = vst [vmem:[#allocation110_spill] sm:$0xff] %v8462_v46  ;;  %v2782_v23 = vmul.f32 %v10325_v55, %v10324_v42  ;;  %v10326_v54 = vld [vmem:[#allocation145_spill] sm:$0xff]  ;;  %v10327_v22 = vld [vmem:[#allocation24_spill] sm:$0xff] }
 0x5db   : > { %v4058_v57 = vmul.f32 %v3897_v61, %v8448_v1  ;;  %v10332_v42 = vld [vmem:[#allocation144_spill] sm:$0xff]  ;;  %v10333_v55 = vld [vmem:[#allocation23_spill] sm:$0xff] }
 0x5dc   : > { %4219 = vrot.lane.b32.xlu0 %v4059_v29, %s4987_s16  ;;  %v8465_v21 = vadd.f32 %v10322_v16, %v2783_v7  ;;  %v8476_v1 = vadd.f32 %v10328_v5, %v2782_v23  ;;  %v10330_v7 = vld [vmem:[#allocation228_spill] sm:$0xff] }
 0x5dd   : > { %v3909_v45 = vpop.permute.xlu0 %3908  ;;  %4217 = vrot.lane.b32.xlu1 %v4058_v57, %s4987_s16  ;;  %v10336_v5 = vld [vmem:[#allocation40_spill] sm:$0xff] }
 0x5de   : > { %v4061_v63 = vmul.f32 %v3909_v45, %v8451_v2  ;;  %10323 = vst [vmem:[#allocation106_spill] sm:$0xff] %v8465_v21  ;;  %v3905_v38 = vpop.permute.xlu1 %3904  ;;  %v2785_v45 = vmul.f32 %v10327_v22, %v10326_v54  ;;  %10329 = vst [vmem:[#allocation112_spill] sm:$0xff] %v8476_v1  ;;  %v2784_v2 = vmul.f32 %v10333_v55, %v10332_v42  ;;  %v10334_v54 = vld [vmem:[#allocation203_spill] sm:$0xff]  ;;  %v10335_v22 = vld [vmem:[#allocation26_spill] sm:$0xff] }
 0x5df   : > { %v4060_v50 = vmul.f32 %v3905_v38, %v8462_v46  ;;  %v10340_v42 = vld [vmem:[#allocation202_spill] sm:$0xff]  ;;  %v10341_v55 = vld [vmem:[#allocation277_spill] sm:$0xff] }
 0x5e0   : > { %4223 = vrot.lane.b32.xlu0 %v4061_v63, %s4987_s16  ;;  %v8479_v16 = vadd.f32 %v10330_v7, %v2785_v45  ;;  %v8490_v46 = vadd.f32 %v10336_v5, %v2784_v2  ;;  %v10338_v45 = vld [vmem:[#allocation169_spill] sm:$0xff]  ;;  %v10344_v5 = vld [vmem:[#allocation227_spill] sm:$0xff] }
 0x5e1   : > { %v3917_v29 = vpop.permute.xlu0 %3916  ;;  %4221 = vrot.lane.b32.xlu1 %v4060_v50, %s4987_s16 }
 0x5e2   : > { %v4063_v61 = vmul.f32 %v3917_v29, %v8465_v21  ;;  %10331 = vst [vmem:[#allocation107_spill] sm:$0xff] %v8479_v16  ;;  %v3913_v57 = vpop.permute.xlu1 %3912  ;;  %v2787_v29 = vmul.f32 %v10335_v22, %v10334_v54  ;;  %10337 = vst [vmem:[#allocation114_spill] sm:$0xff] %v8490_v46  ;;  %v2786_v21 = vmul.f32 %v10341_v55, %v10340_v42  ;;  %v10342_v54 = vld [vmem:[#allocation147_spill] sm:$0xff]  ;;  %v10348_v42 = vld [vmem:[#allocation146_spill] sm:$0xff] }
 0x5e3   : > { %v4062_v23 = vmul.f32 %v3913_v57, %v8476_v1  ;;  %v10343_v22 = vld [vmem:[#allocation279_spill] sm:$0xff]  ;;  %v10349_v55 = vld [vmem:[#allocation278_spill] sm:$0xff] }
 0x5e4   : > { %4227 = vrot.lane.b32.xlu0 %v4063_v61, %s4987_s16  ;;  %v8493_v7 = vadd.f32 %v10338_v45, %v2787_v29  ;;  %v8504_v1 = vadd.f32 %v10344_v5, %v2786_v21  ;;  %v10346_v29 = vld [vmem:[#allocation230_spill] sm:$0xff]  ;;  %v10352_v5 = vld [vmem:[#allocation168_spill] sm:$0xff] }
 0x5e5   : > { %v3925_v63 = vpop.permute.xlu0 %3924  ;;  %4225 = vrot.lane.b32.xlu1 %v4062_v23, %s4987_s16 }
 0x5e6   : > { %v4065_v38 = vmul.f32 %v3925_v63, %v8479_v16  ;;  %10339 = vst [vmem:[#allocation109_spill] sm:$0xff] %v8493_v7  ;;  %v3921_v50 = vpop.permute.xlu1 %3920  ;;  %v2789_v63 = vmul.f32 %v10343_v22, %v10342_v54  ;;  %10345 = vst [vmem:[#allocation116_spill] sm:$0xff] %v8504_v1  ;;  %v2788_v16 = vmul.f32 %v10349_v55, %v10348_v42  ;;  %v10350_v54 = vld [vmem:[#allocation205_spill] sm:$0xff]  ;;  %v10356_v42 = vld [vmem:[#allocation204_spill] sm:$0xff] }
 0x5e7   : > { %v4064_v2 = vmul.f32 %v3921_v50, %v8490_v46  ;;  %v10351_v22 = vld [vmem:[#allocation281_spill] sm:$0xff]  ;;  %v10357_v55 = vld [vmem:[#allocation280_spill] sm:$0xff] }
 0x5e8   : > { %4231 = vrot.lane.b32.xlu0 %v4065_v38, %s4987_s16  ;;  %v8507_v45 = vadd.f32 %v10346_v29, %v2789_v63  ;;  %v8518_v46 = vadd.f32 %v10352_v5, %v2788_v16  ;;  %v10354_v63 = vld [vmem:[#allocation171_spill] sm:$0xff]  ;;  %v10360_v5 = vld [vmem:[#allocation229_spill] sm:$0xff] }
 0x5e9   : > { %v3933_v61 = vpop.permute.xlu0 %3932  ;;  %4229 = vrot.lane.b32.xlu1 %v4064_v2, %s4987_s16 }
 0x5ea   : > { %v4067_v57 = vmul.f32 %v3933_v61, %v8493_v7  ;;  %10347 = vst [vmem:[#allocation111_spill] sm:$0xff] %v8507_v45  ;;  %v3929_v23 = vpop.permute.xlu1 %3928  ;;  %v2791_v61 = vmul.f32 %v10351_v22, %v10350_v54  ;;  %10353 = vst [vmem:[#allocation118_spill] sm:$0xff] %v8518_v46  ;;  %v2790_v7 = vmul.f32 %v10357_v55, %v10356_v42  ;;  %v10358_v54 = vld [vmem:[#allocation149_spill] sm:$0xff]  ;;  %v10359_v22 = vld [vmem:[#allocation283_spill] sm:$0xff] }
 0x5eb   : > { %v4066_v21 = vmul.f32 %v3929_v23, %v8504_v1  ;;  %v10364_v42 = vld [vmem:[#allocation148_spill] sm:$0xff]  ;;  %v10365_v55 = vld [vmem:[#allocation282_spill] sm:$0xff] }
 0x5ec   : > { %4235 = vrot.lane.b32.xlu0 %v4067_v57, %s4987_s16  ;;  %v8521_v29 = vadd.f32 %v10354_v63, %v2791_v61  ;;  %v8532_v1 = vadd.f32 %v10360_v5, %v2790_v7  ;;  %v10362_v61 = vld [vmem:[#allocation232_spill] sm:$0xff]  ;;  %v10368_v5 = vld [vmem:[#allocation170_spill] sm:$0xff] }
 0x5ed   : > { %v3941_v38 = vpop.permute.xlu0 %3940  ;;  %4233 = vrot.lane.b32.xlu1 %v4066_v21, %s4987_s16 }
 0x5ee   : > { %v4069_v50 = vmul.f32 %v3941_v38, %v8507_v45  ;;  %10355 = vst [vmem:[#allocation113_spill] sm:$0xff] %v8521_v29  ;;  %v3937_v2 = vpop.permute.xlu1 %3936  ;;  %v2793_v38 = vmul.f32 %v10359_v22, %v10358_v54  ;;  %10361 = vst [vmem:[#allocation120_spill] sm:$0xff] %v8532_v1  ;;  %v2792_v45 = vmul.f32 %v10365_v55, %v10364_v42  ;;  %v10366_v54 = vld [vmem:[#allocation207_spill] sm:$0xff]  ;;  %v10367_v22 = vld [vmem:[#allocation285_spill] sm:$0xff] }
 0x5ef   : > { %v4068_v16 = vmul.f32 %v3937_v2, %v8518_v46  ;;  %v10372_v42 = vld [vmem:[#allocation206_spill] sm:$0xff]  ;;  %v10373_v55 = vld [vmem:[#allocation284_spill] sm:$0xff] }
 0x5f0   : > { %4239 = vrot.lane.b32.xlu0 %v4069_v50, %s4987_s16  ;;  %v8535_v63 = vadd.f32 %v10362_v61, %v2793_v38  ;;  %v8546_v46 = vadd.f32 %v10368_v5, %v2792_v45  ;;  %v10370_v38 = vld [vmem:[#allocation173_spill] sm:$0xff]  ;;  %v10376_v5 = vld [vmem:[#allocation231_spill] sm:$0xff] }
 0x5f1   : > { %v3949_v57 = vpop.permute.xlu0 %3948  ;;  %4237 = vrot.lane.b32.xlu1 %v4068_v16, %s4987_s16 }
 0x5f2   : > { %v4071_v23 = vmul.f32 %v3949_v57, %v8521_v29  ;;  %10363 = vst [vmem:[#allocation115_spill] sm:$0xff] %v8535_v63  ;;  %v3945_v21 = vpop.permute.xlu1 %3944  ;;  %v2795_v57 = vmul.f32 %v10367_v22, %v10366_v54  ;;  %10369 = vst [vmem:[#allocation122_spill] sm:$0xff] %v8546_v46  ;;  %v2794_v29 = vmul.f32 %v10373_v55, %v10372_v42  ;;  %v10374_v54 = vld [vmem:[#allocation151_spill] sm:$0xff]  ;;  %v10380_v42 = vld [vmem:[#allocation150_spill] sm:$0xff] }
 0x5f3   : > { %v4070_v7 = vmul.f32 %v3945_v21, %v8532_v1  ;;  %v10375_v22 = vld [vmem:[#allocation287_spill] sm:$0xff]  ;;  %v10381_v55 = vld [vmem:[#allocation286_spill] sm:$0xff] }
 0x5f4   : > { %4243 = vrot.lane.b32.xlu0 %v4071_v23, %s4987_s16  ;;  %v8549_v61 = vadd.f32 %v10370_v38, %v2795_v57  ;;  %v8560_v1 = vadd.f32 %v10376_v5, %v2794_v29  ;;  %v10378_v57 = vld [vmem:[#allocation234_spill] sm:$0xff]  ;;  %v10384_v5 = vld [vmem:[#allocation172_spill] sm:$0xff] }
 0x5f5   : > { %v3957_v50 = vpop.permute.xlu0 %3956  ;;  %4241 = vrot.lane.b32.xlu1 %v4070_v7, %s4987_s16 }
 0x5f6   : > { %v4073_v2 = vmul.f32 %v3957_v50, %v8535_v63  ;;  %10371 = vst [vmem:[#allocation117_spill] sm:$0xff] %v8549_v61  ;;  %v3953_v16 = vpop.permute.xlu1 %3952  ;;  %v2797_v50 = vmul.f32 %v10375_v22, %v10374_v54  ;;  %10377 = vst [vmem:[#allocation124_spill] sm:$0xff] %v8560_v1  ;;  %v2796_v63 = vmul.f32 %v10381_v55, %v10380_v42  ;;  %v10382_v54 = vld [vmem:[#allocation209_spill] sm:$0xff]  ;;  %v10388_v42 = vld [vmem:[#allocation208_spill] sm:$0xff] }
 0x5f7   : > { %v4072_v45 = vmul.f32 %v3953_v16, %v8546_v46  ;;  %v10383_v22 = vld [vmem:[#allocation289_spill] sm:$0xff]  ;;  %v10389_v55 = vld [vmem:[#allocation288_spill] sm:$0xff] }
 0x5f8   : > { %4247 = vrot.lane.b32.xlu0 %v4073_v2, %s4987_s16  ;;  %v8563_v38 = vadd.f32 %v10378_v57, %v2797_v50  ;;  %v8574_v46 = vadd.f32 %v10384_v5, %v2796_v63  ;;  %v10386_v50 = vld [vmem:[#allocation175_spill] sm:$0xff]  ;;  %v10392_v5 = vld [vmem:[#allocation233_spill] sm:$0xff] }
 0x5f9   : > { %v3965_v23 = vpop.permute.xlu0 %3964  ;;  %4245 = vrot.lane.b32.xlu1 %v4072_v45, %s4987_s16 }
 0x5fa   : > { %v4075_v21 = vmul.f32 %v3965_v23, %v8549_v61  ;;  %10379 = vst [vmem:[#allocation119_spill] sm:$0xff] %v8563_v38  ;;  %v3961_v7 = vpop.permute.xlu1 %3960  ;;  %v2799_v23 = vmul.f32 %v10383_v22, %v10382_v54  ;;  %10385 = vst [vmem:[#allocation121_spill] sm:$0xff] %v8574_v46  ;;  %v2798_v61 = vmul.f32 %v10389_v55, %v10388_v42  ;;  %v10390_v54 = vld [vmem:[#allocation153_spill] sm:$0xff]  ;;  %v10391_v22 = vld [vmem:[#allocation291_spill] sm:$0xff] }
 0x5fb   : > { %v4074_v29 = vmul.f32 %v3961_v7, %v8560_v1  ;;  %v10395_v42 = vld [vmem:[#allocation152_spill] sm:$0xff]  ;;  %v10396_v55 = vld [vmem:[#allocation290_spill] sm:$0xff] }
 0x5fc   : > { %4251 = vrot.lane.b32.xlu0 %v4075_v21, %s4987_s16  ;;  %v8577_v57 = vadd.f32 %v10386_v50, %v2799_v23  ;;  %v8588_v1 = vadd.f32 %v10392_v5, %v2798_v61  ;;  %v10394_v23 = vld [vmem:[#allocation236_spill] sm:$0xff]  ;;  %v10399_v5 = vld [vmem:[#allocation174_spill] sm:$0xff] }
 0x5fd   : > { %v3973_v2 = vpop.permute.xlu0 %3972  ;;  %4249 = vrot.lane.b32.xlu1 %v4074_v29, %s4987_s16 }
 0x5fe   : > { %v4077_v16 = vmul.f32 %v3973_v2, %v8563_v38  ;;  %10387 = vst [vmem:[#allocation34_spill] sm:$0xff] %v8577_v57  ;;  %v3969_v45 = vpop.permute.xlu1 %3968  ;;  %v2801_v2 = vmul.f32 %v10391_v22, %v10390_v54  ;;  %10393 = vst [vmem:[#allocation35_spill] sm:$0xff] %v8588_v1  ;;  %v2800_v38 = vmul.f32 %v10396_v55, %v10395_v42  ;;  %v10397_v54 = vld [vmem:[#allocation211_spill] sm:$0xff]  ;;  %v10398_v22 = vld [vmem:[#allocation293_spill] sm:$0xff] }
 0x5ff   : > { %v4076_v63 = vmul.f32 %v3969_v45, %v8574_v46  ;;  %v10402_v42 = vld [vmem:[#allocation210_spill] sm:$0xff]  ;;  %v10403_v55 = vld [vmem:[#allocation292_spill] sm:$0xff] }
 0x600   : > { %4255 = vrot.lane.b32.xlu0 %v4077_v16, %s4987_s16  ;;  %v8591_v50 = vadd.f32 %v10394_v23, %v2801_v2  ;;  %v8602_v46 = vadd.f32 %v10399_v5, %v2800_v38  ;;  %v10401_v2 = vld [vmem:[#allocation177_spill] sm:$0xff]  ;;  %v10406_v5 = vld [vmem:[#allocation235_spill] sm:$0xff] }
 0x601   : > { %v3981_v21 = vpop.permute.xlu0 %3980  ;;  %4253 = vrot.lane.b32.xlu1 %v4076_v63, %s4987_s16 }
 0x602   : > { %v4079_v7 = vmul.f32 %v3981_v21, %v8577_v57  ;;  %v3977_v29 = vpop.permute.xlu1 %3976  ;;  %v2803_v21 = vmul.f32 %v10398_v22, %v10397_v54  ;;  %10400 = vst [vmem:[#allocation30_spill] sm:$0xff] %v8602_v46  ;;  %v2802_v57 = vmul.f32 %v10403_v55, %v10402_v42  ;;  %v10404_v54 = vld [vmem:[#allocation155_spill] sm:$0xff]  ;;  %v10409_v42 = vld [vmem:[#allocation294_spill] sm:$0xff] }
 0x603   : > { %v4078_v61 = vmul.f32 %v3977_v29, %v8588_v1  ;;  %v10405_v22 = vld [vmem:[#allocation295_spill] sm:$0xff] }
 0x604   : > { %4259 = vrot.lane.b32.xlu0 %v4079_v7, %s4987_s16  ;;  %v8605_v23 = vadd.f32 %v10401_v2, %v2803_v21  ;;  %v8616_v1 = vadd.f32 %v10406_v5, %v2802_v57  ;;  %v10408_v2 = vld [vmem:[#allocation154_spill] sm:$0xff]  ;;  %v10412_v5 = vld [vmem:[#allocation176_spill] sm:$0xff] }
 0x605   : > { %v3989_v16 = vpop.permute.xlu0 %3988  ;;  %4257 = vrot.lane.b32.xlu1 %v4078_v61, %s4987_s16  ;;  %v2804_v55 = vmul.f32 %v10409_v42, %v10408_v2  ;;  %v10414_v2 = vld [vmem:[#allocation296_spill] sm:$0xff] }
 0x606   : > { %v4081_v45 = vmul.f32 %v3989_v16, %v8591_v50  ;;  %v3985_v63 = vpop.permute.xlu1 %3984  ;;  %v2805_v16 = vmul.f32 %v10405_v22, %v10404_v54  ;;  %10407 = vst [vmem:[#allocation22_spill] sm:$0xff] %v8616_v1  ;;  %v10410_v54 = vld [vmem:[#allocation213_spill] sm:$0xff] }
 0x607   : > { %v4080_v38 = vmul.f32 %v3985_v63, %v8602_v46  ;;  %v10411_v22 = vld [vmem:[#allocation297_spill] sm:$0xff]  ;;  %v8630_v46 = vadd.f32 %v10412_v5, %v2804_v55 }
 0x608   : > { %4263 = vrot.lane.b32.xlu0 %v4081_v45, %s4987_s16  ;;  %v8619_v21 = vadd.f32 %v8013_v56, %v2805_v16  ;;  %v10417_v5 = vld [vmem:[#allocation237_spill] sm:$0xff] }
 0x609   : > { %v3997_v7 = vpop.permute.xlu0 %3996  ;;  %4261 = vrot.lane.b32.xlu1 %v4080_v38, %s4987_s16  ;;  %v10413_v38 = vld [vmem:[#allocation212_spill] sm:$0xff] }
 0x60a   : > { %v4083_v29 = vmul.f32 %v3997_v7, %v8605_v23  ;;  %v3993_v61 = vpop.permute.xlu1 %3992  ;;  %v2807_v7 = vmul.f32 %v10411_v22, %v10410_v54  ;;  %v2806_v42 = vmul.f32 %v10414_v2, %v10413_v38  ;;  %v10415_v54 = vld [vmem:[#allocation157_spill] sm:$0xff]  ;;  %v10416_v22 = vld [vmem:[#allocation299_spill] sm:$0xff]  ;;  %v10419_v38 = vld [vmem:[#allocation298_spill] sm:$0xff] }
 0x60b   : > { %v4082_v57 = vmul.f32 %v3993_v61, %v8616_v1 }
 0x60c   : > { %4267 = vrot.lane.b32.xlu0 %v4083_v29, %s4987_s16  ;;  %v8633_v56 = vadd.f32 %v8019_v25, %v2807_v7  ;;  %v8644_v1 = vadd.f32 %v10417_v5, %v2806_v42 }
 0x60d   : > { %v4005_v45 = vpop.permute.xlu0 %4004  ;;  %4265 = vrot.lane.b32.xlu1 %v4082_v57, %s4987_s16  ;;  %v10418_v57 = vld [vmem:[#allocation156_spill] sm:$0xff] }
 0x60e   : > { %v4085_v63 = vmul.f32 %v4005_v45, %v8619_v21  ;;  %v4001_v29 = vpop.permute.xlu1 %4000  ;;  %v2809_v45 = vmul.f32 %v10416_v22, %v10415_v54  ;;  %v2808_v2 = vmul.f32 %v10419_v38, %v10418_v57 }
 0x60f   : > { %v4084_v55 = vmul.f32 %v4001_v29, %v8630_v46 }
 0x610   : > { %4271 = vrot.lane.b32.xlu0 %v4085_v63, %s4987_s16  ;;  %v8647_v25 = vadd.f32 %v8025_v15, %v2809_v45  ;;  %v8656_v42 = vadd.f32 %v8017_v60, %v2808_v2  ;;  %v3707_v15 = vmul.f32 %v8031_v4, %v8218_v6  ;;  %v10421_v45 = vld [vmem:[#allocation214_spill] sm:$0xff]  ;;  %v3709_v4 = vmul.f32 %v8037_v34, %v8227_v32 }
 0x611   : > { %v4013_v16 = vpop.permute.xlu0 %4012  ;;  %4269 = vrot.lane.b32.xlu1 %v4084_v55, %s4987_s16  ;;  %v3708_v2 = vmul.f32 %v8029_v3, %v8239_v17 }
 0x612   : > { %v4087_v61 = vmul.f32 %v4013_v16, %v8633_v56  ;;  %v4009_v63 = vpop.permute.xlu1 %4008 }
 0x613   : > { %v4086_v29 = vmul.f32 %v4009_v63, %v8644_v1 }
 0x614   : > { %4275 = vrot.lane.b32.xlu0 %v4087_v61, %s4987_s16  ;;  %v10422_v61 = vld [vmem:[#allocation300_spill] sm:$0xff] }
 0x615   : > { %v4021_v7 = vpop.permute.xlu0 %4020  ;;  %4273 = vrot.lane.b32.xlu1 %v4086_v29, %s4987_s16  ;;  %v2810_v55 = vmul.f32 %v10422_v61, %v10421_v45  ;;  %v3712_v45 = vmul.f32 %v8049_v40, %v8266_v24  ;;  %v3717_v61 = vmul.f32 %v8053_v33, %v8283_v8 }
 0x616   : > { %v4089_v16 = vmul.f32 %v4021_v7, %v8647_v25  ;;  %v4017_v54 = vpop.permute.xlu1 %4016 }
 0x617   : > { %v4088_v5 = vmul.f32 %v4017_v54, %v8656_v42  ;;  %v8666_v60 = vadd.f32 %v8023_v26, %v2810_v55  ;;  %v3711_v26 = vmul.f32 %v8035_v37, %v8242_v62  ;;  %v3710_v54 = vmul.f32 %v8043_v9, %v8252_v13 }
 0x618   : > { %4279 = vrot.lane.b32.xlu0 %v4089_v16, %s4987_s16  ;;  %v3714_v55 = vmul.f32 %v8055_v31, %v8280_v12 }
 0x619   : > { %v4156_v22 = vpop.permute.xlu0 %4155  ;;  %4277 = vrot.lane.b32.xlu1 %v4088_v5, %s4987_s16  ;;  %v3719_v5 = vmul.f32 %v8059_v35, %v8297_v14 }
 0x61a   : > { %v4347_v7 = vadd.f32 %v4156_v22, %v3707_v15  ;;  %v4025_v6 = vpop.permute.xlu1 %4024  ;;  %v3713_v15 = vmul.f32 %v8041_v43, %v8255_v27  ;;  %v3715_v22 = vmul.f32 %v8047_v39, %v8269_v30 }
 0x61b   : > { %v4090_v57 = vmul.f32 %v4025_v6, %v8666_v60  ;;  %v3718_v6 = vmul.f32 %v8067_v51, %v8308_v48 }
 0x61c   : > { %4412 = vst.msk [vmem:[%s10420_s13] sm:$0xff] %vm4411_vm8, %v4347_v7  ;;  %v3716_v7 = vmul.f32 %v8061_v19, %v8294_v10 }
 0x61d   : > { %v4160_v63 = vpop.permute.xlu0 %4159  ;;  %4281 = vrot.lane.b32.xlu1 %v4090_v57, %s4987_s16  ;;  %v3720_v57 = vmul.f32 %v8073_v53, %v8322_v58 }
 0x61e   : > { %v4349_v38 = vadd.f32 %v4160_v63, %v3709_v4  ;;  %v4158_v34 = vpop.permute.xlu1 %4157  ;;  %v3721_v4 = vmul.f32 %v8065_v20, %v8311_v18  ;;  %v3723_v63 = vmul.f32 %v8071_v59, %v8325_v49 }
 0x61f   : > { %v4348_v16 = vadd.f32 %v4158_v34, %v3708_v2  ;;  %v3722_v2 = vmul.f32 %v8079_v0, %v8336_v28  ;;  %v10423_v34 = vld [vmem:[#allocation238_spill] sm:$0xff] }
 0x620   : > { %4414 = vst.msk [vmem:[%s10420_s13 + $0x10] sm:$0xff] %vm4411_vm8, %v4349_v38  ;;  %v3725_v38 = vmul.f32 %v8077_v47, %v8339_v36 }
 0x621   : > { %v4164_v32 = vpop.permute.xlu0 %4163  ;;  %4413 = vst.msk [vmem:[%s10420_s13 + $0x8] sm:$0xff] %vm4411_vm8, %v4348_v16  ;;  %v10424_v16 = vld [vmem:[#allocation178_spill] sm:$0xff] }
 0x622   : > { %v4351_v29 = vadd.f32 %v4164_v32, %v3711_v26  ;;  %v4162_v3 = vpop.permute.xlu1 %4161  ;;  %v3727_v26 = vmul.f32 %v8083_v52, %v8353_v41  ;;  %v3724_v32 = vmul.f32 %v10423_v34, %v8350_v11  ;;  %v10443_v34 = vld [vmem:[#allocation102_spill] sm:$0xff] }
 0x623   : > { %v4350_v17 = vadd.f32 %v4162_v3, %v3710_v54  ;;  %v10426_v54 = vld [vmem:[#allocation179_spill] sm:$0xff] }
 0x624   : > { %4416 = vst.msk [vmem:[%s10420_s13 + $0x20] sm:$0xff] %vm4411_vm8, %v4351_v29  ;;  %v3729_v29 = vmul.f32 %v10424_v16, %v8367_v44 }
 0x625   : > { %v4168_v37 = vpop.permute.xlu0 %4167  ;;  %4415 = vst.msk [vmem:[%s10420_s13 + $0x18] sm:$0xff] %vm4411_vm8, %v4350_v17  ;;  %v10427_v17 = vld [vmem:[#allocation94_spill] sm:$0xff] }
 0x626   : > { %v4353_v62 = vadd.f32 %v4168_v37, %v3713_v15  ;;  %v4166_v43 = vpop.permute.xlu1 %4165  ;;  %v10425_v15 = vld [vmem:[#allocation92_spill] sm:$0xff] }
 0x627   : > { %v4352_v13 = vadd.f32 %v4166_v43, %v3712_v45  ;;  %v3726_v3 = vmul.f32 %v10426_v54, %v10425_v15  ;;  %v10429_v45 = vld [vmem:[#allocation99_spill] sm:$0xff]  ;;  %v10430_v43 = vld [vmem:[#allocation240_spill] sm:$0xff] }
 0x628   : > { %4418 = vst.msk [vmem:[%s10420_s13 + $0x30] sm:$0xff] %vm4411_vm8, %v4353_v62  ;;  %v10428_v62 = vld [vmem:[#allocation239_spill] sm:$0xff] }
 0x629   : > { %v4172_v9 = vpop.permute.xlu0 %4171  ;;  %4417 = vst.msk [vmem:[%s10420_s13 + $0x28] sm:$0xff] %vm4411_vm8, %v4352_v13 }
 0x62a   : > { %v4355_v27 = vadd.f32 %v4172_v9, %v3715_v22  ;;  %v4170_v39 = vpop.permute.xlu1 %4169  ;;  %v3731_v22 = vmul.f32 %v10428_v62, %v10427_v17  ;;  %v3728_v9 = vmul.f32 %v10430_v43, %v10429_v45 }
 0x62b   : > { %v4354_v24 = vadd.f32 %v4170_v39, %v3714_v55  ;;  %v10431_v55 = vld [vmem:[#allocation96_spill] sm:$0xff] }
 0x62c   : > { %4420 = vst.msk [vmem:[%s10420_s13 + $0x40] sm:$0xff] %vm4411_vm8, %v4355_v27  ;;  %v10432_v39 = vld [vmem:[#allocation180_spill] sm:$0xff] }
 0x62d   : > { %v4176_v40 = vpop.permute.xlu0 %4175  ;;  %4419 = vst.msk [vmem:[%s10420_s13 + $0x38] sm:$0xff] %vm4411_vm8, %v4354_v24  ;;  %v10433_v24 = vld [vmem:[#allocation101_spill] sm:$0xff] }
 0x62e   : > { %v4357_v30 = vadd.f32 %v4176_v40, %v3717_v61  ;;  %v4174_v33 = vpop.permute.xlu1 %4173  ;;  %v3733_v40 = vmul.f32 %v10432_v39, %v10431_v55 }
 0x62f   : > { %v4356_v12 = vadd.f32 %v4174_v33, %v3716_v7 }
 0x630   : > { %4422 = vst.msk [vmem:[%s10420_s13 + $0x50] sm:$0xff] %vm4411_vm8, %v4357_v30  ;;  %v10434_v30 = vld [vmem:[#allocation181_spill] sm:$0xff] }
 0x631   : > { %v4180_v31 = vpop.permute.xlu0 %4179  ;;  %4421 = vst.msk [vmem:[%s10420_s13 + $0x48] sm:$0xff] %vm4411_vm8, %v4356_v12 }
 0x632   : > { %v4359_v8 = vadd.f32 %v4180_v31, %v3719_v5  ;;  %v4178_v35 = vpop.permute.xlu1 %4177  ;;  %v3730_v5 = vmul.f32 %v10434_v30, %v10433_v24 }
 0x633   : > { %v4358_v10 = vadd.f32 %v4178_v35, %v3718_v6  ;;  %v10437_v35 = vld [vmem:[#allocation103_spill] sm:$0xff] }
 0x634   : > { %4424 = vst.msk [vmem:[%s10420_s13 + $0x60] sm:$0xff] %vm4411_vm8, %v4359_v8  ;;  %v10435_v8 = vld [vmem:[#allocation98_spill] sm:$0xff] }
 0x635   : > { %v4184_v19 = vpop.permute.xlu0 %4183  ;;  %4423 = vst.msk [vmem:[%s10420_s13 + $0x58] sm:$0xff] %vm4411_vm8, %v4358_v10 }
 0x636   : > { %v4361_v14 = vadd.f32 %v4184_v19, %v3721_v4  ;;  %v4182_v20 = vpop.permute.xlu1 %4181  ;;  %v10436_v4 = vld [vmem:[#allocation241_spill] sm:$0xff]  ;;  %v10438_v19 = vld [vmem:[#allocation182_spill] sm:$0xff] }
 0x637   : > { %v4360_v48 = vadd.f32 %v4182_v20, %v3720_v57  ;;  %v3735_v6 = vmul.f32 %v10436_v4, %v10435_v8  ;;  %v3732_v10 = vmul.f32 %v10438_v19, %v10437_v35 }
 0x638   : > { %4426 = vst.msk [vmem:[%s10420_s13 + $0x70] sm:$0xff] %vm4411_vm8, %v4361_v14 }
 0x639   : > { %v4188_v51 = vpop.permute.xlu0 %4187  ;;  %4425 = vst.msk [vmem:[%s10420_s13 + $0x68] sm:$0xff] %vm4411_vm8, %v4360_v48  ;;  %v10440_v48 = vld [vmem:[#allocation183_spill] sm:$0xff] }
 0x63a   : > { %v4363_v18 = vadd.f32 %v4188_v51, %v3723_v63  ;;  %v4186_v59 = vpop.permute.xlu1 %4185  ;;  %v10439_v51 = vld [vmem:[#allocation100_spill] sm:$0xff] }
 0x63b   : > { %v4362_v58 = vadd.f32 %v4186_v59, %v3722_v2  ;;  %v10442_v2 = vld [vmem:[#allocation184_spill] sm:$0xff] }
 0x63c   : > { %4428 = vst.msk [vmem:[%s10420_s13 + $0x80] sm:$0xff] %vm4411_vm8, %v4363_v18  ;;  %v3737_v18 = vmul.f32 %v10440_v48, %v10439_v51 }
 0x63d   : > { %v4192_v53 = vpop.permute.xlu0 %4191  ;;  %4427 = vst.msk [vmem:[%s10420_s13 + $0x78] sm:$0xff] %vm4411_vm8, %v4362_v58 }
 0x63e   : > { %v4365_v49 = vadd.f32 %v4192_v53, %v3725_v38  ;;  %v4190_v47 = vpop.permute.xlu1 %4189  ;;  %v10441_v38 = vld [vmem:[#allocation105_spill] sm:$0xff] }
 0x63f   : > { %v4364_v28 = vadd.f32 %v4190_v47, %v3724_v32  ;;  %v3734_v59 = vmul.f32 %v10442_v2, %v10441_v38  ;;  %v10444_v32 = vld [vmem:[#allocation185_spill] sm:$0xff] }
 0x640   : > { %4430 = vst.msk [vmem:[%s10420_s13 + $0x90] sm:$0xff] %vm4411_vm8, %v4365_v49  ;;  %v3739_v47 = vmul.f32 %v10444_v32, %v10443_v34 }
 0x641   : > { %v4196_v0 = vpop.permute.xlu0 %4195  ;;  %4429 = vst.msk [vmem:[%s10420_s13 + $0x88] sm:$0xff] %vm4411_vm8, %v4364_v28  ;;  %v10446_v28 = vld [vmem:[#allocation68_spill] sm:$0xff] }
 0x642   : > { %v4367_v36 = vadd.f32 %v4196_v0, %v3727_v26  ;;  %v4194_v52 = vpop.permute.xlu1 %4193  ;;  %v10445_v0 = vld [vmem:[#allocation42_spill] sm:$0xff] }
 0x643   : > { %v4366_v41 = vadd.f32 %v4194_v52, %v3726_v3  ;;  %v10447_v3 = vld [vmem:[#allocation104_spill] sm:$0xff]  ;;  %v10448_v52 = vld [vmem:[#allocation66_spill] sm:$0xff] }
 0x644   : > { %4432 = vst.msk [vmem:[%s10420_s13 + $0xa0] sm:$0xff] %vm4411_vm8, %v4367_v36  ;;  %v3736_v36 = vmul.f32 %v10446_v28, %v10445_v0 }
 0x645   : > { %v4200_v11 = vpop.permute.xlu0 %4199  ;;  %4431 = vst.msk [vmem:[%s10420_s13 + $0x98] sm:$0xff] %vm4411_vm8, %v4366_v41  ;;  %v10449_v41 = vld [vmem:[#allocation108_spill] sm:$0xff] }
 0x646   : > { %v4369_v37 = vadd.f32 %v4200_v11, %v3729_v29  ;;  %v4198_v44 = vpop.permute.xlu1 %4197  ;;  %v3741_v11 = vmul.f32 %v10448_v52, %v10447_v3 }
 0x647   : > { %v4368_v27 = vadd.f32 %v4198_v44, %v3728_v9  ;;  %v10451_v9 = vld [vmem:[#allocation106_spill] sm:$0xff]  ;;  %v10452_v44 = vld [vmem:[#allocation65_spill] sm:$0xff] }
 0x648   : > { %4434 = vst.msk [vmem:[%s10420_s13 + $0xb0] sm:$0xff] %vm4411_vm8, %v4369_v37  ;;  %v10450_v37 = vld [vmem:[#allocation70_spill] sm:$0xff] }
 0x649   : > { %v4204_v13 = vpop.permute.xlu0 %4203  ;;  %4433 = vst.msk [vmem:[%s10420_s13 + $0xa8] sm:$0xff] %vm4411_vm8, %v4368_v27  ;;  %v3738_v17 = vmul.f32 %v10450_v37, %v10449_v41  ;;  %v10453_v27 = vld [vmem:[#allocation110_spill] sm:$0xff] }
 0x64a   : > { %v4371_v61 = vadd.f32 %v4204_v13, %v3731_v22  ;;  %v4202_v7 = vpop.permute.xlu1 %4201  ;;  %v3743_v13 = vmul.f32 %v10452_v44, %v10451_v9 }
 0x64b   : > { %v4370_v31 = vadd.f32 %v4202_v7, %v3730_v5  ;;  %v10455_v5 = vld [vmem:[#allocation107_spill] sm:$0xff] }
 0x64c   : > { %4436 = vst.msk [vmem:[%s10420_s13 + $0xc0] sm:$0xff] %vm4411_vm8, %v4371_v61  ;;  %v10454_v61 = vld [vmem:[#allocation72_spill] sm:$0xff]  ;;  %v10456_v7 = vld [vmem:[#allocation67_spill] sm:$0xff] }
 0x64d   : > { %v4208_v33 = vpop.permute.xlu0 %4207  ;;  %4435 = vst.msk [vmem:[%s10420_s13 + $0xb8] sm:$0xff] %vm4411_vm8, %v4370_v31  ;;  %v3740_v55 = vmul.f32 %v10454_v61, %v10453_v27  ;;  %v10457_v31 = vld [vmem:[#allocation112_spill] sm:$0xff] }
 0x64e   : > { %v4373_v12 = vadd.f32 %v4208_v33, %v3733_v40  ;;  %v4206_v14 = vpop.permute.xlu1 %4205  ;;  %v3745_v33 = vmul.f32 %v10456_v7, %v10455_v5 }
 0x64f   : > { %v4372_v57 = vadd.f32 %v4206_v14, %v3732_v10  ;;  %v10459_v10 = vld [vmem:[#allocation109_spill] sm:$0xff] }
 0x650   : > { %4438 = vst.msk [vmem:[%s10420_s13 + $0xd0] sm:$0xff] %vm4411_vm8, %v4373_v12  ;;  %v10458_v12 = vld [vmem:[#allocation74_spill] sm:$0xff]  ;;  %v10460_v14 = vld [vmem:[#allocation69_spill] sm:$0xff] }
 0x651   : > { %v4212_v63 = vpop.permute.xlu0 %4211  ;;  %4437 = vst.msk [vmem:[%s10420_s13 + $0xc8] sm:$0xff] %vm4411_vm8, %v4372_v57  ;;  %v3742_v8 = vmul.f32 %v10458_v12, %v10457_v31  ;;  %v10461_v57 = vld [vmem:[#allocation114_spill] sm:$0xff] }
 0x652   : > { %v4375_v20 = vadd.f32 %v4212_v63, %v3735_v6  ;;  %v4210_v53 = vpop.permute.xlu1 %4209  ;;  %v3747_v63 = vmul.f32 %v10460_v14, %v10459_v10 }
 0x653   : > { %v4374_v49 = vadd.f32 %v4210_v53, %v3734_v59  ;;  %v10463_v59 = vld [vmem:[#allocation111_spill] sm:$0xff] }
 0x654   : > { %4440 = vst.msk [vmem:[%s10420_s13 + $0xe0] sm:$0xff] %vm4411_vm8, %v4375_v20  ;;  %v10462_v20 = vld [vmem:[#allocation76_spill] sm:$0xff]  ;;  %v10464_v53 = vld [vmem:[#allocation71_spill] sm:$0xff] }
 0x655   : > { %v4216_v58 = vpop.permute.xlu0 %4215  ;;  %4439 = vst.msk [vmem:[%s10420_s13 + $0xd8] sm:$0xff] %vm4411_vm8, %v4374_v49  ;;  %v3744_v51 = vmul.f32 %v10462_v20, %v10461_v57  ;;  %v10465_v49 = vld [vmem:[#allocation116_spill] sm:$0xff] }
 0x656   : > { %v4377_v26 = vadd.f32 %v4216_v58, %v3737_v18  ;;  %v4214_v16 = vpop.permute.xlu1 %4213  ;;  %v3749_v58 = vmul.f32 %v10464_v53, %v10463_v59 }
 0x657   : > { %v4376_v15 = vadd.f32 %v4214_v16, %v3736_v36  ;;  %v10467_v36 = vld [vmem:[#allocation113_spill] sm:$0xff] }
 0x658   : > { %4442 = vst.msk [vmem:[%s10420_s13 + $0xf0] sm:$0xff] %vm4411_vm8, %v4377_v26  ;;  %v10466_v26 = vld [vmem:[#allocation78_spill] sm:$0xff]  ;;  %v10468_v16 = vld [vmem:[#allocation73_spill] sm:$0xff] }
 0x659   : > { %v4220_v29 = vpop.permute.xlu0 %4219  ;;  %4441 = vst.msk [vmem:[%s10420_s13 + $0xe8] sm:$0xff] %vm4411_vm8, %v4376_v15  ;;  %v3746_v34 = vmul.f32 %v10466_v26, %v10465_v49  ;;  %v10469_v15 = vld [vmem:[#allocation118_spill] sm:$0xff] }
 0x65a   : > { %v4379_v54 = vadd.f32 %v4220_v29, %v3739_v47  ;;  %v4218_v62 = vpop.permute.xlu1 %4217  ;;  %v3751_v29 = vmul.f32 %v10468_v16, %v10467_v36 }
 0x65b   : > { %v4378_v45 = vadd.f32 %v4218_v62, %v3738_v17  ;;  %v10471_v17 = vld [vmem:[#allocation115_spill] sm:$0xff] }
 0x65c   : > { %4444 = vst.msk [vmem:[%s10420_s13 + $0x100] sm:$0xff] %vm4411_vm8, %v4379_v54  ;;  %v10470_v54 = vld [vmem:[#allocation80_spill] sm:$0xff]  ;;  %v10472_v62 = vld [vmem:[#allocation75_spill] sm:$0xff] }
 0x65d   : > { %v4224_v22 = vpop.permute.xlu0 %4223  ;;  %4443 = vst.msk [vmem:[%s10420_s13 + $0xf8] sm:$0xff] %vm4411_vm8, %v4378_v45  ;;  %v3748_v3 = vmul.f32 %v10470_v54, %v10469_v15  ;;  %v10473_v45 = vld [vmem:[#allocation120_spill] sm:$0xff]  ;;  %v10490_v54 = vld [vmem:[#allocation83_spill] sm:$0xff] }
 0x65e   : > { %v4381_v43 = vadd.f32 %v4224_v22, %v3741_v11  ;;  %v4222_v39 = vpop.permute.xlu1 %4221  ;;  %v3753_v22 = vmul.f32 %v10472_v62, %v10471_v17 }
 0x65f   : > { %v4380_v24 = vadd.f32 %v4222_v39, %v3740_v55  ;;  %v10475_v55 = vld [vmem:[#allocation117_spill] sm:$0xff] }
 0x660   : > { %4446 = vst.msk [vmem:[%s10420_s13 + $0x110] sm:$0xff] %vm4411_vm8, %v4381_v43  ;;  %v10474_v43 = vld [vmem:[#allocation27_spill] sm:$0xff]  ;;  %v10476_v39 = vld [vmem:[#allocation77_spill] sm:$0xff] }
 0x661   : > { %v4228_v40 = vpop.permute.xlu0 %4227  ;;  %4445 = vst.msk [vmem:[%s10420_s13 + $0x108] sm:$0xff] %vm4411_vm8, %v4380_v24  ;;  %v3750_v9 = vmul.f32 %v10474_v43, %v10473_v45  ;;  %v10477_v24 = vld [vmem:[#allocation122_spill] sm:$0xff] }
 0x662   : > { %v4383_v30 = vadd.f32 %v4228_v40, %v3743_v13  ;;  %v4226_v4 = vpop.permute.xlu1 %4225  ;;  %v3755_v40 = vmul.f32 %v10476_v39, %v10475_v55  ;;  %v10494_v43 = vld [vmem:[#allocation22_spill] sm:$0xff] }
 0x663   : > { %v4382_v35 = vadd.f32 %v4226_v4, %v3742_v8  ;;  %v10479_v8 = vld [vmem:[#allocation119_spill] sm:$0xff]  ;;  %v10496_v55 = vld [vmem:[#allocation86_spill] sm:$0xff] }
 0x664   : > { %4448 = vst.msk [vmem:[%s10420_s13 + $0x120] sm:$0xff] %vm4411_vm8, %v4383_v30  ;;  %v10478_v30 = vld [vmem:[#allocation28_spill] sm:$0xff]  ;;  %v10480_v4 = vld [vmem:[#allocation79_spill] sm:$0xff]  ;;  %v3767_v39 = vmul.f32 %v10496_v55, %v8633_v56 }
 0x665   : > { %v4232_v6 = vpop.permute.xlu0 %4231  ;;  %4447 = vst.msk [vmem:[%s10420_s13 + $0x118] sm:$0xff] %vm4411_vm8, %v4382_v35  ;;  %v3752_v5 = vmul.f32 %v10478_v30, %v10477_v24  ;;  %v10481_v35 = vld [vmem:[#allocation124_spill] sm:$0xff] }
 0x666   : > { %v4385_v19 = vadd.f32 %v4232_v6, %v3745_v33  ;;  %v4230_v48 = vpop.permute.xlu1 %4229  ;;  %v3757_v6 = vmul.f32 %v10480_v4, %v10479_v8 }
 0x667   : > { %v4384_v38 = vadd.f32 %v4230_v48, %v3744_v51  ;;  %v10483_v51 = vld [vmem:[#allocation34_spill] sm:$0xff]  ;;  %v10484_v48 = vld [vmem:[#allocation81_spill] sm:$0xff] }
 0x668   : > { %4450 = vst.msk [vmem:[%s10420_s13 + $0x130] sm:$0xff] %vm4411_vm8, %v4385_v19  ;;  %v10482_v19 = vld [vmem:[#allocation29_spill] sm:$0xff] }
 0x669   : > { %v4236_v18 = vpop.permute.xlu0 %4235  ;;  %4449 = vst.msk [vmem:[%s10420_s13 + $0x128] sm:$0xff] %vm4411_vm8, %v4384_v38  ;;  %v3754_v10 = vmul.f32 %v10482_v19, %v10481_v35  ;;  %v10485_v38 = vld [vmem:[#allocation121_spill] sm:$0xff]  ;;  %v10500_v35 = vld [vmem:[#allocation90_spill] sm:$0xff] }
 0x66a   : > { %v4387_v2 = vadd.f32 %v4236_v18, %v3747_v63  ;;  %v4234_v32 = vpop.permute.xlu1 %4233  ;;  %v3759_v18 = vmul.f32 %v10484_v48, %v10483_v51  ;;  %v3768_v19 = vmul.f32 %v10500_v35, %v8656_v42 }
 0x66b   : > { %v4386_v0 = vadd.f32 %v4234_v32, %v3746_v34  ;;  %v10487_v34 = vld [vmem:[#allocation82_spill] sm:$0xff] }
 0x66c   : > { %4452 = vst.msk [vmem:[%s10420_s13 + $0x140] sm:$0xff] %vm4411_vm8, %v4387_v2  ;;  %v10486_v2 = vld [vmem:[#allocation85_spill] sm:$0xff]  ;;  %v3761_v32 = vmul.f32 %v10487_v34, %v8591_v50 }
 0x66d   : > { %v4240_v47 = vpop.permute.xlu0 %4239  ;;  %4451 = vst.msk [vmem:[%s10420_s13 + $0x138] sm:$0xff] %vm4411_vm8, %v4386_v0  ;;  %v3756_v59 = vmul.f32 %v10486_v2, %v10485_v38  ;;  %v10489_v0 = vld [vmem:[#allocation87_spill] sm:$0xff] }
 0x66e   : > { %v4389_v28 = vadd.f32 %v4240_v47, %v3749_v58  ;;  %v4238_v52 = vpop.permute.xlu1 %4237  ;;  %v10488_v47 = vld [vmem:[#allocation35_spill] sm:$0xff] }
 0x66f   : > { %v4388_v41 = vadd.f32 %v4238_v52, %v3748_v3  ;;  %v3763_v3 = vmul.f32 %v10490_v54, %v8605_v23  ;;  %v10491_v52 = vld [vmem:[#allocation30_spill] sm:$0xff] }
 0x670   : > { %4454 = vst.msk [vmem:[%s10420_s13 + $0x150] sm:$0xff] %vm4411_vm8, %v4389_v28  ;;  %v3758_v28 = vmul.f32 %v10489_v0, %v10488_v47 }
 0x671   : > { %v4244_v11 = vpop.permute.xlu0 %4243  ;;  %4453 = vst.msk [vmem:[%s10420_s13 + $0x148] sm:$0xff] %vm4411_vm8, %v4388_v41 }
 0x672   : > { %v4391_v37 = vadd.f32 %v4244_v11, %v3751_v29  ;;  %v4242_v44 = vpop.permute.xlu1 %4241  ;;  %v10492_v11 = vld [vmem:[#allocation89_spill] sm:$0xff] }
 0x673   : > { %v4390_v27 = vadd.f32 %v4242_v44, %v3750_v9  ;;  %v3760_v41 = vmul.f32 %v10492_v11, %v10491_v52  ;;  %v10495_v9 = vld [vmem:[#allocation91_spill] sm:$0xff] }
 0x674   : > { %4456 = vst.msk [vmem:[%s10420_s13 + $0x160] sm:$0xff] %vm4411_vm8, %v4391_v37  ;;  %v3762_v44 = vmul.f32 %v10495_v9, %v10494_v43 }
 0x675   : > { %v4248_v13 = vpop.permute.xlu0 %4247  ;;  %4455 = vst.msk [vmem:[%s10420_s13 + $0x158] sm:$0xff] %vm4411_vm8, %v4390_v27 }
 0x676   : > { %v4393_v61 = vadd.f32 %v4248_v13, %v3753_v22  ;;  %v4246_v7 = vpop.permute.xlu1 %4245  ;;  %v10493_v22 = vld [vmem:[#allocation84_spill] sm:$0xff] }
 0x677   : > { %v4392_v31 = vadd.f32 %v4246_v7, %v3752_v5  ;;  %v3765_v45 = vmul.f32 %v10493_v22, %v8619_v21 }
 0x678   : > { %4458 = vst.msk [vmem:[%s10420_s13 + $0x170] sm:$0xff] %vm4411_vm8, %v4393_v61 }
 0x679   : > { %v4252_v33 = vpop.permute.xlu0 %4251  ;;  %4457 = vst.msk [vmem:[%s10420_s13 + $0x168] sm:$0xff] %vm4411_vm8, %v4392_v31 }
 0x67a   : > { %v4395_v12 = vadd.f32 %v4252_v33, %v3755_v40  ;;  %v4250_v14 = vpop.permute.xlu1 %4249  ;;  %v10497_v40 = vld [vmem:[#allocation93_spill] sm:$0xff]  ;;  %v10498_v33 = vld [vmem:[#allocation88_spill] sm:$0xff] }
 0x67b   : > { %v4394_v57 = vadd.f32 %v4250_v14, %v3754_v10  ;;  %v3764_v24 = vmul.f32 %v10497_v40, %v8630_v46  ;;  %v3769_v31 = vmul.f32 %v10498_v33, %v8647_v25 }
 0x67c   : > { %4460 = vst.msk [vmem:[%s10420_s13 + $0x180] sm:$0xff] %vm4411_vm8, %v4395_v12  ;;  %v10499_v12 = vld [vmem:[#allocation95_spill] sm:$0xff] }
 0x67d   : > { %v4256_v63 = vpop.permute.xlu0 %4255  ;;  %4459 = vst.msk [vmem:[%s10420_s13 + $0x178] sm:$0xff] %vm4411_vm8, %v4394_v57  ;;  %v3766_v56 = vmul.f32 %v10499_v12, %v8644_v1  ;;  %v10501_v1 = vld [vmem:[#allocation97_spill] sm:$0xff] }
 0x67e   : > { %v4397_v20 = vadd.f32 %v4256_v63, %v3757_v6  ;;  %v4254_v53 = vpop.permute.xlu1 %4253  ;;  %v3770_v14 = vmul.f32 %v10501_v1, %v8666_v60 }
 0x67f   : > { %v4396_v49 = vadd.f32 %v4254_v53, %v3756_v59 }
 0x680   : > { %4462 = vst.msk [vmem:[%s10420_s13 + $0x190] sm:$0xff] %vm4411_vm8, %v4397_v20 }
 0x681   : > { %v4260_v58 = vpop.permute.xlu0 %4259  ;;  %4461 = vst.msk [vmem:[%s10420_s13 + $0x188] sm:$0xff] %vm4411_vm8, %v4396_v49 }
 0x682   : > { %v4399_v26 = vadd.f32 %v4260_v58, %v3759_v18  ;;  %v4258_v36 = vpop.permute.xlu1 %4257 }
 0x683   : > { %v4398_v29 = vadd.f32 %v4258_v36, %v3758_v28 }
 0x684   : > { %4464 = vst.msk [vmem:[%s10420_s13 + $0x1a0] sm:$0xff] %vm4411_vm8, %v4399_v26 }
 0x685   : > { %v4264_v16 = vpop.permute.xlu0 %4263  ;;  %4463 = vst.msk [vmem:[%s10420_s13 + $0x198] sm:$0xff] %vm4411_vm8, %v4398_v29 }
 0x686   : > { %v4401_v15 = vadd.f32 %v4264_v16, %v3761_v32  ;;  %v4262_v50 = vpop.permute.xlu1 %4261 }
 0x687   : > { %v4400_v17 = vadd.f32 %v4262_v50, %v3760_v41 }
 0x688   : > { %4466 = vst.msk [vmem:[%s10420_s13 + $0x1b0] sm:$0xff] %vm4411_vm8, %v4401_v15 }
 0x689   : > { %v4268_v37 = vpop.permute.xlu0 %4267  ;;  %4465 = vst.msk [vmem:[%s10420_s13 + $0x1a8] sm:$0xff] %vm4411_vm8, %v4400_v17 }
 0x68a   : > { %v4403_v62 = vadd.f32 %v4268_v37, %v3763_v3  ;;  %v4266_v23 = vpop.permute.xlu1 %4265 }
 0x68b   : > { %v4402_v27 = vadd.f32 %v4266_v23, %v3762_v44 }
 0x68c   : > { %4468 = vst.msk [vmem:[%s10420_s13 + $0x1c0] sm:$0xff] %vm4411_vm8, %v4403_v62 }
 0x68d   : > { %v4272_v13 = vpop.permute.xlu0 %4271  ;;  %4467 = vst.msk [vmem:[%s10420_s13 + $0x1b8] sm:$0xff] %vm4411_vm8, %v4402_v27 }
 0x68e   : > { %v4405_v61 = vadd.f32 %v4272_v13, %v3765_v45  ;;  %v4270_v21 = vpop.permute.xlu1 %4269 }
 0x68f   : > { %v4404_v5 = vadd.f32 %v4270_v21, %v3764_v24 }
 0x690   : > { %4470 = vst.msk [vmem:[%s10420_s13 + $0x1d0] sm:$0xff] %vm4411_vm8, %v4405_v61 }
 0x691   : > { %v4276_v30 = vpop.permute.xlu0 %4275  ;;  %4469 = vst.msk [vmem:[%s10420_s13 + $0x1c8] sm:$0xff] %vm4411_vm8, %v4404_v5 }
 0x692   : > { %v4407_v7 = vadd.f32 %v4276_v30, %v3767_v39  ;;  %v4274_v46 = vpop.permute.xlu1 %4273 }
 0x693   : > { %v4406_v4 = vadd.f32 %v4274_v46, %v3766_v56 }
 0x694   : > { %4472 = vst.msk [vmem:[%s10420_s13 + $0x1e0] sm:$0xff] %vm4411_vm8, %v4407_v7 }
 0x695   : > { %v4280_v8 = vpop.permute.xlu0 %4279  ;;  %4471 = vst.msk [vmem:[%s10420_s13 + $0x1d8] sm:$0xff] %vm4411_vm8, %v4406_v4 }
 0x696   : > { %v4409_v6 = vadd.f32 %v4280_v8, %v3769_v31  ;;  %v4278_v25 = vpop.permute.xlu1 %4277 }
 0x697   : > { %v4408_v10 = vadd.f32 %v4278_v25, %v3768_v19 }
 0x698   : > { %4474 = vst.msk [vmem:[%s10420_s13 + $0x1f0] sm:$0xff] %vm4411_vm8, %v4409_v6 }
 0x699   : > { %4473 = vst.msk [vmem:[%s10420_s13 + $0x1e8] sm:$0xff] %vm4411_vm8, %v4408_v10 }
 0x69a   : > { %v4282_v63 = vpop.permute.xlu1 %4281 }
 0x69b   : > { %v4410_v57 = vadd.f32 %v4282_v63, %v3770_v14 }
 0x69d   : > { %4475 = vst.msk [vmem:[%s10420_s13 + $0x1f8] sm:$0xff] %vm4411_vm8, %v4410_v57 }
 0x69e PF: > { %s10502_s1 = sld [smem:[#allocation15_spill]]  ;;  %s10503_s20 = sld [smem:[#allocation13_spill]] }
 0x69f   : > { %s10504_s21 = sld [smem:[#allocation14_spill]]  ;;  %s10505_s22 = sld [smem:[#allocation16_spill]] }
 0x6a0   : > { %s10506_s0 = sld [smem:[#allocation17_spill]] }
 0x6a4   : > { %s20_s23 = sadd.s32 1, %s10502_s1  }
 0x6a5   : > { %p17_p4 = scmp.ge.s32.totalorder %s20_s23, 10  }
 0x6a7   :  { %19 = sbr.rel (!%p17_p4) target bundleno = 20 (0x14), region = 156 }
 0x6ae   :  { %4506 = vsyncmov [#allocation3] }
 0x6b1   :  { %s4507_s11 = vpop.sfrf %4506 }
 0x6b2   :  { %p4764_p5 = scmp.ne.s32.totalorder %s4507_s11, 0 }
 0x6b4   :  { %4511 = shalt.err (%p4764_p5)  }

</bundles_post_ra>
